<compile_context>
chip_gen: v7x
topology: tpu7x:2x2x1
jax: 0.10.0
libtpu: 0.0.40
codegen_flags: <defaults>
</compile_context>

<pallas_src>
import functools

import jax
import jax.numpy as jnp
from jax.experimental import pallas as pl
from jax.experimental.pallas import tpu as pltpu

# ---------------- synthetic EnCodecMAE configuration ----------------
HOP = 320                     # EnCodec hop @ 24 kHz -> embedding_rate = 75 Hz
CHUNK_FEAT = 8                # real module: 300  (shrunk for the demo)
CHUNK_WAV = CHUNK_FEAT * HOP  # real module: 96000 (same 320:1 ratio)
FEAT_DIM = 32                 # dim of precomputed x['wav_features']
MODEL_DIM = 64                # visible_encoder.model_dim == embedding_dim
NUM_HEADS = 4
HEAD_DIM = MODEL_DIM // NUM_HEADS
FFN_DIM = 256
NUM_LAYERS = 2
LN_EPS = 1e-5
NEG_INF = -1e30


# ---------------- fused per-chunk kernel ----------------
def _encodecmae_chunk_kernel(lens_ref, frames_ref, feats_ref,
                             w_wav_ref, w_feat_ref, b_enc_ref,
                             g1_ref, be1_ref, wqkv_ref, bqkv_ref,
                             wo_ref, bo_ref, g2_ref, be2_ref,
                             w1_ref, b1_ref, w2_ref, b2_ref,
                             out_ref, *, batch, seq, n_layers):
    """wav_encoder projection + n_layers pre-LN transformer layers, one chunk."""
    f32 = jnp.float32
    bf16 = jnp.bfloat16
    rows = batch * seq
    c = pl.program_id(0)

    # ---- wav_encoder hot path: hop-320 framed "conv" + feature projection ----
    frames = frames_ref[...].reshape(rows, HOP).astype(bf16)
    feats = feats_ref[...].reshape(rows, FEAT_DIM).astype(bf16)
    tok = jnp.dot(frames, w_wav_ref[...], preferred_element_type=f32)
    tok = tok + jnp.dot(feats, w_feat_ref[...], preferred_element_type=f32)
    x = tok + b_enc_ref[...]                                  # [rows, D] f32

    # masker.mask(..., ignore_mask=True) is identity on the token stream.

    # ---- key-padding mask: built once per chunk from prefetched lens ----
    key_pos = jax.lax.broadcasted_iota(jnp.int32, (batch, seq, seq), 2)
    batch_pos = jax.lax.broadcasted_iota(jnp.int32, (batch, seq, seq), 0)
    valid = jnp.zeros((batch, seq, seq), jnp.int32)
    for b in range(batch):                      # tiny static unroll over batch
        vb = jnp.clip(lens_ref[b] - c * seq, 0, seq)
        valid = jnp.where(batch_pos == b, vb, valid)
    kmask = jnp.where(key_pos < valid, 0.0, NEG_INF).astype(f32)   # [B, S, S]
    # TODO(synk): fully key-masked query rows (past wav_features_lens) get
    # uniform attention over padded keys -> finite garbage, matching the
    # PyTorch module; downstream must mask them.

    scale = 1.0 / float(HEAD_DIM) ** 0.5

    def ln(v, g, b):                                          # LayerNorm in f32
        mu = jnp.mean(v, axis=-1, keepdims=True)
        var = jnp.mean(jnp.square(v - mu), axis=-1, keepdims=True)
        return (v - mu) * jax.lax.rsqrt(var + LN_EPS) * g + b

    # visible_encoder(return_activations=True): only the tapped layer's
    # activation is needed, so run exactly n_layers layers (static unroll).
    for l in range(n_layers):
        # --- multi-head self-attention (per-head weights, no activation slicing)
        xn = ln(x, g1_ref[l], be1_ref[l]).astype(bf16)        # hoisted bf16 cast
        attn = jnp.zeros((rows, MODEL_DIM), f32)
        for h in range(NUM_HEADS):                            # short static unroll
            iq = (l * 3 + 0) * NUM_HEADS + h
            ik = (l * 3 + 1) * NUM_HEADS + h
            iv = (l * 3 + 2) * NUM_HEADS + h
            q = jnp.dot(xn, wqkv_ref[iq], preferred_element_type=f32) + bqkv_ref[iq]
            k = jnp.dot(xn, wqkv_ref[ik], preferred_element_type=f32) + bqkv_ref[ik]
            v = jnp.dot(xn, wqkv_ref[iv], preferred_element_type=f32) + bqkv_ref[iv]
            q = q.reshape(batch, seq, HEAD_DIM).astype(bf16)
            k = k.reshape(batch, seq, HEAD_DIM).astype(bf16)
            v = v.reshape(batch, seq, HEAD_DIM).astype(bf16)
            s = jnp.einsum('bqd,bkd->bqk', q, k,
                           preferred_element_type=f32) * scale + kmask
            s = s - jnp.max(s, axis=-1, keepdims=True)
            p = jnp.exp(s)
            p = p / jnp.sum(p, axis=-1, keepdims=True)        # exact softmax denom
            ctx = jnp.einsum('bqk,bkd->bqd', p.astype(bf16), v,
                             preferred_element_type=f32)
            # accumulate this head's contribution through its slice of W_O
            attn = attn + jnp.dot(ctx.reshape(rows, HEAD_DIM).astype(bf16),
                                  wo_ref[l * NUM_HEADS + h],
                                  preferred_element_type=f32)
        x = x + attn + bo_ref[l]

        # --- feed-forward ---
        xn2 = ln(x, g2_ref[l], be2_ref[l]).astype(bf16)
        hdn = jnp.dot(xn2, w1_ref[l], preferred_element_type=f32) + b1_ref[l]
        # TODO(synk): PyTorch nn.GELU default is exact erf; tanh approximation
        # kept here (guaranteed EUP lowering).
        hdn = jax.nn.gelu(hdn, approximate=True)
        ffn = jnp.dot(hdn.astype(bf16), w2_ref[l],
                      preferred_element_type=f32) + b2_ref[l]
        x = x + ffn

    # Natural [B, S, D] store (leading-dim split only); see header note on why
    # the (...,128) lane-dense packing was not applied at D=64.
    out_ref[...] = x.reshape(batch, seq, MODEL_DIM).astype(out_ref.dtype)


# ---------------- wrapper around pallas_call ----------------
def encodecmae_upstream_forward(x, params, layer=-1):
    """Mirrors EnCodecMAEUpstream.forward: chunk -> encode -> collect layer."""
    wav = x['wav']
    feats = x['wav_features']
    B, wav_len = wav.shape
    feat_len = feats.shape[1]
    n_chunks = feat_len // CHUNK_FEAT
    # TODO(synk): ragged final chunk (wav_len % CHUNK_WAV != 0) not handled;
    # pad the waveform upstream.
    assert wav_len == n_chunks * CHUNK_WAV
    assert feat_len == n_chunks * CHUNK_FEAT

    S = CHUNK_FEAT
    rows = B * S
    L, D, F, H, HD = NUM_LAYERS, MODEL_DIM, FFN_DIM, NUM_HEADS, HEAD_DIM

    # Free reshape views only -- the chunk axis is addressed by BlockSpec
    # index_maps, so there is no wrapper-side HBM relayout of wav / features.
    frames = wav.reshape(B, n_chunks, S, HOP)
    featsc = feats.reshape(B, n_chunks, S, FEAT_DIM)
    lens = x['wav_features_lens'].astype(jnp.int32)           # scalar-prefetched

    # TODO(synk): wav_lens only feeds EnCodec's internal conv padding; unused by
    # this synthetic framed-matmul wav_encoder.

    # One-time per-head re-layout of the (tiny) attention parameters so the
    # kernel never slices 16-lane chunks out of activations or packed weights.
    bf = lambda a: a.astype(jnp.bfloat16)
    wqkv_h = bf(params['wqkv'].reshape(L, D, 3, H, HD)
                .transpose(0, 2, 3, 1, 4).reshape(L * 3 * H, D, HD))
    bqkv_h = (params['bqkv'].reshape(L, 1, 3, H, HD)
              .transpose(0, 2, 3, 1, 4).reshape(L * 3 * H, 1, HD))
    wo_h = bf(params['wo'].reshape(L, H, HD, D).reshape(L * H, HD, D))

    n_layers_run = (layer % NUM_LAYERS) + 1
    kernel = functools.partial(_encodecmae_chunk_kernel,
                               batch=B, seq=S, n_layers=n_layers_run)

    weight_args = (
        bf(params['w_wav']), bf(params['w_feat']), params['b_enc'],
        params['g1'], params['be1'], wqkv_h, bqkv_h,
        wo_h, params['bo'], params['g2'], params['be2'],
        bf(params['w1']), params['b1'], bf(params['w2']), params['b2'])
    weight_shapes = [tuple(a.shape) for a in weight_args]

    # Advisory cost estimate so XLA can overlap surrounding ops with the kernel.
    mm = (2 * rows * (HOP + FEAT_DIM) * D
          + n_layers_run * (2 * rows * D * 3 * D          # q/k/v projections
                            + 2 * rows * S * D            # scores
                            + 2 * rows * S * D            # probs @ v
                            + 2 * rows * D * D            # output projection
                            + 4 * rows * D * F))          # ffn
    cost = pl.CostEstimate(
        flops=int(n_chunks * mm),
        transcendentals=int(n_chunks * n_layers_run * (H * rows * S + rows * F)),
        bytes_accessed=int(wav.size * 4 + feats.size * 4
                           + B * n_chunks * S * D * 4
                           + sum(int(a.size) * a.dtype.itemsize
                                 for a in weight_args)))

    def run(weight_pipeline_mode):
        def const_spec(shape):
            nd = len(shape)
            idx = lambda c, lens, _n=nd: (0,) * _n        # constant-index block
            if weight_pipeline_mode is None:
                return pl.BlockSpec(shape, idx)
            return pl.BlockSpec(shape, idx, pipeline_mode=weight_pipeline_mode)

        grid_spec = pltpu.PrefetchScalarGridSpec(
            num_scalar_prefetch=1,
            grid=(n_chunks,),
            in_specs=[
                pl.BlockSpec((B, None, S, HOP), lambda c, lens: (0, c, 0, 0)),
                pl.BlockSpec((B, None, S, FEAT_DIM),
                             lambda c, lens: (0, c, 0, 0)),
            ] + [const_spec(s) for s in weight_shapes],
            out_specs=pl.BlockSpec((B, None, S, D), lambda c, lens: (0, c, 0, 0)),
        )
        return pl.pallas_call(
            kernel,
            out_shape=jax.ShapeDtypeStruct((B, n_chunks, S, D), jnp.float32),
            grid_spec=grid_spec,
            compiler_params=pltpu.CompilerParams(
                dimension_semantics=("parallel",)),
            cost_estimate=cost,
        )(lens, frames, featsc, *weight_args)

    try:
        # Constant-index weight blocks are fetched once -> single VMEM buffer.
        out = run(pl.Buffered(1))
    except Exception:
        # Fallback for jax versions without Buffered(1): default double-buffering.
        out = run(None)

    emb = out.reshape(B, n_chunks * S, D)   # free view: chunks concatenated in time
    x['embeddings'] = emb
    return emb


# ---------------- deterministic synthetic parameters ----------------
def init_params(key):
    def dense(k, shape, scale=0.02):
        return scale * jax.random.normal(k, shape, jnp.float32)

    ks = jax.random.split(key, 6)
    L, D, F = NUM_LAYERS, MODEL_DIM, FFN_DIM
    return {
        'w_wav': dense(ks[0], (HOP, D)),
        'w_feat': dense(ks[1], (FEAT_DIM, D)),
        'b_enc': jnp.zeros((1, D), jnp.float32),
        'g1': jnp.ones((L, 1, D), jnp.float32),
        'be1': jnp.zeros((L, 1, D), jnp.float32),
        'wqkv': dense(ks[2], (L, D, 3 * D)),
        'bqkv': jnp.zeros((L, 1, 3 * D), jnp.float32),
        'wo': dense(ks[3], (L, D, D)),
        'bo': jnp.zeros((L, 1, D), jnp.float32),
        'g2': jnp.ones((L, 1, D), jnp.float32),
        'be2': jnp.zeros((L, 1, D), jnp.float32),
        'w1': dense(ks[4], (L, D, F)),
        'b1': jnp.zeros((L, 1, F), jnp.float32),
        'w2': dense(ks[5], (L, F, D)),
        'b2': jnp.zeros((L, 1, D), jnp.float32),
    }


if __name__ == "__main__":
    key = jax.random.PRNGKey(0)
    B = 2
    n_chunks = 2
    wav_len = n_chunks * CHUNK_WAV          # 5120 samples
    feat_len = n_chunks * CHUNK_FEAT        # 16 frames

    k_wav, k_feat, k_params = jax.random.split(key, 3)
    x = {
        'wav': jax.random.normal(k_wav, (B, wav_len), jnp.float32),
        'wav_features': jax.random.normal(k_feat, (B, feat_len, FEAT_DIM),
                                          jnp.float32),
        'wav_lens': jnp.array([wav_len, wav_len // 2], jnp.int32),
        'wav_features_lens': jnp.array([feat_len, feat_len // 2], jnp.int32),
    }
    params = init_params(k_params)

    emb = encodecmae_upstream_forward(x, params, layer=-1)
    jax.block_until_ready(emb)
    assert emb.shape == (B, feat_len, MODEL_DIM), emb.shape
    assert bool(jnp.all(jnp.isfinite(emb)))
    print("KERNEL_OK")
</pallas_src>

<mosaic_0001>
module attributes {stable_mosaic.version = 11 : i64} {
  func.func @_encodecmae_chunk_kernel(%arg0: i32, %arg1: memref<2xi32, #tpu.memory_space<smem>>, %arg2: memref<2x1x8x320xf32, #tpu.memory_space<vmem>>, %arg3: memref<2x1x8x32xf32, #tpu.memory_space<vmem>>, %arg4: memref<320x64xbf16, #tpu.memory_space<vmem>>, %arg5: memref<32x64xbf16, #tpu.memory_space<vmem>>, %arg6: memref<1x64xf32, #tpu.memory_space<vmem>>, %arg7: memref<2x1x64xf32, #tpu.memory_space<vmem>>, %arg8: memref<2x1x64xf32, #tpu.memory_space<vmem>>, %arg9: memref<24x64x16xbf16, #tpu.memory_space<vmem>>, %arg10: memref<24x1x16xf32, #tpu.memory_space<vmem>>, %arg11: memref<8x16x64xbf16, #tpu.memory_space<vmem>>, %arg12: memref<2x1x64xf32, #tpu.memory_space<vmem>>, %arg13: memref<2x1x64xf32, #tpu.memory_space<vmem>>, %arg14: memref<2x1x64xf32, #tpu.memory_space<vmem>>, %arg15: memref<2x64x256xbf16, #tpu.memory_space<vmem>>, %arg16: memref<2x1x256xf32, #tpu.memory_space<vmem>>, %arg17: memref<2x256x64xbf16, #tpu.memory_space<vmem>>, %arg18: memref<2x1x64xf32, #tpu.memory_space<vmem>>, %arg19: memref<2x1x8x64xf32, #tpu.memory_space<vmem>>) attributes {dimension_semantics = [#tpu.dimension_semantics<parallel>], iteration_bounds = array<i64: 2>, scalar_prefetch = 1 : i64, scratch_operands = 0 : i64, tpu.core_type = #tpu.core_type<tc>, window_params = [{transform_indices = @transform_0, window_bounds = array<i64: 2, 1, 8, 320>}, {transform_indices = @transform_1, window_bounds = array<i64: 2, 1, 8, 32>}, {pipeline_mode = #tpu.pipeline_mode<synchronous>, transform_indices = @transform_2, window_bounds = array<i64: 320, 64>}, {pipeline_mode = #tpu.pipeline_mode<synchronous>, transform_indices = @transform_3, window_bounds = array<i64: 32, 64>}, {pipeline_mode = #tpu.pipeline_mode<synchronous>, transform_indices = @transform_4, window_bounds = array<i64: 1, 64>}, {pipeline_mode = #tpu.pipeline_mode<synchronous>, transform_indices = @transform_5, window_bounds = array<i64: 2, 1, 64>}, {pipeline_mode = #tpu.pipeline_mode<synchronous>, transform_indices = @transform_6, window_bounds = array<i64: 2, 1, 64>}, {pipeline_mode = #tpu.pipeline_mode<synchronous>, transform_indices = @transform_7, window_bounds = array<i64: 24, 64, 16>}, {pipeline_mode = #tpu.pipeline_mode<synchronous>, transform_indices = @transform_8, window_bounds = array<i64: 24, 1, 16>}, {pipeline_mode = #tpu.pipeline_mode<synchronous>, transform_indices = @transform_9, window_bounds = array<i64: 8, 16, 64>}, {pipeline_mode = #tpu.pipeline_mode<synchronous>, transform_indices = @transform_10, window_bounds = array<i64: 2, 1, 64>}, {pipeline_mode = #tpu.pipeline_mode<synchronous>, transform_indices = @transform_11, window_bounds = array<i64: 2, 1, 64>}, {pipeline_mode = #tpu.pipeline_mode<synchronous>, transform_indices = @transform_12, window_bounds = array<i64: 2, 1, 64>}, {pipeline_mode = #tpu.pipeline_mode<synchronous>, transform_indices = @transform_13, window_bounds = array<i64: 2, 64, 256>}, {pipeline_mode = #tpu.pipeline_mode<synchronous>, transform_indices = @transform_14, window_bounds = array<i64: 2, 1, 256>}, {pipeline_mode = #tpu.pipeline_mode<synchronous>, transform_indices = @transform_15, window_bounds = array<i64: 2, 256, 64>}, {pipeline_mode = #tpu.pipeline_mode<synchronous>, transform_indices = @transform_16, window_bounds = array<i64: 2, 1, 64>}, {transform_indices = @transform_17, window_bounds = array<i64: 2, 1, 8, 64>}]} {
    %c0 = arith.constant 0 : index
    %c0_0 = arith.constant 0 : index
    %c0_1 = arith.constant 0 : index
    %c0_2 = arith.constant 0 : index
    %0 = vector.load %arg2[%c0, %c0_0, %c0_1, %c0_2] : memref<2x1x8x320xf32, #tpu.memory_space<vmem>>, vector<2x1x8x320xf32>
    %1 = vector.shape_cast %0 : vector<2x1x8x320xf32> to vector<2x8x320xf32>
    %2 = vector.shape_cast %1 : vector<2x8x320xf32> to vector<16x320xf32>
    %3 = arith.truncf %2 : vector<16x320xf32> to vector<16x320xbf16>
    %c0_3 = arith.constant 0 : index
    %c0_4 = arith.constant 0 : index
    %c0_5 = arith.constant 0 : index
    %c0_6 = arith.constant 0 : index
    %4 = vector.load %arg3[%c0_3, %c0_4, %c0_5, %c0_6] : memref<2x1x8x32xf32, #tpu.memory_space<vmem>>, vector<2x1x8x32xf32>
    %5 = vector.shape_cast %4 : vector<2x1x8x32xf32> to vector<2x8x32xf32>
    %6 = vector.shape_cast %5 : vector<2x8x32xf32> to vector<16x32xf32>
    %7 = arith.truncf %6 : vector<16x32xf32> to vector<16x32xbf16>
    %c0_7 = arith.constant 0 : index
    %c0_8 = arith.constant 0 : index
    %8 = vector.load %arg4[%c0_7, %c0_8] : memref<320x64xbf16, #tpu.memory_space<vmem>>, vector<320x64xbf16>
    %cst = arith.constant dense<0.000000e+00> : vector<16x64xf32>
    %9 = tpu.matmul %3, %8, %cst {dimension_numbers = #tpu.dot_dimension_numbers<[1], [0], [0], [1], [0, 0, 1, 1], [], []>} : vector<16x320xbf16>, vector<320x64xbf16>, vector<16x64xf32> -> vector<16x64xf32>
    %c0_9 = arith.constant 0 : index
    %c0_10 = arith.constant 0 : index
    %10 = vector.load %arg5[%c0_9, %c0_10] : memref<32x64xbf16, #tpu.memory_space<vmem>>, vector<32x64xbf16>
    %cst_11 = arith.constant dense<0.000000e+00> : vector<16x64xf32>
    %11 = tpu.matmul %7, %10, %cst_11 {dimension_numbers = #tpu.dot_dimension_numbers<[1], [0], [0], [1], [0, 0, 1, 1], [], []>} : vector<16x32xbf16>, vector<32x64xbf16>, vector<16x64xf32> -> vector<16x64xf32>
    %12 = arith.addf %9, %11 : vector<16x64xf32>
    %c0_12 = arith.constant 0 : index
    %c0_13 = arith.constant 0 : index
    %13 = vector.load %arg6[%c0_12, %c0_13] : memref<1x64xf32, #tpu.memory_space<vmem>>, vector<1x64xf32>
    %14 = vector.broadcast %13 : vector<1x64xf32> to vector<16x64xf32>
    %15 = arith.addf %12, %14 : vector<16x64xf32>
    %16 = tpu.iota {dimensions = array<i32: 2>} : vector<2x8x8xi32>
    %17 = tpu.iota {dimensions = array<i32: 0>} : vector<2x8x8xi32>
    %c0_i32 = arith.constant 0 : i32
    %18 = vector.broadcast %c0_i32 : i32 to vector<2x8x8xi32>
    %c0_14 = arith.constant 0 : index
    %19 = memref.load %arg1[%c0_14] : memref<2xi32, #tpu.memory_space<smem>>
    %c8_i32 = arith.constant 8 : i32
    %20 = arith.muli %arg0, %c8_i32 : i32
    %21 = arith.subi %19, %20 : i32
    %c0_i32_15 = arith.constant 0 : i32
    %c8_i32_16 = arith.constant 8 : i32
    %22 = arith.maxsi %c0_i32_15, %21 : i32
    %23 = arith.minsi %c8_i32_16, %22 : i32
    %c0_i32_17 = arith.constant 0 : i32
    %24 = vector.broadcast %c0_i32_17 : i32 to vector<2x8x8xi32>
    %25 = arith.cmpi eq, %17, %24 : vector<2x8x8xi32>
    %26 = vector.broadcast %23 : i32 to vector<2x8x8xi32>
    %27 = arith.select %25, %26, %18 : vector<2x8x8xi1>, vector<2x8x8xi32>
    %c1 = arith.constant 1 : index
    %28 = memref.load %arg1[%c1] : memref<2xi32, #tpu.memory_space<smem>>
    %c8_i32_18 = arith.constant 8 : i32
    %29 = arith.muli %arg0, %c8_i32_18 : i32
    %30 = arith.subi %28, %29 : i32
    %c0_i32_19 = arith.constant 0 : i32
    %c8_i32_20 = arith.constant 8 : i32
    %31 = arith.maxsi %c0_i32_19, %30 : i32
    %32 = arith.minsi %c8_i32_20, %31 : i32
    %c1_i32 = arith.constant 1 : i32
    %33 = vector.broadcast %c1_i32 : i32 to vector<2x8x8xi32>
    %34 = arith.cmpi eq, %17, %33 : vector<2x8x8xi32>
    %35 = vector.broadcast %32 : i32 to vector<2x8x8xi32>
    %36 = arith.select %34, %35, %27 : vector<2x8x8xi1>, vector<2x8x8xi32>
    %37 = arith.cmpi slt, %16, %36 : vector<2x8x8xi32>
    %cst_21 = arith.constant 0.000000e+00 : f32
    %cst_22 = arith.constant -1.000000e+30 : f32
    %38 = vector.broadcast %cst_21 : f32 to vector<2x8x8xf32>
    %39 = vector.broadcast %cst_22 : f32 to vector<2x8x8xf32>
    %40 = arith.select %37, %38, %39 : vector<2x8x8xi1>, vector<2x8x8xf32>
    %c0_23 = arith.constant 0 : index
    %c0_24 = arith.constant 0 : index
    %c0_25 = arith.constant 0 : index
    %41 = vector.load %arg7[%c0_23, %c0_24, %c0_25] : memref<2x1x64xf32, #tpu.memory_space<vmem>>, vector<1x1x64xf32>
    %42 = vector.shape_cast %41 : vector<1x1x64xf32> to vector<1x64xf32>
    %c0_26 = arith.constant 0 : index
    %c0_27 = arith.constant 0 : index
    %c0_28 = arith.constant 0 : index
    %43 = vector.load %arg8[%c0_26, %c0_27, %c0_28] : memref<2x1x64xf32, #tpu.memory_space<vmem>>, vector<1x1x64xf32>
    %44 = vector.shape_cast %43 : vector<1x1x64xf32> to vector<1x64xf32>
    %cst_29 = arith.constant dense<0.000000e+00> : vector<16xf32>
    %45 = vector.multi_reduction <add>, %15, %cst_29 [1] : vector<16x64xf32> to vector<16xf32>
    %46 = vector.shape_cast %45 : vector<16xf32> to vector<16x1xf32>
    %cst_30 = arith.constant 6.400000e+01 : f32
    %47 = vector.broadcast %cst_30 : f32 to vector<16x1xf32>
    %48 = arith.divf %46, %47 : vector<16x1xf32>
    %49 = vector.broadcast %48 : vector<16x1xf32> to vector<16x64xf32>
    %50 = arith.subf %15, %49 : vector<16x64xf32>
    %51 = arith.mulf %50, %50 : vector<16x64xf32>
    %cst_31 = arith.constant dense<0.000000e+00> : vector<16xf32>
    %52 = vector.multi_reduction <add>, %51, %cst_31 [1] : vector<16x64xf32> to vector<16xf32>
    %53 = vector.shape_cast %52 : vector<16xf32> to vector<16x1xf32>
    %cst_32 = arith.constant 6.400000e+01 : f32
    %54 = vector.broadcast %cst_32 : f32 to vector<16x1xf32>
    %55 = arith.divf %53, %54 : vector<16x1xf32>
    %56 = vector.broadcast %48 : vector<16x1xf32> to vector<16x64xf32>
    %57 = arith.subf %15, %56 : vector<16x64xf32>
    %cst_33 = arith.constant 9.99999974E-6 : f32
    %58 = vector.broadcast %cst_33 : f32 to vector<16x1xf32>
    %59 = arith.addf %55, %58 : vector<16x1xf32>
    %60 = math.rsqrt %59 : vector<16x1xf32>
    %61 = vector.broadcast %60 : vector<16x1xf32> to vector<16x64xf32>
    %62 = arith.mulf %57, %61 : vector<16x64xf32>
    %63 = vector.broadcast %42 : vector<1x64xf32> to vector<16x64xf32>
    %64 = arith.mulf %62, %63 : vector<16x64xf32>
    %65 = vector.broadcast %44 : vector<1x64xf32> to vector<16x64xf32>
    %66 = arith.addf %64, %65 : vector<16x64xf32>
    %67 = arith.truncf %66 : vector<16x64xf32> to vector<16x64xbf16>
    %cst_34 = arith.constant 0.000000e+00 : f32
    %68 = vector.broadcast %cst_34 : f32 to vector<16x64xf32>
    %c0_35 = arith.constant 0 : index
    %c0_36 = arith.constant 0 : index
    %c0_37 = arith.constant 0 : index
    %69 = vector.load %arg9[%c0_35, %c0_36, %c0_37] : memref<24x64x16xbf16, #tpu.memory_space<vmem>>, vector<1x64x16xbf16>
    %70 = vector.shape_cast %69 : vector<1x64x16xbf16> to vector<64x16xbf16>
    %cst_38 = arith.constant dense<0.000000e+00> : vector<16x16xf32>
    %71 = tpu.matmul %67, %70, %cst_38 {dimension_numbers = #tpu.dot_dimension_numbers<[1], [0], [0], [1], [0, 0, 1, 1], [], []>} : vector<16x64xbf16>, vector<64x16xbf16>, vector<16x16xf32> -> vector<16x16xf32>
    %c0_39 = arith.constant 0 : index
    %c0_40 = arith.constant 0 : index
    %c0_41 = arith.constant 0 : index
    %72 = vector.load %arg10[%c0_39, %c0_40, %c0_41] : memref<24x1x16xf32, #tpu.memory_space<vmem>>, vector<1x1x16xf32>
    %73 = vector.shape_cast %72 : vector<1x1x16xf32> to vector<1x16xf32>
    %74 = vector.broadcast %73 : vector<1x16xf32> to vector<16x16xf32>
    %75 = arith.addf %71, %74 : vector<16x16xf32>
    %c4 = arith.constant 4 : index
    %c0_42 = arith.constant 0 : index
    %c0_43 = arith.constant 0 : index
    %76 = vector.load %arg9[%c4, %c0_42, %c0_43] : memref<24x64x16xbf16, #tpu.memory_space<vmem>>, vector<1x64x16xbf16>
    %77 = vector.shape_cast %76 : vector<1x64x16xbf16> to vector<64x16xbf16>
    %cst_44 = arith.constant dense<0.000000e+00> : vector<16x16xf32>
    %78 = tpu.matmul %67, %77, %cst_44 {dimension_numbers = #tpu.dot_dimension_numbers<[1], [0], [0], [1], [0, 0, 1, 1], [], []>} : vector<16x64xbf16>, vector<64x16xbf16>, vector<16x16xf32> -> vector<16x16xf32>
    %c4_45 = arith.constant 4 : index
    %c0_46 = arith.constant 0 : index
    %c0_47 = arith.constant 0 : index
    %79 = vector.load %arg10[%c4_45, %c0_46, %c0_47] : memref<24x1x16xf32, #tpu.memory_space<vmem>>, vector<1x1x16xf32>
    %80 = vector.shape_cast %79 : vector<1x1x16xf32> to vector<1x16xf32>
    %81 = vector.broadcast %80 : vector<1x16xf32> to vector<16x16xf32>
    %82 = arith.addf %78, %81 : vector<16x16xf32>
    %c8 = arith.constant 8 : index
    %c0_48 = arith.constant 0 : index
    %c0_49 = arith.constant 0 : index
    %83 = vector.load %arg9[%c8, %c0_48, %c0_49] : memref<24x64x16xbf16, #tpu.memory_space<vmem>>, vector<1x64x16xbf16>
    %84 = vector.shape_cast %83 : vector<1x64x16xbf16> to vector<64x16xbf16>
    %cst_50 = arith.constant dense<0.000000e+00> : vector<16x16xf32>
    %85 = tpu.matmul %67, %84, %cst_50 {dimension_numbers = #tpu.dot_dimension_numbers<[1], [0], [0], [1], [0, 0, 1, 1], [], []>} : vector<16x64xbf16>, vector<64x16xbf16>, vector<16x16xf32> -> vector<16x16xf32>
    %c8_51 = arith.constant 8 : index
    %c0_52 = arith.constant 0 : index
    %c0_53 = arith.constant 0 : index
    %86 = vector.load %arg10[%c8_51, %c0_52, %c0_53] : memref<24x1x16xf32, #tpu.memory_space<vmem>>, vector<1x1x16xf32>
    %87 = vector.shape_cast %86 : vector<1x1x16xf32> to vector<1x16xf32>
    %88 = vector.broadcast %87 : vector<1x16xf32> to vector<16x16xf32>
    %89 = arith.addf %85, %88 : vector<16x16xf32>
    %90 = vector.shape_cast %75 : vector<16x16xf32> to vector<2x8x16xf32>
    %91 = arith.truncf %90 : vector<2x8x16xf32> to vector<2x8x16xbf16>
    %92 = vector.shape_cast %82 : vector<16x16xf32> to vector<2x8x16xf32>
    %93 = arith.truncf %92 : vector<2x8x16xf32> to vector<2x8x16xbf16>
    %94 = vector.shape_cast %89 : vector<16x16xf32> to vector<2x8x16xf32>
    %95 = arith.truncf %94 : vector<2x8x16xf32> to vector<2x8x16xbf16>
    "tpu.trace_start"() <{level = 10 : i32, message = "bqd,bkd->bqk"}> : () -> ()
    %cst_54 = arith.constant dense<0.000000e+00> : vector<2x8x8xf32>
    %96 = tpu.matmul %91, %93, %cst_54 {dimension_numbers = #tpu.dot_dimension_numbers<[2], [2], [1], [1], [0, 0, 0, 1, 1, 1], [0], [0]>} : vector<2x8x16xbf16>, vector<2x8x16xbf16>, vector<2x8x8xf32> -> vector<2x8x8xf32>
    "tpu.trace_stop"() : () -> ()
    %cst_55 = arith.constant 2.500000e-01 : f32
    %97 = vector.broadcast %cst_55 : f32 to vector<2x8x8xf32>
    %98 = arith.mulf %96, %97 : vector<2x8x8xf32>
    %99 = arith.addf %98, %40 : vector<2x8x8xf32>
    %cst_56 = arith.constant dense<0xFF800000> : vector<2x8xf32>
    %100 = vector.multi_reduction <maximumf>, %99, %cst_56 [2] : vector<2x8x8xf32> to vector<2x8xf32>
    %101 = vector.shape_cast %100 : vector<2x8xf32> to vector<2x8x1xf32>
    %102 = vector.broadcast %101 : vector<2x8x1xf32> to vector<2x8x8xf32>
    %103 = arith.subf %99, %102 : vector<2x8x8xf32>
    %104 = math.exp %103 : vector<2x8x8xf32>
    %cst_57 = arith.constant dense<0.000000e+00> : vector<2x8xf32>
    %105 = vector.multi_reduction <add>, %104, %cst_57 [2] : vector<2x8x8xf32> to vector<2x8xf32>
    %106 = vector.shape_cast %105 : vector<2x8xf32> to vector<2x8x1xf32>
    %107 = vector.broadcast %106 : vector<2x8x1xf32> to vector<2x8x8xf32>
    %108 = arith.divf %104, %107 : vector<2x8x8xf32>
    %109 = arith.truncf %108 : vector<2x8x8xf32> to vector<2x8x8xbf16>
    "tpu.trace_start"() <{level = 10 : i32, message = "bqk,bkd->bqd"}> : () -> ()
    %cst_58 = arith.constant dense<0.000000e+00> : vector<2x8x16xf32>
    %110 = tpu.matmul %109, %95, %cst_58 {dimension_numbers = #tpu.dot_dimension_numbers<[2], [1], [1], [2], [0, 0, 0, 1, 1, 2], [0], [0]>} : vector<2x8x8xbf16>, vector<2x8x16xbf16>, vector<2x8x16xf32> -> vector<2x8x16xf32>
    "tpu.trace_stop"() : () -> ()
    %111 = vector.shape_cast %110 : vector<2x8x16xf32> to vector<16x16xf32>
    %112 = arith.truncf %111 : vector<16x16xf32> to vector<16x16xbf16>
    %c0_59 = arith.constant 0 : index
    %c0_60 = arith.constant 0 : index
    %c0_61 = arith.constant 0 : index
    %113 = vector.load %arg11[%c0_59, %c0_60, %c0_61] : memref<8x16x64xbf16, #tpu.memory_space<vmem>>, vector<1x16x64xbf16>
    %114 = vector.shape_cast %113 : vector<1x16x64xbf16> to vector<16x64xbf16>
    %cst_62 = arith.constant dense<0.000000e+00> : vector<16x64xf32>
    %115 = tpu.matmul %112, %114, %cst_62 {dimension_numbers = #tpu.dot_dimension_numbers<[1], [0], [0], [1], [0, 0, 1, 1], [], []>} : vector<16x16xbf16>, vector<16x64xbf16>, vector<16x64xf32> -> vector<16x64xf32>
    %116 = arith.addf %68, %115 : vector<16x64xf32>
    %c1_63 = arith.constant 1 : index
    %c0_64 = arith.constant 0 : index
    %c0_65 = arith.constant 0 : index
    %117 = vector.load %arg9[%c1_63, %c0_64, %c0_65] : memref<24x64x16xbf16, #tpu.memory_space<vmem>>, vector<1x64x16xbf16>
    %118 = vector.shape_cast %117 : vector<1x64x16xbf16> to vector<64x16xbf16>
    %cst_66 = arith.constant dense<0.000000e+00> : vector<16x16xf32>
    %119 = tpu.matmul %67, %118, %cst_66 {dimension_numbers = #tpu.dot_dimension_numbers<[1], [0], [0], [1], [0, 0, 1, 1], [], []>} : vector<16x64xbf16>, vector<64x16xbf16>, vector<16x16xf32> -> vector<16x16xf32>
    %c1_67 = arith.constant 1 : index
    %c0_68 = arith.constant 0 : index
    %c0_69 = arith.constant 0 : index
    %120 = vector.load %arg10[%c1_67, %c0_68, %c0_69] : memref<24x1x16xf32, #tpu.memory_space<vmem>>, vector<1x1x16xf32>
    %121 = vector.shape_cast %120 : vector<1x1x16xf32> to vector<1x16xf32>
    %122 = vector.broadcast %121 : vector<1x16xf32> to vector<16x16xf32>
    %123 = arith.addf %119, %122 : vector<16x16xf32>
    %c5 = arith.constant 5 : index
    %c0_70 = arith.constant 0 : index
    %c0_71 = arith.constant 0 : index
    %124 = vector.load %arg9[%c5, %c0_70, %c0_71] : memref<24x64x16xbf16, #tpu.memory_space<vmem>>, vector<1x64x16xbf16>
    %125 = vector.shape_cast %124 : vector<1x64x16xbf16> to vector<64x16xbf16>
    %cst_72 = arith.constant dense<0.000000e+00> : vector<16x16xf32>
    %126 = tpu.matmul %67, %125, %cst_72 {dimension_numbers = #tpu.dot_dimension_numbers<[1], [0], [0], [1], [0, 0, 1, 1], [], []>} : vector<16x64xbf16>, vector<64x16xbf16>, vector<16x16xf32> -> vector<16x16xf32>
    %c5_73 = arith.constant 5 : index
    %c0_74 = arith.constant 0 : index
    %c0_75 = arith.constant 0 : index
    %127 = vector.load %arg10[%c5_73, %c0_74, %c0_75] : memref<24x1x16xf32, #tpu.memory_space<vmem>>, vector<1x1x16xf32>
    %128 = vector.shape_cast %127 : vector<1x1x16xf32> to vector<1x16xf32>
    %129 = vector.broadcast %128 : vector<1x16xf32> to vector<16x16xf32>
    %130 = arith.addf %126, %129 : vector<16x16xf32>
    %c9 = arith.constant 9 : index
    %c0_76 = arith.constant 0 : index
    %c0_77 = arith.constant 0 : index
    %131 = vector.load %arg9[%c9, %c0_76, %c0_77] : memref<24x64x16xbf16, #tpu.memory_space<vmem>>, vector<1x64x16xbf16>
    %132 = vector.shape_cast %131 : vector<1x64x16xbf16> to vector<64x16xbf16>
    %cst_78 = arith.constant dense<0.000000e+00> : vector<16x16xf32>
    %133 = tpu.matmul %67, %132, %cst_78 {dimension_numbers = #tpu.dot_dimension_numbers<[1], [0], [0], [1], [0, 0, 1, 1], [], []>} : vector<16x64xbf16>, vector<64x16xbf16>, vector<16x16xf32> -> vector<16x16xf32>
    %c9_79 = arith.constant 9 : index
    %c0_80 = arith.constant 0 : index
    %c0_81 = arith.constant 0 : index
    %134 = vector.load %arg10[%c9_79, %c0_80, %c0_81] : memref<24x1x16xf32, #tpu.memory_space<vmem>>, vector<1x1x16xf32>
    %135 = vector.shape_cast %134 : vector<1x1x16xf32> to vector<1x16xf32>
    %136 = vector.broadcast %135 : vector<1x16xf32> to vector<16x16xf32>
    %137 = arith.addf %133, %136 : vector<16x16xf32>
    %138 = vector.shape_cast %123 : vector<16x16xf32> to vector<2x8x16xf32>
    %139 = arith.truncf %138 : vector<2x8x16xf32> to vector<2x8x16xbf16>
    %140 = vector.shape_cast %130 : vector<16x16xf32> to vector<2x8x16xf32>
    %141 = arith.truncf %140 : vector<2x8x16xf32> to vector<2x8x16xbf16>
    %142 = vector.shape_cast %137 : vector<16x16xf32> to vector<2x8x16xf32>
    %143 = arith.truncf %142 : vector<2x8x16xf32> to vector<2x8x16xbf16>
    "tpu.trace_start"() <{level = 10 : i32, message = "bqd,bkd->bqk"}> : () -> ()
    %cst_82 = arith.constant dense<0.000000e+00> : vector<2x8x8xf32>
    %144 = tpu.matmul %139, %141, %cst_82 {dimension_numbers = #tpu.dot_dimension_numbers<[2], [2], [1], [1], [0, 0, 0, 1, 1, 1], [0], [0]>} : vector<2x8x16xbf16>, vector<2x8x16xbf16>, vector<2x8x8xf32> -> vector<2x8x8xf32>
    "tpu.trace_stop"() : () -> ()
    %cst_83 = arith.constant 2.500000e-01 : f32
    %145 = vector.broadcast %cst_83 : f32 to vector<2x8x8xf32>
    %146 = arith.mulf %144, %145 : vector<2x8x8xf32>
    %147 = arith.addf %146, %40 : vector<2x8x8xf32>
    %cst_84 = arith.constant dense<0xFF800000> : vector<2x8xf32>
    %148 = vector.multi_reduction <maximumf>, %147, %cst_84 [2] : vector<2x8x8xf32> to vector<2x8xf32>
    %149 = vector.shape_cast %148 : vector<2x8xf32> to vector<2x8x1xf32>
    %150 = vector.broadcast %149 : vector<2x8x1xf32> to vector<2x8x8xf32>
    %151 = arith.subf %147, %150 : vector<2x8x8xf32>
    %152 = math.exp %151 : vector<2x8x8xf32>
    %cst_85 = arith.constant dense<0.000000e+00> : vector<2x8xf32>
    %153 = vector.multi_reduction <add>, %152, %cst_85 [2] : vector<2x8x8xf32> to vector<2x8xf32>
    %154 = vector.shape_cast %153 : vector<2x8xf32> to vector<2x8x1xf32>
    %155 = vector.broadcast %154 : vector<2x8x1xf32> to vector<2x8x8xf32>
    %156 = arith.divf %152, %155 : vector<2x8x8xf32>
    %157 = arith.truncf %156 : vector<2x8x8xf32> to vector<2x8x8xbf16>
    "tpu.trace_start"() <{level = 10 : i32, message = "bqk,bkd->bqd"}> : () -> ()
    %cst_86 = arith.constant dense<0.000000e+00> : vector<2x8x16xf32>
    %158 = tpu.matmul %157, %143, %cst_86 {dimension_numbers = #tpu.dot_dimension_numbers<[2], [1], [1], [2], [0, 0, 0, 1, 1, 2], [0], [0]>} : vector<2x8x8xbf16>, vector<2x8x16xbf16>, vector<2x8x16xf32> -> vector<2x8x16xf32>
    "tpu.trace_stop"() : () -> ()
    %159 = vector.shape_cast %158 : vector<2x8x16xf32> to vector<16x16xf32>
    %160 = arith.truncf %159 : vector<16x16xf32> to vector<16x16xbf16>
    %c1_87 = arith.constant 1 : index
    %c0_88 = arith.constant 0 : index
    %c0_89 = arith.constant 0 : index
    %161 = vector.load %arg11[%c1_87, %c0_88, %c0_89] : memref<8x16x64xbf16, #tpu.memory_space<vmem>>, vector<1x16x64xbf16>
    %162 = vector.shape_cast %161 : vector<1x16x64xbf16> to vector<16x64xbf16>
    %cst_90 = arith.constant dense<0.000000e+00> : vector<16x64xf32>
    %163 = tpu.matmul %160, %162, %cst_90 {dimension_numbers = #tpu.dot_dimension_numbers<[1], [0], [0], [1], [0, 0, 1, 1], [], []>} : vector<16x16xbf16>, vector<16x64xbf16>, vector<16x64xf32> -> vector<16x64xf32>
    %164 = arith.addf %116, %163 : vector<16x64xf32>
    %c2 = arith.constant 2 : index
    %c0_91 = arith.constant 0 : index
    %c0_92 = arith.constant 0 : index
    %165 = vector.load %arg9[%c2, %c0_91, %c0_92] : memref<24x64x16xbf16, #tpu.memory_space<vmem>>, vector<1x64x16xbf16>
    %166 = vector.shape_cast %165 : vector<1x64x16xbf16> to vector<64x16xbf16>
    %cst_93 = arith.constant dense<0.000000e+00> : vector<16x16xf32>
    %167 = tpu.matmul %67, %166, %cst_93 {dimension_numbers = #tpu.dot_dimension_numbers<[1], [0], [0], [1], [0, 0, 1, 1], [], []>} : vector<16x64xbf16>, vector<64x16xbf16>, vector<16x16xf32> -> vector<16x16xf32>
    %c2_94 = arith.constant 2 : index
    %c0_95 = arith.constant 0 : index
    %c0_96 = arith.constant 0 : index
    %168 = vector.load %arg10[%c2_94, %c0_95, %c0_96] : memref<24x1x16xf32, #tpu.memory_space<vmem>>, vector<1x1x16xf32>
    %169 = vector.shape_cast %168 : vector<1x1x16xf32> to vector<1x16xf32>
    %170 = vector.broadcast %169 : vector<1x16xf32> to vector<16x16xf32>
    %171 = arith.addf %167, %170 : vector<16x16xf32>
    %c6 = arith.constant 6 : index
    %c0_97 = arith.constant 0 : index
    %c0_98 = arith.constant 0 : index
    %172 = vector.load %arg9[%c6, %c0_97, %c0_98] : memref<24x64x16xbf16, #tpu.memory_space<vmem>>, vector<1x64x16xbf16>
    %173 = vector.shape_cast %172 : vector<1x64x16xbf16> to vector<64x16xbf16>
    %cst_99 = arith.constant dense<0.000000e+00> : vector<16x16xf32>
    %174 = tpu.matmul %67, %173, %cst_99 {dimension_numbers = #tpu.dot_dimension_numbers<[1], [0], [0], [1], [0, 0, 1, 1], [], []>} : vector<16x64xbf16>, vector<64x16xbf16>, vector<16x16xf32> -> vector<16x16xf32>
    %c6_100 = arith.constant 6 : index
    %c0_101 = arith.constant 0 : index
    %c0_102 = arith.constant 0 : index
    %175 = vector.load %arg10[%c6_100, %c0_101, %c0_102] : memref<24x1x16xf32, #tpu.memory_space<vmem>>, vector<1x1x16xf32>
    %176 = vector.shape_cast %175 : vector<1x1x16xf32> to vector<1x16xf32>
    %177 = vector.broadcast %176 : vector<1x16xf32> to vector<16x16xf32>
    %178 = arith.addf %174, %177 : vector<16x16xf32>
    %c10 = arith.constant 10 : index
    %c0_103 = arith.constant 0 : index
    %c0_104 = arith.constant 0 : index
    %179 = vector.load %arg9[%c10, %c0_103, %c0_104] : memref<24x64x16xbf16, #tpu.memory_space<vmem>>, vector<1x64x16xbf16>
    %180 = vector.shape_cast %179 : vector<1x64x16xbf16> to vector<64x16xbf16>
    %cst_105 = arith.constant dense<0.000000e+00> : vector<16x16xf32>
    %181 = tpu.matmul %67, %180, %cst_105 {dimension_numbers = #tpu.dot_dimension_numbers<[1], [0], [0], [1], [0, 0, 1, 1], [], []>} : vector<16x64xbf16>, vector<64x16xbf16>, vector<16x16xf32> -> vector<16x16xf32>
    %c10_106 = arith.constant 10 : index
    %c0_107 = arith.constant 0 : index
    %c0_108 = arith.constant 0 : index
    %182 = vector.load %arg10[%c10_106, %c0_107, %c0_108] : memref<24x1x16xf32, #tpu.memory_space<vmem>>, vector<1x1x16xf32>
    %183 = vector.shape_cast %182 : vector<1x1x16xf32> to vector<1x16xf32>
    %184 = vector.broadcast %183 : vector<1x16xf32> to vector<16x16xf32>
    %185 = arith.addf %181, %184 : vector<16x16xf32>
    %186 = vector.shape_cast %171 : vector<16x16xf32> to vector<2x8x16xf32>
    %187 = arith.truncf %186 : vector<2x8x16xf32> to vector<2x8x16xbf16>
    %188 = vector.shape_cast %178 : vector<16x16xf32> to vector<2x8x16xf32>
    %189 = arith.truncf %188 : vector<2x8x16xf32> to vector<2x8x16xbf16>
    %190 = vector.shape_cast %185 : vector<16x16xf32> to vector<2x8x16xf32>
    %191 = arith.truncf %190 : vector<2x8x16xf32> to vector<2x8x16xbf16>
    "tpu.trace_start"() <{level = 10 : i32, message = "bqd,bkd->bqk"}> : () -> ()
    %cst_109 = arith.constant dense<0.000000e+00> : vector<2x8x8xf32>
    %192 = tpu.matmul %187, %189, %cst_109 {dimension_numbers = #tpu.dot_dimension_numbers<[2], [2], [1], [1], [0, 0, 0, 1, 1, 1], [0], [0]>} : vector<2x8x16xbf16>, vector<2x8x16xbf16>, vector<2x8x8xf32> -> vector<2x8x8xf32>
    "tpu.trace_stop"() : () -> ()
    %cst_110 = arith.constant 2.500000e-01 : f32
    %193 = vector.broadcast %cst_110 : f32 to vector<2x8x8xf32>
    %194 = arith.mulf %192, %193 : vector<2x8x8xf32>
    %195 = arith.addf %194, %40 : vector<2x8x8xf32>
    %cst_111 = arith.constant dense<0xFF800000> : vector<2x8xf32>
    %196 = vector.multi_reduction <maximumf>, %195, %cst_111 [2] : vector<2x8x8xf32> to vector<2x8xf32>
    %197 = vector.shape_cast %196 : vector<2x8xf32> to vector<2x8x1xf32>
    %198 = vector.broadcast %197 : vector<2x8x1xf32> to vector<2x8x8xf32>
    %199 = arith.subf %195, %198 : vector<2x8x8xf32>
    %200 = math.exp %199 : vector<2x8x8xf32>
    %cst_112 = arith.constant dense<0.000000e+00> : vector<2x8xf32>
    %201 = vector.multi_reduction <add>, %200, %cst_112 [2] : vector<2x8x8xf32> to vector<2x8xf32>
    %202 = vector.shape_cast %201 : vector<2x8xf32> to vector<2x8x1xf32>
    %203 = vector.broadcast %202 : vector<2x8x1xf32> to vector<2x8x8xf32>
    %204 = arith.divf %200, %203 : vector<2x8x8xf32>
    %205 = arith.truncf %204 : vector<2x8x8xf32> to vector<2x8x8xbf16>
    "tpu.trace_start"() <{level = 10 : i32, message = "bqk,bkd->bqd"}> : () -> ()
    %cst_113 = arith.constant dense<0.000000e+00> : vector<2x8x16xf32>
    %206 = tpu.matmul %205, %191, %cst_113 {dimension_numbers = #tpu.dot_dimension_numbers<[2], [1], [1], [2], [0, 0, 0, 1, 1, 2], [0], [0]>} : vector<2x8x8xbf16>, vector<2x8x16xbf16>, vector<2x8x16xf32> -> vector<2x8x16xf32>
    "tpu.trace_stop"() : () -> ()
    %207 = vector.shape_cast %206 : vector<2x8x16xf32> to vector<16x16xf32>
    %208 = arith.truncf %207 : vector<16x16xf32> to vector<16x16xbf16>
    %c2_114 = arith.constant 2 : index
    %c0_115 = arith.constant 0 : index
    %c0_116 = arith.constant 0 : index
    %209 = vector.load %arg11[%c2_114, %c0_115, %c0_116] : memref<8x16x64xbf16, #tpu.memory_space<vmem>>, vector<1x16x64xbf16>
    %210 = vector.shape_cast %209 : vector<1x16x64xbf16> to vector<16x64xbf16>
    %cst_117 = arith.constant dense<0.000000e+00> : vector<16x64xf32>
    %211 = tpu.matmul %208, %210, %cst_117 {dimension_numbers = #tpu.dot_dimension_numbers<[1], [0], [0], [1], [0, 0, 1, 1], [], []>} : vector<16x16xbf16>, vector<16x64xbf16>, vector<16x64xf32> -> vector<16x64xf32>
    %212 = arith.addf %164, %211 : vector<16x64xf32>
    %c3 = arith.constant 3 : index
    %c0_118 = arith.constant 0 : index
    %c0_119 = arith.constant 0 : index
    %213 = vector.load %arg9[%c3, %c0_118, %c0_119] : memref<24x64x16xbf16, #tpu.memory_space<vmem>>, vector<1x64x16xbf16>
    %214 = vector.shape_cast %213 : vector<1x64x16xbf16> to vector<64x16xbf16>
    %cst_120 = arith.constant dense<0.000000e+00> : vector<16x16xf32>
    %215 = tpu.matmul %67, %214, %cst_120 {dimension_numbers = #tpu.dot_dimension_numbers<[1], [0], [0], [1], [0, 0, 1, 1], [], []>} : vector<16x64xbf16>, vector<64x16xbf16>, vector<16x16xf32> -> vector<16x16xf32>
    %c3_121 = arith.constant 3 : index
    %c0_122 = arith.constant 0 : index
    %c0_123 = arith.constant 0 : index
    %216 = vector.load %arg10[%c3_121, %c0_122, %c0_123] : memref<24x1x16xf32, #tpu.memory_space<vmem>>, vector<1x1x16xf32>
    %217 = vector.shape_cast %216 : vector<1x1x16xf32> to vector<1x16xf32>
    %218 = vector.broadcast %217 : vector<1x16xf32> to vector<16x16xf32>
    %219 = arith.addf %215, %218 : vector<16x16xf32>
    %c7 = arith.constant 7 : index
    %c0_124 = arith.constant 0 : index
    %c0_125 = arith.constant 0 : index
    %220 = vector.load %arg9[%c7, %c0_124, %c0_125] : memref<24x64x16xbf16, #tpu.memory_space<vmem>>, vector<1x64x16xbf16>
    %221 = vector.shape_cast %220 : vector<1x64x16xbf16> to vector<64x16xbf16>
    %cst_126 = arith.constant dense<0.000000e+00> : vector<16x16xf32>
    %222 = tpu.matmul %67, %221, %cst_126 {dimension_numbers = #tpu.dot_dimension_numbers<[1], [0], [0], [1], [0, 0, 1, 1], [], []>} : vector<16x64xbf16>, vector<64x16xbf16>, vector<16x16xf32> -> vector<16x16xf32>
    %c7_127 = arith.constant 7 : index
    %c0_128 = arith.constant 0 : index
    %c0_129 = arith.constant 0 : index
    %223 = vector.load %arg10[%c7_127, %c0_128, %c0_129] : memref<24x1x16xf32, #tpu.memory_space<vmem>>, vector<1x1x16xf32>
    %224 = vector.shape_cast %223 : vector<1x1x16xf32> to vector<1x16xf32>
    %225 = vector.broadcast %224 : vector<1x16xf32> to vector<16x16xf32>
    %226 = arith.addf %222, %225 : vector<16x16xf32>
    %c11 = arith.constant 11 : index
    %c0_130 = arith.constant 0 : index
    %c0_131 = arith.constant 0 : index
    %227 = vector.load %arg9[%c11, %c0_130, %c0_131] : memref<24x64x16xbf16, #tpu.memory_space<vmem>>, vector<1x64x16xbf16>
    %228 = vector.shape_cast %227 : vector<1x64x16xbf16> to vector<64x16xbf16>
    %cst_132 = arith.constant dense<0.000000e+00> : vector<16x16xf32>
    %229 = tpu.matmul %67, %228, %cst_132 {dimension_numbers = #tpu.dot_dimension_numbers<[1], [0], [0], [1], [0, 0, 1, 1], [], []>} : vector<16x64xbf16>, vector<64x16xbf16>, vector<16x16xf32> -> vector<16x16xf32>
    %c11_133 = arith.constant 11 : index
    %c0_134 = arith.constant 0 : index
    %c0_135 = arith.constant 0 : index
    %230 = vector.load %arg10[%c11_133, %c0_134, %c0_135] : memref<24x1x16xf32, #tpu.memory_space<vmem>>, vector<1x1x16xf32>
    %231 = vector.shape_cast %230 : vector<1x1x16xf32> to vector<1x16xf32>
    %232 = vector.broadcast %231 : vector<1x16xf32> to vector<16x16xf32>
    %233 = arith.addf %229, %232 : vector<16x16xf32>
    %234 = vector.shape_cast %219 : vector<16x16xf32> to vector<2x8x16xf32>
    %235 = arith.truncf %234 : vector<2x8x16xf32> to vector<2x8x16xbf16>
    %236 = vector.shape_cast %226 : vector<16x16xf32> to vector<2x8x16xf32>
    %237 = arith.truncf %236 : vector<2x8x16xf32> to vector<2x8x16xbf16>
    %238 = vector.shape_cast %233 : vector<16x16xf32> to vector<2x8x16xf32>
    %239 = arith.truncf %238 : vector<2x8x16xf32> to vector<2x8x16xbf16>
    "tpu.trace_start"() <{level = 10 : i32, message = "bqd,bkd->bqk"}> : () -> ()
    %cst_136 = arith.constant dense<0.000000e+00> : vector<2x8x8xf32>
    %240 = tpu.matmul %235, %237, %cst_136 {dimension_numbers = #tpu.dot_dimension_numbers<[2], [2], [1], [1], [0, 0, 0, 1, 1, 1], [0], [0]>} : vector<2x8x16xbf16>, vector<2x8x16xbf16>, vector<2x8x8xf32> -> vector<2x8x8xf32>
    "tpu.trace_stop"() : () -> ()
    %cst_137 = arith.constant 2.500000e-01 : f32
    %241 = vector.broadcast %cst_137 : f32 to vector<2x8x8xf32>
    %242 = arith.mulf %240, %241 : vector<2x8x8xf32>
    %243 = arith.addf %242, %40 : vector<2x8x8xf32>
    %cst_138 = arith.constant dense<0xFF800000> : vector<2x8xf32>
    %244 = vector.multi_reduction <maximumf>, %243, %cst_138 [2] : vector<2x8x8xf32> to vector<2x8xf32>
    %245 = vector.shape_cast %244 : vector<2x8xf32> to vector<2x8x1xf32>
    %246 = vector.broadcast %245 : vector<2x8x1xf32> to vector<2x8x8xf32>
    %247 = arith.subf %243, %246 : vector<2x8x8xf32>
    %248 = math.exp %247 : vector<2x8x8xf32>
    %cst_139 = arith.constant dense<0.000000e+00> : vector<2x8xf32>
    %249 = vector.multi_reduction <add>, %248, %cst_139 [2] : vector<2x8x8xf32> to vector<2x8xf32>
    %250 = vector.shape_cast %249 : vector<2x8xf32> to vector<2x8x1xf32>
    %251 = vector.broadcast %250 : vector<2x8x1xf32> to vector<2x8x8xf32>
    %252 = arith.divf %248, %251 : vector<2x8x8xf32>
    %253 = arith.truncf %252 : vector<2x8x8xf32> to vector<2x8x8xbf16>
    "tpu.trace_start"() <{level = 10 : i32, message = "bqk,bkd->bqd"}> : () -> ()
    %cst_140 = arith.constant dense<0.000000e+00> : vector<2x8x16xf32>
    %254 = tpu.matmul %253, %239, %cst_140 {dimension_numbers = #tpu.dot_dimension_numbers<[2], [1], [1], [2], [0, 0, 0, 1, 1, 2], [0], [0]>} : vector<2x8x8xbf16>, vector<2x8x16xbf16>, vector<2x8x16xf32> -> vector<2x8x16xf32>
    "tpu.trace_stop"() : () -> ()
    %255 = vector.shape_cast %254 : vector<2x8x16xf32> to vector<16x16xf32>
    %256 = arith.truncf %255 : vector<16x16xf32> to vector<16x16xbf16>
    %c3_141 = arith.constant 3 : index
    %c0_142 = arith.constant 0 : index
    %c0_143 = arith.constant 0 : index
    %257 = vector.load %arg11[%c3_141, %c0_142, %c0_143] : memref<8x16x64xbf16, #tpu.memory_space<vmem>>, vector<1x16x64xbf16>
    %258 = vector.shape_cast %257 : vector<1x16x64xbf16> to vector<16x64xbf16>
    %cst_144 = arith.constant dense<0.000000e+00> : vector<16x64xf32>
    %259 = tpu.matmul %256, %258, %cst_144 {dimension_numbers = #tpu.dot_dimension_numbers<[1], [0], [0], [1], [0, 0, 1, 1], [], []>} : vector<16x16xbf16>, vector<16x64xbf16>, vector<16x64xf32> -> vector<16x64xf32>
    %260 = arith.addf %212, %259 : vector<16x64xf32>
    %261 = arith.addf %15, %260 : vector<16x64xf32>
    %c0_145 = arith.constant 0 : index
    %c0_146 = arith.constant 0 : index
    %c0_147 = arith.constant 0 : index
    %262 = vector.load %arg12[%c0_145, %c0_146, %c0_147] : memref<2x1x64xf32, #tpu.memory_space<vmem>>, vector<1x1x64xf32>
    %263 = vector.shape_cast %262 : vector<1x1x64xf32> to vector<1x64xf32>
    %264 = vector.broadcast %263 : vector<1x64xf32> to vector<16x64xf32>
    %265 = arith.addf %261, %264 : vector<16x64xf32>
    %c0_148 = arith.constant 0 : index
    %c0_149 = arith.constant 0 : index
    %c0_150 = arith.constant 0 : index
    %266 = vector.load %arg13[%c0_148, %c0_149, %c0_150] : memref<2x1x64xf32, #tpu.memory_space<vmem>>, vector<1x1x64xf32>
    %267 = vector.shape_cast %266 : vector<1x1x64xf32> to vector<1x64xf32>
    %c0_151 = arith.constant 0 : index
    %c0_152 = arith.constant 0 : index
    %c0_153 = arith.constant 0 : index
    %268 = vector.load %arg14[%c0_151, %c0_152, %c0_153] : memref<2x1x64xf32, #tpu.memory_space<vmem>>, vector<1x1x64xf32>
    %269 = vector.shape_cast %268 : vector<1x1x64xf32> to vector<1x64xf32>
    %cst_154 = arith.constant dense<0.000000e+00> : vector<16xf32>
    %270 = vector.multi_reduction <add>, %265, %cst_154 [1] : vector<16x64xf32> to vector<16xf32>
    %271 = vector.shape_cast %270 : vector<16xf32> to vector<16x1xf32>
    %cst_155 = arith.constant 6.400000e+01 : f32
    %272 = vector.broadcast %cst_155 : f32 to vector<16x1xf32>
    %273 = arith.divf %271, %272 : vector<16x1xf32>
    %274 = vector.broadcast %273 : vector<16x1xf32> to vector<16x64xf32>
    %275 = arith.subf %265, %274 : vector<16x64xf32>
    %276 = arith.mulf %275, %275 : vector<16x64xf32>
    %cst_156 = arith.constant dense<0.000000e+00> : vector<16xf32>
    %277 = vector.multi_reduction <add>, %276, %cst_156 [1] : vector<16x64xf32> to vector<16xf32>
    %278 = vector.shape_cast %277 : vector<16xf32> to vector<16x1xf32>
    %cst_157 = arith.constant 6.400000e+01 : f32
    %279 = vector.broadcast %cst_157 : f32 to vector<16x1xf32>
    %280 = arith.divf %278, %279 : vector<16x1xf32>
    %281 = vector.broadcast %273 : vector<16x1xf32> to vector<16x64xf32>
    %282 = arith.subf %265, %281 : vector<16x64xf32>
    %cst_158 = arith.constant 9.99999974E-6 : f32
    %283 = vector.broadcast %cst_158 : f32 to vector<16x1xf32>
    %284 = arith.addf %280, %283 : vector<16x1xf32>
    %285 = math.rsqrt %284 : vector<16x1xf32>
    %286 = vector.broadcast %285 : vector<16x1xf32> to vector<16x64xf32>
    %287 = arith.mulf %282, %286 : vector<16x64xf32>
    %288 = vector.broadcast %267 : vector<1x64xf32> to vector<16x64xf32>
    %289 = arith.mulf %287, %288 : vector<16x64xf32>
    %290 = vector.broadcast %269 : vector<1x64xf32> to vector<16x64xf32>
    %291 = arith.addf %289, %290 : vector<16x64xf32>
    %292 = arith.truncf %291 : vector<16x64xf32> to vector<16x64xbf16>
    %c0_159 = arith.constant 0 : index
    %c0_160 = arith.constant 0 : index
    %c0_161 = arith.constant 0 : index
    %293 = vector.load %arg15[%c0_159, %c0_160, %c0_161] : memref<2x64x256xbf16, #tpu.memory_space<vmem>>, vector<1x64x256xbf16>
    %294 = vector.shape_cast %293 : vector<1x64x256xbf16> to vector<64x256xbf16>
    %cst_162 = arith.constant dense<0.000000e+00> : vector<16x256xf32>
    %295 = tpu.matmul %292, %294, %cst_162 {dimension_numbers = #tpu.dot_dimension_numbers<[1], [0], [0], [1], [0, 0, 1, 1], [], []>} : vector<16x64xbf16>, vector<64x256xbf16>, vector<16x256xf32> -> vector<16x256xf32>
    %c0_163 = arith.constant 0 : index
    %c0_164 = arith.constant 0 : index
    %c0_165 = arith.constant 0 : index
    %296 = vector.load %arg16[%c0_163, %c0_164, %c0_165] : memref<2x1x256xf32, #tpu.memory_space<vmem>>, vector<1x1x256xf32>
    %297 = vector.shape_cast %296 : vector<1x1x256xf32> to vector<1x256xf32>
    %298 = vector.broadcast %297 : vector<1x256xf32> to vector<16x256xf32>
    %299 = arith.addf %295, %298 : vector<16x256xf32>
    %300 = arith.mulf %299, %299 : vector<16x256xf32>
    %301 = arith.mulf %299, %300 : vector<16x256xf32>
    %cst_166 = arith.constant 4.471500e-02 : f32
    %302 = vector.broadcast %cst_166 : f32 to vector<16x256xf32>
    %303 = arith.mulf %302, %301 : vector<16x256xf32>
    %304 = arith.addf %299, %303 : vector<16x256xf32>
    %cst_167 = arith.constant 0.797884583 : f32
    %305 = vector.broadcast %cst_167 : f32 to vector<16x256xf32>
    %306 = arith.mulf %305, %304 : vector<16x256xf32>
    %307 = math.tanh %306 : vector<16x256xf32>
    %cst_168 = arith.constant 1.000000e+00 : f32
    %308 = vector.broadcast %cst_168 : f32 to vector<16x256xf32>
    %309 = arith.addf %308, %307 : vector<16x256xf32>
    %cst_169 = arith.constant 5.000000e-01 : f32
    %310 = vector.broadcast %cst_169 : f32 to vector<16x256xf32>
    %311 = arith.mulf %310, %309 : vector<16x256xf32>
    %312 = arith.mulf %299, %311 : vector<16x256xf32>
    %313 = arith.truncf %312 : vector<16x256xf32> to vector<16x256xbf16>
    %c0_170 = arith.constant 0 : index
    %c0_171 = arith.constant 0 : index
    %c0_172 = arith.constant 0 : index
    %314 = vector.load %arg17[%c0_170, %c0_171, %c0_172] : memref<2x256x64xbf16, #tpu.memory_space<vmem>>, vector<1x256x64xbf16>
    %315 = vector.shape_cast %314 : vector<1x256x64xbf16> to vector<256x64xbf16>
    %cst_173 = arith.constant dense<0.000000e+00> : vector<16x64xf32>
    %316 = tpu.matmul %313, %315, %cst_173 {dimension_numbers = #tpu.dot_dimension_numbers<[1], [0], [0], [1], [0, 0, 1, 1], [], []>} : vector<16x256xbf16>, vector<256x64xbf16>, vector<16x64xf32> -> vector<16x64xf32>
    %c0_174 = arith.constant 0 : index
    %c0_175 = arith.constant 0 : index
    %c0_176 = arith.constant 0 : index
    %317 = vector.load %arg18[%c0_174, %c0_175, %c0_176] : memref<2x1x64xf32, #tpu.memory_space<vmem>>, vector<1x1x64xf32>
    %318 = vector.shape_cast %317 : vector<1x1x64xf32> to vector<1x64xf32>
    %319 = vector.broadcast %318 : vector<1x64xf32> to vector<16x64xf32>
    %320 = arith.addf %316, %319 : vector<16x64xf32>
    %321 = arith.addf %265, %320 : vector<16x64xf32>
    %c1_177 = arith.constant 1 : index
    %c0_178 = arith.constant 0 : index
    %c0_179 = arith.constant 0 : index
    %322 = vector.load %arg7[%c1_177, %c0_178, %c0_179] : memref<2x1x64xf32, #tpu.memory_space<vmem>>, vector<1x1x64xf32>
    %323 = vector.shape_cast %322 : vector<1x1x64xf32> to vector<1x64xf32>
    %c1_180 = arith.constant 1 : index
    %c0_181 = arith.constant 0 : index
    %c0_182 = arith.constant 0 : index
    %324 = vector.load %arg8[%c1_180, %c0_181, %c0_182] : memref<2x1x64xf32, #tpu.memory_space<vmem>>, vector<1x1x64xf32>
    %325 = vector.shape_cast %324 : vector<1x1x64xf32> to vector<1x64xf32>
    %cst_183 = arith.constant dense<0.000000e+00> : vector<16xf32>
    %326 = vector.multi_reduction <add>, %321, %cst_183 [1] : vector<16x64xf32> to vector<16xf32>
    %327 = vector.shape_cast %326 : vector<16xf32> to vector<16x1xf32>
    %cst_184 = arith.constant 6.400000e+01 : f32
    %328 = vector.broadcast %cst_184 : f32 to vector<16x1xf32>
    %329 = arith.divf %327, %328 : vector<16x1xf32>
    %330 = vector.broadcast %329 : vector<16x1xf32> to vector<16x64xf32>
    %331 = arith.subf %321, %330 : vector<16x64xf32>
    %332 = arith.mulf %331, %331 : vector<16x64xf32>
    %cst_185 = arith.constant dense<0.000000e+00> : vector<16xf32>
    %333 = vector.multi_reduction <add>, %332, %cst_185 [1] : vector<16x64xf32> to vector<16xf32>
    %334 = vector.shape_cast %333 : vector<16xf32> to vector<16x1xf32>
    %cst_186 = arith.constant 6.400000e+01 : f32
    %335 = vector.broadcast %cst_186 : f32 to vector<16x1xf32>
    %336 = arith.divf %334, %335 : vector<16x1xf32>
    %337 = vector.broadcast %329 : vector<16x1xf32> to vector<16x64xf32>
    %338 = arith.subf %321, %337 : vector<16x64xf32>
    %cst_187 = arith.constant 9.99999974E-6 : f32
    %339 = vector.broadcast %cst_187 : f32 to vector<16x1xf32>
    %340 = arith.addf %336, %339 : vector<16x1xf32>
    %341 = math.rsqrt %340 : vector<16x1xf32>
    %342 = vector.broadcast %341 : vector<16x1xf32> to vector<16x64xf32>
    %343 = arith.mulf %338, %342 : vector<16x64xf32>
    %344 = vector.broadcast %323 : vector<1x64xf32> to vector<16x64xf32>
    %345 = arith.mulf %343, %344 : vector<16x64xf32>
    %346 = vector.broadcast %325 : vector<1x64xf32> to vector<16x64xf32>
    %347 = arith.addf %345, %346 : vector<16x64xf32>
    %348 = arith.truncf %347 : vector<16x64xf32> to vector<16x64xbf16>
    %cst_188 = arith.constant 0.000000e+00 : f32
    %349 = vector.broadcast %cst_188 : f32 to vector<16x64xf32>
    %c12 = arith.constant 12 : index
    %c0_189 = arith.constant 0 : index
    %c0_190 = arith.constant 0 : index
    %350 = vector.load %arg9[%c12, %c0_189, %c0_190] : memref<24x64x16xbf16, #tpu.memory_space<vmem>>, vector<1x64x16xbf16>
    %351 = vector.shape_cast %350 : vector<1x64x16xbf16> to vector<64x16xbf16>
    %cst_191 = arith.constant dense<0.000000e+00> : vector<16x16xf32>
    %352 = tpu.matmul %348, %351, %cst_191 {dimension_numbers = #tpu.dot_dimension_numbers<[1], [0], [0], [1], [0, 0, 1, 1], [], []>} : vector<16x64xbf16>, vector<64x16xbf16>, vector<16x16xf32> -> vector<16x16xf32>
    %c12_192 = arith.constant 12 : index
    %c0_193 = arith.constant 0 : index
    %c0_194 = arith.constant 0 : index
    %353 = vector.load %arg10[%c12_192, %c0_193, %c0_194] : memref<24x1x16xf32, #tpu.memory_space<vmem>>, vector<1x1x16xf32>
    %354 = vector.shape_cast %353 : vector<1x1x16xf32> to vector<1x16xf32>
    %355 = vector.broadcast %354 : vector<1x16xf32> to vector<16x16xf32>
    %356 = arith.addf %352, %355 : vector<16x16xf32>
    %c16 = arith.constant 16 : index
    %c0_195 = arith.constant 0 : index
    %c0_196 = arith.constant 0 : index
    %357 = vector.load %arg9[%c16, %c0_195, %c0_196] : memref<24x64x16xbf16, #tpu.memory_space<vmem>>, vector<1x64x16xbf16>
    %358 = vector.shape_cast %357 : vector<1x64x16xbf16> to vector<64x16xbf16>
    %cst_197 = arith.constant dense<0.000000e+00> : vector<16x16xf32>
    %359 = tpu.matmul %348, %358, %cst_197 {dimension_numbers = #tpu.dot_dimension_numbers<[1], [0], [0], [1], [0, 0, 1, 1], [], []>} : vector<16x64xbf16>, vector<64x16xbf16>, vector<16x16xf32> -> vector<16x16xf32>
    %c16_198 = arith.constant 16 : index
    %c0_199 = arith.constant 0 : index
    %c0_200 = arith.constant 0 : index
    %360 = vector.load %arg10[%c16_198, %c0_199, %c0_200] : memref<24x1x16xf32, #tpu.memory_space<vmem>>, vector<1x1x16xf32>
    %361 = vector.shape_cast %360 : vector<1x1x16xf32> to vector<1x16xf32>
    %362 = vector.broadcast %361 : vector<1x16xf32> to vector<16x16xf32>
    %363 = arith.addf %359, %362 : vector<16x16xf32>
    %c20 = arith.constant 20 : index
    %c0_201 = arith.constant 0 : index
    %c0_202 = arith.constant 0 : index
    %364 = vector.load %arg9[%c20, %c0_201, %c0_202] : memref<24x64x16xbf16, #tpu.memory_space<vmem>>, vector<1x64x16xbf16>
    %365 = vector.shape_cast %364 : vector<1x64x16xbf16> to vector<64x16xbf16>
    %cst_203 = arith.constant dense<0.000000e+00> : vector<16x16xf32>
    %366 = tpu.matmul %348, %365, %cst_203 {dimension_numbers = #tpu.dot_dimension_numbers<[1], [0], [0], [1], [0, 0, 1, 1], [], []>} : vector<16x64xbf16>, vector<64x16xbf16>, vector<16x16xf32> -> vector<16x16xf32>
    %c20_204 = arith.constant 20 : index
    %c0_205 = arith.constant 0 : index
    %c0_206 = arith.constant 0 : index
    %367 = vector.load %arg10[%c20_204, %c0_205, %c0_206] : memref<24x1x16xf32, #tpu.memory_space<vmem>>, vector<1x1x16xf32>
    %368 = vector.shape_cast %367 : vector<1x1x16xf32> to vector<1x16xf32>
    %369 = vector.broadcast %368 : vector<1x16xf32> to vector<16x16xf32>
    %370 = arith.addf %366, %369 : vector<16x16xf32>
    %371 = vector.shape_cast %356 : vector<16x16xf32> to vector<2x8x16xf32>
    %372 = arith.truncf %371 : vector<2x8x16xf32> to vector<2x8x16xbf16>
    %373 = vector.shape_cast %363 : vector<16x16xf32> to vector<2x8x16xf32>
    %374 = arith.truncf %373 : vector<2x8x16xf32> to vector<2x8x16xbf16>
    %375 = vector.shape_cast %370 : vector<16x16xf32> to vector<2x8x16xf32>
    %376 = arith.truncf %375 : vector<2x8x16xf32> to vector<2x8x16xbf16>
    "tpu.trace_start"() <{level = 10 : i32, message = "bqd,bkd->bqk"}> : () -> ()
    %cst_207 = arith.constant dense<0.000000e+00> : vector<2x8x8xf32>
    %377 = tpu.matmul %372, %374, %cst_207 {dimension_numbers = #tpu.dot_dimension_numbers<[2], [2], [1], [1], [0, 0, 0, 1, 1, 1], [0], [0]>} : vector<2x8x16xbf16>, vector<2x8x16xbf16>, vector<2x8x8xf32> -> vector<2x8x8xf32>
    "tpu.trace_stop"() : () -> ()
    %cst_208 = arith.constant 2.500000e-01 : f32
    %378 = vector.broadcast %cst_208 : f32 to vector<2x8x8xf32>
    %379 = arith.mulf %377, %378 : vector<2x8x8xf32>
    %380 = arith.addf %379, %40 : vector<2x8x8xf32>
    %cst_209 = arith.constant dense<0xFF800000> : vector<2x8xf32>
    %381 = vector.multi_reduction <maximumf>, %380, %cst_209 [2] : vector<2x8x8xf32> to vector<2x8xf32>
    %382 = vector.shape_cast %381 : vector<2x8xf32> to vector<2x8x1xf32>
    %383 = vector.broadcast %382 : vector<2x8x1xf32> to vector<2x8x8xf32>
    %384 = arith.subf %380, %383 : vector<2x8x8xf32>
    %385 = math.exp %384 : vector<2x8x8xf32>
    %cst_210 = arith.constant dense<0.000000e+00> : vector<2x8xf32>
    %386 = vector.multi_reduction <add>, %385, %cst_210 [2] : vector<2x8x8xf32> to vector<2x8xf32>
    %387 = vector.shape_cast %386 : vector<2x8xf32> to vector<2x8x1xf32>
    %388 = vector.broadcast %387 : vector<2x8x1xf32> to vector<2x8x8xf32>
    %389 = arith.divf %385, %388 : vector<2x8x8xf32>
    %390 = arith.truncf %389 : vector<2x8x8xf32> to vector<2x8x8xbf16>
    "tpu.trace_start"() <{level = 10 : i32, message = "bqk,bkd->bqd"}> : () -> ()
    %cst_211 = arith.constant dense<0.000000e+00> : vector<2x8x16xf32>
    %391 = tpu.matmul %390, %376, %cst_211 {dimension_numbers = #tpu.dot_dimension_numbers<[2], [1], [1], [2], [0, 0, 0, 1, 1, 2], [0], [0]>} : vector<2x8x8xbf16>, vector<2x8x16xbf16>, vector<2x8x16xf32> -> vector<2x8x16xf32>
    "tpu.trace_stop"() : () -> ()
    %392 = vector.shape_cast %391 : vector<2x8x16xf32> to vector<16x16xf32>
    %393 = arith.truncf %392 : vector<16x16xf32> to vector<16x16xbf16>
    %c4_212 = arith.constant 4 : index
    %c0_213 = arith.constant 0 : index
    %c0_214 = arith.constant 0 : index
    %394 = vector.load %arg11[%c4_212, %c0_213, %c0_214] : memref<8x16x64xbf16, #tpu.memory_space<vmem>>, vector<1x16x64xbf16>
    %395 = vector.shape_cast %394 : vector<1x16x64xbf16> to vector<16x64xbf16>
    %cst_215 = arith.constant dense<0.000000e+00> : vector<16x64xf32>
    %396 = tpu.matmul %393, %395, %cst_215 {dimension_numbers = #tpu.dot_dimension_numbers<[1], [0], [0], [1], [0, 0, 1, 1], [], []>} : vector<16x16xbf16>, vector<16x64xbf16>, vector<16x64xf32> -> vector<16x64xf32>
    %397 = arith.addf %349, %396 : vector<16x64xf32>
    %c13 = arith.constant 13 : index
    %c0_216 = arith.constant 0 : index
    %c0_217 = arith.constant 0 : index
    %398 = vector.load %arg9[%c13, %c0_216, %c0_217] : memref<24x64x16xbf16, #tpu.memory_space<vmem>>, vector<1x64x16xbf16>
    %399 = vector.shape_cast %398 : vector<1x64x16xbf16> to vector<64x16xbf16>
    %cst_218 = arith.constant dense<0.000000e+00> : vector<16x16xf32>
    %400 = tpu.matmul %348, %399, %cst_218 {dimension_numbers = #tpu.dot_dimension_numbers<[1], [0], [0], [1], [0, 0, 1, 1], [], []>} : vector<16x64xbf16>, vector<64x16xbf16>, vector<16x16xf32> -> vector<16x16xf32>
    %c13_219 = arith.constant 13 : index
    %c0_220 = arith.constant 0 : index
    %c0_221 = arith.constant 0 : index
    %401 = vector.load %arg10[%c13_219, %c0_220, %c0_221] : memref<24x1x16xf32, #tpu.memory_space<vmem>>, vector<1x1x16xf32>
    %402 = vector.shape_cast %401 : vector<1x1x16xf32> to vector<1x16xf32>
    %403 = vector.broadcast %402 : vector<1x16xf32> to vector<16x16xf32>
    %404 = arith.addf %400, %403 : vector<16x16xf32>
    %c17 = arith.constant 17 : index
    %c0_222 = arith.constant 0 : index
    %c0_223 = arith.constant 0 : index
    %405 = vector.load %arg9[%c17, %c0_222, %c0_223] : memref<24x64x16xbf16, #tpu.memory_space<vmem>>, vector<1x64x16xbf16>
    %406 = vector.shape_cast %405 : vector<1x64x16xbf16> to vector<64x16xbf16>
    %cst_224 = arith.constant dense<0.000000e+00> : vector<16x16xf32>
    %407 = tpu.matmul %348, %406, %cst_224 {dimension_numbers = #tpu.dot_dimension_numbers<[1], [0], [0], [1], [0, 0, 1, 1], [], []>} : vector<16x64xbf16>, vector<64x16xbf16>, vector<16x16xf32> -> vector<16x16xf32>
    %c17_225 = arith.constant 17 : index
    %c0_226 = arith.constant 0 : index
    %c0_227 = arith.constant 0 : index
    %408 = vector.load %arg10[%c17_225, %c0_226, %c0_227] : memref<24x1x16xf32, #tpu.memory_space<vmem>>, vector<1x1x16xf32>
    %409 = vector.shape_cast %408 : vector<1x1x16xf32> to vector<1x16xf32>
    %410 = vector.broadcast %409 : vector<1x16xf32> to vector<16x16xf32>
    %411 = arith.addf %407, %410 : vector<16x16xf32>
    %c21 = arith.constant 21 : index
    %c0_228 = arith.constant 0 : index
    %c0_229 = arith.constant 0 : index
    %412 = vector.load %arg9[%c21, %c0_228, %c0_229] : memref<24x64x16xbf16, #tpu.memory_space<vmem>>, vector<1x64x16xbf16>
    %413 = vector.shape_cast %412 : vector<1x64x16xbf16> to vector<64x16xbf16>
    %cst_230 = arith.constant dense<0.000000e+00> : vector<16x16xf32>
    %414 = tpu.matmul %348, %413, %cst_230 {dimension_numbers = #tpu.dot_dimension_numbers<[1], [0], [0], [1], [0, 0, 1, 1], [], []>} : vector<16x64xbf16>, vector<64x16xbf16>, vector<16x16xf32> -> vector<16x16xf32>
    %c21_231 = arith.constant 21 : index
    %c0_232 = arith.constant 0 : index
    %c0_233 = arith.constant 0 : index
    %415 = vector.load %arg10[%c21_231, %c0_232, %c0_233] : memref<24x1x16xf32, #tpu.memory_space<vmem>>, vector<1x1x16xf32>
    %416 = vector.shape_cast %415 : vector<1x1x16xf32> to vector<1x16xf32>
    %417 = vector.broadcast %416 : vector<1x16xf32> to vector<16x16xf32>
    %418 = arith.addf %414, %417 : vector<16x16xf32>
    %419 = vector.shape_cast %404 : vector<16x16xf32> to vector<2x8x16xf32>
    %420 = arith.truncf %419 : vector<2x8x16xf32> to vector<2x8x16xbf16>
    %421 = vector.shape_cast %411 : vector<16x16xf32> to vector<2x8x16xf32>
    %422 = arith.truncf %421 : vector<2x8x16xf32> to vector<2x8x16xbf16>
    %423 = vector.shape_cast %418 : vector<16x16xf32> to vector<2x8x16xf32>
    %424 = arith.truncf %423 : vector<2x8x16xf32> to vector<2x8x16xbf16>
    "tpu.trace_start"() <{level = 10 : i32, message = "bqd,bkd->bqk"}> : () -> ()
    %cst_234 = arith.constant dense<0.000000e+00> : vector<2x8x8xf32>
    %425 = tpu.matmul %420, %422, %cst_234 {dimension_numbers = #tpu.dot_dimension_numbers<[2], [2], [1], [1], [0, 0, 0, 1, 1, 1], [0], [0]>} : vector<2x8x16xbf16>, vector<2x8x16xbf16>, vector<2x8x8xf32> -> vector<2x8x8xf32>
    "tpu.trace_stop"() : () -> ()
    %cst_235 = arith.constant 2.500000e-01 : f32
    %426 = vector.broadcast %cst_235 : f32 to vector<2x8x8xf32>
    %427 = arith.mulf %425, %426 : vector<2x8x8xf32>
    %428 = arith.addf %427, %40 : vector<2x8x8xf32>
    %cst_236 = arith.constant dense<0xFF800000> : vector<2x8xf32>
    %429 = vector.multi_reduction <maximumf>, %428, %cst_236 [2] : vector<2x8x8xf32> to vector<2x8xf32>
    %430 = vector.shape_cast %429 : vector<2x8xf32> to vector<2x8x1xf32>
    %431 = vector.broadcast %430 : vector<2x8x1xf32> to vector<2x8x8xf32>
    %432 = arith.subf %428, %431 : vector<2x8x8xf32>
    %433 = math.exp %432 : vector<2x8x8xf32>
    %cst_237 = arith.constant dense<0.000000e+00> : vector<2x8xf32>
    %434 = vector.multi_reduction <add>, %433, %cst_237 [2] : vector<2x8x8xf32> to vector<2x8xf32>
    %435 = vector.shape_cast %434 : vector<2x8xf32> to vector<2x8x1xf32>
    %436 = vector.broadcast %435 : vector<2x8x1xf32> to vector<2x8x8xf32>
    %437 = arith.divf %433, %436 : vector<2x8x8xf32>
    %438 = arith.truncf %437 : vector<2x8x8xf32> to vector<2x8x8xbf16>
    "tpu.trace_start"() <{level = 10 : i32, message = "bqk,bkd->bqd"}> : () -> ()
    %cst_238 = arith.constant dense<0.000000e+00> : vector<2x8x16xf32>
    %439 = tpu.matmul %438, %424, %cst_238 {dimension_numbers = #tpu.dot_dimension_numbers<[2], [1], [1], [2], [0, 0, 0, 1, 1, 2], [0], [0]>} : vector<2x8x8xbf16>, vector<2x8x16xbf16>, vector<2x8x16xf32> -> vector<2x8x16xf32>
    "tpu.trace_stop"() : () -> ()
    %440 = vector.shape_cast %439 : vector<2x8x16xf32> to vector<16x16xf32>
    %441 = arith.truncf %440 : vector<16x16xf32> to vector<16x16xbf16>
    %c5_239 = arith.constant 5 : index
    %c0_240 = arith.constant 0 : index
    %c0_241 = arith.constant 0 : index
    %442 = vector.load %arg11[%c5_239, %c0_240, %c0_241] : memref<8x16x64xbf16, #tpu.memory_space<vmem>>, vector<1x16x64xbf16>
    %443 = vector.shape_cast %442 : vector<1x16x64xbf16> to vector<16x64xbf16>
    %cst_242 = arith.constant dense<0.000000e+00> : vector<16x64xf32>
    %444 = tpu.matmul %441, %443, %cst_242 {dimension_numbers = #tpu.dot_dimension_numbers<[1], [0], [0], [1], [0, 0, 1, 1], [], []>} : vector<16x16xbf16>, vector<16x64xbf16>, vector<16x64xf32> -> vector<16x64xf32>
    %445 = arith.addf %397, %444 : vector<16x64xf32>
    %c14 = arith.constant 14 : index
    %c0_243 = arith.constant 0 : index
    %c0_244 = arith.constant 0 : index
    %446 = vector.load %arg9[%c14, %c0_243, %c0_244] : memref<24x64x16xbf16, #tpu.memory_space<vmem>>, vector<1x64x16xbf16>
    %447 = vector.shape_cast %446 : vector<1x64x16xbf16> to vector<64x16xbf16>
    %cst_245 = arith.constant dense<0.000000e+00> : vector<16x16xf32>
    %448 = tpu.matmul %348, %447, %cst_245 {dimension_numbers = #tpu.dot_dimension_numbers<[1], [0], [0], [1], [0, 0, 1, 1], [], []>} : vector<16x64xbf16>, vector<64x16xbf16>, vector<16x16xf32> -> vector<16x16xf32>
    %c14_246 = arith.constant 14 : index
    %c0_247 = arith.constant 0 : index
    %c0_248 = arith.constant 0 : index
    %449 = vector.load %arg10[%c14_246, %c0_247, %c0_248] : memref<24x1x16xf32, #tpu.memory_space<vmem>>, vector<1x1x16xf32>
    %450 = vector.shape_cast %449 : vector<1x1x16xf32> to vector<1x16xf32>
    %451 = vector.broadcast %450 : vector<1x16xf32> to vector<16x16xf32>
    %452 = arith.addf %448, %451 : vector<16x16xf32>
    %c18 = arith.constant 18 : index
    %c0_249 = arith.constant 0 : index
    %c0_250 = arith.constant 0 : index
    %453 = vector.load %arg9[%c18, %c0_249, %c0_250] : memref<24x64x16xbf16, #tpu.memory_space<vmem>>, vector<1x64x16xbf16>
    %454 = vector.shape_cast %453 : vector<1x64x16xbf16> to vector<64x16xbf16>
    %cst_251 = arith.constant dense<0.000000e+00> : vector<16x16xf32>
    %455 = tpu.matmul %348, %454, %cst_251 {dimension_numbers = #tpu.dot_dimension_numbers<[1], [0], [0], [1], [0, 0, 1, 1], [], []>} : vector<16x64xbf16>, vector<64x16xbf16>, vector<16x16xf32> -> vector<16x16xf32>
    %c18_252 = arith.constant 18 : index
    %c0_253 = arith.constant 0 : index
    %c0_254 = arith.constant 0 : index
    %456 = vector.load %arg10[%c18_252, %c0_253, %c0_254] : memref<24x1x16xf32, #tpu.memory_space<vmem>>, vector<1x1x16xf32>
    %457 = vector.shape_cast %456 : vector<1x1x16xf32> to vector<1x16xf32>
    %458 = vector.broadcast %457 : vector<1x16xf32> to vector<16x16xf32>
    %459 = arith.addf %455, %458 : vector<16x16xf32>
    %c22 = arith.constant 22 : index
    %c0_255 = arith.constant 0 : index
    %c0_256 = arith.constant 0 : index
    %460 = vector.load %arg9[%c22, %c0_255, %c0_256] : memref<24x64x16xbf16, #tpu.memory_space<vmem>>, vector<1x64x16xbf16>
    %461 = vector.shape_cast %460 : vector<1x64x16xbf16> to vector<64x16xbf16>
    %cst_257 = arith.constant dense<0.000000e+00> : vector<16x16xf32>
    %462 = tpu.matmul %348, %461, %cst_257 {dimension_numbers = #tpu.dot_dimension_numbers<[1], [0], [0], [1], [0, 0, 1, 1], [], []>} : vector<16x64xbf16>, vector<64x16xbf16>, vector<16x16xf32> -> vector<16x16xf32>
    %c22_258 = arith.constant 22 : index
    %c0_259 = arith.constant 0 : index
    %c0_260 = arith.constant 0 : index
    %463 = vector.load %arg10[%c22_258, %c0_259, %c0_260] : memref<24x1x16xf32, #tpu.memory_space<vmem>>, vector<1x1x16xf32>
    %464 = vector.shape_cast %463 : vector<1x1x16xf32> to vector<1x16xf32>
    %465 = vector.broadcast %464 : vector<1x16xf32> to vector<16x16xf32>
    %466 = arith.addf %462, %465 : vector<16x16xf32>
    %467 = vector.shape_cast %452 : vector<16x16xf32> to vector<2x8x16xf32>
    %468 = arith.truncf %467 : vector<2x8x16xf32> to vector<2x8x16xbf16>
    %469 = vector.shape_cast %459 : vector<16x16xf32> to vector<2x8x16xf32>
    %470 = arith.truncf %469 : vector<2x8x16xf32> to vector<2x8x16xbf16>
    %471 = vector.shape_cast %466 : vector<16x16xf32> to vector<2x8x16xf32>
    %472 = arith.truncf %471 : vector<2x8x16xf32> to vector<2x8x16xbf16>
    "tpu.trace_start"() <{level = 10 : i32, message = "bqd,bkd->bqk"}> : () -> ()
    %cst_261 = arith.constant dense<0.000000e+00> : vector<2x8x8xf32>
    %473 = tpu.matmul %468, %470, %cst_261 {dimension_numbers = #tpu.dot_dimension_numbers<[2], [2], [1], [1], [0, 0, 0, 1, 1, 1], [0], [0]>} : vector<2x8x16xbf16>, vector<2x8x16xbf16>, vector<2x8x8xf32> -> vector<2x8x8xf32>
    "tpu.trace_stop"() : () -> ()
    %cst_262 = arith.constant 2.500000e-01 : f32
    %474 = vector.broadcast %cst_262 : f32 to vector<2x8x8xf32>
    %475 = arith.mulf %473, %474 : vector<2x8x8xf32>
    %476 = arith.addf %475, %40 : vector<2x8x8xf32>
    %cst_263 = arith.constant dense<0xFF800000> : vector<2x8xf32>
    %477 = vector.multi_reduction <maximumf>, %476, %cst_263 [2] : vector<2x8x8xf32> to vector<2x8xf32>
    %478 = vector.shape_cast %477 : vector<2x8xf32> to vector<2x8x1xf32>
    %479 = vector.broadcast %478 : vector<2x8x1xf32> to vector<2x8x8xf32>
    %480 = arith.subf %476, %479 : vector<2x8x8xf32>
    %481 = math.exp %480 : vector<2x8x8xf32>
    %cst_264 = arith.constant dense<0.000000e+00> : vector<2x8xf32>
    %482 = vector.multi_reduction <add>, %481, %cst_264 [2] : vector<2x8x8xf32> to vector<2x8xf32>
    %483 = vector.shape_cast %482 : vector<2x8xf32> to vector<2x8x1xf32>
    %484 = vector.broadcast %483 : vector<2x8x1xf32> to vector<2x8x8xf32>
    %485 = arith.divf %481, %484 : vector<2x8x8xf32>
    %486 = arith.truncf %485 : vector<2x8x8xf32> to vector<2x8x8xbf16>
    "tpu.trace_start"() <{level = 10 : i32, message = "bqk,bkd->bqd"}> : () -> ()
    %cst_265 = arith.constant dense<0.000000e+00> : vector<2x8x16xf32>
    %487 = tpu.matmul %486, %472, %cst_265 {dimension_numbers = #tpu.dot_dimension_numbers<[2], [1], [1], [2], [0, 0, 0, 1, 1, 2], [0], [0]>} : vector<2x8x8xbf16>, vector<2x8x16xbf16>, vector<2x8x16xf32> -> vector<2x8x16xf32>
    "tpu.trace_stop"() : () -> ()
    %488 = vector.shape_cast %487 : vector<2x8x16xf32> to vector<16x16xf32>
    %489 = arith.truncf %488 : vector<16x16xf32> to vector<16x16xbf16>
    %c6_266 = arith.constant 6 : index
    %c0_267 = arith.constant 0 : index
    %c0_268 = arith.constant 0 : index
    %490 = vector.load %arg11[%c6_266, %c0_267, %c0_268] : memref<8x16x64xbf16, #tpu.memory_space<vmem>>, vector<1x16x64xbf16>
    %491 = vector.shape_cast %490 : vector<1x16x64xbf16> to vector<16x64xbf16>
    %cst_269 = arith.constant dense<0.000000e+00> : vector<16x64xf32>
    %492 = tpu.matmul %489, %491, %cst_269 {dimension_numbers = #tpu.dot_dimension_numbers<[1], [0], [0], [1], [0, 0, 1, 1], [], []>} : vector<16x16xbf16>, vector<16x64xbf16>, vector<16x64xf32> -> vector<16x64xf32>
    %493 = arith.addf %445, %492 : vector<16x64xf32>
    %c15 = arith.constant 15 : index
    %c0_270 = arith.constant 0 : index
    %c0_271 = arith.constant 0 : index
    %494 = vector.load %arg9[%c15, %c0_270, %c0_271] : memref<24x64x16xbf16, #tpu.memory_space<vmem>>, vector<1x64x16xbf16>
    %495 = vector.shape_cast %494 : vector<1x64x16xbf16> to vector<64x16xbf16>
    %cst_272 = arith.constant dense<0.000000e+00> : vector<16x16xf32>
    %496 = tpu.matmul %348, %495, %cst_272 {dimension_numbers = #tpu.dot_dimension_numbers<[1], [0], [0], [1], [0, 0, 1, 1], [], []>} : vector<16x64xbf16>, vector<64x16xbf16>, vector<16x16xf32> -> vector<16x16xf32>
    %c15_273 = arith.constant 15 : index
    %c0_274 = arith.constant 0 : index
    %c0_275 = arith.constant 0 : index
    %497 = vector.load %arg10[%c15_273, %c0_274, %c0_275] : memref<24x1x16xf32, #tpu.memory_space<vmem>>, vector<1x1x16xf32>
    %498 = vector.shape_cast %497 : vector<1x1x16xf32> to vector<1x16xf32>
    %499 = vector.broadcast %498 : vector<1x16xf32> to vector<16x16xf32>
    %500 = arith.addf %496, %499 : vector<16x16xf32>
    %c19 = arith.constant 19 : index
    %c0_276 = arith.constant 0 : index
    %c0_277 = arith.constant 0 : index
    %501 = vector.load %arg9[%c19, %c0_276, %c0_277] : memref<24x64x16xbf16, #tpu.memory_space<vmem>>, vector<1x64x16xbf16>
    %502 = vector.shape_cast %501 : vector<1x64x16xbf16> to vector<64x16xbf16>
    %cst_278 = arith.constant dense<0.000000e+00> : vector<16x16xf32>
    %503 = tpu.matmul %348, %502, %cst_278 {dimension_numbers = #tpu.dot_dimension_numbers<[1], [0], [0], [1], [0, 0, 1, 1], [], []>} : vector<16x64xbf16>, vector<64x16xbf16>, vector<16x16xf32> -> vector<16x16xf32>
    %c19_279 = arith.constant 19 : index
    %c0_280 = arith.constant 0 : index
    %c0_281 = arith.constant 0 : index
    %504 = vector.load %arg10[%c19_279, %c0_280, %c0_281] : memref<24x1x16xf32, #tpu.memory_space<vmem>>, vector<1x1x16xf32>
    %505 = vector.shape_cast %504 : vector<1x1x16xf32> to vector<1x16xf32>
    %506 = vector.broadcast %505 : vector<1x16xf32> to vector<16x16xf32>
    %507 = arith.addf %503, %506 : vector<16x16xf32>
    %c23 = arith.constant 23 : index
    %c0_282 = arith.constant 0 : index
    %c0_283 = arith.constant 0 : index
    %508 = vector.load %arg9[%c23, %c0_282, %c0_283] : memref<24x64x16xbf16, #tpu.memory_space<vmem>>, vector<1x64x16xbf16>
    %509 = vector.shape_cast %508 : vector<1x64x16xbf16> to vector<64x16xbf16>
    %cst_284 = arith.constant dense<0.000000e+00> : vector<16x16xf32>
    %510 = tpu.matmul %348, %509, %cst_284 {dimension_numbers = #tpu.dot_dimension_numbers<[1], [0], [0], [1], [0, 0, 1, 1], [], []>} : vector<16x64xbf16>, vector<64x16xbf16>, vector<16x16xf32> -> vector<16x16xf32>
    %c23_285 = arith.constant 23 : index
    %c0_286 = arith.constant 0 : index
    %c0_287 = arith.constant 0 : index
    %511 = vector.load %arg10[%c23_285, %c0_286, %c0_287] : memref<24x1x16xf32, #tpu.memory_space<vmem>>, vector<1x1x16xf32>
    %512 = vector.shape_cast %511 : vector<1x1x16xf32> to vector<1x16xf32>
    %513 = vector.broadcast %512 : vector<1x16xf32> to vector<16x16xf32>
    %514 = arith.addf %510, %513 : vector<16x16xf32>
    %515 = vector.shape_cast %500 : vector<16x16xf32> to vector<2x8x16xf32>
    %516 = arith.truncf %515 : vector<2x8x16xf32> to vector<2x8x16xbf16>
    %517 = vector.shape_cast %507 : vector<16x16xf32> to vector<2x8x16xf32>
    %518 = arith.truncf %517 : vector<2x8x16xf32> to vector<2x8x16xbf16>
    %519 = vector.shape_cast %514 : vector<16x16xf32> to vector<2x8x16xf32>
    %520 = arith.truncf %519 : vector<2x8x16xf32> to vector<2x8x16xbf16>
    "tpu.trace_start"() <{level = 10 : i32, message = "bqd,bkd->bqk"}> : () -> ()
    %cst_288 = arith.constant dense<0.000000e+00> : vector<2x8x8xf32>
    %521 = tpu.matmul %516, %518, %cst_288 {dimension_numbers = #tpu.dot_dimension_numbers<[2], [2], [1], [1], [0, 0, 0, 1, 1, 1], [0], [0]>} : vector<2x8x16xbf16>, vector<2x8x16xbf16>, vector<2x8x8xf32> -> vector<2x8x8xf32>
    "tpu.trace_stop"() : () -> ()
    %cst_289 = arith.constant 2.500000e-01 : f32
    %522 = vector.broadcast %cst_289 : f32 to vector<2x8x8xf32>
    %523 = arith.mulf %521, %522 : vector<2x8x8xf32>
    %524 = arith.addf %523, %40 : vector<2x8x8xf32>
    %cst_290 = arith.constant dense<0xFF800000> : vector<2x8xf32>
    %525 = vector.multi_reduction <maximumf>, %524, %cst_290 [2] : vector<2x8x8xf32> to vector<2x8xf32>
    %526 = vector.shape_cast %525 : vector<2x8xf32> to vector<2x8x1xf32>
    %527 = vector.broadcast %526 : vector<2x8x1xf32> to vector<2x8x8xf32>
    %528 = arith.subf %524, %527 : vector<2x8x8xf32>
    %529 = math.exp %528 : vector<2x8x8xf32>
    %cst_291 = arith.constant dense<0.000000e+00> : vector<2x8xf32>
    %530 = vector.multi_reduction <add>, %529, %cst_291 [2] : vector<2x8x8xf32> to vector<2x8xf32>
    %531 = vector.shape_cast %530 : vector<2x8xf32> to vector<2x8x1xf32>
    %532 = vector.broadcast %531 : vector<2x8x1xf32> to vector<2x8x8xf32>
    %533 = arith.divf %529, %532 : vector<2x8x8xf32>
    %534 = arith.truncf %533 : vector<2x8x8xf32> to vector<2x8x8xbf16>
    "tpu.trace_start"() <{level = 10 : i32, message = "bqk,bkd->bqd"}> : () -> ()
    %cst_292 = arith.constant dense<0.000000e+00> : vector<2x8x16xf32>
    %535 = tpu.matmul %534, %520, %cst_292 {dimension_numbers = #tpu.dot_dimension_numbers<[2], [1], [1], [2], [0, 0, 0, 1, 1, 2], [0], [0]>} : vector<2x8x8xbf16>, vector<2x8x16xbf16>, vector<2x8x16xf32> -> vector<2x8x16xf32>
    "tpu.trace_stop"() : () -> ()
    %536 = vector.shape_cast %535 : vector<2x8x16xf32> to vector<16x16xf32>
    %537 = arith.truncf %536 : vector<16x16xf32> to vector<16x16xbf16>
    %c7_293 = arith.constant 7 : index
    %c0_294 = arith.constant 0 : index
    %c0_295 = arith.constant 0 : index
    %538 = vector.load %arg11[%c7_293, %c0_294, %c0_295] : memref<8x16x64xbf16, #tpu.memory_space<vmem>>, vector<1x16x64xbf16>
    %539 = vector.shape_cast %538 : vector<1x16x64xbf16> to vector<16x64xbf16>
    %cst_296 = arith.constant dense<0.000000e+00> : vector<16x64xf32>
    %540 = tpu.matmul %537, %539, %cst_296 {dimension_numbers = #tpu.dot_dimension_numbers<[1], [0], [0], [1], [0, 0, 1, 1], [], []>} : vector<16x16xbf16>, vector<16x64xbf16>, vector<16x64xf32> -> vector<16x64xf32>
    %541 = arith.addf %493, %540 : vector<16x64xf32>
    %542 = arith.addf %321, %541 : vector<16x64xf32>
    %c1_297 = arith.constant 1 : index
    %c0_298 = arith.constant 0 : index
    %c0_299 = arith.constant 0 : index
    %543 = vector.load %arg12[%c1_297, %c0_298, %c0_299] : memref<2x1x64xf32, #tpu.memory_space<vmem>>, vector<1x1x64xf32>
    %544 = vector.shape_cast %543 : vector<1x1x64xf32> to vector<1x64xf32>
    %545 = vector.broadcast %544 : vector<1x64xf32> to vector<16x64xf32>
    %546 = arith.addf %542, %545 : vector<16x64xf32>
    %c1_300 = arith.constant 1 : index
    %c0_301 = arith.constant 0 : index
    %c0_302 = arith.constant 0 : index
    %547 = vector.load %arg13[%c1_300, %c0_301, %c0_302] : memref<2x1x64xf32, #tpu.memory_space<vmem>>, vector<1x1x64xf32>
    %548 = vector.shape_cast %547 : vector<1x1x64xf32> to vector<1x64xf32>
    %c1_303 = arith.constant 1 : index
    %c0_304 = arith.constant 0 : index
    %c0_305 = arith.constant 0 : index
    %549 = vector.load %arg14[%c1_303, %c0_304, %c0_305] : memref<2x1x64xf32, #tpu.memory_space<vmem>>, vector<1x1x64xf32>
    %550 = vector.shape_cast %549 : vector<1x1x64xf32> to vector<1x64xf32>
    %cst_306 = arith.constant dense<0.000000e+00> : vector<16xf32>
    %551 = vector.multi_reduction <add>, %546, %cst_306 [1] : vector<16x64xf32> to vector<16xf32>
    %552 = vector.shape_cast %551 : vector<16xf32> to vector<16x1xf32>
    %cst_307 = arith.constant 6.400000e+01 : f32
    %553 = vector.broadcast %cst_307 : f32 to vector<16x1xf32>
    %554 = arith.divf %552, %553 : vector<16x1xf32>
    %555 = vector.broadcast %554 : vector<16x1xf32> to vector<16x64xf32>
    %556 = arith.subf %546, %555 : vector<16x64xf32>
    %557 = arith.mulf %556, %556 : vector<16x64xf32>
    %cst_308 = arith.constant dense<0.000000e+00> : vector<16xf32>
    %558 = vector.multi_reduction <add>, %557, %cst_308 [1] : vector<16x64xf32> to vector<16xf32>
    %559 = vector.shape_cast %558 : vector<16xf32> to vector<16x1xf32>
    %cst_309 = arith.constant 6.400000e+01 : f32
    %560 = vector.broadcast %cst_309 : f32 to vector<16x1xf32>
    %561 = arith.divf %559, %560 : vector<16x1xf32>
    %562 = vector.broadcast %554 : vector<16x1xf32> to vector<16x64xf32>
    %563 = arith.subf %546, %562 : vector<16x64xf32>
    %cst_310 = arith.constant 9.99999974E-6 : f32
    %564 = vector.broadcast %cst_310 : f32 to vector<16x1xf32>
    %565 = arith.addf %561, %564 : vector<16x1xf32>
    %566 = math.rsqrt %565 : vector<16x1xf32>
    %567 = vector.broadcast %566 : vector<16x1xf32> to vector<16x64xf32>
    %568 = arith.mulf %563, %567 : vector<16x64xf32>
    %569 = vector.broadcast %548 : vector<1x64xf32> to vector<16x64xf32>
    %570 = arith.mulf %568, %569 : vector<16x64xf32>
    %571 = vector.broadcast %550 : vector<1x64xf32> to vector<16x64xf32>
    %572 = arith.addf %570, %571 : vector<16x64xf32>
    %573 = arith.truncf %572 : vector<16x64xf32> to vector<16x64xbf16>
    %c1_311 = arith.constant 1 : index
    %c0_312 = arith.constant 0 : index
    %c0_313 = arith.constant 0 : index
    %574 = vector.load %arg15[%c1_311, %c0_312, %c0_313] : memref<2x64x256xbf16, #tpu.memory_space<vmem>>, vector<1x64x256xbf16>
    %575 = vector.shape_cast %574 : vector<1x64x256xbf16> to vector<64x256xbf16>
    %cst_314 = arith.constant dense<0.000000e+00> : vector<16x256xf32>
    %576 = tpu.matmul %573, %575, %cst_314 {dimension_numbers = #tpu.dot_dimension_numbers<[1], [0], [0], [1], [0, 0, 1, 1], [], []>} : vector<16x64xbf16>, vector<64x256xbf16>, vector<16x256xf32> -> vector<16x256xf32>
    %c1_315 = arith.constant 1 : index
    %c0_316 = arith.constant 0 : index
    %c0_317 = arith.constant 0 : index
    %577 = vector.load %arg16[%c1_315, %c0_316, %c0_317] : memref<2x1x256xf32, #tpu.memory_space<vmem>>, vector<1x1x256xf32>
    %578 = vector.shape_cast %577 : vector<1x1x256xf32> to vector<1x256xf32>
    %579 = vector.broadcast %578 : vector<1x256xf32> to vector<16x256xf32>
    %580 = arith.addf %576, %579 : vector<16x256xf32>
    %581 = arith.mulf %580, %580 : vector<16x256xf32>
    %582 = arith.mulf %580, %581 : vector<16x256xf32>
    %cst_318 = arith.constant 4.471500e-02 : f32
    %583 = vector.broadcast %cst_318 : f32 to vector<16x256xf32>
    %584 = arith.mulf %583, %582 : vector<16x256xf32>
    %585 = arith.addf %580, %584 : vector<16x256xf32>
    %cst_319 = arith.constant 0.797884583 : f32
    %586 = vector.broadcast %cst_319 : f32 to vector<16x256xf32>
    %587 = arith.mulf %586, %585 : vector<16x256xf32>
    %588 = math.tanh %587 : vector<16x256xf32>
    %cst_320 = arith.constant 1.000000e+00 : f32
    %589 = vector.broadcast %cst_320 : f32 to vector<16x256xf32>
    %590 = arith.addf %589, %588 : vector<16x256xf32>
    %cst_321 = arith.constant 5.000000e-01 : f32
    %591 = vector.broadcast %cst_321 : f32 to vector<16x256xf32>
    %592 = arith.mulf %591, %590 : vector<16x256xf32>
    %593 = arith.mulf %580, %592 : vector<16x256xf32>
    %594 = arith.truncf %593 : vector<16x256xf32> to vector<16x256xbf16>
    %c1_322 = arith.constant 1 : index
    %c0_323 = arith.constant 0 : index
    %c0_324 = arith.constant 0 : index
    %595 = vector.load %arg17[%c1_322, %c0_323, %c0_324] : memref<2x256x64xbf16, #tpu.memory_space<vmem>>, vector<1x256x64xbf16>
    %596 = vector.shape_cast %595 : vector<1x256x64xbf16> to vector<256x64xbf16>
    %cst_325 = arith.constant dense<0.000000e+00> : vector<16x64xf32>
    %597 = tpu.matmul %594, %596, %cst_325 {dimension_numbers = #tpu.dot_dimension_numbers<[1], [0], [0], [1], [0, 0, 1, 1], [], []>} : vector<16x256xbf16>, vector<256x64xbf16>, vector<16x64xf32> -> vector<16x64xf32>
    %c1_326 = arith.constant 1 : index
    %c0_327 = arith.constant 0 : index
    %c0_328 = arith.constant 0 : index
    %598 = vector.load %arg18[%c1_326, %c0_327, %c0_328] : memref<2x1x64xf32, #tpu.memory_space<vmem>>, vector<1x1x64xf32>
    %599 = vector.shape_cast %598 : vector<1x1x64xf32> to vector<1x64xf32>
    %600 = vector.broadcast %599 : vector<1x64xf32> to vector<16x64xf32>
    %601 = arith.addf %597, %600 : vector<16x64xf32>
    %602 = arith.addf %546, %601 : vector<16x64xf32>
    %603 = vector.shape_cast %602 : vector<16x64xf32> to vector<2x8x64xf32>
    %c0_329 = arith.constant 0 : index
    %c0_330 = arith.constant 0 : index
    %c0_331 = arith.constant 0 : index
    %c0_332 = arith.constant 0 : index
    %604 = vector.load %arg19[%c0_329, %c0_330, %c0_331, %c0_332] : memref<2x1x8x64xf32, #tpu.memory_space<vmem>>, vector<2x1x8x64xf32>
    %605 = vector.shape_cast %604 : vector<2x1x8x64xf32> to vector<2x8x64xf32>
    %606 = vector.shape_cast %603 : vector<2x8x64xf32> to vector<2x1x8x64xf32>
    tpu.vector_store %arg19[%c0_329, %c0_330, %c0_331, %c0_332], %606 {strides = array<i32>} : memref<2x1x8x64xf32, #tpu.memory_space<vmem>>, vector<2x1x8x64xf32>,
    return
  }
  func.func @transform_0(%arg0: i32, %arg1: memref<2xi32, #tpu.memory_space<smem>>) -> (i32, i32, i32, i32) {
    %c0_i32 = arith.constant 0 : i32
    %c0_i32_0 = arith.constant 0 : i32
    %c0_i32_1 = arith.constant 0 : i32
    %c0_i32_2 = arith.constant 0 : i32
    return %c0_i32, %arg0, %c0_i32_0, %c0_i32_1 : i32, i32, i32, i32
  }
  func.func @transform_1(%arg0: i32, %arg1: memref<2xi32, #tpu.memory_space<smem>>) -> (i32, i32, i32, i32) {
    %c0_i32 = arith.constant 0 : i32
    %c0_i32_0 = arith.constant 0 : i32
    %c0_i32_1 = arith.constant 0 : i32
    %c0_i32_2 = arith.constant 0 : i32
    return %c0_i32, %arg0, %c0_i32_0, %c0_i32_1 : i32, i32, i32, i32
  }
  func.func @transform_2(%arg0: i32, %arg1: memref<2xi32, #tpu.memory_space<smem>>) -> (i32, i32) {
    %c0_i32 = arith.constant 0 : i32
    %c0_i32_0 = arith.constant 0 : i32
    %c0_i32_1 = arith.constant 0 : i32
    return %c0_i32, %c0_i32_0 : i32, i32
  }
  func.func @transform_3(%arg0: i32, %arg1: memref<2xi32, #tpu.memory_space<smem>>) -> (i32, i32) {
    %c0_i32 = arith.constant 0 : i32
    %c0_i32_0 = arith.constant 0 : i32
    %c0_i32_1 = arith.constant 0 : i32
    return %c0_i32, %c0_i32_0 : i32, i32
  }
  func.func @transform_4(%arg0: i32, %arg1: memref<2xi32, #tpu.memory_space<smem>>) -> (i32, i32) {
    %c0_i32 = arith.constant 0 : i32
    %c0_i32_0 = arith.constant 0 : i32
    %c0_i32_1 = arith.constant 0 : i32
    return %c0_i32, %c0_i32_0 : i32, i32
  }
  func.func @transform_5(%arg0: i32, %arg1: memref<2xi32, #tpu.memory_space<smem>>) -> (i32, i32, i32) {
    %c0_i32 = arith.constant 0 : i32
    %c0_i32_0 = arith.constant 0 : i32
    %c0_i32_1 = arith.constant 0 : i32
    %c0_i32_2 = arith.constant 0 : i32
    return %c0_i32, %c0_i32_0, %c0_i32_1 : i32, i32, i32
  }
  func.func @transform_6(%arg0: i32, %arg1: memref<2xi32, #tpu.memory_space<smem>>) -> (i32, i32, i32) {
    %c0_i32 = arith.constant 0 : i32
    %c0_i32_0 = arith.constant 0 : i32
    %c0_i32_1 = arith.constant 0 : i32
    %c0_i32_2 = arith.constant 0 : i32
    return %c0_i32, %c0_i32_0, %c0_i32_1 : i32, i32, i32
  }
  func.func @transform_7(%arg0: i32, %arg1: memref<2xi32, #tpu.memory_space<smem>>) -> (i32, i32, i32) {
    %c0_i32 = arith.constant 0 : i32
    %c0_i32_0 = arith.constant 0 : i32
    %c0_i32_1 = arith.constant 0 : i32
    %c0_i32_2 = arith.constant 0 : i32
    return %c0_i32, %c0_i32_0, %c0_i32_1 : i32, i32, i32
  }
  func.func @transform_8(%arg0: i32, %arg1: memref<2xi32, #tpu.memory_space<smem>>) -> (i32, i32, i32) {
    %c0_i32 = arith.constant 0 : i32
    %c0_i32_0 = arith.constant 0 : i32
    %c0_i32_1 = arith.constant 0 : i32
    %c0_i32_2 = arith.constant 0 : i32
    return %c0_i32, %c0_i32_0, %c0_i32_1 : i32, i32, i32
  }
  func.func @transform_9(%arg0: i32, %arg1: memref<2xi32, #tpu.memory_space<smem>>) -> (i32, i32, i32) {
    %c0_i32 = arith.constant 0 : i32
    %c0_i32_0 = arith.constant 0 : i32
    %c0_i32_1 = arith.constant 0 : i32
    %c0_i32_2 = arith.constant 0 : i32
    return %c0_i32, %c0_i32_0, %c0_i32_1 : i32, i32, i32
  }
  func.func @transform_10(%arg0: i32, %arg1: memref<2xi32, #tpu.memory_space<smem>>) -> (i32, i32, i32) {
    %c0_i32 = arith.constant 0 : i32
    %c0_i32_0 = arith.constant 0 : i32
    %c0_i32_1 = arith.constant 0 : i32
    %c0_i32_2 = arith.constant 0 : i32
    return %c0_i32, %c0_i32_0, %c0_i32_1 : i32, i32, i32
  }
  func.func @transform_11(%arg0: i32, %arg1: memref<2xi32, #tpu.memory_space<smem>>) -> (i32, i32, i32) {
    %c0_i32 = arith.constant 0 : i32
    %c0_i32_0 = arith.constant 0 : i32
    %c0_i32_1 = arith.constant 0 : i32
    %c0_i32_2 = arith.constant 0 : i32
    return %c0_i32, %c0_i32_0, %c0_i32_1 : i32, i32, i32
  }
  func.func @transform_12(%arg0: i32, %arg1: memref<2xi32, #tpu.memory_space<smem>>) -> (i32, i32, i32) {
    %c0_i32 = arith.constant 0 : i32
    %c0_i32_0 = arith.constant 0 : i32
    %c0_i32_1 = arith.constant 0 : i32
    %c0_i32_2 = arith.constant 0 : i32
    return %c0_i32, %c0_i32_0, %c0_i32_1 : i32, i32, i32
  }
  func.func @transform_13(%arg0: i32, %arg1: memref<2xi32, #tpu.memory_space<smem>>) -> (i32, i32, i32) {
    %c0_i32 = arith.constant 0 : i32
    %c0_i32_0 = arith.constant 0 : i32
    %c0_i32_1 = arith.constant 0 : i32
    %c0_i32_2 = arith.constant 0 : i32
    return %c0_i32, %c0_i32_0, %c0_i32_1 : i32, i32, i32
  }
  func.func @transform_14(%arg0: i32, %arg1: memref<2xi32, #tpu.memory_space<smem>>) -> (i32, i32, i32) {
    %c0_i32 = arith.constant 0 : i32
    %c0_i32_0 = arith.constant 0 : i32
    %c0_i32_1 = arith.constant 0 : i32
    %c0_i32_2 = arith.constant 0 : i32
    return %c0_i32, %c0_i32_0, %c0_i32_1 : i32, i32, i32
  }
  func.func @transform_15(%arg0: i32, %arg1: memref<2xi32, #tpu.memory_space<smem>>) -> (i32, i32, i32) {
    %c0_i32 = arith.constant 0 : i32
    %c0_i32_0 = arith.constant 0 : i32
    %c0_i32_1 = arith.constant 0 : i32
    %c0_i32_2 = arith.constant 0 : i32
    return %c0_i32, %c0_i32_0, %c0_i32_1 : i32, i32, i32
  }
  func.func @transform_16(%arg0: i32, %arg1: memref<2xi32, #tpu.memory_space<smem>>) -> (i32, i32, i32) {
    %c0_i32 = arith.constant 0 : i32
    %c0_i32_0 = arith.constant 0 : i32
    %c0_i32_1 = arith.constant 0 : i32
    %c0_i32_2 = arith.constant 0 : i32
    return %c0_i32, %c0_i32_0, %c0_i32_1 : i32, i32, i32
  }
  func.func @transform_17(%arg0: i32, %arg1: memref<2xi32, #tpu.memory_space<smem>>) -> (i32, i32, i32, i32) {
    %c0_i32 = arith.constant 0 : i32
    %c0_i32_0 = arith.constant 0 : i32
    %c0_i32_1 = arith.constant 0 : i32
    %c0_i32_2 = arith.constant 0 : i32
    return %c0_i32, %arg0, %c0_i32_0, %c0_i32_1 : i32, i32, i32, i32
  }
}

module attributes {stable_mosaic.version = 11 : i64} {
  func.func @_encodecmae_chunk_kernel(%arg0: i32, %arg1: memref<2xi32, #tpu.memory_space<smem>>, %arg2: memref<2x1x8x320xf32, #tpu.memory_space<vmem>>, %arg3: memref<2x1x8x32xf32, #tpu.memory_space<vmem>>, %arg4: memref<320x64xbf16, #tpu.memory_space<vmem>>, %arg5: memref<32x64xbf16, #tpu.memory_space<vmem>>, %arg6: memref<1x64xf32, #tpu.memory_space<vmem>>, %arg7: memref<2x1x64xf32, #tpu.memory_space<vmem>>, %arg8: memref<2x1x64xf32, #tpu.memory_space<vmem>>, %arg9: memref<24x64x16xbf16, #tpu.memory_space<vmem>>, %arg10: memref<24x1x16xf32, #tpu.memory_space<vmem>>, %arg11: memref<8x16x64xbf16, #tpu.memory_space<vmem>>, %arg12: memref<2x1x64xf32, #tpu.memory_space<vmem>>, %arg13: memref<2x1x64xf32, #tpu.memory_space<vmem>>, %arg14: memref<2x1x64xf32, #tpu.memory_space<vmem>>, %arg15: memref<2x64x256xbf16, #tpu.memory_space<vmem>>, %arg16: memref<2x1x256xf32, #tpu.memory_space<vmem>>, %arg17: memref<2x256x64xbf16, #tpu.memory_space<vmem>>, %arg18: memref<2x1x64xf32, #tpu.memory_space<vmem>>, %arg19: memref<2x1x8x64xf32, #tpu.memory_space<vmem>>) attributes {dimension_semantics = [#tpu.dimension_semantics<parallel>], iteration_bounds = array<i64: 2>, scalar_prefetch = 1 : i64, scratch_operands = 0 : i64, tpu.core_type = #tpu.core_type<tc>, window_params = [{transform_indices = @transform_0, window_bounds = array<i64: 2, 1, 8, 320>}, {transform_indices = @transform_1, window_bounds = array<i64: 2, 1, 8, 32>}, {pipeline_mode = #tpu.pipeline_mode<synchronous>, transform_indices = @transform_2, window_bounds = array<i64: 320, 64>}, {pipeline_mode = #tpu.pipeline_mode<synchronous>, transform_indices = @transform_3, window_bounds = array<i64: 32, 64>}, {pipeline_mode = #tpu.pipeline_mode<synchronous>, transform_indices = @transform_4, window_bounds = array<i64: 1, 64>}, {pipeline_mode = #tpu.pipeline_mode<synchronous>, transform_indices = @transform_5, window_bounds = array<i64: 2, 1, 64>}, {pipeline_mode = #tpu.pipeline_mode<synchronous>, transform_indices = @transform_6, window_bounds = array<i64: 2, 1, 64>}, {pipeline_mode = #tpu.pipeline_mode<synchronous>, transform_indices = @transform_7, window_bounds = array<i64: 24, 64, 16>}, {pipeline_mode = #tpu.pipeline_mode<synchronous>, transform_indices = @transform_8, window_bounds = array<i64: 24, 1, 16>}, {pipeline_mode = #tpu.pipeline_mode<synchronous>, transform_indices = @transform_9, window_bounds = array<i64: 8, 16, 64>}, {pipeline_mode = #tpu.pipeline_mode<synchronous>, transform_indices = @transform_10, window_bounds = array<i64: 2, 1, 64>}, {pipeline_mode = #tpu.pipeline_mode<synchronous>, transform_indices = @transform_11, window_bounds = array<i64: 2, 1, 64>}, {pipeline_mode = #tpu.pipeline_mode<synchronous>, transform_indices = @transform_12, window_bounds = array<i64: 2, 1, 64>}, {pipeline_mode = #tpu.pipeline_mode<synchronous>, transform_indices = @transform_13, window_bounds = array<i64: 2, 64, 256>}, {pipeline_mode = #tpu.pipeline_mode<synchronous>, transform_indices = @transform_14, window_bounds = array<i64: 2, 1, 256>}, {pipeline_mode = #tpu.pipeline_mode<synchronous>, transform_indices = @transform_15, window_bounds = array<i64: 2, 256, 64>}, {pipeline_mode = #tpu.pipeline_mode<synchronous>, transform_indices = @transform_16, window_bounds = array<i64: 2, 1, 64>}, {transform_indices = @transform_17, window_bounds = array<i64: 2, 1, 8, 64>}]} {
    %c0 = arith.constant 0 : index
    %c0_0 = arith.constant 0 : index
    %c0_1 = arith.constant 0 : index
    %c0_2 = arith.constant 0 : index
    %0 = vector.load %arg2[%c0, %c0_0, %c0_1, %c0_2] : memref<2x1x8x320xf32, #tpu.memory_space<vmem>>, vector<2x1x8x320xf32>
    %1 = vector.shape_cast %0 : vector<2x1x8x320xf32> to vector<2x8x320xf32>
    %2 = vector.shape_cast %1 : vector<2x8x320xf32> to vector<16x320xf32>
    %3 = arith.truncf %2 : vector<16x320xf32> to vector<16x320xbf16>
    %c0_3 = arith.constant 0 : index
    %c0_4 = arith.constant 0 : index
    %c0_5 = arith.constant 0 : index
    %c0_6 = arith.constant 0 : index
    %4 = vector.load %arg3[%c0_3, %c0_4, %c0_5, %c0_6] : memref<2x1x8x32xf32, #tpu.memory_space<vmem>>, vector<2x1x8x32xf32>
    %5 = vector.shape_cast %4 : vector<2x1x8x32xf32> to vector<2x8x32xf32>
    %6 = vector.shape_cast %5 : vector<2x8x32xf32> to vector<16x32xf32>
    %7 = arith.truncf %6 : vector<16x32xf32> to vector<16x32xbf16>
    %c0_7 = arith.constant 0 : index
    %c0_8 = arith.constant 0 : index
    %8 = vector.load %arg4[%c0_7, %c0_8] : memref<320x64xbf16, #tpu.memory_space<vmem>>, vector<320x64xbf16>
    %cst = arith.constant dense<0.000000e+00> : vector<16x64xf32>
    %9 = tpu.matmul %3, %8, %cst {dimension_numbers = #tpu.dot_dimension_numbers<[1], [0], [0], [1], [0, 0, 1, 1], [], []>} : vector<16x320xbf16>, vector<320x64xbf16>, vector<16x64xf32> -> vector<16x64xf32>
    %c0_9 = arith.constant 0 : index
    %c0_10 = arith.constant 0 : index
    %10 = vector.load %arg5[%c0_9, %c0_10] : memref<32x64xbf16, #tpu.memory_space<vmem>>, vector<32x64xbf16>
    %cst_11 = arith.constant dense<0.000000e+00> : vector<16x64xf32>
    %11 = tpu.matmul %7, %10, %cst_11 {dimension_numbers = #tpu.dot_dimension_numbers<[1], [0], [0], [1], [0, 0, 1, 1], [], []>} : vector<16x32xbf16>, vector<32x64xbf16>, vector<16x64xf32> -> vector<16x64xf32>
    %12 = arith.addf %9, %11 : vector<16x64xf32>
    %c0_12 = arith.constant 0 : index
    %c0_13 = arith.constant 0 : index
    %13 = vector.load %arg6[%c0_12, %c0_13] : memref<1x64xf32, #tpu.memory_space<vmem>>, vector<1x64xf32>
    %14 = vector.broadcast %13 : vector<1x64xf32> to vector<16x64xf32>
    %15 = arith.addf %12, %14 : vector<16x64xf32>
    %16 = tpu.iota {dimensions = array<i32: 2>} : vector<2x8x8xi32>
    %17 = tpu.iota {dimensions = array<i32: 0>} : vector<2x8x8xi32>
    %c0_i32 = arith.constant 0 : i32
    %18 = vector.broadcast %c0_i32 : i32 to vector<2x8x8xi32>
    %c0_14 = arith.constant 0 : index
    %19 = memref.load %arg1[%c0_14] : memref<2xi32, #tpu.memory_space<smem>>
    %c8_i32 = arith.constant 8 : i32
    %20 = arith.muli %arg0, %c8_i32 : i32
    %21 = arith.subi %19, %20 : i32
    %c0_i32_15 = arith.constant 0 : i32
    %c8_i32_16 = arith.constant 8 : i32
    %22 = arith.maxsi %c0_i32_15, %21 : i32
    %23 = arith.minsi %c8_i32_16, %22 : i32
    %c0_i32_17 = arith.constant 0 : i32
    %24 = vector.broadcast %c0_i32_17 : i32 to vector<2x8x8xi32>
    %25 = arith.cmpi eq, %17, %24 : vector<2x8x8xi32>
    %26 = vector.broadcast %23 : i32 to vector<2x8x8xi32>
    %27 = arith.select %25, %26, %18 : vector<2x8x8xi1>, vector<2x8x8xi32>
    %c1 = arith.constant 1 : index
    %28 = memref.load %arg1[%c1] : memref<2xi32, #tpu.memory_space<smem>>
    %c8_i32_18 = arith.constant 8 : i32
    %29 = arith.muli %arg0, %c8_i32_18 : i32
    %30 = arith.subi %28, %29 : i32
    %c0_i32_19 = arith.constant 0 : i32
    %c8_i32_20 = arith.constant 8 : i32
    %31 = arith.maxsi %c0_i32_19, %30 : i32
    %32 = arith.minsi %c8_i32_20, %31 : i32
    %c1_i32 = arith.constant 1 : i32
    %33 = vector.broadcast %c1_i32 : i32 to vector<2x8x8xi32>
    %34 = arith.cmpi eq, %17, %33 : vector<2x8x8xi32>
    %35 = vector.broadcast %32 : i32 to vector<2x8x8xi32>
    %36 = arith.select %34, %35, %27 : vector<2x8x8xi1>, vector<2x8x8xi32>
    %37 = arith.cmpi slt, %16, %36 : vector<2x8x8xi32>
    %cst_21 = arith.constant 0.000000e+00 : f32
    %cst_22 = arith.constant -1.000000e+30 : f32
    %38 = vector.broadcast %cst_21 : f32 to vector<2x8x8xf32>
    %39 = vector.broadcast %cst_22 : f32 to vector<2x8x8xf32>
    %40 = arith.select %37, %38, %39 : vector<2x8x8xi1>, vector<2x8x8xf32>
    %c0_23 = arith.constant 0 : index
    %c0_24 = arith.constant 0 : index
    %c0_25 = arith.constant 0 : index
    %41 = vector.load %arg7[%c0_23, %c0_24, %c0_25] : memref<2x1x64xf32, #tpu.memory_space<vmem>>, vector<1x1x64xf32>
    %42 = vector.shape_cast %41 : vector<1x1x64xf32> to vector<1x64xf32>
    %c0_26 = arith.constant 0 : index
    %c0_27 = arith.constant 0 : index
    %c0_28 = arith.constant 0 : index
    %43 = vector.load %arg8[%c0_26, %c0_27, %c0_28] : memref<2x1x64xf32, #tpu.memory_space<vmem>>, vector<1x1x64xf32>
    %44 = vector.shape_cast %43 : vector<1x1x64xf32> to vector<1x64xf32>
    %cst_29 = arith.constant dense<0.000000e+00> : vector<16xf32>
    %45 = vector.multi_reduction <add>, %15, %cst_29 [1] : vector<16x64xf32> to vector<16xf32>
    %46 = vector.shape_cast %45 : vector<16xf32> to vector<16x1xf32>
    %cst_30 = arith.constant 6.400000e+01 : f32
    %47 = vector.broadcast %cst_30 : f32 to vector<16x1xf32>
    %48 = arith.divf %46, %47 : vector<16x1xf32>
    %49 = vector.broadcast %48 : vector<16x1xf32> to vector<16x64xf32>
    %50 = arith.subf %15, %49 : vector<16x64xf32>
    %51 = arith.mulf %50, %50 : vector<16x64xf32>
    %cst_31 = arith.constant dense<0.000000e+00> : vector<16xf32>
    %52 = vector.multi_reduction <add>, %51, %cst_31 [1] : vector<16x64xf32> to vector<16xf32>
    %53 = vector.shape_cast %52 : vector<16xf32> to vector<16x1xf32>
    %cst_32 = arith.constant 6.400000e+01 : f32
    %54 = vector.broadcast %cst_32 : f32 to vector<16x1xf32>
    %55 = arith.divf %53, %54 : vector<16x1xf32>
    %56 = vector.broadcast %48 : vector<16x1xf32> to vector<16x64xf32>
    %57 = arith.subf %15, %56 : vector<16x64xf32>
    %cst_33 = arith.constant 9.99999974E-6 : f32
    %58 = vector.broadcast %cst_33 : f32 to vector<16x1xf32>
    %59 = arith.addf %55, %58 : vector<16x1xf32>
    %60 = math.rsqrt %59 : vector<16x1xf32>
    %61 = vector.broadcast %60 : vector<16x1xf32> to vector<16x64xf32>
    %62 = arith.mulf %57, %61 : vector<16x64xf32>
    %63 = vector.broadcast %42 : vector<1x64xf32> to vector<16x64xf32>
    %64 = arith.mulf %62, %63 : vector<16x64xf32>
    %65 = vector.broadcast %44 : vector<1x64xf32> to vector<16x64xf32>
    %66 = arith.addf %64, %65 : vector<16x64xf32>
    %67 = arith.truncf %66 : vector<16x64xf32> to vector<16x64xbf16>
    %cst_34 = arith.constant 0.000000e+00 : f32
    %68 = vector.broadcast %cst_34 : f32 to vector<16x64xf32>
    %c0_35 = arith.constant 0 : index
    %c0_36 = arith.constant 0 : index
    %c0_37 = arith.constant 0 : index
    %69 = vector.load %arg9[%c0_35, %c0_36, %c0_37] : memref<24x64x16xbf16, #tpu.memory_space<vmem>>, vector<1x64x16xbf16>
    %70 = vector.shape_cast %69 : vector<1x64x16xbf16> to vector<64x16xbf16>
    %cst_38 = arith.constant dense<0.000000e+00> : vector<16x16xf32>
    %71 = tpu.matmul %67, %70, %cst_38 {dimension_numbers = #tpu.dot_dimension_numbers<[1], [0], [0], [1], [0, 0, 1, 1], [], []>} : vector<16x64xbf16>, vector<64x16xbf16>, vector<16x16xf32> -> vector<16x16xf32>
    %c0_39 = arith.constant 0 : index
    %c0_40 = arith.constant 0 : index
    %c0_41 = arith.constant 0 : index
    %72 = vector.load %arg10[%c0_39, %c0_40, %c0_41] : memref<24x1x16xf32, #tpu.memory_space<vmem>>, vector<1x1x16xf32>
    %73 = vector.shape_cast %72 : vector<1x1x16xf32> to vector<1x16xf32>
    %74 = vector.broadcast %73 : vector<1x16xf32> to vector<16x16xf32>
    %75 = arith.addf %71, %74 : vector<16x16xf32>
    %c4 = arith.constant 4 : index
    %c0_42 = arith.constant 0 : index
    %c0_43 = arith.constant 0 : index
    %76 = vector.load %arg9[%c4, %c0_42, %c0_43] : memref<24x64x16xbf16, #tpu.memory_space<vmem>>, vector<1x64x16xbf16>
    %77 = vector.shape_cast %76 : vector<1x64x16xbf16> to vector<64x16xbf16>
    %cst_44 = arith.constant dense<0.000000e+00> : vector<16x16xf32>
    %78 = tpu.matmul %67, %77, %cst_44 {dimension_numbers = #tpu.dot_dimension_numbers<[1], [0], [0], [1], [0, 0, 1, 1], [], []>} : vector<16x64xbf16>, vector<64x16xbf16>, vector<16x16xf32> -> vector<16x16xf32>
    %c4_45 = arith.constant 4 : index
    %c0_46 = arith.constant 0 : index
    %c0_47 = arith.constant 0 : index
    %79 = vector.load %arg10[%c4_45, %c0_46, %c0_47] : memref<24x1x16xf32, #tpu.memory_space<vmem>>, vector<1x1x16xf32>
    %80 = vector.shape_cast %79 : vector<1x1x16xf32> to vector<1x16xf32>
    %81 = vector.broadcast %80 : vector<1x16xf32> to vector<16x16xf32>
    %82 = arith.addf %78, %81 : vector<16x16xf32>
    %c8 = arith.constant 8 : index
    %c0_48 = arith.constant 0 : index
    %c0_49 = arith.constant 0 : index
    %83 = vector.load %arg9[%c8, %c0_48, %c0_49] : memref<24x64x16xbf16, #tpu.memory_space<vmem>>, vector<1x64x16xbf16>
    %84 = vector.shape_cast %83 : vector<1x64x16xbf16> to vector<64x16xbf16>
    %cst_50 = arith.constant dense<0.000000e+00> : vector<16x16xf32>
    %85 = tpu.matmul %67, %84, %cst_50 {dimension_numbers = #tpu.dot_dimension_numbers<[1], [0], [0], [1], [0, 0, 1, 1], [], []>} : vector<16x64xbf16>, vector<64x16xbf16>, vector<16x16xf32> -> vector<16x16xf32>
    %c8_51 = arith.constant 8 : index
    %c0_52 = arith.constant 0 : index
    %c0_53 = arith.constant 0 : index
    %86 = vector.load %arg10[%c8_51, %c0_52, %c0_53] : memref<24x1x16xf32, #tpu.memory_space<vmem>>, vector<1x1x16xf32>
    %87 = vector.shape_cast %86 : vector<1x1x16xf32> to vector<1x16xf32>
    %88 = vector.broadcast %87 : vector<1x16xf32> to vector<16x16xf32>
    %89 = arith.addf %85, %88 : vector<16x16xf32>
    %90 = vector.shape_cast %75 : vector<16x16xf32> to vector<2x8x16xf32>
    %91 = arith.truncf %90 : vector<2x8x16xf32> to vector<2x8x16xbf16>
    %92 = vector.shape_cast %82 : vector<16x16xf32> to vector<2x8x16xf32>
    %93 = arith.truncf %92 : vector<2x8x16xf32> to vector<2x8x16xbf16>
    %94 = vector.shape_cast %89 : vector<16x16xf32> to vector<2x8x16xf32>
    %95 = arith.truncf %94 : vector<2x8x16xf32> to vector<2x8x16xbf16>
    "tpu.trace_start"() <{level = 10 : i32, message = "bqd,bkd->bqk"}> : () -> ()
    %cst_54 = arith.constant dense<0.000000e+00> : vector<2x8x8xf32>
    %96 = tpu.matmul %91, %93, %cst_54 {dimension_numbers = #tpu.dot_dimension_numbers<[2], [2], [1], [1], [0, 0, 0, 1, 1, 1], [0], [0]>} : vector<2x8x16xbf16>, vector<2x8x16xbf16>, vector<2x8x8xf32> -> vector<2x8x8xf32>
    "tpu.trace_stop"() : () -> ()
    %cst_55 = arith.constant 2.500000e-01 : f32
    %97 = vector.broadcast %cst_55 : f32 to vector<2x8x8xf32>
    %98 = arith.mulf %96, %97 : vector<2x8x8xf32>
    %99 = arith.addf %98, %40 : vector<2x8x8xf32>
    %cst_56 = arith.constant dense<0xFF800000> : vector<2x8xf32>
    %100 = vector.multi_reduction <maximumf>, %99, %cst_56 [2] : vector<2x8x8xf32> to vector<2x8xf32>
    %101 = vector.shape_cast %100 : vector<2x8xf32> to vector<2x8x1xf32>
    %102 = vector.broadcast %101 : vector<2x8x1xf32> to vector<2x8x8xf32>
    %103 = arith.subf %99, %102 : vector<2x8x8xf32>
    %104 = math.exp %103 : vector<2x8x8xf32>
    %cst_57 = arith.constant dense<0.000000e+00> : vector<2x8xf32>
    %105 = vector.multi_reduction <add>, %104, %cst_57 [2] : vector<2x8x8xf32> to vector<2x8xf32>
    %106 = vector.shape_cast %105 : vector<2x8xf32> to vector<2x8x1xf32>
    %107 = vector.broadcast %106 : vector<2x8x1xf32> to vector<2x8x8xf32>
    %108 = arith.divf %104, %107 : vector<2x8x8xf32>
    %109 = arith.truncf %108 : vector<2x8x8xf32> to vector<2x8x8xbf16>
    "tpu.trace_start"() <{level = 10 : i32, message = "bqk,bkd->bqd"}> : () -> ()
    %cst_58 = arith.constant dense<0.000000e+00> : vector<2x8x16xf32>
    %110 = tpu.matmul %109, %95, %cst_58 {dimension_numbers = #tpu.dot_dimension_numbers<[2], [1], [1], [2], [0, 0, 0, 1, 1, 2], [0], [0]>} : vector<2x8x8xbf16>, vector<2x8x16xbf16>, vector<2x8x16xf32> -> vector<2x8x16xf32>
    "tpu.trace_stop"() : () -> ()
    %111 = vector.shape_cast %110 : vector<2x8x16xf32> to vector<16x16xf32>
    %112 = arith.truncf %111 : vector<16x16xf32> to vector<16x16xbf16>
    %c0_59 = arith.constant 0 : index
    %c0_60 = arith.constant 0 : index
    %c0_61 = arith.constant 0 : index
    %113 = vector.load %arg11[%c0_59, %c0_60, %c0_61] : memref<8x16x64xbf16, #tpu.memory_space<vmem>>, vector<1x16x64xbf16>
    %114 = vector.shape_cast %113 : vector<1x16x64xbf16> to vector<16x64xbf16>
    %cst_62 = arith.constant dense<0.000000e+00> : vector<16x64xf32>
    %115 = tpu.matmul %112, %114, %cst_62 {dimension_numbers = #tpu.dot_dimension_numbers<[1], [0], [0], [1], [0, 0, 1, 1], [], []>} : vector<16x16xbf16>, vector<16x64xbf16>, vector<16x64xf32> -> vector<16x64xf32>
    %116 = arith.addf %68, %115 : vector<16x64xf32>
    %c1_63 = arith.constant 1 : index
    %c0_64 = arith.constant 0 : index
    %c0_65 = arith.constant 0 : index
    %117 = vector.load %arg9[%c1_63, %c0_64, %c0_65] : memref<24x64x16xbf16, #tpu.memory_space<vmem>>, vector<1x64x16xbf16>
    %118 = vector.shape_cast %117 : vector<1x64x16xbf16> to vector<64x16xbf16>
    %cst_66 = arith.constant dense<0.000000e+00> : vector<16x16xf32>
    %119 = tpu.matmul %67, %118, %cst_66 {dimension_numbers = #tpu.dot_dimension_numbers<[1], [0], [0], [1], [0, 0, 1, 1], [], []>} : vector<16x64xbf16>, vector<64x16xbf16>, vector<16x16xf32> -> vector<16x16xf32>
    %c1_67 = arith.constant 1 : index
    %c0_68 = arith.constant 0 : index
    %c0_69 = arith.constant 0 : index
    %120 = vector.load %arg10[%c1_67, %c0_68, %c0_69] : memref<24x1x16xf32, #tpu.memory_space<vmem>>, vector<1x1x16xf32>
    %121 = vector.shape_cast %120 : vector<1x1x16xf32> to vector<1x16xf32>
    %122 = vector.broadcast %121 : vector<1x16xf32> to vector<16x16xf32>
    %123 = arith.addf %119, %122 : vector<16x16xf32>
    %c5 = arith.constant 5 : index
    %c0_70 = arith.constant 0 : index
    %c0_71 = arith.constant 0 : index
    %124 = vector.load %arg9[%c5, %c0_70, %c0_71] : memref<24x64x16xbf16, #tpu.memory_space<vmem>>, vector<1x64x16xbf16>
    %125 = vector.shape_cast %124 : vector<1x64x16xbf16> to vector<64x16xbf16>
    %cst_72 = arith.constant dense<0.000000e+00> : vector<16x16xf32>
    %126 = tpu.matmul %67, %125, %cst_72 {dimension_numbers = #tpu.dot_dimension_numbers<[1], [0], [0], [1], [0, 0, 1, 1], [], []>} : vector<16x64xbf16>, vector<64x16xbf16>, vector<16x16xf32> -> vector<16x16xf32>
    %c5_73 = arith.constant 5 : index
    %c0_74 = arith.constant 0 : index
    %c0_75 = arith.constant 0 : index
    %127 = vector.load %arg10[%c5_73, %c0_74, %c0_75] : memref<24x1x16xf32, #tpu.memory_space<vmem>>, vector<1x1x16xf32>
    %128 = vector.shape_cast %127 : vector<1x1x16xf32> to vector<1x16xf32>
    %129 = vector.broadcast %128 : vector<1x16xf32> to vector<16x16xf32>
    %130 = arith.addf %126, %129 : vector<16x16xf32>
    %c9 = arith.constant 9 : index
    %c0_76 = arith.constant 0 : index
    %c0_77 = arith.constant 0 : index
    %131 = vector.load %arg9[%c9, %c0_76, %c0_77] : memref<24x64x16xbf16, #tpu.memory_space<vmem>>, vector<1x64x16xbf16>
    %132 = vector.shape_cast %131 : vector<1x64x16xbf16> to vector<64x16xbf16>
    %cst_78 = arith.constant dense<0.000000e+00> : vector<16x16xf32>
    %133 = tpu.matmul %67, %132, %cst_78 {dimension_numbers = #tpu.dot_dimension_numbers<[1], [0], [0], [1], [0, 0, 1, 1], [], []>} : vector<16x64xbf16>, vector<64x16xbf16>, vector<16x16xf32> -> vector<16x16xf32>
    %c9_79 = arith.constant 9 : index
    %c0_80 = arith.constant 0 : index
    %c0_81 = arith.constant 0 : index
    %134 = vector.load %arg10[%c9_79, %c0_80, %c0_81] : memref<24x1x16xf32, #tpu.memory_space<vmem>>, vector<1x1x16xf32>
    %135 = vector.shape_cast %134 : vector<1x1x16xf32> to vector<1x16xf32>
    %136 = vector.broadcast %135 : vector<1x16xf32> to vector<16x16xf32>
    %137 = arith.addf %133, %136 : vector<16x16xf32>
    %138 = vector.shape_cast %123 : vector<16x16xf32> to vector<2x8x16xf32>
    %139 = arith.truncf %138 : vector<2x8x16xf32> to vector<2x8x16xbf16>
    %140 = vector.shape_cast %130 : vector<16x16xf32> to vector<2x8x16xf32>
    %141 = arith.truncf %140 : vector<2x8x16xf32> to vector<2x8x16xbf16>
    %142 = vector.shape_cast %137 : vector<16x16xf32> to vector<2x8x16xf32>
    %143 = arith.truncf %142 : vector<2x8x16xf32> to vector<2x8x16xbf16>
    "tpu.trace_start"() <{level = 10 : i32, message = "bqd,bkd->bqk"}> : () -> ()
    %cst_82 = arith.constant dense<0.000000e+00> : vector<2x8x8xf32>
    %144 = tpu.matmul %139, %141, %cst_82 {dimension_numbers = #tpu.dot_dimension_numbers<[2], [2], [1], [1], [0, 0, 0, 1, 1, 1], [0], [0]>} : vector<2x8x16xbf16>, vector<2x8x16xbf16>, vector<2x8x8xf32> -> vector<2x8x8xf32>
    "tpu.trace_stop"() : () -> ()
    %cst_83 = arith.constant 2.500000e-01 : f32
    %145 = vector.broadcast %cst_83 : f32 to vector<2x8x8xf32>
    %146 = arith.mulf %144, %145 : vector<2x8x8xf32>
    %147 = arith.addf %146, %40 : vector<2x8x8xf32>
    %cst_84 = arith.constant dense<0xFF800000> : vector<2x8xf32>
    %148 = vector.multi_reduction <maximumf>, %147, %cst_84 [2] : vector<2x8x8xf32> to vector<2x8xf32>
    %149 = vector.shape_cast %148 : vector<2x8xf32> to vector<2x8x1xf32>
    %150 = vector.broadcast %149 : vector<2x8x1xf32> to vector<2x8x8xf32>
    %151 = arith.subf %147, %150 : vector<2x8x8xf32>
    %152 = math.exp %151 : vector<2x8x8xf32>
    %cst_85 = arith.constant dense<0.000000e+00> : vector<2x8xf32>
    %153 = vector.multi_reduction <add>, %152, %cst_85 [2] : vector<2x8x8xf32> to vector<2x8xf32>
    %154 = vector.shape_cast %153 : vector<2x8xf32> to vector<2x8x1xf32>
    %155 = vector.broadcast %154 : vector<2x8x1xf32> to vector<2x8x8xf32>
    %156 = arith.divf %152, %155 : vector<2x8x8xf32>
    %157 = arith.truncf %156 : vector<2x8x8xf32> to vector<2x8x8xbf16>
    "tpu.trace_start"() <{level = 10 : i32, message = "bqk,bkd->bqd"}> : () -> ()
    %cst_86 = arith.constant dense<0.000000e+00> : vector<2x8x16xf32>
    %158 = tpu.matmul %157, %143, %cst_86 {dimension_numbers = #tpu.dot_dimension_numbers<[2], [1], [1], [2], [0, 0, 0, 1, 1, 2], [0], [0]>} : vector<2x8x8xbf16>, vector<2x8x16xbf16>, vector<2x8x16xf32> -> vector<2x8x16xf32>
    "tpu.trace_stop"() : () -> ()
    %159 = vector.shape_cast %158 : vector<2x8x16xf32> to vector<16x16xf32>
    %160 = arith.truncf %159 : vector<16x16xf32> to vector<16x16xbf16>
    %c1_87 = arith.constant 1 : index
    %c0_88 = arith.constant 0 : index
    %c0_89 = arith.constant 0 : index
    %161 = vector.load %arg11[%c1_87, %c0_88, %c0_89] : memref<8x16x64xbf16, #tpu.memory_space<vmem>>, vector<1x16x64xbf16>
    %162 = vector.shape_cast %161 : vector<1x16x64xbf16> to vector<16x64xbf16>
    %cst_90 = arith.constant dense<0.000000e+00> : vector<16x64xf32>
    %163 = tpu.matmul %160, %162, %cst_90 {dimension_numbers = #tpu.dot_dimension_numbers<[1], [0], [0], [1], [0, 0, 1, 1], [], []>} : vector<16x16xbf16>, vector<16x64xbf16>, vector<16x64xf32> -> vector<16x64xf32>
    %164 = arith.addf %116, %163 : vector<16x64xf32>
    %c2 = arith.constant 2 : index
    %c0_91 = arith.constant 0 : index
    %c0_92 = arith.constant 0 : index
    %165 = vector.load %arg9[%c2, %c0_91, %c0_92] : memref<24x64x16xbf16, #tpu.memory_space<vmem>>, vector<1x64x16xbf16>
    %166 = vector.shape_cast %165 : vector<1x64x16xbf16> to vector<64x16xbf16>
    %cst_93 = arith.constant dense<0.000000e+00> : vector<16x16xf32>
    %167 = tpu.matmul %67, %166, %cst_93 {dimension_numbers = #tpu.dot_dimension_numbers<[1], [0], [0], [1], [0, 0, 1, 1], [], []>} : vector<16x64xbf16>, vector<64x16xbf16>, vector<16x16xf32> -> vector<16x16xf32>
    %c2_94 = arith.constant 2 : index
    %c0_95 = arith.constant 0 : index
    %c0_96 = arith.constant 0 : index
    %168 = vector.load %arg10[%c2_94, %c0_95, %c0_96] : memref<24x1x16xf32, #tpu.memory_space<vmem>>, vector<1x1x16xf32>
    %169 = vector.shape_cast %168 : vector<1x1x16xf32> to vector<1x16xf32>
    %170 = vector.broadcast %169 : vector<1x16xf32> to vector<16x16xf32>
    %171 = arith.addf %167, %170 : vector<16x16xf32>
    %c6 = arith.constant 6 : index
    %c0_97 = arith.constant 0 : index
    %c0_98 = arith.constant 0 : index
    %172 = vector.load %arg9[%c6, %c0_97, %c0_98] : memref<24x64x16xbf16, #tpu.memory_space<vmem>>, vector<1x64x16xbf16>
    %173 = vector.shape_cast %172 : vector<1x64x16xbf16> to vector<64x16xbf16>
    %cst_99 = arith.constant dense<0.000000e+00> : vector<16x16xf32>
    %174 = tpu.matmul %67, %173, %cst_99 {dimension_numbers = #tpu.dot_dimension_numbers<[1], [0], [0], [1], [0, 0, 1, 1], [], []>} : vector<16x64xbf16>, vector<64x16xbf16>, vector<16x16xf32> -> vector<16x16xf32>
    %c6_100 = arith.constant 6 : index
    %c0_101 = arith.constant 0 : index
    %c0_102 = arith.constant 0 : index
    %175 = vector.load %arg10[%c6_100, %c0_101, %c0_102] : memref<24x1x16xf32, #tpu.memory_space<vmem>>, vector<1x1x16xf32>
    %176 = vector.shape_cast %175 : vector<1x1x16xf32> to vector<1x16xf32>
    %177 = vector.broadcast %176 : vector<1x16xf32> to vector<16x16xf32>
    %178 = arith.addf %174, %177 : vector<16x16xf32>
    %c10 = arith.constant 10 : index
    %c0_103 = arith.constant 0 : index
    %c0_104 = arith.constant 0 : index
    %179 = vector.load %arg9[%c10, %c0_103, %c0_104] : memref<24x64x16xbf16, #tpu.memory_space<vmem>>, vector<1x64x16xbf16>
    %180 = vector.shape_cast %179 : vector<1x64x16xbf16> to vector<64x16xbf16>
    %cst_105 = arith.constant dense<0.000000e+00> : vector<16x16xf32>
    %181 = tpu.matmul %67, %180, %cst_105 {dimension_numbers = #tpu.dot_dimension_numbers<[1], [0], [0], [1], [0, 0, 1, 1], [], []>} : vector<16x64xbf16>, vector<64x16xbf16>, vector<16x16xf32> -> vector<16x16xf32>
    %c10_106 = arith.constant 10 : index
    %c0_107 = arith.constant 0 : index
    %c0_108 = arith.constant 0 : index
    %182 = vector.load %arg10[%c10_106, %c0_107, %c0_108] : memref<24x1x16xf32, #tpu.memory_space<vmem>>, vector<1x1x16xf32>
    %183 = vector.shape_cast %182 : vector<1x1x16xf32> to vector<1x16xf32>
    %184 = vector.broadcast %183 : vector<1x16xf32> to vector<16x16xf32>
    %185 = arith.addf %181, %184 : vector<16x16xf32>
    %186 = vector.shape_cast %171 : vector<16x16xf32> to vector<2x8x16xf32>
    %187 = arith.truncf %186 : vector<2x8x16xf32> to vector<2x8x16xbf16>
    %188 = vector.shape_cast %178 : vector<16x16xf32> to vector<2x8x16xf32>
    %189 = arith.truncf %188 : vector<2x8x16xf32> to vector<2x8x16xbf16>
    %190 = vector.shape_cast %185 : vector<16x16xf32> to vector<2x8x16xf32>
    %191 = arith.truncf %190 : vector<2x8x16xf32> to vector<2x8x16xbf16>
    "tpu.trace_start"() <{level = 10 : i32, message = "bqd,bkd->bqk"}> : () -> ()
    %cst_109 = arith.constant dense<0.000000e+00> : vector<2x8x8xf32>
    %192 = tpu.matmul %187, %189, %cst_109 {dimension_numbers = #tpu.dot_dimension_numbers<[2], [2], [1], [1], [0, 0, 0, 1, 1, 1], [0], [0]>} : vector<2x8x16xbf16>, vector<2x8x16xbf16>, vector<2x8x8xf32> -> vector<2x8x8xf32>
    "tpu.trace_stop"() : () -> ()
    %cst_110 = arith.constant 2.500000e-01 : f32
    %193 = vector.broadcast %cst_110 : f32 to vector<2x8x8xf32>
    %194 = arith.mulf %192, %193 : vector<2x8x8xf32>
    %195 = arith.addf %194, %40 : vector<2x8x8xf32>
    %cst_111 = arith.constant dense<0xFF800000> : vector<2x8xf32>
    %196 = vector.multi_reduction <maximumf>, %195, %cst_111 [2] : vector<2x8x8xf32> to vector<2x8xf32>
    %197 = vector.shape_cast %196 : vector<2x8xf32> to vector<2x8x1xf32>
    %198 = vector.broadcast %197 : vector<2x8x1xf32> to vector<2x8x8xf32>
    %199 = arith.subf %195, %198 : vector<2x8x8xf32>
    %200 = math.exp %199 : vector<2x8x8xf32>
    %cst_112 = arith.constant dense<0.000000e+00> : vector<2x8xf32>
    %201 = vector.multi_reduction <add>, %200, %cst_112 [2] : vector<2x8x8xf32> to vector<2x8xf32>
    %202 = vector.shape_cast %201 : vector<2x8xf32> to vector<2x8x1xf32>
    %203 = vector.broadcast %202 : vector<2x8x1xf32> to vector<2x8x8xf32>
    %204 = arith.divf %200, %203 : vector<2x8x8xf32>
    %205 = arith.truncf %204 : vector<2x8x8xf32> to vector<2x8x8xbf16>
    "tpu.trace_start"() <{level = 10 : i32, message = "bqk,bkd->bqd"}> : () -> ()
    %cst_113 = arith.constant dense<0.000000e+00> : vector<2x8x16xf32>
    %206 = tpu.matmul %205, %191, %cst_113 {dimension_numbers = #tpu.dot_dimension_numbers<[2], [1], [1], [2], [0, 0, 0, 1, 1, 2], [0], [0]>} : vector<2x8x8xbf16>, vector<2x8x16xbf16>, vector<2x8x16xf32> -> vector<2x8x16xf32>
    "tpu.trace_stop"() : () -> ()
    %207 = vector.shape_cast %206 : vector<2x8x16xf32> to vector<16x16xf32>
    %208 = arith.truncf %207 : vector<16x16xf32> to vector<16x16xbf16>
    %c2_114 = arith.constant 2 : index
    %c0_115 = arith.constant 0 : index
    %c0_116 = arith.constant 0 : index
    %209 = vector.load %arg11[%c2_114, %c0_115, %c0_116] : memref<8x16x64xbf16, #tpu.memory_space<vmem>>, vector<1x16x64xbf16>
    %210 = vector.shape_cast %209 : vector<1x16x64xbf16> to vector<16x64xbf16>
    %cst_117 = arith.constant dense<0.000000e+00> : vector<16x64xf32>
    %211 = tpu.matmul %208, %210, %cst_117 {dimension_numbers = #tpu.dot_dimension_numbers<[1], [0], [0], [1], [0, 0, 1, 1], [], []>} : vector<16x16xbf16>, vector<16x64xbf16>, vector<16x64xf32> -> vector<16x64xf32>
    %212 = arith.addf %164, %211 : vector<16x64xf32>
    %c3 = arith.constant 3 : index
    %c0_118 = arith.constant 0 : index
    %c0_119 = arith.constant 0 : index
    %213 = vector.load %arg9[%c3, %c0_118, %c0_119] : memref<24x64x16xbf16, #tpu.memory_space<vmem>>, vector<1x64x16xbf16>
    %214 = vector.shape_cast %213 : vector<1x64x16xbf16> to vector<64x16xbf16>
    %cst_120 = arith.constant dense<0.000000e+00> : vector<16x16xf32>
    %215 = tpu.matmul %67, %214, %cst_120 {dimension_numbers = #tpu.dot_dimension_numbers<[1], [0], [0], [1], [0, 0, 1, 1], [], []>} : vector<16x64xbf16>, vector<64x16xbf16>, vector<16x16xf32> -> vector<16x16xf32>
    %c3_121 = arith.constant 3 : index
    %c0_122 = arith.constant 0 : index
    %c0_123 = arith.constant 0 : index
    %216 = vector.load %arg10[%c3_121, %c0_122, %c0_123] : memref<24x1x16xf32, #tpu.memory_space<vmem>>, vector<1x1x16xf32>
    %217 = vector.shape_cast %216 : vector<1x1x16xf32> to vector<1x16xf32>
    %218 = vector.broadcast %217 : vector<1x16xf32> to vector<16x16xf32>
    %219 = arith.addf %215, %218 : vector<16x16xf32>
    %c7 = arith.constant 7 : index
    %c0_124 = arith.constant 0 : index
    %c0_125 = arith.constant 0 : index
    %220 = vector.load %arg9[%c7, %c0_124, %c0_125] : memref<24x64x16xbf16, #tpu.memory_space<vmem>>, vector<1x64x16xbf16>
    %221 = vector.shape_cast %220 : vector<1x64x16xbf16> to vector<64x16xbf16>
    %cst_126 = arith.constant dense<0.000000e+00> : vector<16x16xf32>
    %222 = tpu.matmul %67, %221, %cst_126 {dimension_numbers = #tpu.dot_dimension_numbers<[1], [0], [0], [1], [0, 0, 1, 1], [], []>} : vector<16x64xbf16>, vector<64x16xbf16>, vector<16x16xf32> -> vector<16x16xf32>
    %c7_127 = arith.constant 7 : index
    %c0_128 = arith.constant 0 : index
    %c0_129 = arith.constant 0 : index
    %223 = vector.load %arg10[%c7_127, %c0_128, %c0_129] : memref<24x1x16xf32, #tpu.memory_space<vmem>>, vector<1x1x16xf32>
    %224 = vector.shape_cast %223 : vector<1x1x16xf32> to vector<1x16xf32>
    %225 = vector.broadcast %224 : vector<1x16xf32> to vector<16x16xf32>
    %226 = arith.addf %222, %225 : vector<16x16xf32>
    %c11 = arith.constant 11 : index
    %c0_130 = arith.constant 0 : index
    %c0_131 = arith.constant 0 : index
    %227 = vector.load %arg9[%c11, %c0_130, %c0_131] : memref<24x64x16xbf16, #tpu.memory_space<vmem>>, vector<1x64x16xbf16>
    %228 = vector.shape_cast %227 : vector<1x64x16xbf16> to vector<64x16xbf16>
    %cst_132 = arith.constant dense<0.000000e+00> : vector<16x16xf32>
    %229 = tpu.matmul %67, %228, %cst_132 {dimension_numbers = #tpu.dot_dimension_numbers<[1], [0], [0], [1], [0, 0, 1, 1], [], []>} : vector<16x64xbf16>, vector<64x16xbf16>, vector<16x16xf32> -> vector<16x16xf32>
    %c11_133 = arith.constant 11 : index
    %c0_134 = arith.constant 0 : index
    %c0_135 = arith.constant 0 : index
    %230 = vector.load %arg10[%c11_133, %c0_134, %c0_135] : memref<24x1x16xf32, #tpu.memory_space<vmem>>, vector<1x1x16xf32>
    %231 = vector.shape_cast %230 : vector<1x1x16xf32> to vector<1x16xf32>
    %232 = vector.broadcast %231 : vector<1x16xf32> to vector<16x16xf32>
    %233 = arith.addf %229, %232 : vector<16x16xf32>
    %234 = vector.shape_cast %219 : vector<16x16xf32> to vector<2x8x16xf32>
    %235 = arith.truncf %234 : vector<2x8x16xf32> to vector<2x8x16xbf16>
    %236 = vector.shape_cast %226 : vector<16x16xf32> to vector<2x8x16xf32>
    %237 = arith.truncf %236 : vector<2x8x16xf32> to vector<2x8x16xbf16>
    %238 = vector.shape_cast %233 : vector<16x16xf32> to vector<2x8x16xf32>
    %239 = arith.truncf %238 : vector<2x8x16xf32> to vector<2x8x16xbf16>
    "tpu.trace_start"() <{level = 10 : i32, message = "bqd,bkd->bqk"}> : () -> ()
    %cst_136 = arith.constant dense<0.000000e+00> : vector<2x8x8xf32>
    %240 = tpu.matmul %235, %237, %cst_136 {dimension_numbers = #tpu.dot_dimension_numbers<[2], [2], [1], [1], [0, 0, 0, 1, 1, 1], [0], [0]>} : vector<2x8x16xbf16>, vector<2x8x16xbf16>, vector<2x8x8xf32> -> vector<2x8x8xf32>
    "tpu.trace_stop"() : () -> ()
    %cst_137 = arith.constant 2.500000e-01 : f32
    %241 = vector.broadcast %cst_137 : f32 to vector<2x8x8xf32>
    %242 = arith.mulf %240, %241 : vector<2x8x8xf32>
    %243 = arith.addf %242, %40 : vector<2x8x8xf32>
    %cst_138 = arith.constant dense<0xFF800000> : vector<2x8xf32>
    %244 = vector.multi_reduction <maximumf>, %243, %cst_138 [2] : vector<2x8x8xf32> to vector<2x8xf32>
    %245 = vector.shape_cast %244 : vector<2x8xf32> to vector<2x8x1xf32>
    %246 = vector.broadcast %245 : vector<2x8x1xf32> to vector<2x8x8xf32>
    %247 = arith.subf %243, %246 : vector<2x8x8xf32>
    %248 = math.exp %247 : vector<2x8x8xf32>
    %cst_139 = arith.constant dense<0.000000e+00> : vector<2x8xf32>
    %249 = vector.multi_reduction <add>, %248, %cst_139 [2] : vector<2x8x8xf32> to vector<2x8xf32>
    %250 = vector.shape_cast %249 : vector<2x8xf32> to vector<2x8x1xf32>
    %251 = vector.broadcast %250 : vector<2x8x1xf32> to vector<2x8x8xf32>
    %252 = arith.divf %248, %251 : vector<2x8x8xf32>
    %253 = arith.truncf %252 : vector<2x8x8xf32> to vector<2x8x8xbf16>
    "tpu.trace_start"() <{level = 10 : i32, message = "bqk,bkd->bqd"}> : () -> ()
    %cst_140 = arith.constant dense<0.000000e+00> : vector<2x8x16xf32>
    %254 = tpu.matmul %253, %239, %cst_140 {dimension_numbers = #tpu.dot_dimension_numbers<[2], [1], [1], [2], [0, 0, 0, 1, 1, 2], [0], [0]>} : vector<2x8x8xbf16>, vector<2x8x16xbf16>, vector<2x8x16xf32> -> vector<2x8x16xf32>
    "tpu.trace_stop"() : () -> ()
    %255 = vector.shape_cast %254 : vector<2x8x16xf32> to vector<16x16xf32>
    %256 = arith.truncf %255 : vector<16x16xf32> to vector<16x16xbf16>
    %c3_141 = arith.constant 3 : index
    %c0_142 = arith.constant 0 : index
    %c0_143 = arith.constant 0 : index
    %257 = vector.load %arg11[%c3_141, %c0_142, %c0_143] : memref<8x16x64xbf16, #tpu.memory_space<vmem>>, vector<1x16x64xbf16>
    %258 = vector.shape_cast %257 : vector<1x16x64xbf16> to vector<16x64xbf16>
    %cst_144 = arith.constant dense<0.000000e+00> : vector<16x64xf32>
    %259 = tpu.matmul %256, %258, %cst_144 {dimension_numbers = #tpu.dot_dimension_numbers<[1], [0], [0], [1], [0, 0, 1, 1], [], []>} : vector<16x16xbf16>, vector<16x64xbf16>, vector<16x64xf32> -> vector<16x64xf32>
    %260 = arith.addf %212, %259 : vector<16x64xf32>
    %261 = arith.addf %15, %260 : vector<16x64xf32>
    %c0_145 = arith.constant 0 : index
    %c0_146 = arith.constant 0 : index
    %c0_147 = arith.constant 0 : index
    %262 = vector.load %arg12[%c0_145, %c0_146, %c0_147] : memref<2x1x64xf32, #tpu.memory_space<vmem>>, vector<1x1x64xf32>
    %263 = vector.shape_cast %262 : vector<1x1x64xf32> to vector<1x64xf32>
    %264 = vector.broadcast %263 : vector<1x64xf32> to vector<16x64xf32>
    %265 = arith.addf %261, %264 : vector<16x64xf32>
    %c0_148 = arith.constant 0 : index
    %c0_149 = arith.constant 0 : index
    %c0_150 = arith.constant 0 : index
    %266 = vector.load %arg13[%c0_148, %c0_149, %c0_150] : memref<2x1x64xf32, #tpu.memory_space<vmem>>, vector<1x1x64xf32>
    %267 = vector.shape_cast %266 : vector<1x1x64xf32> to vector<1x64xf32>
    %c0_151 = arith.constant 0 : index
    %c0_152 = arith.constant 0 : index
    %c0_153 = arith.constant 0 : index
    %268 = vector.load %arg14[%c0_151, %c0_152, %c0_153] : memref<2x1x64xf32, #tpu.memory_space<vmem>>, vector<1x1x64xf32>
    %269 = vector.shape_cast %268 : vector<1x1x64xf32> to vector<1x64xf32>
    %cst_154 = arith.constant dense<0.000000e+00> : vector<16xf32>
    %270 = vector.multi_reduction <add>, %265, %cst_154 [1] : vector<16x64xf32> to vector<16xf32>
    %271 = vector.shape_cast %270 : vector<16xf32> to vector<16x1xf32>
    %cst_155 = arith.constant 6.400000e+01 : f32
    %272 = vector.broadcast %cst_155 : f32 to vector<16x1xf32>
    %273 = arith.divf %271, %272 : vector<16x1xf32>
    %274 = vector.broadcast %273 : vector<16x1xf32> to vector<16x64xf32>
    %275 = arith.subf %265, %274 : vector<16x64xf32>
    %276 = arith.mulf %275, %275 : vector<16x64xf32>
    %cst_156 = arith.constant dense<0.000000e+00> : vector<16xf32>
    %277 = vector.multi_reduction <add>, %276, %cst_156 [1] : vector<16x64xf32> to vector<16xf32>
    %278 = vector.shape_cast %277 : vector<16xf32> to vector<16x1xf32>
    %cst_157 = arith.constant 6.400000e+01 : f32
    %279 = vector.broadcast %cst_157 : f32 to vector<16x1xf32>
    %280 = arith.divf %278, %279 : vector<16x1xf32>
    %281 = vector.broadcast %273 : vector<16x1xf32> to vector<16x64xf32>
    %282 = arith.subf %265, %281 : vector<16x64xf32>
    %cst_158 = arith.constant 9.99999974E-6 : f32
    %283 = vector.broadcast %cst_158 : f32 to vector<16x1xf32>
    %284 = arith.addf %280, %283 : vector<16x1xf32>
    %285 = math.rsqrt %284 : vector<16x1xf32>
    %286 = vector.broadcast %285 : vector<16x1xf32> to vector<16x64xf32>
    %287 = arith.mulf %282, %286 : vector<16x64xf32>
    %288 = vector.broadcast %267 : vector<1x64xf32> to vector<16x64xf32>
    %289 = arith.mulf %287, %288 : vector<16x64xf32>
    %290 = vector.broadcast %269 : vector<1x64xf32> to vector<16x64xf32>
    %291 = arith.addf %289, %290 : vector<16x64xf32>
    %292 = arith.truncf %291 : vector<16x64xf32> to vector<16x64xbf16>
    %c0_159 = arith.constant 0 : index
    %c0_160 = arith.constant 0 : index
    %c0_161 = arith.constant 0 : index
    %293 = vector.load %arg15[%c0_159, %c0_160, %c0_161] : memref<2x64x256xbf16, #tpu.memory_space<vmem>>, vector<1x64x256xbf16>
    %294 = vector.shape_cast %293 : vector<1x64x256xbf16> to vector<64x256xbf16>
    %cst_162 = arith.constant dense<0.000000e+00> : vector<16x256xf32>
    %295 = tpu.matmul %292, %294, %cst_162 {dimension_numbers = #tpu.dot_dimension_numbers<[1], [0], [0], [1], [0, 0, 1, 1], [], []>} : vector<16x64xbf16>, vector<64x256xbf16>, vector<16x256xf32> -> vector<16x256xf32>
    %c0_163 = arith.constant 0 : index
    %c0_164 = arith.constant 0 : index
    %c0_165 = arith.constant 0 : index
    %296 = vector.load %arg16[%c0_163, %c0_164, %c0_165] : memref<2x1x256xf32, #tpu.memory_space<vmem>>, vector<1x1x256xf32>
    %297 = vector.shape_cast %296 : vector<1x1x256xf32> to vector<1x256xf32>
    %298 = vector.broadcast %297 : vector<1x256xf32> to vector<16x256xf32>
    %299 = arith.addf %295, %298 : vector<16x256xf32>
    %300 = arith.mulf %299, %299 : vector<16x256xf32>
    %301 = arith.mulf %299, %300 : vector<16x256xf32>
    %cst_166 = arith.constant 4.471500e-02 : f32
    %302 = vector.broadcast %cst_166 : f32 to vector<16x256xf32>
    %303 = arith.mulf %302, %301 : vector<16x256xf32>
    %304 = arith.addf %299, %303 : vector<16x256xf32>
    %cst_167 = arith.constant 0.797884583 : f32
    %305 = vector.broadcast %cst_167 : f32 to vector<16x256xf32>
    %306 = arith.mulf %305, %304 : vector<16x256xf32>
    %307 = math.tanh %306 : vector<16x256xf32>
    %cst_168 = arith.constant 1.000000e+00 : f32
    %308 = vector.broadcast %cst_168 : f32 to vector<16x256xf32>
    %309 = arith.addf %308, %307 : vector<16x256xf32>
    %cst_169 = arith.constant 5.000000e-01 : f32
    %310 = vector.broadcast %cst_169 : f32 to vector<16x256xf32>
    %311 = arith.mulf %310, %309 : vector<16x256xf32>
    %312 = arith.mulf %299, %311 : vector<16x256xf32>
    %313 = arith.truncf %312 : vector<16x256xf32> to vector<16x256xbf16>
    %c0_170 = arith.constant 0 : index
    %c0_171 = arith.constant 0 : index
    %c0_172 = arith.constant 0 : index
    %314 = vector.load %arg17[%c0_170, %c0_171, %c0_172] : memref<2x256x64xbf16, #tpu.memory_space<vmem>>, vector<1x256x64xbf16>
    %315 = vector.shape_cast %314 : vector<1x256x64xbf16> to vector<256x64xbf16>
    %cst_173 = arith.constant dense<0.000000e+00> : vector<16x64xf32>
    %316 = tpu.matmul %313, %315, %cst_173 {dimension_numbers = #tpu.dot_dimension_numbers<[1], [0], [0], [1], [0, 0, 1, 1], [], []>} : vector<16x256xbf16>, vector<256x64xbf16>, vector<16x64xf32> -> vector<16x64xf32>
    %c0_174 = arith.constant 0 : index
    %c0_175 = arith.constant 0 : index
    %c0_176 = arith.constant 0 : index
    %317 = vector.load %arg18[%c0_174, %c0_175, %c0_176] : memref<2x1x64xf32, #tpu.memory_space<vmem>>, vector<1x1x64xf32>
    %318 = vector.shape_cast %317 : vector<1x1x64xf32> to vector<1x64xf32>
    %319 = vector.broadcast %318 : vector<1x64xf32> to vector<16x64xf32>
    %320 = arith.addf %316, %319 : vector<16x64xf32>
    %321 = arith.addf %265, %320 : vector<16x64xf32>
    %c1_177 = arith.constant 1 : index
    %c0_178 = arith.constant 0 : index
    %c0_179 = arith.constant 0 : index
    %322 = vector.load %arg7[%c1_177, %c0_178, %c0_179] : memref<2x1x64xf32, #tpu.memory_space<vmem>>, vector<1x1x64xf32>
    %323 = vector.shape_cast %322 : vector<1x1x64xf32> to vector<1x64xf32>
    %c1_180 = arith.constant 1 : index
    %c0_181 = arith.constant 0 : index
    %c0_182 = arith.constant 0 : index
    %324 = vector.load %arg8[%c1_180, %c0_181, %c0_182] : memref<2x1x64xf32, #tpu.memory_space<vmem>>, vector<1x1x64xf32>
    %325 = vector.shape_cast %324 : vector<1x1x64xf32> to vector<1x64xf32>
    %cst_183 = arith.constant dense<0.000000e+00> : vector<16xf32>
    %326 = vector.multi_reduction <add>, %321, %cst_183 [1] : vector<16x64xf32> to vector<16xf32>
    %327 = vector.shape_cast %326 : vector<16xf32> to vector<16x1xf32>
    %cst_184 = arith.constant 6.400000e+01 : f32
    %328 = vector.broadcast %cst_184 : f32 to vector<16x1xf32>
    %329 = arith.divf %327, %328 : vector<16x1xf32>
    %330 = vector.broadcast %329 : vector<16x1xf32> to vector<16x64xf32>
    %331 = arith.subf %321, %330 : vector<16x64xf32>
    %332 = arith.mulf %331, %331 : vector<16x64xf32>
    %cst_185 = arith.constant dense<0.000000e+00> : vector<16xf32>
    %333 = vector.multi_reduction <add>, %332, %cst_185 [1] : vector<16x64xf32> to vector<16xf32>
    %334 = vector.shape_cast %333 : vector<16xf32> to vector<16x1xf32>
    %cst_186 = arith.constant 6.400000e+01 : f32
    %335 = vector.broadcast %cst_186 : f32 to vector<16x1xf32>
    %336 = arith.divf %334, %335 : vector<16x1xf32>
    %337 = vector.broadcast %329 : vector<16x1xf32> to vector<16x64xf32>
    %338 = arith.subf %321, %337 : vector<16x64xf32>
    %cst_187 = arith.constant 9.99999974E-6 : f32
    %339 = vector.broadcast %cst_187 : f32 to vector<16x1xf32>
    %340 = arith.addf %336, %339 : vector<16x1xf32>
    %341 = math.rsqrt %340 : vector<16x1xf32>
    %342 = vector.broadcast %341 : vector<16x1xf32> to vector<16x64xf32>
    %343 = arith.mulf %338, %342 : vector<16x64xf32>
    %344 = vector.broadcast %323 : vector<1x64xf32> to vector<16x64xf32>
    %345 = arith.mulf %343, %344 : vector<16x64xf32>
    %346 = vector.broadcast %325 : vector<1x64xf32> to vector<16x64xf32>
    %347 = arith.addf %345, %346 : vector<16x64xf32>
    %348 = arith.truncf %347 : vector<16x64xf32> to vector<16x64xbf16>
    %cst_188 = arith.constant 0.000000e+00 : f32
    %349 = vector.broadcast %cst_188 : f32 to vector<16x64xf32>
    %c12 = arith.constant 12 : index
    %c0_189 = arith.constant 0 : index
    %c0_190 = arith.constant 0 : index
    %350 = vector.load %arg9[%c12, %c0_189, %c0_190] : memref<24x64x16xbf16, #tpu.memory_space<vmem>>, vector<1x64x16xbf16>
    %351 = vector.shape_cast %350 : vector<1x64x16xbf16> to vector<64x16xbf16>
    %cst_191 = arith.constant dense<0.000000e+00> : vector<16x16xf32>
    %352 = tpu.matmul %348, %351, %cst_191 {dimension_numbers = #tpu.dot_dimension_numbers<[1], [0], [0], [1], [0, 0, 1, 1], [], []>} : vector<16x64xbf16>, vector<64x16xbf16>, vector<16x16xf32> -> vector<16x16xf32>
    %c12_192 = arith.constant 12 : index
    %c0_193 = arith.constant 0 : index
    %c0_194 = arith.constant 0 : index
    %353 = vector.load %arg10[%c12_192, %c0_193, %c0_194] : memref<24x1x16xf32, #tpu.memory_space<vmem>>, vector<1x1x16xf32>
    %354 = vector.shape_cast %353 : vector<1x1x16xf32> to vector<1x16xf32>
    %355 = vector.broadcast %354 : vector<1x16xf32> to vector<16x16xf32>
    %356 = arith.addf %352, %355 : vector<16x16xf32>
    %c16 = arith.constant 16 : index
    %c0_195 = arith.constant 0 : index
    %c0_196 = arith.constant 0 : index
    %357 = vector.load %arg9[%c16, %c0_195, %c0_196] : memref<24x64x16xbf16, #tpu.memory_space<vmem>>, vector<1x64x16xbf16>
    %358 = vector.shape_cast %357 : vector<1x64x16xbf16> to vector<64x16xbf16>
    %cst_197 = arith.constant dense<0.000000e+00> : vector<16x16xf32>
    %359 = tpu.matmul %348, %358, %cst_197 {dimension_numbers = #tpu.dot_dimension_numbers<[1], [0], [0], [1], [0, 0, 1, 1], [], []>} : vector<16x64xbf16>, vector<64x16xbf16>, vector<16x16xf32> -> vector<16x16xf32>
    %c16_198 = arith.constant 16 : index
    %c0_199 = arith.constant 0 : index
    %c0_200 = arith.constant 0 : index
    %360 = vector.load %arg10[%c16_198, %c0_199, %c0_200] : memref<24x1x16xf32, #tpu.memory_space<vmem>>, vector<1x1x16xf32>
    %361 = vector.shape_cast %360 : vector<1x1x16xf32> to vector<1x16xf32>
    %362 = vector.broadcast %361 : vector<1x16xf32> to vector<16x16xf32>
    %363 = arith.addf %359, %362 : vector<16x16xf32>
    %c20 = arith.constant 20 : index
    %c0_201 = arith.constant 0 : index
    %c0_202 = arith.constant 0 : index
    %364 = vector.load %arg9[%c20, %c0_201, %c0_202] : memref<24x64x16xbf16, #tpu.memory_space<vmem>>, vector<1x64x16xbf16>
    %365 = vector.shape_cast %364 : vector<1x64x16xbf16> to vector<64x16xbf16>
    %cst_203 = arith.constant dense<0.000000e+00> : vector<16x16xf32>
    %366 = tpu.matmul %348, %365, %cst_203 {dimension_numbers = #tpu.dot_dimension_numbers<[1], [0], [0], [1], [0, 0, 1, 1], [], []>} : vector<16x64xbf16>, vector<64x16xbf16>, vector<16x16xf32> -> vector<16x16xf32>
    %c20_204 = arith.constant 20 : index
    %c0_205 = arith.constant 0 : index
    %c0_206 = arith.constant 0 : index
    %367 = vector.load %arg10[%c20_204, %c0_205, %c0_206] : memref<24x1x16xf32, #tpu.memory_space<vmem>>, vector<1x1x16xf32>
    %368 = vector.shape_cast %367 : vector<1x1x16xf32> to vector<1x16xf32>
    %369 = vector.broadcast %368 : vector<1x16xf32> to vector<16x16xf32>
    %370 = arith.addf %366, %369 : vector<16x16xf32>
    %371 = vector.shape_cast %356 : vector<16x16xf32> to vector<2x8x16xf32>
    %372 = arith.truncf %371 : vector<2x8x16xf32> to vector<2x8x16xbf16>
    %373 = vector.shape_cast %363 : vector<16x16xf32> to vector<2x8x16xf32>
    %374 = arith.truncf %373 : vector<2x8x16xf32> to vector<2x8x16xbf16>
    %375 = vector.shape_cast %370 : vector<16x16xf32> to vector<2x8x16xf32>
    %376 = arith.truncf %375 : vector<2x8x16xf32> to vector<2x8x16xbf16>
    "tpu.trace_start"() <{level = 10 : i32, message = "bqd,bkd->bqk"}> : () -> ()
    %cst_207 = arith.constant dense<0.000000e+00> : vector<2x8x8xf32>
    %377 = tpu.matmul %372, %374, %cst_207 {dimension_numbers = #tpu.dot_dimension_numbers<[2], [2], [1], [1], [0, 0, 0, 1, 1, 1], [0], [0]>} : vector<2x8x16xbf16>, vector<2x8x16xbf16>, vector<2x8x8xf32> -> vector<2x8x8xf32>
    "tpu.trace_stop"() : () -> ()
    %cst_208 = arith.constant 2.500000e-01 : f32
    %378 = vector.broadcast %cst_208 : f32 to vector<2x8x8xf32>
    %379 = arith.mulf %377, %378 : vector<2x8x8xf32>
    %380 = arith.addf %379, %40 : vector<2x8x8xf32>
    %cst_209 = arith.constant dense<0xFF800000> : vector<2x8xf32>
    %381 = vector.multi_reduction <maximumf>, %380, %cst_209 [2] : vector<2x8x8xf32> to vector<2x8xf32>
    %382 = vector.shape_cast %381 : vector<2x8xf32> to vector<2x8x1xf32>
    %383 = vector.broadcast %382 : vector<2x8x1xf32> to vector<2x8x8xf32>
    %384 = arith.subf %380, %383 : vector<2x8x8xf32>
    %385 = math.exp %384 : vector<2x8x8xf32>
    %cst_210 = arith.constant dense<0.000000e+00> : vector<2x8xf32>
    %386 = vector.multi_reduction <add>, %385, %cst_210 [2] : vector<2x8x8xf32> to vector<2x8xf32>
    %387 = vector.shape_cast %386 : vector<2x8xf32> to vector<2x8x1xf32>
    %388 = vector.broadcast %387 : vector<2x8x1xf32> to vector<2x8x8xf32>
    %389 = arith.divf %385, %388 : vector<2x8x8xf32>
    %390 = arith.truncf %389 : vector<2x8x8xf32> to vector<2x8x8xbf16>
    "tpu.trace_start"() <{level = 10 : i32, message = "bqk,bkd->bqd"}> : () -> ()
    %cst_211 = arith.constant dense<0.000000e+00> : vector<2x8x16xf32>
    %391 = tpu.matmul %390, %376, %cst_211 {dimension_numbers = #tpu.dot_dimension_numbers<[2], [1], [1], [2], [0, 0, 0, 1, 1, 2], [0], [0]>} : vector<2x8x8xbf16>, vector<2x8x16xbf16>, vector<2x8x16xf32> -> vector<2x8x16xf32>
    "tpu.trace_stop"() : () -> ()
    %392 = vector.shape_cast %391 : vector<2x8x16xf32> to vector<16x16xf32>
    %393 = arith.truncf %392 : vector<16x16xf32> to vector<16x16xbf16>
    %c4_212 = arith.constant 4 : index
    %c0_213 = arith.constant 0 : index
    %c0_214 = arith.constant 0 : index
    %394 = vector.load %arg11[%c4_212, %c0_213, %c0_214] : memref<8x16x64xbf16, #tpu.memory_space<vmem>>, vector<1x16x64xbf16>
    %395 = vector.shape_cast %394 : vector<1x16x64xbf16> to vector<16x64xbf16>
    %cst_215 = arith.constant dense<0.000000e+00> : vector<16x64xf32>
    %396 = tpu.matmul %393, %395, %cst_215 {dimension_numbers = #tpu.dot_dimension_numbers<[1], [0], [0], [1], [0, 0, 1, 1], [], []>} : vector<16x16xbf16>, vector<16x64xbf16>, vector<16x64xf32> -> vector<16x64xf32>
    %397 = arith.addf %349, %396 : vector<16x64xf32>
    %c13 = arith.constant 13 : index
    %c0_216 = arith.constant 0 : index
    %c0_217 = arith.constant 0 : index
    %398 = vector.load %arg9[%c13, %c0_216, %c0_217] : memref<24x64x16xbf16, #tpu.memory_space<vmem>>, vector<1x64x16xbf16>
    %399 = vector.shape_cast %398 : vector<1x64x16xbf16> to vector<64x16xbf16>
    %cst_218 = arith.constant dense<0.000000e+00> : vector<16x16xf32>
    %400 = tpu.matmul %348, %399, %cst_218 {dimension_numbers = #tpu.dot_dimension_numbers<[1], [0], [0], [1], [0, 0, 1, 1], [], []>} : vector<16x64xbf16>, vector<64x16xbf16>, vector<16x16xf32> -> vector<16x16xf32>
    %c13_219 = arith.constant 13 : index
    %c0_220 = arith.constant 0 : index
    %c0_221 = arith.constant 0 : index
    %401 = vector.load %arg10[%c13_219, %c0_220, %c0_221] : memref<24x1x16xf32, #tpu.memory_space<vmem>>, vector<1x1x16xf32>
    %402 = vector.shape_cast %401 : vector<1x1x16xf32> to vector<1x16xf32>
    %403 = vector.broadcast %402 : vector<1x16xf32> to vector<16x16xf32>
    %404 = arith.addf %400, %403 : vector<16x16xf32>
    %c17 = arith.constant 17 : index
    %c0_222 = arith.constant 0 : index
    %c0_223 = arith.constant 0 : index
    %405 = vector.load %arg9[%c17, %c0_222, %c0_223] : memref<24x64x16xbf16, #tpu.memory_space<vmem>>, vector<1x64x16xbf16>
    %406 = vector.shape_cast %405 : vector<1x64x16xbf16> to vector<64x16xbf16>
    %cst_224 = arith.constant dense<0.000000e+00> : vector<16x16xf32>
    %407 = tpu.matmul %348, %406, %cst_224 {dimension_numbers = #tpu.dot_dimension_numbers<[1], [0], [0], [1], [0, 0, 1, 1], [], []>} : vector<16x64xbf16>, vector<64x16xbf16>, vector<16x16xf32> -> vector<16x16xf32>
    %c17_225 = arith.constant 17 : index
    %c0_226 = arith.constant 0 : index
    %c0_227 = arith.constant 0 : index
    %408 = vector.load %arg10[%c17_225, %c0_226, %c0_227] : memref<24x1x16xf32, #tpu.memory_space<vmem>>, vector<1x1x16xf32>
    %409 = vector.shape_cast %408 : vector<1x1x16xf32> to vector<1x16xf32>
    %410 = vector.broadcast %409 : vector<1x16xf32> to vector<16x16xf32>
    %411 = arith.addf %407, %410 : vector<16x16xf32>
    %c21 = arith.constant 21 : index
    %c0_228 = arith.constant 0 : index
    %c0_229 = arith.constant 0 : index
    %412 = vector.load %arg9[%c21, %c0_228, %c0_229] : memref<24x64x16xbf16, #tpu.memory_space<vmem>>, vector<1x64x16xbf16>
    %413 = vector.shape_cast %412 : vector<1x64x16xbf16> to vector<64x16xbf16>
    %cst_230 = arith.constant dense<0.000000e+00> : vector<16x16xf32>
    %414 = tpu.matmul %348, %413, %cst_230 {dimension_numbers = #tpu.dot_dimension_numbers<[1], [0], [0], [1], [0, 0, 1, 1], [], []>} : vector<16x64xbf16>, vector<64x16xbf16>, vector<16x16xf32> -> vector<16x16xf32>
    %c21_231 = arith.constant 21 : index
    %c0_232 = arith.constant 0 : index
    %c0_233 = arith.constant 0 : index
    %415 = vector.load %arg10[%c21_231, %c0_232, %c0_233] : memref<24x1x16xf32, #tpu.memory_space<vmem>>, vector<1x1x16xf32>
    %416 = vector.shape_cast %415 : vector<1x1x16xf32> to vector<1x16xf32>
    %417 = vector.broadcast %416 : vector<1x16xf32> to vector<16x16xf32>
    %418 = arith.addf %414, %417 : vector<16x16xf32>
    %419 = vector.shape_cast %404 : vector<16x16xf32> to vector<2x8x16xf32>
    %420 = arith.truncf %419 : vector<2x8x16xf32> to vector<2x8x16xbf16>
    %421 = vector.shape_cast %411 : vector<16x16xf32> to vector<2x8x16xf32>
    %422 = arith.truncf %421 : vector<2x8x16xf32> to vector<2x8x16xbf16>
    %423 = vector.shape_cast %418 : vector<16x16xf32> to vector<2x8x16xf32>
    %424 = arith.truncf %423 : vector<2x8x16xf32> to vector<2x8x16xbf16>
    "tpu.trace_start"() <{level = 10 : i32, message = "bqd,bkd->bqk"}> : () -> ()
    %cst_234 = arith.constant dense<0.000000e+00> : vector<2x8x8xf32>
    %425 = tpu.matmul %420, %422, %cst_234 {dimension_numbers = #tpu.dot_dimension_numbers<[2], [2], [1], [1], [0, 0, 0, 1, 1, 1], [0], [0]>} : vector<2x8x16xbf16>, vector<2x8x16xbf16>, vector<2x8x8xf32> -> vector<2x8x8xf32>
    "tpu.trace_stop"() : () -> ()
    %cst_235 = arith.constant 2.500000e-01 : f32
    %426 = vector.broadcast %cst_235 : f32 to vector<2x8x8xf32>
    %427 = arith.mulf %425, %426 : vector<2x8x8xf32>
    %428 = arith.addf %427, %40 : vector<2x8x8xf32>
    %cst_236 = arith.constant dense<0xFF800000> : vector<2x8xf32>
    %429 = vector.multi_reduction <maximumf>, %428, %cst_236 [2] : vector<2x8x8xf32> to vector<2x8xf32>
    %430 = vector.shape_cast %429 : vector<2x8xf32> to vector<2x8x1xf32>
    %431 = vector.broadcast %430 : vector<2x8x1xf32> to vector<2x8x8xf32>
    %432 = arith.subf %428, %431 : vector<2x8x8xf32>
    %433 = math.exp %432 : vector<2x8x8xf32>
    %cst_237 = arith.constant dense<0.000000e+00> : vector<2x8xf32>
    %434 = vector.multi_reduction <add>, %433, %cst_237 [2] : vector<2x8x8xf32> to vector<2x8xf32>
    %435 = vector.shape_cast %434 : vector<2x8xf32> to vector<2x8x1xf32>
    %436 = vector.broadcast %435 : vector<2x8x1xf32> to vector<2x8x8xf32>
    %437 = arith.divf %433, %436 : vector<2x8x8xf32>
    %438 = arith.truncf %437 : vector<2x8x8xf32> to vector<2x8x8xbf16>
    "tpu.trace_start"() <{level = 10 : i32, message = "bqk,bkd->bqd"}> : () -> ()
    %cst_238 = arith.constant dense<0.000000e+00> : vector<2x8x16xf32>
    %439 = tpu.matmul %438, %424, %cst_238 {dimension_numbers = #tpu.dot_dimension_numbers<[2], [1], [1], [2], [0, 0, 0, 1, 1, 2], [0], [0]>} : vector<2x8x8xbf16>, vector<2x8x16xbf16>, vector<2x8x16xf32> -> vector<2x8x16xf32>
    "tpu.trace_stop"() : () -> ()
    %440 = vector.shape_cast %439 : vector<2x8x16xf32> to vector<16x16xf32>
    %441 = arith.truncf %440 : vector<16x16xf32> to vector<16x16xbf16>
    %c5_239 = arith.constant 5 : index
    %c0_240 = arith.constant 0 : index
    %c0_241 = arith.constant 0 : index
    %442 = vector.load %arg11[%c5_239, %c0_240, %c0_241] : memref<8x16x64xbf16, #tpu.memory_space<vmem>>, vector<1x16x64xbf16>
    %443 = vector.shape_cast %442 : vector<1x16x64xbf16> to vector<16x64xbf16>
    %cst_242 = arith.constant dense<0.000000e+00> : vector<16x64xf32>
    %444 = tpu.matmul %441, %443, %cst_242 {dimension_numbers = #tpu.dot_dimension_numbers<[1], [0], [0], [1], [0, 0, 1, 1], [], []>} : vector<16x16xbf16>, vector<16x64xbf16>, vector<16x64xf32> -> vector<16x64xf32>
    %445 = arith.addf %397, %444 : vector<16x64xf32>
    %c14 = arith.constant 14 : index
    %c0_243 = arith.constant 0 : index
    %c0_244 = arith.constant 0 : index
    %446 = vector.load %arg9[%c14, %c0_243, %c0_244] : memref<24x64x16xbf16, #tpu.memory_space<vmem>>, vector<1x64x16xbf16>
    %447 = vector.shape_cast %446 : vector<1x64x16xbf16> to vector<64x16xbf16>
    %cst_245 = arith.constant dense<0.000000e+00> : vector<16x16xf32>
    %448 = tpu.matmul %348, %447, %cst_245 {dimension_numbers = #tpu.dot_dimension_numbers<[1], [0], [0], [1], [0, 0, 1, 1], [], []>} : vector<16x64xbf16>, vector<64x16xbf16>, vector<16x16xf32> -> vector<16x16xf32>
    %c14_246 = arith.constant 14 : index
    %c0_247 = arith.constant 0 : index
    %c0_248 = arith.constant 0 : index
    %449 = vector.load %arg10[%c14_246, %c0_247, %c0_248] : memref<24x1x16xf32, #tpu.memory_space<vmem>>, vector<1x1x16xf32>
    %450 = vector.shape_cast %449 : vector<1x1x16xf32> to vector<1x16xf32>
    %451 = vector.broadcast %450 : vector<1x16xf32> to vector<16x16xf32>
    %452 = arith.addf %448, %451 : vector<16x16xf32>
    %c18 = arith.constant 18 : index
    %c0_249 = arith.constant 0 : index
    %c0_250 = arith.constant 0 : index
    %453 = vector.load %arg9[%c18, %c0_249, %c0_250] : memref<24x64x16xbf16, #tpu.memory_space<vmem>>, vector<1x64x16xbf16>
    %454 = vector.shape_cast %453 : vector<1x64x16xbf16> to vector<64x16xbf16>
    %cst_251 = arith.constant dense<0.000000e+00> : vector<16x16xf32>
    %455 = tpu.matmul %348, %454, %cst_251 {dimension_numbers = #tpu.dot_dimension_numbers<[1], [0], [0], [1], [0, 0, 1, 1], [], []>} : vector<16x64xbf16>, vector<64x16xbf16>, vector<16x16xf32> -> vector<16x16xf32>
    %c18_252 = arith.constant 18 : index
    %c0_253 = arith.constant 0 : index
    %c0_254 = arith.constant 0 : index
    %456 = vector.load %arg10[%c18_252, %c0_253, %c0_254] : memref<24x1x16xf32, #tpu.memory_space<vmem>>, vector<1x1x16xf32>
    %457 = vector.shape_cast %456 : vector<1x1x16xf32> to vector<1x16xf32>
    %458 = vector.broadcast %457 : vector<1x16xf32> to vector<16x16xf32>
    %459 = arith.addf %455, %458 : vector<16x16xf32>
    %c22 = arith.constant 22 : index
    %c0_255 = arith.constant 0 : index
    %c0_256 = arith.constant 0 : index
    %460 = vector.load %arg9[%c22, %c0_255, %c0_256] : memref<24x64x16xbf16, #tpu.memory_space<vmem>>, vector<1x64x16xbf16>
    %461 = vector.shape_cast %460 : vector<1x64x16xbf16> to vector<64x16xbf16>
    %cst_257 = arith.constant dense<0.000000e+00> : vector<16x16xf32>
    %462 = tpu.matmul %348, %461, %cst_257 {dimension_numbers = #tpu.dot_dimension_numbers<[1], [0], [0], [1], [0, 0, 1, 1], [], []>} : vector<16x64xbf16>, vector<64x16xbf16>, vector<16x16xf32> -> vector<16x16xf32>
    %c22_258 = arith.constant 22 : index
    %c0_259 = arith.constant 0 : index
    %c0_260 = arith.constant 0 : index
    %463 = vector.load %arg10[%c22_258, %c0_259, %c0_260] : memref<24x1x16xf32, #tpu.memory_space<vmem>>, vector<1x1x16xf32>
    %464 = vector.shape_cast %463 : vector<1x1x16xf32> to vector<1x16xf32>
    %465 = vector.broadcast %464 : vector<1x16xf32> to vector<16x16xf32>
    %466 = arith.addf %462, %465 : vector<16x16xf32>
    %467 = vector.shape_cast %452 : vector<16x16xf32> to vector<2x8x16xf32>
    %468 = arith.truncf %467 : vector<2x8x16xf32> to vector<2x8x16xbf16>
    %469 = vector.shape_cast %459 : vector<16x16xf32> to vector<2x8x16xf32>
    %470 = arith.truncf %469 : vector<2x8x16xf32> to vector<2x8x16xbf16>
    %471 = vector.shape_cast %466 : vector<16x16xf32> to vector<2x8x16xf32>
    %472 = arith.truncf %471 : vector<2x8x16xf32> to vector<2x8x16xbf16>
    "tpu.trace_start"() <{level = 10 : i32, message = "bqd,bkd->bqk"}> : () -> ()
    %cst_261 = arith.constant dense<0.000000e+00> : vector<2x8x8xf32>
    %473 = tpu.matmul %468, %470, %cst_261 {dimension_numbers = #tpu.dot_dimension_numbers<[2], [2], [1], [1], [0, 0, 0, 1, 1, 1], [0], [0]>} : vector<2x8x16xbf16>, vector<2x8x16xbf16>, vector<2x8x8xf32> -> vector<2x8x8xf32>
    "tpu.trace_stop"() : () -> ()
    %cst_262 = arith.constant 2.500000e-01 : f32
    %474 = vector.broadcast %cst_262 : f32 to vector<2x8x8xf32>
    %475 = arith.mulf %473, %474 : vector<2x8x8xf32>
    %476 = arith.addf %475, %40 : vector<2x8x8xf32>
    %cst_263 = arith.constant dense<0xFF800000> : vector<2x8xf32>
    %477 = vector.multi_reduction <maximumf>, %476, %cst_263 [2] : vector<2x8x8xf32> to vector<2x8xf32>
    %478 = vector.shape_cast %477 : vector<2x8xf32> to vector<2x8x1xf32>
    %479 = vector.broadcast %478 : vector<2x8x1xf32> to vector<2x8x8xf32>
    %480 = arith.subf %476, %479 : vector<2x8x8xf32>
    %481 = math.exp %480 : vector<2x8x8xf32>
    %cst_264 = arith.constant dense<0.000000e+00> : vector<2x8xf32>
    %482 = vector.multi_reduction <add>, %481, %cst_264 [2] : vector<2x8x8xf32> to vector<2x8xf32>
    %483 = vector.shape_cast %482 : vector<2x8xf32> to vector<2x8x1xf32>
    %484 = vector.broadcast %483 : vector<2x8x1xf32> to vector<2x8x8xf32>
    %485 = arith.divf %481, %484 : vector<2x8x8xf32>
    %486 = arith.truncf %485 : vector<2x8x8xf32> to vector<2x8x8xbf16>
    "tpu.trace_start"() <{level = 10 : i32, message = "bqk,bkd->bqd"}> : () -> ()
    %cst_265 = arith.constant dense<0.000000e+00> : vector<2x8x16xf32>
    %487 = tpu.matmul %486, %472, %cst_265 {dimension_numbers = #tpu.dot_dimension_numbers<[2], [1], [1], [2], [0, 0, 0, 1, 1, 2], [0], [0]>} : vector<2x8x8xbf16>, vector<2x8x16xbf16>, vector<2x8x16xf32> -> vector<2x8x16xf32>
    "tpu.trace_stop"() : () -> ()
    %488 = vector.shape_cast %487 : vector<2x8x16xf32> to vector<16x16xf32>
    %489 = arith.truncf %488 : vector<16x16xf32> to vector<16x16xbf16>
    %c6_266 = arith.constant 6 : index
    %c0_267 = arith.constant 0 : index
    %c0_268 = arith.constant 0 : index
    %490 = vector.load %arg11[%c6_266, %c0_267, %c0_268] : memref<8x16x64xbf16, #tpu.memory_space<vmem>>, vector<1x16x64xbf16>
    %491 = vector.shape_cast %490 : vector<1x16x64xbf16> to vector<16x64xbf16>
    %cst_269 = arith.constant dense<0.000000e+00> : vector<16x64xf32>
    %492 = tpu.matmul %489, %491, %cst_269 {dimension_numbers = #tpu.dot_dimension_numbers<[1], [0], [0], [1], [0, 0, 1, 1], [], []>} : vector<16x16xbf16>, vector<16x64xbf16>, vector<16x64xf32> -> vector<16x64xf32>
    %493 = arith.addf %445, %492 : vector<16x64xf32>
    %c15 = arith.constant 15 : index
    %c0_270 = arith.constant 0 : index
    %c0_271 = arith.constant 0 : index
    %494 = vector.load %arg9[%c15, %c0_270, %c0_271] : memref<24x64x16xbf16, #tpu.memory_space<vmem>>, vector<1x64x16xbf16>
    %495 = vector.shape_cast %494 : vector<1x64x16xbf16> to vector<64x16xbf16>
    %cst_272 = arith.constant dense<0.000000e+00> : vector<16x16xf32>
    %496 = tpu.matmul %348, %495, %cst_272 {dimension_numbers = #tpu.dot_dimension_numbers<[1], [0], [0], [1], [0, 0, 1, 1], [], []>} : vector<16x64xbf16>, vector<64x16xbf16>, vector<16x16xf32> -> vector<16x16xf32>
    %c15_273 = arith.constant 15 : index
    %c0_274 = arith.constant 0 : index
    %c0_275 = arith.constant 0 : index
    %497 = vector.load %arg10[%c15_273, %c0_274, %c0_275] : memref<24x1x16xf32, #tpu.memory_space<vmem>>, vector<1x1x16xf32>
    %498 = vector.shape_cast %497 : vector<1x1x16xf32> to vector<1x16xf32>
    %499 = vector.broadcast %498 : vector<1x16xf32> to vector<16x16xf32>
    %500 = arith.addf %496, %499 : vector<16x16xf32>
    %c19 = arith.constant 19 : index
    %c0_276 = arith.constant 0 : index
    %c0_277 = arith.constant 0 : index
    %501 = vector.load %arg9[%c19, %c0_276, %c0_277] : memref<24x64x16xbf16, #tpu.memory_space<vmem>>, vector<1x64x16xbf16>
    %502 = vector.shape_cast %501 : vector<1x64x16xbf16> to vector<64x16xbf16>
    %cst_278 = arith.constant dense<0.000000e+00> : vector<16x16xf32>
    %503 = tpu.matmul %348, %502, %cst_278 {dimension_numbers = #tpu.dot_dimension_numbers<[1], [0], [0], [1], [0, 0, 1, 1], [], []>} : vector<16x64xbf16>, vector<64x16xbf16>, vector<16x16xf32> -> vector<16x16xf32>
    %c19_279 = arith.constant 19 : index
    %c0_280 = arith.constant 0 : index
    %c0_281 = arith.constant 0 : index
    %504 = vector.load %arg10[%c19_279, %c0_280, %c0_281] : memref<24x1x16xf32, #tpu.memory_space<vmem>>, vector<1x1x16xf32>
    %505 = vector.shape_cast %504 : vector<1x1x16xf32> to vector<1x16xf32>
    %506 = vector.broadcast %505 : vector<1x16xf32> to vector<16x16xf32>
    %507 = arith.addf %503, %506 : vector<16x16xf32>
    %c23 = arith.constant 23 : index
    %c0_282 = arith.constant 0 : index
    %c0_283 = arith.constant 0 : index
    %508 = vector.load %arg9[%c23, %c0_282, %c0_283] : memref<24x64x16xbf16, #tpu.memory_space<vmem>>, vector<1x64x16xbf16>
    %509 = vector.shape_cast %508 : vector<1x64x16xbf16> to vector<64x16xbf16>
    %cst_284 = arith.constant dense<0.000000e+00> : vector<16x16xf32>
    %510 = tpu.matmul %348, %509, %cst_284 {dimension_numbers = #tpu.dot_dimension_numbers<[1], [0], [0], [1], [0, 0, 1, 1], [], []>} : vector<16x64xbf16>, vector<64x16xbf16>, vector<16x16xf32> -> vector<16x16xf32>
    %c23_285 = arith.constant 23 : index
    %c0_286 = arith.constant 0 : index
    %c0_287 = arith.constant 0 : index
    %511 = vector.load %arg10[%c23_285, %c0_286, %c0_287] : memref<24x1x16xf32, #tpu.memory_space<vmem>>, vector<1x1x16xf32>
    %512 = vector.shape_cast %511 : vector<1x1x16xf32> to vector<1x16xf32>
    %513 = vector.broadcast %512 : vector<1x16xf32> to vector<16x16xf32>
    %514 = arith.addf %510, %513 : vector<16x16xf32>
    %515 = vector.shape_cast %500 : vector<16x16xf32> to vector<2x8x16xf32>
    %516 = arith.truncf %515 : vector<2x8x16xf32> to vector<2x8x16xbf16>
    %517 = vector.shape_cast %507 : vector<16x16xf32> to vector<2x8x16xf32>
    %518 = arith.truncf %517 : vector<2x8x16xf32> to vector<2x8x16xbf16>
    %519 = vector.shape_cast %514 : vector<16x16xf32> to vector<2x8x16xf32>
    %520 = arith.truncf %519 : vector<2x8x16xf32> to vector<2x8x16xbf16>
    "tpu.trace_start"() <{level = 10 : i32, message = "bqd,bkd->bqk"}> : () -> ()
    %cst_288 = arith.constant dense<0.000000e+00> : vector<2x8x8xf32>
    %521 = tpu.matmul %516, %518, %cst_288 {dimension_numbers = #tpu.dot_dimension_numbers<[2], [2], [1], [1], [0, 0, 0, 1, 1, 1], [0], [0]>} : vector<2x8x16xbf16>, vector<2x8x16xbf16>, vector<2x8x8xf32> -> vector<2x8x8xf32>
    "tpu.trace_stop"() : () -> ()
    %cst_289 = arith.constant 2.500000e-01 : f32
    %522 = vector.broadcast %cst_289 : f32 to vector<2x8x8xf32>
    %523 = arith.mulf %521, %522 : vector<2x8x8xf32>
    %524 = arith.addf %523, %40 : vector<2x8x8xf32>
    %cst_290 = arith.constant dense<0xFF800000> : vector<2x8xf32>
    %525 = vector.multi_reduction <maximumf>, %524, %cst_290 [2] : vector<2x8x8xf32> to vector<2x8xf32>
    %526 = vector.shape_cast %525 : vector<2x8xf32> to vector<2x8x1xf32>
    %527 = vector.broadcast %526 : vector<2x8x1xf32> to vector<2x8x8xf32>
    %528 = arith.subf %524, %527 : vector<2x8x8xf32>
    %529 = math.exp %528 : vector<2x8x8xf32>
    %cst_291 = arith.constant dense<0.000000e+00> : vector<2x8xf32>
    %530 = vector.multi_reduction <add>, %529, %cst_291 [2] : vector<2x8x8xf32> to vector<2x8xf32>
    %531 = vector.shape_cast %530 : vector<2x8xf32> to vector<2x8x1xf32>
    %532 = vector.broadcast %531 : vector<2x8x1xf32> to vector<2x8x8xf32>
    %533 = arith.divf %529, %532 : vector<2x8x8xf32>
    %534 = arith.truncf %533 : vector<2x8x8xf32> to vector<2x8x8xbf16>
    "tpu.trace_start"() <{level = 10 : i32, message = "bqk,bkd->bqd"}> : () -> ()
    %cst_292 = arith.constant dense<0.000000e+00> : vector<2x8x16xf32>
    %535 = tpu.matmul %534, %520, %cst_292 {dimension_numbers = #tpu.dot_dimension_numbers<[2], [1], [1], [2], [0, 0, 0, 1, 1, 2], [0], [0]>} : vector<2x8x8xbf16>, vector<2x8x16xbf16>, vector<2x8x16xf32> -> vector<2x8x16xf32>
    "tpu.trace_stop"() : () -> ()
    %536 = vector.shape_cast %535 : vector<2x8x16xf32> to vector<16x16xf32>
    %537 = arith.truncf %536 : vector<16x16xf32> to vector<16x16xbf16>
    %c7_293 = arith.constant 7 : index
    %c0_294 = arith.constant 0 : index
    %c0_295 = arith.constant 0 : index
    %538 = vector.load %arg11[%c7_293, %c0_294, %c0_295] : memref<8x16x64xbf16, #tpu.memory_space<vmem>>, vector<1x16x64xbf16>
    %539 = vector.shape_cast %538 : vector<1x16x64xbf16> to vector<16x64xbf16>
    %cst_296 = arith.constant dense<0.000000e+00> : vector<16x64xf32>
    %540 = tpu.matmul %537, %539, %cst_296 {dimension_numbers = #tpu.dot_dimension_numbers<[1], [0], [0], [1], [0, 0, 1, 1], [], []>} : vector<16x16xbf16>, vector<16x64xbf16>, vector<16x64xf32> -> vector<16x64xf32>
    %541 = arith.addf %493, %540 : vector<16x64xf32>
    %542 = arith.addf %321, %541 : vector<16x64xf32>
    %c1_297 = arith.constant 1 : index
    %c0_298 = arith.constant 0 : index
    %c0_299 = arith.constant 0 : index
    %543 = vector.load %arg12[%c1_297, %c0_298, %c0_299] : memref<2x1x64xf32, #tpu.memory_space<vmem>>, vector<1x1x64xf32>
    %544 = vector.shape_cast %543 : vector<1x1x64xf32> to vector<1x64xf32>
    %545 = vector.broadcast %544 : vector<1x64xf32> to vector<16x64xf32>
    %546 = arith.addf %542, %545 : vector<16x64xf32>
    %c1_300 = arith.constant 1 : index
    %c0_301 = arith.constant 0 : index
    %c0_302 = arith.constant 0 : index
    %547 = vector.load %arg13[%c1_300, %c0_301, %c0_302] : memref<2x1x64xf32, #tpu.memory_space<vmem>>, vector<1x1x64xf32>
    %548 = vector.shape_cast %547 : vector<1x1x64xf32> to vector<1x64xf32>
    %c1_303 = arith.constant 1 : index
    %c0_304 = arith.constant 0 : index
    %c0_305 = arith.constant 0 : index
    %549 = vector.load %arg14[%c1_303, %c0_304, %c0_305] : memref<2x1x64xf32, #tpu.memory_space<vmem>>, vector<1x1x64xf32>
    %550 = vector.shape_cast %549 : vector<1x1x64xf32> to vector<1x64xf32>
    %cst_306 = arith.constant dense<0.000000e+00> : vector<16xf32>
    %551 = vector.multi_reduction <add>, %546, %cst_306 [1] : vector<16x64xf32> to vector<16xf32>
    %552 = vector.shape_cast %551 : vector<16xf32> to vector<16x1xf32>
    %cst_307 = arith.constant 6.400000e+01 : f32
    %553 = vector.broadcast %cst_307 : f32 to vector<16x1xf32>
    %554 = arith.divf %552, %553 : vector<16x1xf32>
    %555 = vector.broadcast %554 : vector<16x1xf32> to vector<16x64xf32>
    %556 = arith.subf %546, %555 : vector<16x64xf32>
    %557 = arith.mulf %556, %556 : vector<16x64xf32>
    %cst_308 = arith.constant dense<0.000000e+00> : vector<16xf32>
    %558 = vector.multi_reduction <add>, %557, %cst_308 [1] : vector<16x64xf32> to vector<16xf32>
    %559 = vector.shape_cast %558 : vector<16xf32> to vector<16x1xf32>
    %cst_309 = arith.constant 6.400000e+01 : f32
    %560 = vector.broadcast %cst_309 : f32 to vector<16x1xf32>
    %561 = arith.divf %559, %560 : vector<16x1xf32>
    %562 = vector.broadcast %554 : vector<16x1xf32> to vector<16x64xf32>
    %563 = arith.subf %546, %562 : vector<16x64xf32>
    %cst_310 = arith.constant 9.99999974E-6 : f32
    %564 = vector.broadcast %cst_310 : f32 to vector<16x1xf32>
    %565 = arith.addf %561, %564 : vector<16x1xf32>
    %566 = math.rsqrt %565 : vector<16x1xf32>
    %567 = vector.broadcast %566 : vector<16x1xf32> to vector<16x64xf32>
    %568 = arith.mulf %563, %567 : vector<16x64xf32>
    %569 = vector.broadcast %548 : vector<1x64xf32> to vector<16x64xf32>
    %570 = arith.mulf %568, %569 : vector<16x64xf32>
    %571 = vector.broadcast %550 : vector<1x64xf32> to vector<16x64xf32>
    %572 = arith.addf %570, %571 : vector<16x64xf32>
    %573 = arith.truncf %572 : vector<16x64xf32> to vector<16x64xbf16>
    %c1_311 = arith.constant 1 : index
    %c0_312 = arith.constant 0 : index
    %c0_313 = arith.constant 0 : index
    %574 = vector.load %arg15[%c1_311, %c0_312, %c0_313] : memref<2x64x256xbf16, #tpu.memory_space<vmem>>, vector<1x64x256xbf16>
    %575 = vector.shape_cast %574 : vector<1x64x256xbf16> to vector<64x256xbf16>
    %cst_314 = arith.constant dense<0.000000e+00> : vector<16x256xf32>
    %576 = tpu.matmul %573, %575, %cst_314 {dimension_numbers = #tpu.dot_dimension_numbers<[1], [0], [0], [1], [0, 0, 1, 1], [], []>} : vector<16x64xbf16>, vector<64x256xbf16>, vector<16x256xf32> -> vector<16x256xf32>
    %c1_315 = arith.constant 1 : index
    %c0_316 = arith.constant 0 : index
    %c0_317 = arith.constant 0 : index
    %577 = vector.load %arg16[%c1_315, %c0_316, %c0_317] : memref<2x1x256xf32, #tpu.memory_space<vmem>>, vector<1x1x256xf32>
    %578 = vector.shape_cast %577 : vector<1x1x256xf32> to vector<1x256xf32>
    %579 = vector.broadcast %578 : vector<1x256xf32> to vector<16x256xf32>
    %580 = arith.addf %576, %579 : vector<16x256xf32>
    %581 = arith.mulf %580, %580 : vector<16x256xf32>
    %582 = arith.mulf %580, %581 : vector<16x256xf32>
    %cst_318 = arith.constant 4.471500e-02 : f32
    %583 = vector.broadcast %cst_318 : f32 to vector<16x256xf32>
    %584 = arith.mulf %583, %582 : vector<16x256xf32>
    %585 = arith.addf %580, %584 : vector<16x256xf32>
    %cst_319 = arith.constant 0.797884583 : f32
    %586 = vector.broadcast %cst_319 : f32 to vector<16x256xf32>
    %587 = arith.mulf %586, %585 : vector<16x256xf32>
    %588 = math.tanh %587 : vector<16x256xf32>
    %cst_320 = arith.constant 1.000000e+00 : f32
    %589 = vector.broadcast %cst_320 : f32 to vector<16x256xf32>
    %590 = arith.addf %589, %588 : vector<16x256xf32>
    %cst_321 = arith.constant 5.000000e-01 : f32
    %591 = vector.broadcast %cst_321 : f32 to vector<16x256xf32>
    %592 = arith.mulf %591, %590 : vector<16x256xf32>
    %593 = arith.mulf %580, %592 : vector<16x256xf32>
    %594 = arith.truncf %593 : vector<16x256xf32> to vector<16x256xbf16>
    %c1_322 = arith.constant 1 : index
    %c0_323 = arith.constant 0 : index
    %c0_324 = arith.constant 0 : index
    %595 = vector.load %arg17[%c1_322, %c0_323, %c0_324] : memref<2x256x64xbf16, #tpu.memory_space<vmem>>, vector<1x256x64xbf16>
    %596 = vector.shape_cast %595 : vector<1x256x64xbf16> to vector<256x64xbf16>
    %cst_325 = arith.constant dense<0.000000e+00> : vector<16x64xf32>
    %597 = tpu.matmul %594, %596, %cst_325 {dimension_numbers = #tpu.dot_dimension_numbers<[1], [0], [0], [1], [0, 0, 1, 1], [], []>} : vector<16x256xbf16>, vector<256x64xbf16>, vector<16x64xf32> -> vector<16x64xf32>
    %c1_326 = arith.constant 1 : index
    %c0_327 = arith.constant 0 : index
    %c0_328 = arith.constant 0 : index
    %598 = vector.load %arg18[%c1_326, %c0_327, %c0_328] : memref<2x1x64xf32, #tpu.memory_space<vmem>>, vector<1x1x64xf32>
    %599 = vector.shape_cast %598 : vector<1x1x64xf32> to vector<1x64xf32>
    %600 = vector.broadcast %599 : vector<1x64xf32> to vector<16x64xf32>
    %601 = arith.addf %597, %600 : vector<16x64xf32>
    %602 = arith.addf %546, %601 : vector<16x64xf32>
    %603 = vector.shape_cast %602 : vector<16x64xf32> to vector<2x8x64xf32>
    %c0_329 = arith.constant 0 : index
    %c0_330 = arith.constant 0 : index
    %c0_331 = arith.constant 0 : index
    %c0_332 = arith.constant 0 : index
    %604 = vector.load %arg19[%c0_329, %c0_330, %c0_331, %c0_332] : memref<2x1x8x64xf32, #tpu.memory_space<vmem>>, vector<2x1x8x64xf32>
    %605 = vector.shape_cast %604 : vector<2x1x8x64xf32> to vector<2x8x64xf32>
    %606 = vector.shape_cast %603 : vector<2x8x64xf32> to vector<2x1x8x64xf32>
    tpu.vector_store %arg19[%c0_329, %c0_330, %c0_331, %c0_332], %606 {strides = array<i32>} : memref<2x1x8x64xf32, #tpu.memory_space<vmem>>, vector<2x1x8x64xf32>,
    return
  }
  func.func @transform_0(%arg0: i32, %arg1: memref<2xi32, #tpu.memory_space<smem>>) -> (i32, i32, i32, i32) {
    %c0_i32 = arith.constant 0 : i32
    %c0_i32_0 = arith.constant 0 : i32
    %c0_i32_1 = arith.constant 0 : i32
    %c0_i32_2 = arith.constant 0 : i32
    return %c0_i32, %arg0, %c0_i32_0, %c0_i32_1 : i32, i32, i32, i32
  }
  func.func @transform_1(%arg0: i32, %arg1: memref<2xi32, #tpu.memory_space<smem>>) -> (i32, i32, i32, i32) {
    %c0_i32 = arith.constant 0 : i32
    %c0_i32_0 = arith.constant 0 : i32
    %c0_i32_1 = arith.constant 0 : i32
    %c0_i32_2 = arith.constant 0 : i32
    return %c0_i32, %arg0, %c0_i32_0, %c0_i32_1 : i32, i32, i32, i32
  }
  func.func @transform_2(%arg0: i32, %arg1: memref<2xi32, #tpu.memory_space<smem>>) -> (i32, i32) {
    %c0_i32 = arith.constant 0 : i32
    %c0_i32_0 = arith.constant 0 : i32
    %c0_i32_1 = arith.constant 0 : i32
    return %c0_i32, %c0_i32_0 : i32, i32
  }
  func.func @transform_3(%arg0: i32, %arg1: memref<2xi32, #tpu.memory_space<smem>>) -> (i32, i32) {
    %c0_i32 = arith.constant 0 : i32
    %c0_i32_0 = arith.constant 0 : i32
    %c0_i32_1 = arith.constant 0 : i32
    return %c0_i32, %c0_i32_0 : i32, i32
  }
  func.func @transform_4(%arg0: i32, %arg1: memref<2xi32, #tpu.memory_space<smem>>) -> (i32, i32) {
    %c0_i32 = arith.constant 0 : i32
    %c0_i32_0 = arith.constant 0 : i32
    %c0_i32_1 = arith.constant 0 : i32
    return %c0_i32, %c0_i32_0 : i32, i32
  }
  func.func @transform_5(%arg0: i32, %arg1: memref<2xi32, #tpu.memory_space<smem>>) -> (i32, i32, i32) {
    %c0_i32 = arith.constant 0 : i32
    %c0_i32_0 = arith.constant 0 : i32
    %c0_i32_1 = arith.constant 0 : i32
    %c0_i32_2 = arith.constant 0 : i32
    return %c0_i32, %c0_i32_0, %c0_i32_1 : i32, i32, i32
  }
  func.func @transform_6(%arg0: i32, %arg1: memref<2xi32, #tpu.memory_space<smem>>) -> (i32, i32, i32) {
    %c0_i32 = arith.constant 0 : i32
    %c0_i32_0 = arith.constant 0 : i32
    %c0_i32_1 = arith.constant 0 : i32
    %c0_i32_2 = arith.constant 0 : i32
    return %c0_i32, %c0_i32_0, %c0_i32_1 : i32, i32, i32
  }
  func.func @transform_7(%arg0: i32, %arg1: memref<2xi32, #tpu.memory_space<smem>>) -> (i32, i32, i32) {
    %c0_i32 = arith.constant 0 : i32
    %c0_i32_0 = arith.constant 0 : i32
    %c0_i32_1 = arith.constant 0 : i32
    %c0_i32_2 = arith.constant 0 : i32
    return %c0_i32, %c0_i32_0, %c0_i32_1 : i32, i32, i32
  }
  func.func @transform_8(%arg0: i32, %arg1: memref<2xi32, #tpu.memory_space<smem>>) -> (i32, i32, i32) {
    %c0_i32 = arith.constant 0 : i32
    %c0_i32_0 = arith.constant 0 : i32
    %c0_i32_1 = arith.constant 0 : i32
    %c0_i32_2 = arith.constant 0 : i32
    return %c0_i32, %c0_i32_0, %c0_i32_1 : i32, i32, i32
  }
  func.func @transform_9(%arg0: i32, %arg1: memref<2xi32, #tpu.memory_space<smem>>) -> (i32, i32, i32) {
    %c0_i32 = arith.constant 0 : i32
    %c0_i32_0 = arith.constant 0 : i32
    %c0_i32_1 = arith.constant 0 : i32
    %c0_i32_2 = arith.constant 0 : i32
    return %c0_i32, %c0_i32_0, %c0_i32_1 : i32, i32, i32
  }
  func.func @transform_10(%arg0: i32, %arg1: memref<2xi32, #tpu.memory_space<smem>>) -> (i32, i32, i32) {
    %c0_i32 = arith.constant 0 : i32
    %c0_i32_0 = arith.constant 0 : i32
    %c0_i32_1 = arith.constant 0 : i32
    %c0_i32_2 = arith.constant 0 : i32
    return %c0_i32, %c0_i32_0, %c0_i32_1 : i32, i32, i32
  }
  func.func @transform_11(%arg0: i32, %arg1: memref<2xi32, #tpu.memory_space<smem>>) -> (i32, i32, i32) {
    %c0_i32 = arith.constant 0 : i32
    %c0_i32_0 = arith.constant 0 : i32
    %c0_i32_1 = arith.constant 0 : i32
    %c0_i32_2 = arith.constant 0 : i32
    return %c0_i32, %c0_i32_0, %c0_i32_1 : i32, i32, i32
  }
  func.func @transform_12(%arg0: i32, %arg1: memref<2xi32, #tpu.memory_space<smem>>) -> (i32, i32, i32) {
    %c0_i32 = arith.constant 0 : i32
    %c0_i32_0 = arith.constant 0 : i32
    %c0_i32_1 = arith.constant 0 : i32
    %c0_i32_2 = arith.constant 0 : i32
    return %c0_i32, %c0_i32_0, %c0_i32_1 : i32, i32, i32
  }
  func.func @transform_13(%arg0: i32, %arg1: memref<2xi32, #tpu.memory_space<smem>>) -> (i32, i32, i32) {
    %c0_i32 = arith.constant 0 : i32
    %c0_i32_0 = arith.constant 0 : i32
    %c0_i32_1 = arith.constant 0 : i32
    %c0_i32_2 = arith.constant 0 : i32
    return %c0_i32, %c0_i32_0, %c0_i32_1 : i32, i32, i32
  }
  func.func @transform_14(%arg0: i32, %arg1: memref<2xi32, #tpu.memory_space<smem>>) -> (i32, i32, i32) {
    %c0_i32 = arith.constant 0 : i32
    %c0_i32_0 = arith.constant 0 : i32
    %c0_i32_1 = arith.constant 0 : i32
    %c0_i32_2 = arith.constant 0 : i32
    return %c0_i32, %c0_i32_0, %c0_i32_1 : i32, i32, i32
  }
  func.func @transform_15(%arg0: i32, %arg1: memref<2xi32, #tpu.memory_space<smem>>) -> (i32, i32, i32) {
    %c0_i32 = arith.constant 0 : i32
    %c0_i32_0 = arith.constant 0 : i32
    %c0_i32_1 = arith.constant 0 : i32
    %c0_i32_2 = arith.constant 0 : i32
    return %c0_i32, %c0_i32_0, %c0_i32_1 : i32, i32, i32
  }
  func.func @transform_16(%arg0: i32, %arg1: memref<2xi32, #tpu.memory_space<smem>>) -> (i32, i32, i32) {
    %c0_i32 = arith.constant 0 : i32
    %c0_i32_0 = arith.constant 0 : i32
    %c0_i32_1 = arith.constant 0 : i32
    %c0_i32_2 = arith.constant 0 : i32
    return %c0_i32, %c0_i32_0, %c0_i32_1 : i32, i32, i32
  }
  func.func @transform_17(%arg0: i32, %arg1: memref<2xi32, #tpu.memory_space<smem>>) -> (i32, i32, i32, i32) {
    %c0_i32 = arith.constant 0 : i32
    %c0_i32_0 = arith.constant 0 : i32
    %c0_i32_1 = arith.constant 0 : i32
    %c0_i32_2 = arith.constant 0 : i32
    return %c0_i32, %arg0, %c0_i32_0, %c0_i32_1 : i32, i32, i32, i32
  }
}

</mosaic_0001>

<bundles_post_ra>
// kernel: tpu_custom_call.1
= control target key start
LH: loop header
LB: loop body
LE: loop exit
PB: predicated region body
PF: predicated region fallthrough
CT: control target
= control target key end

     0   :  { %s9356_s0 = inlined_call_operand.vmem [shape: s32[2], index: 0, kind: input, shape index: {}]   ;;  %s9357_s1 = inlined_call_operand.vmem [shape: f32[2,2,8,320], index: 1, kind: input, shape index: {}]   ;;  %s9358_s2 = inlined_call_operand.vmem [shape: f32[2,2,8,32], index: 2, kind: input, shape index: {}]   ;;  %s9359_s3 = inlined_call_operand.vmem [shape: bf16[320,64], index: 3, kind: input, shape index: {}]   ;;  %s9360_s4 = inlined_call_operand.vmem [shape: bf16[32,64], index: 4, kind: input, shape index: {}]   ;;  %s9361_s5 = inlined_call_operand.vmem [shape: f32[1,64], index: 5, kind: input, shape index: {}]   ;;  %s9362_s6 = inlined_call_operand.vmem [shape: f32[2,1,64], index: 6, kind: input, shape index: {}]   ;;  %s9363_s7 = inlined_call_operand.vmem [shape: f32[2,1,64], index: 7, kind: input, shape index: {}]   ;;  %s9364_s8 = inlined_call_operand.vmem [shape: bf16[24,64,16], index: 8, kind: input, shape index: {}]   ;;  %s9365_s9 = inlined_call_operand.vmem [shape: f32[24,1,16], index: 9, kind: input, shape index: {}]   ;;  %s9366_s10 = inlined_call_operand.vmem [shape: bf16[8,16,64], index: 10, kind: input, shape index: {}]   ;;  %s9367_s11 = inlined_call_operand.vmem [shape: f32[2,1,64], index: 11, kind: input, shape index: {}]   ;;  %s9368_s12 = inlined_call_operand.vmem [shape: f32[2,1,64], index: 12, kind: input, shape index: {}]   ;;  %s9369_s13 = inlined_call_operand.vmem [shape: f32[2,1,64], index: 13, kind: input, shape index: {}]   ;;  %s9370_s14 = inlined_call_operand.vmem [shape: bf16[2,64,256], index: 14, kind: input, shape index: {}]   ;;  %s9371_s15 = inlined_call_operand.vmem [shape: f32[2,1,256], index: 15, kind: input, shape index: {}]   ;;  %s9372_s16 = inlined_call_operand.vmem [shape: bf16[2,256,64], index: 16, kind: input, shape index: {}]   ;;  %s9373_s17 = inlined_call_operand.vmem [shape: f32[2,1,64], index: 17, kind: input, shape index: {}]   ;;  %s9374_s18 = inlined_call_operand.hbm [shape: f32[2,2,8,64], index: 18, kind: output, shape index: {}]  }
   0x1   :  { %9381 = sst [smem:[#allocation14_spill]] %s9356_s0 }
   0x2   :  { %9382 = sst [smem:[#allocation15_spill]] %s9357_s1  ;;  %s9386_s29 = sld [smem:[#allocation14_spill]] }
   0x3   :  { %9383 = sst [smem:[#allocation16_spill]] %s9358_s2 }
   0x4   :  { %9384 = sst [smem:[#allocation17_spill]] %s9359_s3 }
   0x5   :  { %9385 = sst [smem:[#allocation18_spill]] %s9368_s12 }
   0x8   :  { %s23_s12 = sshll.u32 %s9386_s29, 4  ;;  %s24_s12 = int_to_ptr.vmem [resolvable:$true] %s23_s12 }
   0x9   :  { %s7833_s30 = scalar_lea.vmem %s24_s12, 16  ;;  %p7838_p1 = scmp.lt.s32.totalorder %s24_s12, %s24_s12 }
   0xa   :  { %p7834_p0 = scmp.ne.s32.totalorder %s24_s12, %s7833_s30  ;;  %p7839_p2 = scmp.lt.s32.totalorder %s7833_s30, %s7833_s30 }
   0xc   :  { %p7840_p3 = por %p7839_p2, %p7838_p1 }
   0xe   :  { %p7841_p4 = pnand %p7840_p3, %p7834_p0 }
  0x10   :  { %7844 = shalt.err (!%p7841_p4)  }
  0x11   :  { %s7911_s0 = smov [#allocation3]  }
  0x12   :  { %26 = dma.vmem_to_smem %s24_s12, 16, %s7911_s0, [#allocation2] }
  0x13   :  { %7889 = dma.done.wait [#allocation2], 16 }
  0x14   :  { %7890 = vsyncadd [#allocation2], 4294967280 }
  0x15   :  { %28 = sfence }
  0x16   :  { %29 = vsyncpa [#allocation7], 0 }
  0x17   :  { %31 = vsyncpa [#allocation7 + $0x1], 0  ;;  %s8018_s19 = smov 0   ;;  %s8020_s1 = smov 0  }
  0x18   :  { %s8022_s20 = smov 0   ;;  %s8024_s21 = smov 0  }
  0x19 LB: > { %9387 = sst [smem:[#allocation10_spill]] %s7897_s19  ;;  %s8039_s12 = sadd.s32 4294967295, %s7909_s21   ;;  %s7909_s21 = sphi %s8024_s21, %s9402_s21   ;;  %s7905_s20 = sphi %s8022_s20, %s9406_s20   ;;  %s7901_s1 = sphi %s8020_s1, %s9405_s1   ;;  %s7897_s19 = sphi %s8018_s19, %s9404_s19  }
  0x1a   : > { %s6107_s22 = sadd.s32 4294967294, %s7909_s21   ;;  %s8043_s2 = sadd.s32 1, %s7909_s21  }
  0x1b   : > { %9388 = sst [smem:[#allocation11_spill]] %s8043_s2  ;;  %s44_s23 = sadd.s32 1, %s7905_s20 }
  0x1c   : > { %s41_s24 = ssub.s32 %s7909_s21, %s8043_s2  ;;  %p51_p5 = scmp.ne.s32.totalorder %s7905_s20, %s7901_s1 }
  0x1d   : > { %p42_p6 = scmp.eq.s32.totalorder %s41_s24, 0  ;;  %p52_p7 = scmp.eq.s32.totalorder %s7909_s21, 0 }
  0x1e   : > { %p422_p8 = scmp.eq.s32.totalorder %s8039_s12, 1  ;;  %p427_p9 = scmp.ne.s32.totalorder %s7901_s1, %s7897_s19 }
  0x1f   : > { %s8055_s25 = scalar_select %p42_p6, %s7905_s20, %s44_s23  }
  0x20   : > { %p8057_p10 = por %p52_p7, %p51_p5  ;;  %p8061_p11 = por %p422_p8, %p51_p5 }
  0x21   : > { %9389 = sst [smem:[#allocation12_spill]] %s8055_s25  ;;  %p428_p12 = scmp.eq.s32.totalorder %s6107_s22, 1 }
  0x22   : > { %p6109_p0 = scmp.ge.s32.totalorder %s7909_s21, 2 }
  0x23   : > { %p8065_p13 = por %p428_p12, %p427_p9 }
  0x24   : > { %489 = sbr.rel (%p6109_p0) target bundleno = 66 (0x42), region = 76 }
  0x25   : > { %s9392_s28 = scalar_select %p8065_p13, 1, 0 }
  0x27   : > { %9393 = sst [smem:[#allocation13_spill]] %s9392_s28 }
  0x2b   : > { %492 = sbr.rel (!%p8057_p10) target bundleno = 55 (0x37), region = 80  ;;  %s494_s29 = sand.u32 (%p8057_p10), 1, %s7905_s20  }
  0x2c   : > { %s7506_s30 = smul.u32 (%p8057_p10), 24, %s7909_s21  ;;  %s9394_s22 = sld [smem:[#allocation15_spill]] (%p8057_p10) }
  0x2d   : > { %s7505_s0 = smul.u32 (%p8057_p10), 48, %s494_s29 }
  0x2f   : > { %s496_s2 = scalar_lea.vmem (%p8057_p10), [#allocation4], %s7505_s0 }
  0x32   : > { %s499_s25 = scalar_lea.vmem %s9394_s22, %s7506_s30 }
  0x33   : > { %v512_v0 = vld [vmem:[%s499_s25] sm:$0xff]  ;;  %v514_v1 = vld [vmem:[%s499_s25 + $0x8] sm:$0xff]  ;;  %v516_v2 = vld [vmem:[%s499_s25 + $0x10] sm:$0xff] }
  0x34   : > { %513 = vst [vmem:[%s496_s2] sm:$0xff] %v512_v0  ;;  %515 = vst [vmem:[%s496_s2 + $0x8] sm:$0xff] %v514_v1  ;;  %v518_v3 = vld [vmem:[%s499_s25 + $0x30] sm:$0xff]  ;;  %v520_v4 = vld [vmem:[%s499_s25 + $0x38] sm:$0xff] }
  0x35   : > { %517 = vst [vmem:[%s496_s2 + $0x10] sm:$0xff] %v516_v2  ;;  %v522_v5 = vld [vmem:[%s499_s25 + $0x40] sm:$0xff]  ;;  %519 = vst [vmem:[%s496_s2 + $0x18] sm:$0xff] %v518_v3 }
  0x36   : > { %521 = vst [vmem:[%s496_s2 + $0x20] sm:$0xff] %v520_v4  ;;  %523 = vst [vmem:[%s496_s2 + $0x28] sm:$0xff] %v522_v5 }
  0x37 PF: > { %529 = sbr.rel (!%p8057_p10) target bundleno = 66 (0x42), region = 103  ;;  %s531_s29 = sand.u32 (%p8057_p10), 1, %s7905_s20  }
  0x38   : > { %s6112_s30 = sshll.u32 (%p8057_p10), %s7909_s21, 3  ;;  %s6111_s23 = sshll.u32 (%p8057_p10), %s531_s29, 4 }
  0x39   : > { %s9395_s22 = sld [smem:[#allocation16_spill]] (%p8057_p10)  ;;  %s533_s19 = scalar_lea.vmem (%p8057_p10), [#allocation5], %s6111_s23 }
  0x3f   : > { %s535_s28 = scalar_lea.vmem %s9395_s22, %s6112_s30 }
  0x40   : > { %v565_v6 = vld [vmem:[%s535_s28] sm:$0xff]  ;;  %v567_v7 = vld [vmem:[%s535_s28 + $0x10] sm:$0xff] }
  0x41   : > { %566 = vst [vmem:[%s533_s19] sm:$0xff] %v565_v6  ;;  %568 = vst [vmem:[%s533_s19 + $0x8] sm:$0xff] %v567_v7 }
  0x42 PF: > { %p6113_p1 = scmp.ge.s32.totalorder %s7909_s21, 1  ;;  %p573_p2 = scmp.lt.s32.totalorder %s7909_s21, 3 }
  0x44   : > { %p574_p3 = pnand %p6113_p1, %p573_p2 }
  0x45   : > { %v7555_v8 = vld [vmem:[%s9360_s4] sm:$0xff] (!%p574_p3)   ;;  %v7912_v9 = vmov (!%p574_p3), 0.0   ;;  %v7556_v10 = vld [vmem:[%s9360_s4 + $0x8] sm:$0xff] (!%p574_p3)   ;;  %vm7913_vm0 = vmmov (!%p574_p3), 0   ;;  %s8099_s28 = sand.u32 (!%p574_p3), 1, %s7901_s1   ;;  %s9396_s3 = sld [smem:[#allocation17_spill]] (!%p574_p3) }
  0x46   : > { %577 = sbr.rel (%p574_p3) target bundleno = 10467 (0x28e3), region = 141  ;;  %6957 = vmatprep.subr.bf16.mxu1 (!%p574_p3), %v7912_v9  ;;  %6965 = vmatprep.subr.bf16.mxu0 (!%p574_p3), %v7912_v9  ;;  %s9380_s29 = sshll.u32 (!%p574_p3), %s8099_s28, 4  ;;  %vm711_vm1 = vcmask (!%p574_p3), 261120   ;;  %vm876_vm2 = vcmask (!%p574_p3), 523264   ;;  %v6140_v58 = vld [vmem:[%s9361_s5] ss:$0 sm:$0xff] (!%p574_p3) }
  0x47   : > { %6958 = vmatpush3.bf16.msra.mxu1 (!%p574_p3), %v7555_v8  ;;  %6961 = vmatprep.mubr.msk.bf16.mxu1 (!%p574_p3), %vm7913_vm0, %v7912_v9  ;;  %s589_s24 = scalar_lea.vmem (!%p574_p3), [#allocation5], %s9380_s29  ;;  %s7507_s19 = smul.u32 (!%p574_p3), 48, %s8099_s28  ;;  %vm1291_vm3 = vcmask (!%p574_p3), 130048   ;;  %vm1416_vm4 = vcmask (!%p574_p3), 1043456   ;;  %vm1388_vm7 = vcmask (!%p574_p3), 64512  }
  0x48   : > { %6959 = vmatprep.subr.bf16.mxu1 (!%p574_p3), %v7912_v9  ;;  %6973 = vmatprep.mubr.msk.bf16.mxu0 (!%p574_p3), %vm7913_vm0, %v7912_v9  ;;  %v652_v12 = vld [vmem:[%s589_s24] sm:$0xff] (!%p574_p3)  ;;  %v653_v13 = vld [vmem:[%s589_s24 + $0x8] sm:$0xff] (!%p574_p3)  ;;  %s973_s23 = sld [smem:[#allocation3]] (!%p574_p3)  ;;  %s6147_s24 = sld [smem:[#allocation3 + $0x1]] (!%p574_p3) }
  0x49   : > { %v654_v14 = vpack.c.bf16 (!%p574_p3), %v653_v13, %v652_v12  ;;  %s582_s30 = scalar_lea.vmem (!%p574_p3), [#allocation4], %s7507_s19  ;;  %v7577_v13 = vld [vmem:[%s9364_s8] sm:$0xff] (!%p574_p3)   ;;  %s6141_s0 = sshll.u32 (!%p574_p3), %s8039_s12, 3 }
  0x4a   : > { %v644_v27 = vld [vmem:[%s582_s30 + $0x8] sm:$0xff] (!%p574_p3)  ;;  %v647_v28 = vld [vmem:[%s582_s30 + $0x20] sm:$0xff] (!%p574_p3)  ;;  %v645_v33 = vld [vmem:[%s582_s30 + $0x10] sm:$0xff] (!%p574_p3)  ;;  %s6676_s19 = sshll.u32 (!%p574_p3), %s8039_s12, 7 }
  0x4b   : > { %v7557_v11 = vld [vmem:[%s9396_s3 + $0x40] sm:$0xff] (!%p574_p3)   ;;  %6960 = vmatpush3.bf16.msra.mxu1 (!%p574_p3), %v7556_v10  ;;  %v7559_v16 = vld [vmem:[%s9396_s3 + $0x48] sm:$0xff] (!%p574_p3)   ;;  %v7561_v18 = vld [vmem:[%s9396_s3 + $0x50] sm:$0xff] (!%p574_p3)   ;;  %v650_v30 = vpack.c.bf16 (!%p574_p3), %v647_v28, %v644_v27  ;;  %s9309_s29 = scalar_lea.hbm (!%p574_p3), %s9374_s18, %s6676_s19 }
  0x4c   : > { %v7558_v15 = vld [vmem:[%s9396_s3] sm:$0xff] (!%p574_p3)   ;;  %6686 = vmatprep.subr.bf16.mxu1 (!%p574_p3), %v7557_v11  ;;  %v7560_v17 = vld [vmem:[%s9396_s3 + $0x8] sm:$0xff] (!%p574_p3)   ;;  %v7562_v20 = vld [vmem:[%s9396_s3 + $0x10] sm:$0xff] (!%p574_p3)  }
  0x4d   : > { %v7567_v19 = vld [vmem:[%s9396_s3 + $0x80] sm:$0xff]   ;;  %v7563_v21 = vld [vmem:[%s9396_s3 + $0x58] sm:$0xff]   ;;  %v7570_v22 = vld [vmem:[%s9396_s3 + $0x88] sm:$0xff]  }
  0x4e   : > { %6962 = vmatmul.mubr.msk.bf16.vlgmr.msra.gmra.mrb[0].mxu1 %vm711_vm1, %v654_v14  ;;  %6966 = vmatpush3.bf16.msra.mxu0 %v7567_v19  ;;  %v7564_v23 = vld [vmem:[%s9396_s3 + $0x18] sm:$0xff]   ;;  %v7565_v24 = vld [vmem:[%s9396_s3 + $0x60] sm:$0xff]   ;;  %v7573_v25 = vld [vmem:[%s9396_s3 + $0x90] sm:$0xff]   ;;  %s975_s22 = ssub.s32 %s973_s23, %s6141_s0 }
  0x4f   : > { %6687 = vmatpush3.bf16.msra.mxu1 %v7558_v15  ;;  %6967 = vmatprep.subr.bf16.mxu0 %v7912_v9  ;;  %v7566_v26 = vld [vmem:[%s9396_s3 + $0x20] sm:$0xff]   ;;  %v7568_v29 = vld [vmem:[%s9396_s3 + $0x68] sm:$0xff]   ;;  %v7576_v31 = vld [vmem:[%s9396_s3 + $0x98] sm:$0xff]   ;;  %p976_p4 = scmp.gt.s32.totalorder %s975_s22, 0  ;;  %p6142_p6 = scmp.lt.s32.totalorder %s975_s22, 8 }
  0x50   : > { %6688 = vmatprep.subr.bf16.mxu1 %v7559_v16  ;;  %v7569_v32 = vld [vmem:[%s9396_s3 + $0x28] sm:$0xff]   ;;  %v7571_v35 = vld [vmem:[%s9396_s3 + $0x70] sm:$0xff]   ;;  %912 = vmatprep.mubr.bf16.mxu1 %v650_v30  ;;  %v7574_v38 = vld [vmem:[%s9396_s3 + $0x78] sm:$0xff]  }
  0x51   : > { %v648_v34 = vld [vmem:[%s582_s30 + $0x28] sm:$0xff]  ;;  %v7572_v37 = vld [vmem:[%s9396_s3 + $0x30] sm:$0xff]   ;;  %v646_v41 = vld [vmem:[%s582_s30 + $0x18] sm:$0xff]  ;;  %s977_s2 = scalar_select %p976_p4, %s975_s22, 0 }
  0x52   : > { %6968 = vmatpush3.bf16.msra.mxu0 %v7570_v22  ;;  %v651_v36 = vpack.c.bf16 %v648_v34, %v645_v33  ;;  %v7575_v39 = vld [vmem:[%s9396_s3 + $0x38] sm:$0xff]   ;;  %v643_v40 = vld [vmem:[%s582_s30] sm:$0xff]  ;;  %v7579_v15 = vld [vmem:[%s9364_s8 + $0x8] sm:$0xff]   ;;  %s982_s30 = ssub.s32 %s6147_s24, %s6141_s0  ;;  %s9398_s22 = sshll.u32 %s8099_s28, 4 }
  0x53   : > { %6689 = vmatpush3.bf16.msra.mxu1 %v7560_v17  ;;  %6969 = vmatprep.subr.bf16.mxu0 %v7912_v9  ;;  %v649_v42 = vpack.c.bf16 %v646_v41, %v643_v40  ;;  %v7578_v14 = vld [vmem:[%s9364_s8 + $0x80] sm:$0xff]   ;;  %v7580_v16 = vld [vmem:[%s9364_s8 + $0x88] sm:$0xff]   ;;  %v7581_v17 = vld [vmem:[%s9364_s8 + $0x10] sm:$0xff]   ;;  %p983_p5 = scmp.gt.s32.totalorder %s982_s30, 0  ;;  %p6148_p7 = scmp.lt.s32.totalorder %s982_s30, 8 }
  0x54   : > { %6690 = vmatprep.subr.bf16.mxu1 %v7561_v18  ;;  %v7582_v18 = vld [vmem:[%s9364_s8 + $0x90] sm:$0xff]   ;;  %v7583_v19 = vld [vmem:[%s9364_s8 + $0x18] sm:$0xff]   ;;  %v6154_v33 = vld [vmem:[%s9363_s7] ss:$0 sm:$0xff]  ;;  %s9410_s2 = smov (!%p6142_p6, %s977_s2), 8  ;;  %s7916_s24 = smov [#allocation6]  }
  0x55   : > { %v7587_v40 = vld [vmem:[%s9364_s8 + $0x110] sm:$0xff]   ;;  %v7588_v41 = vld [vmem:[%s9364_s8 + $0x118] sm:$0xff]   ;;  %s9408_s30 = smov (!%p983_p5, %s982_s30), 0  ;;  %s7849_s0 = sshll.u32 %s7916_s24, 4  ;;  %s7850_s0 = int_to_ptr.vmem [resolvable:$false] %s7849_s0 }
  0x56   : > { %6970 = vmatpush3.bf16.msra.mxu0 %v7573_v25  ;;  %s9412_s30 = smov (!%p6148_p7, %s9408_s30), 8 }
  0x57   : > { %6691 = vmatpush3.bf16.msra.mxu1 %v7562_v20  ;;  %6971 = vmatprep.subr.bf16.mxu0 %v7912_v9  ;;  %v7584_v20 = vld [vmem:[%s9364_s8 + $0x98] sm:$0xff]  }
  0x58   : > { %6692 = vmatprep.subr.bf16.mxu1 %v7563_v21 }
  0x5a   : > { %6972 = vmatpush3.bf16.msra.mxu0 %v7576_v31 }
  0x5b   : > { %6693 = vmatpush3.bf16.msra.mxu1 %v7564_v23  ;;  %6977 = vmatprep.subr.bf16.mxu0 %v7912_v9 }
  0x5c   : > { %6694 = vmatprep.subr.bf16.mxu1 %v7565_v24 }
  0x5d   : > { %6974 = vmatmul.mubr.msk.bf16.vlgmr.msra.gmra.mrb[0].mxu0 %vm876_vm2, %v651_v36 }
  0x5e   : > { %6985 = vmatprep.mubr.msk.bf16.mxu0 %vm7913_vm0, %v7912_v9  ;;  %6978 = vmatpush3.bf16.msra.mxu0 %v7577_v13 }
  0x5f   : > { %6695 = vmatpush3.bf16.msra.mxu1 %v7566_v26  ;;  %6979 = vmatprep.subr.bf16.mxu0 %v7912_v9 }
  0x60   : > { %6696 = vmatprep.subr.bf16.mxu1 %v7568_v29  ;;  %v6153_v29 = vld [vmem:[%s9362_s6] ss:$0 sm:$0xff] }
  0x62   : > { %6980 = vmatpush3.bf16.msra.mxu0 %v7579_v15  ;;  %v987_v15 = vstv %s9412_s30  ;;  %s9397_s30 = sld [smem:[#allocation18_spill]] }
  0x63   : > { %6697 = vmatpush3.bf16.msra.mxu1 %v7569_v32  ;;  %6981 = vmatprep.subr.bf16.mxu0 %v7912_v9 }
  0x64   : > { %6698 = vmatprep.subr.bf16.mxu1 %v7571_v35 }
  0x66   : > { %6982 = vmatpush3.bf16.msra.mxu0 %v7581_v17  ;;  %v7914_v17 = vmov -1e+30  }
  0x67   : > { %6699 = vmatpush3.bf16.msra.mxu1 %v7572_v37  ;;  %6983 = vmatprep.subr.bf16.mxu0 %v7912_v9  ;;  %v7585_v37 = vld [vmem:[%s9364_s8 + $0x100] sm:$0xff]  }
  0x68   : > { %6700 = vmatprep.subr.bf16.mxu1 %v7574_v38 }
  0x6a   : > { %6984 = vmatpush3.bf16.msra.mxu0 %v7583_v19 }
  0x6b   : > { %6701 = vmatpush3.bf16.msra.mxu1 %v7575_v39  ;;  %7001 = vmatprep.subr.bf16.mxu0 %v7912_v9  ;;  %v7586_v39 = vld [vmem:[%s9364_s8 + $0x108] sm:$0xff]  }
  0x6c   : > { %6989 = vmatprep.subr.bf16.mxu1 %v7912_v9 }
  0x6e   : > { %913 = vmatmul.mubr.bf16.vlgmr.msra.gmra.mrb[4].mxu1 %v649_v42  ;;  %v6170_v42 = vld [vmem:[%s9365_s9 + $0x4] ss:$0 sm:$0xff] }
  0x6f   : > { %6997 = vmatprep.mubr.msk.bf16.mxu1 %vm7913_vm0, %v7912_v9  ;;  %6990 = vmatpush3.bf16.msra.mxu1 %v7578_v14  ;;  %v980_v14 = vstv %s9410_s2  ;;  %s641_s2 = scalar_lea.vmem [#allocation6], %s9398_s22  ;;  %s7851_s22 = scalar_lea.vmem %s7850_s0, 512 }
  0x70   : > { %6991 = vmatprep.subr.bf16.mxu1 %v7912_v9  ;;  %s6021_s3 = sshll.u32 %s641_s2, 4  ;;  %s9304_s3 = int_to_ptr.vmem [resolvable:$true] %s6021_s3 }
  0x71   : > { %s7845_s23 = scalar_lea.vmem %s9304_s3, 256  ;;  %p7852_p12 = scmp.lt.s32.totalorder %s9304_s3, %s7850_s0 }
  0x72   : > { %p7846_p8 = scmp.ne.s32.totalorder %s9304_s3, %s7845_s23  ;;  %p7853_p1 = scmp.lt.s32.totalorder %s7851_s22, %s7845_s23 }
  0x73   : > { %6992 = vmatpush3.bf16.msra.mxu1 %v7580_v16 }
  0x74   : > { %6993 = vmatprep.subr.bf16.mxu1 %v7912_v9  ;;  %p7847_p9 = pnand %p7846_p8, %p8061_p11  ;;  %p7854_p2 = por %p7853_p1, %p7852_p12 }
  0x76   : > { %p7848_p10 = pneg %p7847_p9 }
  0x77   : > { %6994 = vmatpush3.bf16.msra.mxu1 %v7582_v18 }
  0x78   : > { %6995 = vmatprep.subr.bf16.mxu1 %v7912_v9  ;;  %p7855_p3 = pnand %p7854_p2, %p7848_p10 }
  0x7b   : > { %6996 = vmatpush3.bf16.msra.mxu1 %v7584_v20 }
  0x7c   : > { %7013 = vmatprep.subr.bf16.mxu1 %v7912_v9 }
 0x121   : > { %v749_v43 = vpop.f32.mrb[0].mxu1 }
 0x122   : > { %v6963_v44 = vpop.f32.mrb[1].mxu1 }
 0x123   : > { %v752_v45 = vpop.f32.mrb[2].mxu1 }
 0x124   : > { %v6964_v46 = vpop.f32.mrb[3].mxu1 }
 0x130   : > { %v955_v47 = vpop.f32.mrb[0].mxu0 }
 0x131   : > { %v6975_v48 = vpop.f32.mrb[1].mxu0 }
 0x132   : > { %v958_v49 = vpop.f32.mrb[2].mxu0 }
 0x133   : > { %v6976_v50 = vpop.f32.mrb[3].mxu0 }
 0x141   : > { %v6702_v51 = vpop.f32.mrb[4].mxu1 }
 0x142   : > { %v6703_v52 = vpop.f32.mrb[5].mxu1 }
 0x143   : > { %v6704_v53 = vadd.f32 %v6703_v52, %v6702_v51  ;;  %v6705_v54 = vpop.f32.mrb[6].mxu1 }
 0x144   : > { %v6706_v55 = vpop.f32.mrb[7].mxu1 }
 0x145   : > { %v915_v56 = vadd.f32 %v6704_v53, %v749_v43  ;;  %v6707_v57 = vadd.f32 %v6706_v55, %v6705_v54  ;;  %v6155_v54 = vld [vmem:[%s9365_s9] ss:$0 sm:$0xff] }
 0x147   : > { %v956_v59 = vadd.f32 %v955_v47, %v915_v56  ;;  %v918_v60 = vadd.f32 %v6707_v57, %v752_v45 }
 0x149   : > { %v8181_v61 = vadd.f32 %v6140_v58, %v956_v59  ;;  %v959_v62 = vadd.f32 %v958_v49, %v918_v60 }
 0x14b   : > { %v8183_v63 = vadd.f32 %v6140_v58, %v959_v62  ;;  %v994_v0 = vsel %vm876_vm2, %v8181_v61, 0.0 }
 0x14c   : > { %995 = vadd.xlane.f32.xlu0 %v994_v0  ;;  %v6185_v0 = vld [vmem:[%s9365_s9 + $0x8] ss:$0 sm:$0xff] }
 0x14d   : > { %v997_v1 = vsel %vm876_vm2, %v8183_v63, 0.0 }
 0x150   : > { %998 = vadd.xlane.f32.xlu0 %v997_v1 }
 0x1d9   : > { %v996_v2 = vpop.xlane.xlu0 %995 }
 0x1da   : > { %v1001_v3 = vmul.f32 0.015625, %v996_v2 }
 0x1dc   : > { %v1003_v4 = vsub.f32 %v8181_v61, %v1001_v3 }
 0x1dd   : > { %v999_v5 = vpop.xlane.xlu0 %998 }
 0x1de   : > { %v1002_v6 = vmul.f32 0.015625, %v999_v5  ;;  %v1005_v7 = vmul.f32 %v1003_v4, %v1003_v4 }
 0x1e0   : > { %v1004_v8 = vsub.f32 %v8183_v63, %v1002_v6  ;;  %v1007_v10 = vsel %vm876_vm2, %v1005_v7, 0.0 }
 0x1e1   : > { %1008 = vadd.xlane.f32.xlu1 %v1007_v10 }
 0x1e2   : > { %v1006_v11 = vmul.f32 %v1004_v8, %v1004_v8 }
 0x1e4   : > { %v1010_v12 = vsel %vm876_vm2, %v1006_v11, 0.0 }
 0x1e5   : > { %1011 = vadd.xlane.f32.xlu1 %v1010_v12  ;;  %v971_v12 = vlaneseq }
 0x1e7   : > { %v972_v13 = vand.u32 127, %v971_v12 }
 0x1e9   : > { %vm988_vm5 = vcmp.lt.s32.totalorder %v972_v13, %v980_v14  ;;  %vm989_vm6 = vcmp.lt.s32.totalorder %v972_v13, %v987_v15  ;;  %v6219_v14 = vld [vmem:[%s9365_s9 + $0x5] ss:$0 sm:$0xff] }
 0x1ea   : > { %v8286_v18 = vsel %vm988_vm5, 0.0, %v7914_v17 }
 0x26e   : > { %v1009_v21 = vpop.xlane.xlu1 %1008 }
 0x26f   : > { %v1013_v22 = vmul.f32 0.015625, %v1009_v21 }
 0x271   : > { %v1015_v23 = vadd.f32 1e-05, %v1013_v22 }
 0x272   : > { %v1012_v24 = vpop.xlane.xlu1 %1011 }
 0x273   : > { %7737 = vrsqrt.f32 %v1015_v23  ;;  %v1014_v25 = vmul.f32 0.015625, %v1012_v24  ;;  %v8288_v23 = vsel %vm989_vm6, 0.0, %v7914_v17 }
 0x275   : > { %v1016_v26 = vadd.f32 1e-05, %v1014_v25 }
 0x277   : > { %7739 = vrsqrt.f32 %v1016_v26 }
 0x27d   : > { %v7738_v27 = vpop.eup %7737 }
 0x27e   : > { %v1019_v28 = vmul.f32 %v7738_v27, %v1003_v4 }
 0x280   : > { %v1027_v31 = vmul.f32 %v6153_v29, %v1019_v28 }
 0x281   : > { %v7740_v30 = vpop.eup %7739 }
 0x282   : > { %v1020_v32 = vmul.f32 %v7740_v30, %v1004_v8  ;;  %v1035_v35 = vadd.f32 %v6154_v33, %v1027_v31 }
 0x284   : > { %v1028_v34 = vmul.f32 %v6153_v29, %v1020_v32 }
 0x286   : > { %v1036_v36 = vadd.f32 %v6154_v33, %v1028_v34 }
 0x288   : > { %v8234_v38 = vpack.c.bf16 %v1036_v36, %v1035_v35 }
 0x28a   : > { %6986 = vmatmul.mubr.msk.bf16.vlgmr.msra.gmra.mrb[4].mxu0 %vm876_vm2, %v8234_v38  ;;  %6998 = vmatmul.mubr.msk.bf16.vlgmr.msra.gmra.mrb[8].mxu1 %vm876_vm2, %v8234_v38 }
 0x28b   : > { %7002 = vmatpush3.bf16.msra.mxu0 %v7585_v37  ;;  %7009 = vmatprep.mubr.msk.bf16.mxu0 %vm7913_vm0, %v7912_v9 }
 0x28c   : > { %7003 = vmatprep.subr.bf16.mxu0 %v7912_v9  ;;  %7015 = vmatprep.mubr.msk.bf16.mxu1 %vm7913_vm0, %v7912_v9 }
 0x28f   : > { %7004 = vmatpush3.bf16.msra.mxu0 %v7586_v39 }
 0x290   : > { %7005 = vmatprep.subr.bf16.mxu0 %v7912_v9 }
 0x293   : > { %7006 = vmatpush3.bf16.msra.mxu0 %v7587_v40 }
 0x294   : > { %7007 = vmatprep.subr.bf16.mxu0 %v7912_v9 }
 0x297   : > { %7008 = vmatpush3.bf16.msra.mxu0 %v7588_v41 }
 0x298   : > { %7019 = vmatprep.subr.bf16.mxu0 %v7912_v9 }
 0x29a   : > { %7010 = vmatmul.mubr.msk.bf16.vlgmr.msra.gmra.mrb[8].mxu0 %vm876_vm2, %v8234_v38 }
 0x29b   : > { %7021 = vmatprep.mubr.msk.bf16.mxu0 %vm7913_vm0, %v7912_v9 }
 0x35d   : > { %v1114_v43 = vpop.f32.mrb[4].mxu0  ;;  %v1196_v44 = vpop.f32.mrb[8].mxu1 }
 0x35e   : > { %v1197_v45 = vadd.f32 %v6170_v42, %v1196_v44  ;;  %v6987_v46 = vpop.f32.mrb[5].mxu0  ;;  %v6999_v47 = vpop.f32.mrb[9].mxu1  ;;  %v1115_v57 = vadd.f32 %v6155_v54, %v1114_v43 }
 0x35f   : > { %v1117_v48 = vpop.f32.mrb[6].mxu0  ;;  %v1199_v49 = vpop.f32.mrb[10].mxu1 }
 0x360   : > { %v1287_v50 = vpack.c.bf16 %v1197_v45, %v1197_v45  ;;  %v1200_v51 = vadd.f32 %v6170_v42, %v1199_v49  ;;  %v6988_v52 = vpop.f32.mrb[7].mxu0  ;;  %v7000_v53 = vpop.f32.mrb[11].mxu1  ;;  %v1118_v59 = vadd.f32 %v6155_v54, %v1117_v48  ;;  %v1285_v60 = vpack.c.bf16 %v1115_v57, %v1115_v57  ;;  %v7589_v49 = vld [vmem:[%s9364_s8 + $0x20] sm:$0xff]   ;;  %v7591_v54 = vld [vmem:[%s9364_s8 + $0x28] sm:$0xff]   ;;  %v7594_v57 = vld [vmem:[%s9364_s8 + $0xb0] sm:$0xff]  }
 0x361   : > { %v7590_v52 = vld [vmem:[%s9364_s8 + $0xa0] sm:$0xff]  }
 0x362   : > { %v1296_v55 = vsel %vm1291_vm3, %v1287_v50, 0  ;;  %v1288_v56 = vpack.c.bf16 %v1200_v51, %v1200_v51  ;;  %v1286_v62 = vpack.c.bf16 %v1118_v59, %v1118_v59  ;;  %v7596_v59 = vld [vmem:[%s9364_s8 + $0xb8] sm:$0xff]  }
 0x363   : > { %7014 = vmatpush3.bf16.xpose.msra.mxu1 %v1296_v55  ;;  %v7592_v55 = vld [vmem:[%s9364_s8 + $0xa8] sm:$0xff]  }
 0x364   : > { %v1342_v58 = vsel %vm1291_vm3, %v1288_v56, 0  ;;  %7025 = vmatprep.subr.bf16.mxu1 %v7912_v9  ;;  %v7593_v56 = vld [vmem:[%s9364_s8 + $0x30] sm:$0xff]  }
 0x365   : > { %7020 = vmatpush3.bf16.xpose.msra.mxu0 %v1342_v58  ;;  %v7595_v58 = vld [vmem:[%s9364_s8 + $0x38] sm:$0xff]  }
 0x366   : > { %7031 = vmatprep.subr.bf16.mxu0 %v7912_v9 }
 0x36a   : > { %7016 = vmatmul.mubr.msk.bf16.vlgmr.msra.gmra.mrb[12].mxu1 %vm1291_vm3, %v1285_v60  ;;  %v7597_v60 = vld [vmem:[%s9364_s8 + $0x120] sm:$0xff]  }
 0x36b   : > { %7027 = vmatprep.mubr.msk.bf16.mxu1 %vm7913_vm0, %v7912_v9 }
 0x36c   : > { %7022 = vmatmul.mubr.msk.bf16.vlgmr.msra.gmra.mrb[12].mxu0 %vm1291_vm3, %v1286_v62  ;;  %v7598_v62 = vld [vmem:[%s9364_s8 + $0x128] sm:$0xff]  }
 0x36d   : > { %v1278_v1 = vpop.f32.mrb[8].mxu0  ;;  %7033 = vmatprep.mubr.msk.bf16.mxu0 %vm7913_vm0, %v7912_v9 }
 0x36e   : > { %v1279_v2 = vadd.f32 %v6185_v0, %v1278_v1  ;;  %v7011_v3 = vpop.f32.mrb[9].mxu0  ;;  %v7600_v1 = vld [vmem:[%s9364_s8 + $0x138] sm:$0xff]  }
 0x36f   : > { %v1281_v4 = vpop.f32.mrb[10].mxu0 }
 0x370   : > { %v1289_v5 = vpack.c.bf16 %v1279_v2, %v1279_v2  ;;  %v1282_v6 = vadd.f32 %v6185_v0, %v1281_v4  ;;  %v7012_v7 = vpop.f32.mrb[11].mxu0  ;;  %v7599_v0 = vld [vmem:[%s9364_s8 + $0x130] sm:$0xff]  }
 0x372   : > { %v1418_v8 = vsel %vm1416_vm4, %v1289_v5, 0  ;;  %v1290_v10 = vpack.c.bf16 %v1282_v6, %v1282_v6 }
 0x373   : > { %7026 = vmatpush3.bf16.msra.mxu1 %v1418_v8 }
 0x374   : > { %v1464_v11 = vsel %vm1416_vm4, %v1290_v10, 0  ;;  %7037 = vmatprep.subr.bf16.mxu1 %v7912_v9 }
 0x375   : > { %7032 = vmatpush3.bf16.msra.mxu0 %v1464_v11 }
 0x376   : > { %7049 = vmatprep.subr.bf16.mxu0 %v7912_v9 }
 0x43d   : > { %v1332_v16 = vpop.f32.mrb[12].mxu1 }
 0x43e   : > { %v1384_v19 = vmul.f32 0.25, %v1332_v16  ;;  %v7017_v20 = vpop.f32.mrb[13].mxu1 }
 0x43f   : > { %v1335_v21 = vpop.f32.mrb[14].mxu1  ;;  %v1378_v22 = vpop.f32.mrb[12].mxu0 }
 0x440   : > { %v1385_v24 = vmul.f32 0.25, %v1378_v22  ;;  %v7018_v25 = vpop.f32.mrb[15].mxu1  ;;  %v7023_v26 = vpop.f32.mrb[13].mxu0  ;;  %v1386_v27 = vadd.f32 %v1384_v19, %v8286_v18 }
 0x441   : > { %v1381_v28 = vpop.f32.mrb[14].mxu0  ;;  %v6204_v26 = vld [vmem:[%s9365_s9 + $0x1] ss:$0 sm:$0xff] }
 0x442   : > { %v7024_v29 = vpop.f32.mrb[15].mxu0  ;;  %v1389_v30 = vsel %vm1388_vm7, %v1386_v27, -inf  ;;  %v1387_v31 = vadd.f32 %v1385_v24, %v8288_v23 }
 0x443   : > { %1390 = vmax.xlane.f32.xlu1 %v1389_v30 }
 0x444   : > { %v1392_v32 = vsel %vm1388_vm7, %v1387_v31, -inf }
 0x445   : > { %1393 = vmax.xlane.f32.xlu0 %v1392_v32  ;;  %v6234_v32 = vld [vmem:[%s9365_s9 + $0x9] ss:$0 sm:$0xff] }
 0x4d0   : > { %v1391_v33 = vpop.xlane.xlu1 %1390 }
 0x4d1   : > { %v1395_v34 = vsub.f32 %v1386_v27, %v1391_v33 }
 0x4d2   : > { %v1394_v35 = vpop.xlane.xlu0 %1393 }
 0x4d3   : > { %v1397_v36 = vmul.f32 1.442695, %v1395_v34  ;;  %v1396_v37 = vsub.f32 %v1387_v31, %v1394_v35 }
 0x4d5   : > { %7741 = vpow2.f32 %v1397_v36  ;;  %v1399_v39 = vmul.f32 1.442695, %v1396_v37 }
 0x4d7   : > { %7743 = vpow2.f32 %v1399_v39 }
 0x4df   : > { %v7742_v40 = vpop.eup %7741 }
 0x4e0   : > { %v1401_v41 = vsel %vm1388_vm7, %v7742_v40, 0.0 }
 0x4e1   : > { %v7744_v42 = vpop.eup %7743  ;;  %1402 = vadd.xlane.f32.xlu1 %v1401_v41 }
 0x4e2   : > { %v1404_v43 = vsel %vm1388_vm7, %v7744_v42, 0.0 }
 0x4e3   : > { %1405 = vadd.xlane.f32.xlu0 %v1404_v43 }
 0x56e   : > { %v1403_v44 = vpop.xlane.xlu1 %1402 }
 0x56f   : > { %7745 = vrcp.f32 %v1403_v44 }
 0x570   : > { %v1406_v45 = vpop.xlane.xlu0 %1405 }
 0x571   : > { %7747 = vrcp.f32 %v1406_v45 }
 0x579   : > { %v7746_v46 = vpop.eup %7745 }
 0x57a   : > { %v1408_v47 = vmul.f32 %v7746_v46, %v7742_v40 }
 0x57b   : > { %v7748_v48 = vpop.eup %7747 }
 0x57c   : > { %v1410_v50 = vmul.f32 %v7748_v48, %v7744_v42  ;;  %v1411_v51 = vpack.c.bf16 %v1408_v47, %v1408_v47 }
 0x57e   : > { %7028 = vmatmul.mubr.msk.bf16.vlgmr.msra.gmra.mrb[16].mxu1 %vm1388_vm7, %v1411_v51  ;;  %v1412_v53 = vpack.c.bf16 %v1410_v50, %v1410_v50 }
 0x57f   : > { %7038 = vmatpush3.bf16.msra.mxu1 %v7589_v49  ;;  %7045 = vmatprep.mubr.msk.bf16.mxu1 %vm7913_vm0, %v7912_v9 }
 0x580   : > { %7034 = vmatmul.mubr.msk.bf16.vlgmr.msra.gmra.mrb[16].mxu0 %vm1388_vm7, %v1412_v53  ;;  %7039 = vmatprep.subr.bf16.mxu1 %v7912_v9 }
 0x581   : > { %7050 = vmatpush3.bf16.msra.mxu0 %v7590_v52  ;;  %7057 = vmatprep.mubr.msk.bf16.mxu0 %vm7913_vm0, %v7912_v9 }
 0x582   : > { %7051 = vmatprep.subr.bf16.mxu0 %v7912_v9 }
 0x583   : > { %7040 = vmatpush3.bf16.msra.mxu1 %v7591_v54 }
 0x584   : > { %7041 = vmatprep.subr.bf16.mxu1 %v7912_v9 }
 0x585   : > { %7052 = vmatpush3.bf16.msra.mxu0 %v7592_v55 }
 0x586   : > { %7053 = vmatprep.subr.bf16.mxu0 %v7912_v9 }
 0x587   : > { %7042 = vmatpush3.bf16.msra.mxu1 %v7593_v56 }
 0x588   : > { %7043 = vmatprep.subr.bf16.mxu1 %v7912_v9 }
 0x589   : > { %7054 = vmatpush3.bf16.msra.mxu0 %v7594_v57 }
 0x58a   : > { %7055 = vmatprep.subr.bf16.mxu0 %v7912_v9 }
 0x58b   : > { %7044 = vmatpush3.bf16.msra.mxu1 %v7595_v58 }
 0x58c   : > { %7061 = vmatprep.subr.bf16.mxu1 %v7912_v9 }
 0x58d   : > { %7056 = vmatpush3.bf16.msra.mxu0 %v7596_v59 }
 0x58e   : > { %7046 = vmatmul.mubr.msk.bf16.vlgmr.msra.gmra.mrb[20].mxu1 %vm876_vm2, %v8234_v38  ;;  %7073 = vmatprep.subr.bf16.mxu0 %v7912_v9 }
 0x58f   : > { %7062 = vmatpush3.bf16.msra.mxu1 %v7597_v60  ;;  %7069 = vmatprep.mubr.msk.bf16.mxu1 %vm7913_vm0, %v7912_v9 }
 0x590   : > { %7058 = vmatmul.mubr.msk.bf16.vlgmr.msra.gmra.mrb[20].mxu0 %vm876_vm2, %v8234_v38  ;;  %7063 = vmatprep.subr.bf16.mxu1 %v7912_v9 }
 0x591   : > { %7075 = vmatprep.mubr.msk.bf16.mxu0 %vm7913_vm0, %v7912_v9 }
 0x593   : > { %7064 = vmatpush3.bf16.msra.mxu1 %v7598_v62 }
 0x594   : > { %7065 = vmatprep.subr.bf16.mxu1 %v7912_v9 }
 0x597   : > { %7066 = vmatpush3.bf16.msra.mxu1 %v7599_v0 }
 0x598   : > { %7067 = vmatprep.subr.bf16.mxu1 %v7912_v9 }
 0x59b   : > { %7068 = vmatpush3.bf16.msra.mxu1 %v7600_v1 }
 0x59c   : > { %7085 = vmatprep.subr.bf16.mxu1 %v7912_v9 }
 0x59e   : > { %7070 = vmatmul.mubr.msk.bf16.vlgmr.msra.gmra.mrb[24].mxu1 %vm876_vm2, %v8234_v38 }
 0x59f   : > { %7087 = vmatprep.mubr.msk.bf16.mxu1 %vm7913_vm0, %v7912_v9 }
 0x651   : > { %v8362_v2 = vpop.f32.mrb[16].mxu1 }
 0x652   : > { %v7029_v3 = vpop.f32.mrb[17].mxu1 }
 0x653   : > { %v1457_v4 = vpop.f32.mrb[18].mxu1  ;;  %v8364_v5 = vpop.f32.mrb[16].mxu0 }
 0x654   : > { %v1506_v6 = vpack.c.bf16 %v8364_v5, %v8362_v2  ;;  %v7030_v7 = vpop.f32.mrb[19].mxu1  ;;  %v7035_v8 = vpop.f32.mrb[17].mxu0  ;;  %v7605_v2 = vld [vmem:[%s9364_s8 + $0xd8] sm:$0xff]   ;;  %v7606_v5 = vld [vmem:[%s9366_s10 + $0x8] sm:$0xff]  }
 0x655   : > { %v1503_v10 = vpop.f32.mrb[18].mxu0 }
 0x656   : > { %v7036_v11 = vpop.f32.mrb[19].mxu0 }
 0x661   : > { %v1584_v13 = vpop.f32.mrb[20].mxu1 }
 0x662   : > { %v7047_v15 = vpop.f32.mrb[21].mxu1  ;;  %v1585_v29 = vadd.f32 %v6204_v26, %v1584_v13 }
 0x663   : > { %v1587_v16 = vpop.f32.mrb[22].mxu1  ;;  %v1666_v17 = vpop.f32.mrb[20].mxu0 }
 0x664   : > { %v1667_v19 = vadd.f32 %v6219_v14, %v1666_v17  ;;  %v7048_v20 = vpop.f32.mrb[23].mxu1  ;;  %v7059_v21 = vpop.f32.mrb[21].mxu0  ;;  %v1755_v31 = vpack.c.bf16 %v1585_v29, %v1585_v29  ;;  %v1588_v35 = vadd.f32 %v6204_v26, %v1587_v16  ;;  %v7603_v26 = vld [vmem:[%s9364_s8 + $0xc8] sm:$0xff]  }
 0x665   : > { %v1669_v22 = vpop.f32.mrb[22].mxu0 }
 0x666   : > { %v1757_v24 = vpack.c.bf16 %v1667_v19, %v1667_v19  ;;  %v7060_v25 = vpop.f32.mrb[23].mxu0  ;;  %v1670_v28 = vadd.f32 %v6219_v14, %v1669_v22  ;;  %v1756_v43 = vpack.c.bf16 %v1588_v35, %v1588_v35  ;;  %v7601_v22 = vld [vmem:[%s9366_s10] sm:$0xff]  }
 0x667   : > { %v7602_v25 = vld [vmem:[%s9364_s8 + $0xc0] sm:$0xff]  }
 0x668   : > { %v1765_v27 = vsel %vm1291_vm3, %v1757_v24, 0  ;;  %v1758_v30 = vpack.c.bf16 %v1670_v28, %v1670_v28 }
 0x669   : > { %7074 = vmatpush3.bf16.xpose.msra.mxu0 %v1765_v27  ;;  %v7604_v27 = vld [vmem:[%s9364_s8 + $0xd0] sm:$0xff]  }
 0x66a   : > { %7079 = vmatprep.subr.bf16.mxu0 %v7912_v9  ;;  %v1811_v33 = vsel %vm1291_vm3, %v1758_v30, 0 }
 0x670   : > { %7076 = vmatmul.mubr.msk.bf16.vlgmr.msra.gmra.mrb[24].mxu0 %vm1291_vm3, %v1755_v31 }
 0x671   : > { %v1748_v34 = vpop.f32.mrb[24].mxu1  ;;  %7080 = vmatpush3.bf16.xpose.msra.mxu0 %v1811_v33  ;;  %7081 = vmatprep.mubr.msk.bf16.mxu0 %vm7913_vm0, %v7912_v9 }
 0x672   : > { %v1749_v36 = vadd.f32 %v6234_v32, %v1748_v34  ;;  %v7071_v37 = vpop.f32.mrb[25].mxu1  ;;  %7091 = vmatprep.subr.bf16.mxu0 %v7912_v9 }
 0x673   : > { %v1751_v39 = vpop.f32.mrb[26].mxu1  ;;  %v7608_v37 = vld [vmem:[%s9364_s8 + $0x48] sm:$0xff]  }
 0x674   : > { %v1759_v40 = vpack.c.bf16 %v1749_v36, %v1749_v36  ;;  %v1752_v41 = vadd.f32 %v6234_v32, %v1751_v39  ;;  %v7072_v42 = vpop.f32.mrb[27].mxu1  ;;  %v7607_v32 = vld [vmem:[%s9364_s8 + $0x40] sm:$0xff]  }
 0x676   : > { %v1885_v44 = vsel %vm1416_vm4, %v1759_v40, 0  ;;  %v1760_v45 = vpack.c.bf16 %v1752_v41, %v1752_v41  ;;  %v7609_v40 = vld [vmem:[%s9364_s8 + $0x50] sm:$0xff]  }
 0x677   : > { %7086 = vmatpush3.bf16.msra.mxu1 %v1885_v44  ;;  %v7610_v44 = vld [vmem:[%s9364_s8 + $0x58] sm:$0xff]  }
 0x678   : > { %v1931_v46 = vsel %vm1416_vm4, %v1760_v45, 0  ;;  %7082 = vmatmul.mubr.msk.bf16.vlgmr.msra.gmra.mrb[28].mxu0 %vm1291_vm3, %v1756_v43  ;;  %7097 = vmatprep.subr.bf16.mxu1 %v7912_v9  ;;  %v7611_v45 = vld [vmem:[%s9364_s8 + $0x140] sm:$0xff]  }
 0x679   : > { %7092 = vmatpush3.bf16.msra.mxu0 %v1931_v46  ;;  %7093 = vmatprep.mubr.msk.bf16.mxu0 %vm7913_vm0, %v7912_v9  ;;  %v7612_v46 = vld [vmem:[%s9364_s8 + $0x148] sm:$0xff]  }
 0x67a   : > { %7103 = vmatprep.subr.bf16.mxu0 %v7912_v9 }
 0x743   : > { %v1801_v47 = vpop.f32.mrb[24].mxu0 }
 0x744   : > { %v1853_v48 = vmul.f32 0.25, %v1801_v47  ;;  %v7077_v49 = vpop.f32.mrb[25].mxu0  ;;  %v6274_v47 = vld [vmem:[%s9365_s9 + $0x6] ss:$0 sm:$0xff] }
 0x745   : > { %v1804_v50 = vpop.f32.mrb[26].mxu0  ;;  %v7613_v49 = vld [vmem:[%s9364_s8 + $0x150] sm:$0xff]  }
 0x746   : > { %v7078_v51 = vpop.f32.mrb[27].mxu0  ;;  %v1855_v52 = vadd.f32 %v1853_v48, %v8286_v18 }
 0x748   : > { %v1857_v53 = vsel %vm1388_vm7, %v1855_v52, -inf }
 0x749   : > { %1858 = vmax.xlane.f32.xlu0 %v1857_v53 }
 0x74b   : > { %v1847_v54 = vpop.f32.mrb[28].mxu0 }
 0x74c   : > { %v1854_v55 = vmul.f32 0.25, %v1847_v54  ;;  %v7083_v56 = vpop.f32.mrb[29].mxu0 }
 0x74d   : > { %v1850_v57 = vpop.f32.mrb[30].mxu0  ;;  %v7614_v56 = vld [vmem:[%s9364_s8 + $0x158] sm:$0xff]  }
 0x74e   : > { %v7084_v58 = vpop.f32.mrb[31].mxu0  ;;  %v1856_v59 = vadd.f32 %v1854_v55, %v8288_v23 }
 0x750   : > { %v1860_v60 = vsel %vm1388_vm7, %v1856_v59, -inf }
 0x751   : > { %1861 = vmax.xlane.f32.xlu1 %v1860_v60 }
 0x7d6   : > { %v1859_v62 = vpop.xlane.xlu0 %1858 }
 0x7d7   : > { %v1863_v0 = vsub.f32 %v1855_v52, %v1859_v62 }
 0x7d9   : > { %v1865_v1 = vmul.f32 1.442695, %v1863_v0 }
 0x7db   : > { %7749 = vpow2.f32 %v1865_v1 }
 0x7de   : > { %v1862_v3 = vpop.xlane.xlu1 %1861 }
 0x7df   : > { %v1864_v4 = vsub.f32 %v1856_v59, %v1862_v3  ;;  %v6259_v3 = vld [vmem:[%s9365_s9 + $0x2] ss:$0 sm:$0xff] }
 0x7e1   : > { %v1867_v7 = vmul.f32 1.442695, %v1864_v4 }
 0x7e3   : > { %7751 = vpow2.f32 %v1867_v7 }
 0x7e5   : > { %v7750_v8 = vpop.eup %7749 }
 0x7e6   : > { %v1869_v10 = vsel %vm1388_vm7, %v7750_v8, 0.0 }
 0x7e7   : > { %1870 = vadd.xlane.f32.xlu0 %v1869_v10 }
 0x7ed   : > { %v7752_v11 = vpop.eup %7751 }
 0x7ee   : > { %v1872_v13 = vsel %vm1388_vm7, %v7752_v11, 0.0 }
 0x7ef   : > { %1873 = vadd.xlane.f32.xlu1 %v1872_v13 }
 0x874   : > { %v1871_v14 = vpop.xlane.xlu0 %1870 }
 0x875   : > { %7753 = vrcp.f32 %v1871_v14 }
 0x87c   : > { %v1874_v15 = vpop.xlane.xlu1 %1873 }
 0x87d   : > { %7755 = vrcp.f32 %v1874_v15 }
 0x87f   : > { %v7754_v16 = vpop.eup %7753 }
 0x880   : > { %v1876_v17 = vmul.f32 %v7754_v16, %v7750_v8 }
 0x882   : > { %v1879_v19 = vpack.c.bf16 %v1876_v17, %v1876_v17 }
 0x884   : > { %7088 = vmatmul.mubr.msk.bf16.vlgmr.msra.gmra.mrb[28].mxu1 %vm1388_vm7, %v1879_v19  ;;  %v6289_v19 = vld [vmem:[%s9365_s9 + $0xa] ss:$0 sm:$0xff] }
 0x885   : > { %7099 = vmatprep.mubr.msk.bf16.mxu1 %vm7913_vm0, %v7912_v9  ;;  %7098 = vmatpush3.bf16.msra.mxu1 %v7606_v5 }
 0x886   : > { %7109 = vmatprep.subr.bf16.mxu1 %v7912_v9 }
 0x887   : > { %v7756_v20 = vpop.eup %7755 }
 0x888   : > { %v1878_v21 = vmul.f32 %v7756_v20, %v7752_v11 }
 0x88a   : > { %v1880_v24 = vpack.c.bf16 %v1878_v21, %v1878_v21 }
 0x88c   : > { %7094 = vmatmul.mubr.msk.bf16.vlgmr.msra.gmra.mrb[32].mxu0 %vm1388_vm7, %v1880_v24 }
 0x88d   : > { %7104 = vmatpush3.bf16.msra.mxu0 %v7601_v22  ;;  %7105 = vmatprep.mubr.msk.bf16.mxu0 %vm7913_vm0, %v7912_v9 }
 0x88e   : > { %7121 = vmatprep.subr.bf16.mxu0 %v7912_v9 }
 0x894   : > { %7106 = vmatmul.mubr.msk.bf16.vlgmr.msra.gmra.mrb[36].mxu0 %vm1291_vm3, %v1506_v6 }
 0x895   : > { %7122 = vmatpush3.bf16.msra.mxu0 %v7602_v25  ;;  %7129 = vmatprep.mubr.msk.bf16.mxu0 %vm7913_vm0, %v7912_v9 }
 0x896   : > { %7123 = vmatprep.subr.bf16.mxu0 %v7912_v9 }
 0x899   : > { %7124 = vmatpush3.bf16.msra.mxu0 %v7603_v26 }
 0x89a   : > { %7125 = vmatprep.subr.bf16.mxu0 %v7912_v9 }
 0x89d   : > { %7126 = vmatpush3.bf16.msra.mxu0 %v7604_v27 }
 0x89e   : > { %7127 = vmatprep.subr.bf16.mxu0 %v7912_v9 }
 0x8a1   : > { %7128 = vmatpush3.bf16.msra.mxu0 %v7605_v2 }
 0x8a2   : > { %7145 = vmatprep.subr.bf16.mxu0 %v7912_v9 }
 0x8a4   : > { %7130 = vmatmul.mubr.msk.bf16.vlgmr.msra.gmra.mrb[40].mxu0 %vm876_vm2, %v8234_v38 }
 0x8a5   : > { %7147 = vmatprep.mubr.msk.bf16.mxu0 %vm7913_vm0, %v7912_v9 }
 0x957   : > { %v1921_v6 = vpop.f32.mrb[28].mxu1 }
 0x958   : > { %v7089_v28 = vpop.f32.mrb[29].mxu1 }
 0x959   : > { %v1924_v29 = vpop.f32.mrb[30].mxu1 }
 0x95a   : > { %v7090_v30 = vpop.f32.mrb[31].mxu1 }
 0x95f   : > { %v1967_v31 = vpop.f32.mrb[32].mxu0 }
 0x960   : > { %v1973_v33 = vpack.c.bf16 %v1967_v31, %v1921_v6  ;;  %v7095_v34 = vpop.f32.mrb[33].mxu0 }
 0x961   : > { %v1970_v35 = vpop.f32.mrb[34].mxu0 }
 0x962   : > { %v7096_v36 = vpop.f32.mrb[35].mxu0  ;;  %7100 = vmatmul.mubr.msk.bf16.vlgmr.msra.gmra.mrb[32].mxu1 %vm1291_vm3, %v1973_v33 }
 0x963   : > { %7110 = vmatpush3.bf16.msra.mxu1 %v7607_v32  ;;  %7117 = vmatprep.mubr.msk.bf16.mxu1 %vm7913_vm0, %v7912_v9 }
 0x964   : > { %7111 = vmatprep.subr.bf16.mxu1 %v7912_v9 }
 0x967   : > { %7112 = vmatpush3.bf16.msra.mxu1 %v7608_v37  ;;  %v2070_v39 = vpop.f32.mrb[36].mxu0 }
 0x968   : > { %v7107_v41 = vpop.f32.mrb[37].mxu0  ;;  %7113 = vmatprep.subr.bf16.mxu1 %v7912_v9 }
 0x969   : > { %v2073_v42 = vpop.f32.mrb[38].mxu0 }
 0x96a   : > { %v7108_v43 = vpop.f32.mrb[39].mxu0 }
 0x96b   : > { %7114 = vmatpush3.bf16.msra.mxu1 %v7609_v40 }
 0x96c   : > { %7115 = vmatprep.subr.bf16.mxu1 %v7912_v9 }
 0x96f   : > { %7116 = vmatpush3.bf16.msra.mxu1 %v7610_v44 }
 0x970   : > { %7133 = vmatprep.subr.bf16.mxu1 %v7912_v9 }
 0x972   : > { %7118 = vmatmul.mubr.msk.bf16.vlgmr.msra.gmra.mrb[36].mxu1 %vm876_vm2, %v8234_v38 }
 0x973   : > { %7134 = vmatpush3.bf16.msra.mxu1 %v7611_v45  ;;  %7141 = vmatprep.mubr.msk.bf16.mxu1 %vm7913_vm0, %v7912_v9 }
 0x974   : > { %7135 = vmatprep.subr.bf16.mxu1 %v7912_v9 }
 0x977   : > { %v2234_v48 = vpop.f32.mrb[40].mxu0  ;;  %7136 = vmatpush3.bf16.msra.mxu1 %v7612_v46 }
 0x978   : > { %v2235_v50 = vadd.f32 %v6274_v47, %v2234_v48  ;;  %v7131_v51 = vpop.f32.mrb[41].mxu0  ;;  %7137 = vmatprep.subr.bf16.mxu1 %v7912_v9 }
 0x979   : > { %v2237_v52 = vpop.f32.mrb[42].mxu0 }
 0x97a   : > { %v2325_v53 = vpack.c.bf16 %v2235_v50, %v2235_v50  ;;  %v2238_v54 = vadd.f32 %v6274_v47, %v2237_v52  ;;  %v7132_v55 = vpop.f32.mrb[43].mxu0 }
 0x97b   : > { %7138 = vmatpush3.bf16.msra.mxu1 %v7613_v49 }
 0x97c   : > { %v2333_v57 = vsel %vm1291_vm3, %v2325_v53, 0  ;;  %7139 = vmatprep.subr.bf16.mxu1 %v7912_v9  ;;  %v2326_v7 = vpack.c.bf16 %v2238_v54, %v2238_v54 }
 0x97d   : > { %7146 = vmatpush3.bf16.xpose.msra.mxu0 %v2333_v57 }
 0x97e   : > { %7151 = vmatprep.subr.bf16.mxu0 %v7912_v9  ;;  %v2379_v15 = vsel %vm1291_vm3, %v2326_v7, 0  ;;  %v7618_v7 = vld [vmem:[%s9364_s8 + $0x78] sm:$0xff]  }
 0x97f   : > { %7140 = vmatpush3.bf16.msra.mxu1 %v7614_v56 }
 0x980   : > { %7157 = vmatprep.subr.bf16.mxu1 %v7912_v9 }
 0x982   : > { %7142 = vmatmul.mubr.msk.bf16.vlgmr.msra.gmra.mrb[40].mxu1 %vm876_vm2, %v8234_v38 }
 0x983   : > { %7159 = vmatprep.mubr.msk.bf16.mxu1 %vm7913_vm0, %v7912_v9 }
 0xa35   : > { %v2020_v58 = vpop.f32.mrb[32].mxu1 }
 0xa36   : > { %v8485_v59 = vadd.f32 %v2070_v39, %v2020_v58  ;;  %v7101_v60 = vpop.f32.mrb[33].mxu1 }
 0xa37   : > { %v2023_v62 = vpop.f32.mrb[34].mxu1 }
 0xa38   : > { %v8487_v0 = vadd.f32 %v2073_v42, %v2023_v62  ;;  %v7102_v1 = vpop.f32.mrb[35].mxu1  ;;  %v7615_v62 = vld [vmem:[%s9364_s8 + $0x60] sm:$0xff]  }
 0xa45   : > { %v2152_v4 = vpop.f32.mrb[36].mxu1 }
 0xa46   : > { %v2153_v8 = vadd.f32 %v6259_v3, %v2152_v4  ;;  %v7119_v10 = vpop.f32.mrb[37].mxu1  ;;  %v7617_v4 = vld [vmem:[%s9364_s8 + $0x70] sm:$0xff]  }
 0xa47   : > { %v2155_v11 = vpop.f32.mrb[38].mxu1  ;;  %v7620_v10 = vld [vmem:[%s9364_s8 + $0x168] sm:$0xff]  }
 0xa48   : > { %v2323_v13 = vpack.c.bf16 %v2153_v8, %v2153_v8  ;;  %v7120_v14 = vpop.f32.mrb[39].mxu1  ;;  %v2156_v16 = vadd.f32 %v6259_v3, %v2155_v11  ;;  %v7616_v3 = vld [vmem:[%s9364_s8 + $0x68] sm:$0xff]   ;;  %v7619_v8 = vld [vmem:[%s9364_s8 + $0x160] sm:$0xff]   ;;  %v7621_v11 = vld [vmem:[%s9364_s8 + $0x170] sm:$0xff]  }
 0xa49   : > { %v7623_v14 = vld [vmem:[%s9366_s10 + $0x10] sm:$0xff]  }
 0xa4a   : > { %7148 = vmatmul.mubr.msk.bf16.vlgmr.msra.gmra.mrb[44].mxu0 %vm1291_vm3, %v2323_v13  ;;  %v2324_v17 = vpack.c.bf16 %v2156_v16, %v2156_v16  ;;  %v7622_v13 = vld [vmem:[%s9364_s8 + $0x178] sm:$0xff]  }
 0xa4b   : > { %7152 = vmatpush3.bf16.xpose.msra.mxu0 %v2379_v15  ;;  %7153 = vmatprep.mubr.msk.bf16.mxu0 %vm7913_vm0, %v7912_v9 }
 0xa4c   : > { %7163 = vmatprep.subr.bf16.mxu0 %v7912_v9 }
 0xa52   : > { %7154 = vmatmul.mubr.msk.bf16.vlgmr.msra.gmra.mrb[48].mxu0 %vm1291_vm3, %v2324_v17 }
 0xa53   : > { %7165 = vmatprep.mubr.msk.bf16.mxu0 %vm7913_vm0, %v7912_v9 }
 0xa55   : > { %v2316_v20 = vpop.f32.mrb[40].mxu1 }
 0xa56   : > { %v2317_v21 = vadd.f32 %v6289_v19, %v2316_v20  ;;  %v7143_v22 = vpop.f32.mrb[41].mxu1 }
 0xa57   : > { %v2319_v24 = vpop.f32.mrb[42].mxu1 }
 0xa58   : > { %v2327_v25 = vpack.c.bf16 %v2317_v21, %v2317_v21  ;;  %v2320_v26 = vadd.f32 %v6289_v19, %v2319_v24  ;;  %v7144_v27 = vpop.f32.mrb[43].mxu1  ;;  %v7624_v21 = vld [vmem:[%s9364_s8 + $0xe0] sm:$0xff]  }
 0xa59   : > { %v7625_v27 = vld [vmem:[%s9364_s8 + $0xe8] sm:$0xff]  }
 0xa5a   : > { %v2453_v2 = vsel %vm1416_vm4, %v2327_v25, 0  ;;  %v2328_v5 = vpack.c.bf16 %v2320_v26, %v2320_v26 }
 0xa5b   : > { %7158 = vmatpush3.bf16.msra.mxu1 %v2453_v2  ;;  %v7626_v2 = vld [vmem:[%s9364_s8 + $0xf0] sm:$0xff]  }
 0xa5c   : > { %v2499_v6 = vsel %vm1416_vm4, %v2328_v5, 0  ;;  %7169 = vmatprep.subr.bf16.mxu1 %v7912_v9  ;;  %v7627_v5 = vld [vmem:[%s9364_s8 + $0xf8] sm:$0xff]  }
 0xa5d   : > { %7164 = vmatpush3.bf16.msra.mxu0 %v2499_v6 }
 0xa5e   : > { %7175 = vmatprep.subr.bf16.mxu0 %v7912_v9 }
 0xb1d   : > { %v2369_v28 = vpop.f32.mrb[44].mxu0 }
 0xb1e   : > { %v2421_v29 = vmul.f32 0.25, %v2369_v28  ;;  %v7149_v30 = vpop.f32.mrb[45].mxu0 }
 0xb1f   : > { %v2372_v31 = vpop.f32.mrb[46].mxu0 }
 0xb20   : > { %v7150_v32 = vpop.f32.mrb[47].mxu0  ;;  %v2423_v33 = vadd.f32 %v2421_v29, %v8286_v18  ;;  %v6342_v31 = vld [vmem:[%s9365_s9 + $0xb] ss:$0 sm:$0xff] }
 0xb22   : > { %v2425_v34 = vsel %vm1388_vm7, %v2423_v33, -inf }
 0xb23   : > { %2426 = vmax.xlane.f32.xlu0 %v2425_v34 }
 0xb25   : > { %v2415_v35 = vpop.f32.mrb[48].mxu0 }
 0xb26   : > { %v2422_v36 = vmul.f32 0.25, %v2415_v35  ;;  %v7155_v37 = vpop.f32.mrb[49].mxu0 }
 0xb27   : > { %v2418_v39 = vpop.f32.mrb[50].mxu0 }
 0xb28   : > { %v7156_v40 = vpop.f32.mrb[51].mxu0  ;;  %v2424_v41 = vadd.f32 %v2422_v36, %v8288_v23 }
 0xb2a   : > { %v2428_v42 = vsel %vm1388_vm7, %v2424_v41, -inf }
 0xb2b   : > { %2429 = vmax.xlane.f32.xlu1 %v2428_v42 }
 0xbb0   : > { %v2427_v43 = vpop.xlane.xlu0 %2426 }
 0xbb1   : > { %v2431_v44 = vsub.f32 %v2423_v33, %v2427_v43 }
 0xbb3   : > { %v2433_v45 = vmul.f32 1.442695, %v2431_v44 }
 0xbb5   : > { %7757 = vpow2.f32 %v2433_v45 }
 0xbb8   : > { %v2430_v46 = vpop.xlane.xlu1 %2429 }
 0xbb9   : > { %v2432_v47 = vsub.f32 %v2424_v41, %v2430_v46  ;;  %v6327_v46 = vld [vmem:[%s9365_s9 + $0x7] ss:$0 sm:$0xff] }
 0xbbb   : > { %v2435_v48 = vmul.f32 1.442695, %v2432_v47 }
 0xbbd   : > { %7759 = vpow2.f32 %v2435_v48 }
 0xbbf   : > { %v7758_v49 = vpop.eup %7757 }
 0xbc0   : > { %v2437_v50 = vsel %vm1388_vm7, %v7758_v49, 0.0 }
 0xbc1   : > { %2438 = vadd.xlane.f32.xlu0 %v2437_v50 }
 0xbc7   : > { %v7760_v51 = vpop.eup %7759 }
 0xbc8   : > { %v2440_v52 = vsel %vm1388_vm7, %v7760_v51, 0.0 }
 0xbc9   : > { %2441 = vadd.xlane.f32.xlu1 %v2440_v52 }
 0xc4e   : > { %v2439_v53 = vpop.xlane.xlu0 %2438 }
 0xc4f   : > { %7761 = vrcp.f32 %v2439_v53 }
 0xc56   : > { %v2442_v54 = vpop.xlane.xlu1 %2441 }
 0xc57   : > { %7763 = vrcp.f32 %v2442_v54 }
 0xc59   : > { %v7762_v55 = vpop.eup %7761 }
 0xc5a   : > { %v2444_v56 = vmul.f32 %v7762_v55, %v7758_v49 }
 0xc5c   : > { %v2447_v57 = vpack.c.bf16 %v2444_v56, %v2444_v56 }
 0xc5e   : > { %7160 = vmatmul.mubr.msk.bf16.vlgmr.msra.gmra.mrb[44].mxu1 %vm1388_vm7, %v2447_v57 }
 0xc5f   : > { %7171 = vmatprep.mubr.msk.bf16.mxu1 %vm7913_vm0, %v7912_v9  ;;  %7170 = vmatpush3.bf16.msra.mxu1 %v7623_v14 }
 0xc60   : > { %7187 = vmatprep.subr.bf16.mxu1 %v7912_v9 }
 0xc61   : > { %v7764_v58 = vpop.eup %7763 }
 0xc62   : > { %v2446_v60 = vmul.f32 %v7764_v58, %v7760_v51 }
 0xc64   : > { %v2448_v1 = vpack.c.bf16 %v2446_v60, %v2446_v60 }
 0xc66   : > { %7166 = vmatmul.mubr.msk.bf16.vlgmr.msra.gmra.mrb[52].mxu0 %vm1388_vm7, %v2448_v1 }
 0xc67   : > { %7176 = vmatpush3.bf16.msra.mxu0 %v7615_v62  ;;  %7183 = vmatprep.mubr.msk.bf16.mxu0 %vm7913_vm0, %v7912_v9 }
 0xc68   : > { %7177 = vmatprep.subr.bf16.mxu0 %v7912_v9 }
 0xc6b   : > { %7178 = vmatpush3.bf16.msra.mxu0 %v7616_v3 }
 0xc6c   : > { %7179 = vmatprep.subr.bf16.mxu0 %v7912_v9 }
 0xc6f   : > { %7180 = vmatpush3.bf16.msra.mxu0 %v7617_v4 }
 0xc70   : > { %7181 = vmatprep.subr.bf16.mxu0 %v7912_v9 }
 0xc73   : > { %7182 = vmatpush3.bf16.msra.mxu0 %v7618_v7 }
 0xc74   : > { %7199 = vmatprep.subr.bf16.mxu0 %v7912_v9 }
 0xc76   : > { %7184 = vmatmul.mubr.msk.bf16.vlgmr.msra.gmra.mrb[56].mxu0 %vm876_vm2, %v8234_v38 }
 0xc77   : > { %7200 = vmatpush3.bf16.msra.mxu0 %v7619_v8  ;;  %7207 = vmatprep.mubr.msk.bf16.mxu0 %vm7913_vm0, %v7912_v9 }
 0xc78   : > { %7201 = vmatprep.subr.bf16.mxu0 %v7912_v9 }
 0xc7b   : > { %7202 = vmatpush3.bf16.msra.mxu0 %v7620_v10 }
 0xc7c   : > { %7203 = vmatprep.subr.bf16.mxu0 %v7912_v9 }
 0xc7f   : > { %7204 = vmatpush3.bf16.msra.mxu0 %v7621_v11 }
 0xc80   : > { %7205 = vmatprep.subr.bf16.mxu0 %v7912_v9 }
 0xc83   : > { %7206 = vmatpush3.bf16.msra.mxu0 %v7622_v13 }
 0xc84   : > { %7223 = vmatprep.subr.bf16.mxu0 %v7912_v9 }
 0xc86   : > { %7208 = vmatmul.mubr.msk.bf16.vlgmr.msra.gmra.mrb[60].mxu0 %vm876_vm2, %v8234_v38 }
 0xc87   : > { %7225 = vmatprep.mubr.msk.bf16.mxu0 %vm7913_vm0, %v7912_v9 }
 0xd31   : > { %v2489_v15 = vpop.f32.mrb[44].mxu1 }
 0xd32   : > { %v7161_v16 = vpop.f32.mrb[45].mxu1 }
 0xd33   : > { %v2492_v17 = vpop.f32.mrb[46].mxu1 }
 0xd34   : > { %v7162_v19 = vpop.f32.mrb[47].mxu1 }
 0xd39   : > { %v2535_v20 = vpop.f32.mrb[52].mxu0 }
 0xd3a   : > { %v2541_v22 = vpack.c.bf16 %v2535_v20, %v2489_v15  ;;  %v7167_v24 = vpop.f32.mrb[53].mxu0 }
 0xd3b   : > { %v2538_v25 = vpop.f32.mrb[54].mxu0 }
 0xd3c   : > { %v7168_v26 = vpop.f32.mrb[55].mxu0  ;;  %7172 = vmatmul.mubr.msk.bf16.vlgmr.msra.gmra.mrb[48].mxu1 %vm1291_vm3, %v2541_v22 }
 0xd3d   : > { %7188 = vmatpush3.bf16.msra.mxu1 %v7624_v21  ;;  %7195 = vmatprep.mubr.msk.bf16.mxu1 %vm7913_vm0, %v7912_v9 }
 0xd3e   : > { %7189 = vmatprep.subr.bf16.mxu1 %v7912_v9 }
 0xd41   : > { %7190 = vmatpush3.bf16.msra.mxu1 %v7625_v27 }
 0xd42   : > { %7191 = vmatprep.subr.bf16.mxu1 %v7912_v9 }
 0xd45   : > { %7192 = vmatpush3.bf16.msra.mxu1 %v7626_v2 }
 0xd46   : > { %7193 = vmatprep.subr.bf16.mxu1 %v7912_v9 }
 0xd49   : > { %v2672_v6 = vpop.f32.mrb[56].mxu0  ;;  %7194 = vmatpush3.bf16.msra.mxu1 %v7627_v5 }
 0xd4a   : > { %v7185_v28 = vpop.f32.mrb[57].mxu0  ;;  %7211 = vmatprep.subr.bf16.mxu1 %v7912_v9 }
 0xd4b   : > { %v2675_v29 = vpop.f32.mrb[58].mxu0 }
 0xd4c   : > { %v7186_v30 = vpop.f32.mrb[59].mxu0  ;;  %7196 = vmatmul.mubr.msk.bf16.vlgmr.msra.gmra.mrb[52].mxu1 %vm876_vm2, %v8234_v38 }
 0xd4d   : > { %7213 = vmatprep.mubr.msk.bf16.mxu1 %vm7913_vm0, %v7912_v9 }
 0xd59   : > { %v2836_v32 = vpop.f32.mrb[60].mxu0 }
 0xd5a   : > { %v2837_v33 = vadd.f32 %v6342_v31, %v2836_v32  ;;  %v7209_v34 = vpop.f32.mrb[61].mxu0 }
 0xd5b   : > { %v2839_v35 = vpop.f32.mrb[62].mxu0 }
 0xd5c   : > { %v2847_v36 = vpack.c.bf16 %v2837_v33, %v2837_v33  ;;  %v2840_v37 = vadd.f32 %v6342_v31, %v2839_v35  ;;  %v7210_v39 = vpop.f32.mrb[63].mxu0 }
 0xd5d   : > { %v7628_v39 = vld [vmem:[%s9366_s10 + $0x18] sm:$0xff]  }
 0xd5e   : > { %v2973_v40 = vsel %vm1416_vm4, %v2847_v36, 0  ;;  %v2848_v60 = vpack.c.bf16 %v2840_v37, %v2840_v37 }
 0xd5f   : > { %7224 = vmatpush3.bf16.msra.mxu0 %v2973_v40 }
 0xd60   : > { %7235 = vmatprep.subr.bf16.mxu0 %v7912_v9  ;;  %v3019_v1 = vsel %vm1416_vm4, %v2848_v60, 0 }
 0xe0f   : > { %v2588_v38 = vpop.f32.mrb[48].mxu1 }
 0xe10   : > { %v8592_v41 = vadd.f32 %v2588_v38, %v8485_v59  ;;  %v7173_v42 = vpop.f32.mrb[49].mxu1  ;;  %v6312_v59 = vld [vmem:[%s9365_s9 + $0x3] ss:$0 sm:$0xff] }
 0xe11   : > { %v2591_v43 = vpop.f32.mrb[50].mxu1  ;;  %v2676_v58 = vadd.f32 %v6312_v59, %v2675_v29 }
 0xe12   : > { %v8595_v44 = vadd.f32 %v2591_v43, %v8487_v0  ;;  %v7174_v45 = vpop.f32.mrb[51].mxu1  ;;  %v2673_v0 = vadd.f32 %v6312_v59, %v2672_v6  ;;  %v6356_v59 = vld [vmem:[%s9367_s11] ss:$0 sm:$0xff] }
 0xe13   : > { %v2844_v62 = vpack.c.bf16 %v2676_v58, %v2676_v58 }
 0xe14   : > { %v2843_v56 = vpack.c.bf16 %v2673_v0, %v2673_v0 }
 0xe1f   : > { %v2754_v47 = vpop.f32.mrb[52].mxu1 }
 0xe20   : > { %v2755_v48 = vadd.f32 %v6327_v46, %v2754_v47  ;;  %v7197_v49 = vpop.f32.mrb[53].mxu1 }
 0xe21   : > { %v2757_v50 = vpop.f32.mrb[54].mxu1 }
 0xe22   : > { %v2845_v51 = vpack.c.bf16 %v2755_v48, %v2755_v48  ;;  %v7198_v52 = vpop.f32.mrb[55].mxu1  ;;  %v2758_v54 = vadd.f32 %v6327_v46, %v2757_v50 }
 0xe24   : > { %v2853_v53 = vsel %vm1291_vm3, %v2845_v51, 0  ;;  %v2846_v55 = vpack.c.bf16 %v2758_v54, %v2758_v54 }
 0xe25   : > { %7212 = vmatpush3.bf16.xpose.msra.mxu1 %v2853_v53 }
 0xe26   : > { %7217 = vmatprep.subr.bf16.mxu1 %v7912_v9  ;;  %v2899_v57 = vsel %vm1291_vm3, %v2846_v55, 0 }
 0xe2c   : > { %7214 = vmatmul.mubr.msk.bf16.vlgmr.msra.gmra.mrb[56].mxu1 %vm1291_vm3, %v2843_v56 }
 0xe2d   : > { %7218 = vmatpush3.bf16.xpose.msra.mxu1 %v2899_v57  ;;  %7219 = vmatprep.mubr.msk.bf16.mxu1 %vm7913_vm0, %v7912_v9 }
 0xe2e   : > { %7229 = vmatprep.subr.bf16.mxu1 %v7912_v9 }
 0xe34   : > { %7220 = vmatmul.mubr.msk.bf16.vlgmr.msra.gmra.mrb[60].mxu1 %vm1291_vm3, %v2844_v62 }
 0xe35   : > { %7230 = vmatpush3.bf16.msra.mxu1 %v3019_v1  ;;  %7231 = vmatprep.mubr.msk.bf16.mxu1 %vm7913_vm0, %v7912_v9 }
 0xeff   : > { %v2889_v3 = vpop.f32.mrb[56].mxu1 }
 0xf00   : > { %v2941_v4 = vmul.f32 0.25, %v2889_v3  ;;  %v7215_v7 = vpop.f32.mrb[57].mxu1 }
 0xf01   : > { %v2892_v8 = vpop.f32.mrb[58].mxu1 }
 0xf02   : > { %v7216_v10 = vpop.f32.mrb[59].mxu1  ;;  %v2943_v11 = vadd.f32 %v2941_v4, %v8286_v18 }
 0xf04   : > { %v2945_v13 = vsel %vm1388_vm7, %v2943_v11, -inf }
 0xf05   : > { %2946 = vmax.xlane.f32.xlu0 %v2945_v13  ;;  %v7629_v13 = vld [vmem:[%s9370_s14] ss:$8 sps:$4 sm:$0xff]  }
 0xf07   : > { %v2935_v14 = vpop.f32.mrb[60].mxu1 }
 0xf08   : > { %v2942_v15 = vmul.f32 0.25, %v2935_v14  ;;  %v7221_v16 = vpop.f32.mrb[61].mxu1  ;;  %v7634_v14 = vld [vmem:[%s9370_s14 + $0x14] ss:$8 sps:$4 sm:$0xff]  }
 0xf09   : > { %v2938_v17 = vpop.f32.mrb[62].mxu1  ;;  %v7637_v16 = vld [vmem:[%s9370_s14 + $0x24] ss:$8 sps:$4 sm:$0xff]  }
 0xf0a   : > { %v7222_v19 = vpop.f32.mrb[63].mxu1  ;;  %v2944_v20 = vadd.f32 %v2942_v15, %v8288_v23  ;;  %v7632_v15 = vld [vmem:[%s9370_s14 + $0x10] ss:$8 sps:$4 sm:$0xff]   ;;  %v7635_v17 = vld [vmem:[%s9370_s14 + $0x20] ss:$8 sps:$4 sm:$0xff]  }
 0xf0b   : > { %v7638_v19 = vld [vmem:[%s9370_s14 + $0x30] ss:$8 sps:$4 sm:$0xff]  }
 0xf0c   : > { %v2948_v21 = vsel %vm1388_vm7, %v2944_v20, -inf }
 0xf0d   : > { %2949 = vmax.xlane.f32.xlu1 %v2948_v21  ;;  %v7915_v21 = vmov 0  }
 0xf92   : > { %v2947_v22 = vpop.xlane.xlu0 %2946 }
 0xf93   : > { %v2951_v24 = vsub.f32 %v2943_v11, %v2947_v22  ;;  %v7631_v11 = vld [vmem:[%s9370_s14 + $0x4] ss:$8 sps:$4 sm:$0xff]  }
 0xf94   : > { %3236 = vmatprep.subr.bf16.mxu1 %v7631_v11 }
 0xf95   : > { %v2953_v25 = vmul.f32 1.442695, %v2951_v24 }
 0xf97   : > { %7765 = vpow2.f32 %v2953_v25 }
 0xf9a   : > { %v2950_v26 = vpop.xlane.xlu1 %2949 }
 0xf9b   : > { %v2952_v27 = vsub.f32 %v2944_v20, %v2950_v26  ;;  %v7640_v20 = vld [vmem:[%s9370_s14 + $0x34] ss:$8 sps:$4 sm:$0xff]  }
 0xf9d   : > { %v2955_v2 = vmul.f32 1.442695, %v2952_v27 }
 0xf9f   : > { %7767 = vpow2.f32 %v2955_v2 }
 0xfa1   : > { %v7766_v5 = vpop.eup %7765 }
 0xfa2   : > { %v2957_v6 = vsel %vm1388_vm7, %v7766_v5, 0.0 }
 0xfa3   : > { %2958 = vadd.xlane.f32.xlu0 %v2957_v6  ;;  %v6357_v6 = vld [vmem:[%s9397_s30] ss:$0 sm:$0xff] }
 0xfa9   : > { %v7768_v28 = vpop.eup %7767 }
 0xfaa   : > { %v2960_v29 = vsel %vm1388_vm7, %v7768_v28, 0.0 }
 0xfab   : > { %2961 = vadd.xlane.f32.xlu1 %v2960_v29 }
0x1030   : > { %v2959_v30 = vpop.xlane.xlu0 %2958 }
0x1031   : > { %7769 = vrcp.f32 %v2959_v30 }
0x1038   : > { %v2962_v31 = vpop.xlane.xlu1 %2961 }
0x1039   : > { %7771 = vrcp.f32 %v2962_v31 }
0x103b   : > { %v7770_v32 = vpop.eup %7769 }
0x103c   : > { %v2964_v33 = vmul.f32 %v7770_v32, %v7766_v5  ;;  %v6358_v32 = vld [vmem:[%s9369_s13] ss:$0 sm:$0xff] }
0x103e   : > { %v2967_v34 = vpack.c.bf16 %v2964_v33, %v2964_v33 }
0x1040   : > { %7226 = vmatmul.mubr.msk.bf16.vlgmr.msra.gmra.mrb[64].mxu0 %vm1388_vm7, %v2967_v34 }
0x1041   : > { %7237 = vmatprep.mubr.msk.bf16.mxu0 %vm7913_vm0, %v7912_v9  ;;  %7236 = vmatpush3.bf16.msra.mxu0 %v7628_v39  ;;  %v7642_v39 = vld [vmem:[%s9372_s16] sm:$0xff]  }
0x1043   : > { %v7772_v35 = vpop.eup %7771 }
0x1044   : > { %v2966_v36 = vmul.f32 %v7772_v35, %v7768_v28 }
0x1046   : > { %v2968_v37 = vpack.c.bf16 %v2966_v36, %v2966_v36 }
0x1048   : > { %7232 = vmatmul.mubr.msk.bf16.vlgmr.msra.gmra.mrb[64].mxu1 %vm1388_vm7, %v2968_v37  ;;  %v7641_v37 = vld [vmem:[%s9372_s16 + $0x40] sm:$0xff]  }
0x1049   : > { %3237 = vmatpush1.bf16.msra.mxu1 %v7629_v13  ;;  %3268 = vmatprep.mubr.bf16.mxu1 %v7915_v21 }
0x104a   : > { %3238 = vmatprep.subr.bf16.mxu1 %v7634_v14  ;;  %6813 = vmatprep.subr.bf16.mxu0 %v7641_v37 }
0x104d   : > { %3239 = vmatpush1.bf16.msra.mxu1 %v7632_v15 }
0x104e   : > { %3240 = vmatprep.subr.bf16.mxu1 %v7637_v16 }
0x1051   : > { %3241 = vmatpush1.bf16.msra.mxu1 %v7635_v17 }
0x1052   : > { %3242 = vmatprep.subr.bf16.mxu1 %v7640_v20 }
0x1055   : > { %3243 = vmatpush1.bf16.msra.mxu1 %v7638_v19 }
0x1056   : > { %7241 = vmatprep.subr.bf16.mxu1 %v7912_v9 }
0x1113   : > { %v3009_v40 = vpop.f32.mrb[64].mxu0 }
0x1114   : > { %v7227_v38 = vpop.f32.mrb[65].mxu0 }
0x1115   : > { %v3012_v42 = vpop.f32.mrb[66].mxu0  ;;  %v7644_v38 = vld [vmem:[%s9372_s16 + $0x8] sm:$0xff]  }
0x1116   : > { %v7228_v43 = vpop.f32.mrb[67].mxu0  ;;  %v7645_v42 = vld [vmem:[%s9372_s16 + $0x50] sm:$0xff]  }
0x1117   : > { %v7646_v43 = vld [vmem:[%s9372_s16 + $0x10] sm:$0xff]  }
0x111b   : > { %v3055_v45 = vpop.f32.mrb[64].mxu1 }
0x111c   : > { %v3061_v46 = vpack.c.bf16 %v3055_v45, %v3009_v40  ;;  %v7233_v47 = vpop.f32.mrb[65].mxu1  ;;  %v7643_v40 = vld [vmem:[%s9372_s16 + $0x48] sm:$0xff]   ;;  %v7647_v45 = vld [vmem:[%s9372_s16 + $0x58] sm:$0xff]  }
0x111d   : > { %v3058_v48 = vpop.f32.mrb[66].mxu1  ;;  %v7649_v47 = vld [vmem:[%s9372_s16 + $0x60] sm:$0xff]  }
0x111e   : > { %v7234_v49 = vpop.f32.mrb[67].mxu1  ;;  %7238 = vmatmul.mubr.msk.bf16.vlgmr.msra.gmra.mrb[68].mxu0 %vm1291_vm3, %v3061_v46  ;;  %v7648_v46 = vld [vmem:[%s9372_s16 + $0x18] sm:$0xff]   ;;  %v7650_v48 = vld [vmem:[%s9372_s16 + $0x20] sm:$0xff]  }
0x111f   : > { %6814 = vmatpush3.bf16.msra.mxu0 %v7642_v39  ;;  %v7651_v49 = vld [vmem:[%s9372_s16 + $0x68] sm:$0xff]  }
0x1120   : > { %6815 = vmatprep.subr.bf16.mxu0 %v7643_v40 }
0x1123   : > { %6816 = vmatpush3.bf16.msra.mxu0 %v7644_v38 }
0x1124   : > { %6817 = vmatprep.subr.bf16.mxu0 %v7645_v42 }
0x1127   : > { %6818 = vmatpush3.bf16.msra.mxu0 %v7646_v43 }
0x1128   : > { %6819 = vmatprep.subr.bf16.mxu0 %v7647_v45 }
0x112b   : > { %6820 = vmatpush3.bf16.msra.mxu0 %v7648_v46 }
0x112c   : > { %6821 = vmatprep.subr.bf16.mxu0 %v7649_v47 }
0x112f   : > { %6822 = vmatpush3.bf16.msra.mxu0 %v7650_v48 }
0x1130   : > { %6823 = vmatprep.subr.bf16.mxu0 %v7651_v49 }
0x11f1   : > { %v3108_v50 = vpop.f32.mrb[68].mxu0 }
0x11f2   : > { %v3115_v51 = vadd.f32 %v3108_v50, %v8592_v41  ;;  %v7239_v52 = vpop.f32.mrb[69].mxu0  ;;  %v7652_v50 = vld [vmem:[%s9372_s16 + $0x28] sm:$0xff]  }
0x11f3   : > { %v3111_v53 = vpop.f32.mrb[70].mxu0  ;;  %6824 = vmatpush3.bf16.msra.mxu0 %v7652_v50  ;;  %v7654_v52 = vld [vmem:[%s9372_s16 + $0x30] sm:$0xff]   ;;  %v6368_v50 = vld [vmem:[%s9373_s17] ss:$0 sm:$0xff] }
0x11f4   : > { %v3117_v54 = vadd.f32 %v3115_v51, %v8181_v61  ;;  %v3116_v0 = vadd.f32 %v3111_v53, %v8595_v44  ;;  %v7240_v55 = vpop.f32.mrb[71].mxu0  ;;  %v7653_v51 = vld [vmem:[%s9372_s16 + $0x70] sm:$0xff]   ;;  %v7656_v53 = vld [vmem:[%s9372_s16 + $0x38] sm:$0xff]  }
0x11f5   : > { %6825 = vmatprep.subr.bf16.mxu0 %v7653_v51  ;;  %v3181_v55 = vld [vmem:[%s9371_s15] sm:$0x3] }
0x11f6   : > { %v8634_v56 = vadd.f32 %v6356_v59, %v3117_v54  ;;  %v3118_v57 = vadd.f32 %v3116_v0, %v8183_v63  ;;  %v8732_v54 = vshrl.u32 %v971_v12, 7 }
0x11f7   : > { %6826 = vmatpush3.bf16.msra.mxu0 %v7654_v52 }
0x11f8   : > { %v8637_v58 = vadd.f32 %v6356_v59, %v3118_v57  ;;  %v3130_v41 = vsel %vm876_vm2, %v8634_v56, 0.0  ;;  %v7655_v59 = vld [vmem:[%s9372_s16 + $0x78] sm:$0xff]   ;;  %v3185_v0 = vsub.s32 0, %v8732_v54  ;;  %v3189_v57 = vsub.s32 1, %v8732_v54 }
0x11f9   : > { %3131 = vadd.xlane.f32.xlu0 %v3130_v41  ;;  %6827 = vmatprep.subr.bf16.mxu0 %v7655_v59 }
0x11fa   : > { %v3133_v60 = vsel %vm876_vm2, %v8637_v58, 0.0  ;;  %v3186_v41 = vrot.slane %v3181_v55, %v3185_v0 }
0x11fb   : > { %3134 = vadd.xlane.f32.xlu1 %v3133_v60  ;;  %6828 = vmatpush3.bf16.msra.mxu0 %v7656_v53  ;;  %v3190_v60 = vrot.slane %v3181_v55, %v3189_v57 }
0x11fc   : > { %7265 = vmatprep.subr.bf16.mxu0 %v7912_v9 }
0x1286   : > { %v3132_v62 = vpop.xlane.xlu0 %3131 }
0x1287   : > { %v3136_v1 = vmul.f32 0.015625, %v3132_v62 }
0x1288   : > { %v3135_v61 = vpop.xlane.xlu1 %3134 }
0x1289   : > { %v3138_v44 = vsub.f32 %v8634_v56, %v3136_v1  ;;  %v3137_v3 = vmul.f32 0.015625, %v3135_v61 }
0x128b   : > { %v3139_v4 = vsub.f32 %v8637_v58, %v3137_v3  ;;  %v3140_v7 = vmul.f32 %v3138_v44, %v3138_v44 }
0x128d   : > { %v3142_v63 = vsel %vm876_vm2, %v3140_v7, 0.0  ;;  %v3141_v8 = vmul.f32 %v3139_v4, %v3139_v4 }
0x128e   : > { %3143 = vadd.xlane.f32.xlu0 %v3142_v63 }
0x128f   : > { %v3145_v10 = vsel %vm876_vm2, %v3141_v8, 0.0 }
0x1290   : > { %3146 = vadd.xlane.f32.xlu1 %v3145_v10 }
0x131b   : > { %v3144_v22 = vpop.xlane.xlu0 %3143 }
0x131c   : > { %v3148_v24 = vmul.f32 0.015625, %v3144_v22 }
0x131d   : > { %v3147_v25 = vpop.xlane.xlu1 %3146 }
0x131e   : > { %v3150_v26 = vadd.f32 1e-05, %v3148_v24  ;;  %v3149_v27 = vmul.f32 0.015625, %v3147_v25 }
0x1320   : > { %7773 = vrsqrt.f32 %v3150_v26  ;;  %v3151_v2 = vadd.f32 1e-05, %v3149_v27 }
0x1322   : > { %7775 = vrsqrt.f32 %v3151_v2 }
0x132a   : > { %v7774_v5 = vpop.eup %7773 }
0x132b   : > { %v3154_v28 = vmul.f32 %v7774_v5, %v3138_v44 }
0x132c   : > { %v7776_v29 = vpop.eup %7775 }
0x132d   : > { %v3162_v30 = vmul.f32 %v6357_v6, %v3154_v28  ;;  %v3155_v31 = vmul.f32 %v7776_v29, %v3139_v4 }
0x132f   : > { %v3163_v33 = vmul.f32 %v6357_v6, %v3155_v31  ;;  %v3170_v34 = vadd.f32 %v6358_v32, %v3162_v30 }
0x1331   : > { %v3171_v35 = vadd.f32 %v6358_v32, %v3163_v33 }
0x1333   : > { %v3172_v36 = vpack.c.bf16 %v3171_v35, %v3170_v34 }
0x1335   : > { %6367 = vmatmul.mubr.msk.bf16.vlgmr.msra.gmra.mrb[68].mxu1 %vm876_vm2, %v3172_v36 }
0x1336   : > { %7249 = vmatprep.mubr.msk.bf16.mxu1 %vm7913_vm0, %v7912_v9 }
0x1408   : > { %v3270_v62 = vpop.f32.mrb[68].mxu1 }
0x1409   : > { %v3271_v1 = vadd.f32 %v3270_v62, %v3186_v41  ;;  %v3272_v61 = vpop.f32.mrb[69].mxu1 }
0x140a   : > { %v3273_v44 = vadd.f32 %v3272_v61, %v3190_v60  ;;  %v3274_v12 = vpop.f32.mrb[70].mxu1 }
0x140b   : > { %v3279_v3 = vmul.f32 %v3271_v1, %v3271_v1  ;;  %v3275_v4 = vadd.f32 %v3274_v12, %v3186_v41  ;;  %v3276_v7 = vpop.f32.mrb[71].mxu1 }
0x140c   : > { %v3280_v63 = vmul.f32 %v3273_v44, %v3273_v44  ;;  %v3277_v8 = vadd.f32 %v3276_v7, %v3190_v60 }
0x140d   : > { %v3283_v10 = vmul.f32 %v3279_v3, %v3271_v1  ;;  %v3281_v11 = vmul.f32 %v3275_v4, %v3275_v4 }
0x140e   : > { %v3284_v13 = vmul.f32 %v3280_v63, %v3273_v44  ;;  %v3282_v14 = vmul.f32 %v3277_v8, %v3277_v8 }
0x140f   : > { %v3287_v15 = vmul.f32 0.044715, %v3283_v10  ;;  %v3285_v16 = vmul.f32 %v3281_v11, %v3275_v4 }
0x1410   : > { %v3288_v17 = vmul.f32 0.044715, %v3284_v13  ;;  %v3286_v19 = vmul.f32 %v3282_v14, %v3277_v8  ;;  %v7657_v13 = vld [vmem:[%s9364_s8 + $0x180] sm:$0xff]  }
0x1411   : > { %v3291_v20 = vadd.f32 %v3287_v15, %v3271_v1  ;;  %v3289_v22 = vmul.f32 0.044715, %v3285_v16  ;;  %v7658_v14 = vld [vmem:[%s9364_s8 + $0x280] sm:$0xff]   ;;  %7242 = vmatpush3.bf16.msra.mxu1 %v7657_v13  ;;  %v7659_v15 = vld [vmem:[%s9364_s8 + $0x188] sm:$0xff]  }
0x1412   : > { %v3292_v24 = vadd.f32 %v3288_v17, %v3273_v44  ;;  %v3290_v25 = vmul.f32 0.044715, %v3286_v19  ;;  %7243 = vmatprep.subr.bf16.mxu1 %v7912_v9  ;;  %v7660_v16 = vld [vmem:[%s9364_s8 + $0x288] sm:$0xff]   ;;  %v7661_v17 = vld [vmem:[%s9364_s8 + $0x190] sm:$0xff]  }
0x1413   : > { %v3295_v26 = vmul.f32 0.7978846, %v3291_v20  ;;  %v3293_v27 = vadd.f32 %v3289_v22, %v3275_v4  ;;  %v7662_v19 = vld [vmem:[%s9364_s8 + $0x290] sm:$0xff]   ;;  %v7663_v20 = vld [vmem:[%s9364_s8 + $0x198] sm:$0xff]  }
0x1414   : > { %v3296_v2 = vmul.f32 0.7978846, %v3292_v24  ;;  %v3294_v5 = vadd.f32 %v3290_v25, %v3277_v8  ;;  %v7664_v22 = vld [vmem:[%s9364_s8 + $0x298] sm:$0xff]  }
0x1415   : > { %7777 = vtanh.f32 %v3295_v26  ;;  %v3297_v6 = vmul.f32 0.7978846, %v3293_v27  ;;  %7244 = vmatpush3.bf16.msra.mxu1 %v7659_v15 }
0x1416   : > { %7779 = vtanh.f32 %v3296_v2  ;;  %v3298_v28 = vmul.f32 0.7978846, %v3294_v5  ;;  %7245 = vmatprep.subr.bf16.mxu1 %v7912_v9 }
0x1417   : > { %7781 = vtanh.f32 %v3297_v6 }
0x1418   : > { %7783 = vtanh.f32 %v3298_v28  ;;  %v6387_v28 = vld [vmem:[%s9362_s6 + $0x1] ss:$0 sm:$0xff] }
0x1419   : > { %7246 = vmatpush3.bf16.msra.mxu1 %v7661_v17 }
0x141a   : > { %7247 = vmatprep.subr.bf16.mxu1 %v7912_v9 }
0x141d   : > { %7248 = vmatpush3.bf16.msra.mxu1 %v7663_v20 }
0x141e   : > { %7253 = vmatprep.subr.bf16.mxu1 %v7912_v9 }
0x141f   : > { %v7778_v29 = vpop.eup %7777 }
0x1420   : > { %v7780_v30 = vpop.eup %7779  ;;  %v3303_v31 = vadd.f32 1.0, %v7778_v29 }
0x1421   : > { %v7782_v32 = vpop.eup %7781  ;;  %v3304_v33 = vadd.f32 1.0, %v7780_v30 }
0x1422   : > { %v7784_v34 = vpop.eup %7783  ;;  %v3307_v35 = vmul.f32 0.5, %v3303_v31  ;;  %v3305_v36 = vadd.f32 1.0, %v7782_v32 }
0x1423   : > { %v3306_v37 = vadd.f32 1.0, %v7784_v34  ;;  %v3308_v39 = vmul.f32 0.5, %v3304_v33  ;;  %v6388_v33 = vld [vmem:[%s9363_s7 + $0x1] ss:$0 sm:$0xff] }
0x1424   : > { %v3309_v40 = vmul.f32 0.5, %v3305_v36  ;;  %v3311_v42 = vmul.f32 %v3307_v35, %v3271_v1 }
0x1425   : > { %v3310_v38 = vmul.f32 0.5, %v3306_v37  ;;  %v3312_v45 = vmul.f32 %v3308_v39, %v3273_v44  ;;  %v7665_v37 = vld [vmem:[%s9364_s8 + $0x200] sm:$0xff]  }
0x1426   : > { %v3313_v43 = vmul.f32 %v3309_v40, %v3275_v4  ;;  %v7666_v40 = vld [vmem:[%s9364_s8 + $0x208] sm:$0xff]  }
0x1427   : > { %v3314_v46 = vmul.f32 %v3310_v38, %v3277_v8  ;;  %v7667_v38 = vld [vmem:[%s9364_s8 + $0x210] sm:$0xff]  }
0x1428   : > { %v3315_v47 = vpack.c.bf16 %v3313_v43, %v3311_v42  ;;  %v7668_v42 = vld [vmem:[%s9364_s8 + $0x218] sm:$0xff]  }
0x1429   : > { %v3316_v48 = vpack.c.bf16 %v3314_v46, %v3312_v45 }
0x142b   : > { %3484 = vmatprep.mubr.bf16.mxu0 %v3316_v48 }
0x142c   : > { %3485 = vmatmul.mubr.bf16.vlgmr.msra.gmra.mrb[72].mxu0 %v3315_v47 }
0x142d   : > { %7273 = vmatprep.mubr.msk.bf16.mxu0 %vm7913_vm0, %v7912_v9  ;;  %7266 = vmatpush3.bf16.msra.mxu0 %v7658_v14 }
0x142e   : > { %7267 = vmatprep.subr.bf16.mxu0 %v7912_v9 }
0x1431   : > { %7268 = vmatpush3.bf16.msra.mxu0 %v7660_v16 }
0x1432   : > { %7269 = vmatprep.subr.bf16.mxu0 %v7912_v9 }
0x1435   : > { %7270 = vmatpush3.bf16.msra.mxu0 %v7662_v19 }
0x1436   : > { %7271 = vmatprep.subr.bf16.mxu0 %v7912_v9 }
0x1439   : > { %7272 = vmatpush3.bf16.msra.mxu0 %v7664_v22 }
0x143a   : > { %7283 = vmatprep.subr.bf16.mxu0 %v7912_v9 }
0x14ff   : > { %v6829_v49 = vpop.f32.mrb[72].mxu0 }
0x1500   : > { %v6830_v51 = vpop.f32.mrb[73].mxu0 }
0x1501   : > { %v6831_v52 = vadd.f32 %v6830_v51, %v6829_v49  ;;  %v6832_v59 = vpop.f32.mrb[74].mxu0 }
0x1502   : > { %v6833_v53 = vpop.f32.mrb[75].mxu0 }
0x1503   : > { %v3487_v55 = vadd.f32 %v6831_v52, %v6368_v50  ;;  %v6834_v41 = vadd.f32 %v6833_v53, %v6832_v59  ;;  %v6413_v52 = vld [vmem:[%s9365_s9 + $0x10] ss:$0 sm:$0xff] }
0x1505   : > { %v8749_v60 = vadd.f32 %v3487_v55, %v8634_v56  ;;  %v3490_v62 = vadd.f32 %v6834_v41, %v6368_v50  ;;  %v6428_v41 = vld [vmem:[%s9365_s9 + $0x14] ss:$0 sm:$0xff] }
0x1507   : > { %v8752_v1 = vadd.f32 %v3490_v62, %v8637_v58  ;;  %v3499_v61 = vsel %vm876_vm2, %v8749_v60, 0.0 }
0x1508   : > { %3500 = vadd.xlane.f32.xlu0 %v3499_v61 }
0x1509   : > { %v3502_v44 = vsel %vm876_vm2, %v8752_v1, 0.0 }
0x150a   : > { %3503 = vadd.xlane.f32.xlu1 %v3502_v44 }
0x1595   : > { %v3501_v12 = vpop.xlane.xlu0 %3500 }
0x1596   : > { %v3505_v3 = vmul.f32 0.015625, %v3501_v12 }
0x1597   : > { %v3504_v4 = vpop.xlane.xlu1 %3503 }
0x1598   : > { %v3507_v7 = vsub.f32 %v8749_v60, %v3505_v3  ;;  %v3506_v63 = vmul.f32 0.015625, %v3504_v4  ;;  %v6398_v3 = vld [vmem:[%s9365_s9 + $0xc] ss:$0 sm:$0xff] }
0x159a   : > { %v3508_v56 = vsub.f32 %v8752_v1, %v3506_v63  ;;  %v3509_v8 = vmul.f32 %v3507_v7, %v3507_v7 }
0x159c   : > { %v3511_v58 = vsel %vm876_vm2, %v3509_v8, 0.0  ;;  %v3510_v10 = vmul.f32 %v3508_v56, %v3508_v56 }
0x159d   : > { %3512 = vadd.xlane.f32.xlu0 %v3511_v58 }
0x159e   : > { %v3514_v11 = vsel %vm876_vm2, %v3510_v10, 0.0 }
0x159f   : > { %3515 = vadd.xlane.f32.xlu1 %v3514_v11 }
0x162a   : > { %v3513_v24 = vpop.xlane.xlu0 %3512 }
0x162b   : > { %v3517_v25 = vmul.f32 0.015625, %v3513_v24 }
0x162c   : > { %v3516_v26 = vpop.xlane.xlu1 %3515 }
0x162d   : > { %v3519_v27 = vadd.f32 1e-05, %v3517_v25  ;;  %v3518_v2 = vmul.f32 0.015625, %v3516_v26 }
0x162f   : > { %7785 = vrsqrt.f32 %v3519_v27  ;;  %v3520_v5 = vadd.f32 1e-05, %v3518_v2 }
0x1631   : > { %7787 = vrsqrt.f32 %v3520_v5 }
0x1639   : > { %v7786_v6 = vpop.eup %7785 }
0x163a   : > { %v3523_v29 = vmul.f32 %v7786_v6, %v3507_v7 }
0x163b   : > { %v7788_v30 = vpop.eup %7787 }
0x163c   : > { %v3531_v31 = vmul.f32 %v6387_v28, %v3523_v29  ;;  %v3524_v32 = vmul.f32 %v7788_v30, %v3508_v56 }
0x163e   : > { %v3532_v34 = vmul.f32 %v6387_v28, %v3524_v32  ;;  %v3539_v35 = vadd.f32 %v6388_v33, %v3531_v31 }
0x1640   : > { %v3540_v36 = vadd.f32 %v6388_v33, %v3532_v34 }
0x1642   : > { %v8803_v39 = vpack.c.bf16 %v3540_v36, %v3539_v35 }
0x1644   : > { %7250 = vmatmul.mubr.msk.bf16.vlgmr.msra.gmra.mrb[72].mxu1 %vm876_vm2, %v8803_v39  ;;  %7274 = vmatmul.mubr.msk.bf16.vlgmr.msra.gmra.mrb[76].mxu0 %vm876_vm2, %v8803_v39 }
0x1645   : > { %7254 = vmatpush3.bf16.msra.mxu1 %v7665_v37  ;;  %7261 = vmatprep.mubr.msk.bf16.mxu1 %vm7913_vm0, %v7912_v9 }
0x1646   : > { %7255 = vmatprep.subr.bf16.mxu1 %v7912_v9  ;;  %7285 = vmatprep.mubr.msk.bf16.mxu0 %vm7913_vm0, %v7912_v9 }
0x1649   : > { %7256 = vmatpush3.bf16.msra.mxu1 %v7666_v40 }
0x164a   : > { %7257 = vmatprep.subr.bf16.mxu1 %v7912_v9 }
0x164d   : > { %7258 = vmatpush3.bf16.msra.mxu1 %v7667_v38 }
0x164e   : > { %7259 = vmatprep.subr.bf16.mxu1 %v7912_v9 }
0x1651   : > { %7260 = vmatpush3.bf16.msra.mxu1 %v7668_v42 }
0x1652   : > { %7277 = vmatprep.subr.bf16.mxu1 %v7912_v9 }
0x1654   : > { %7262 = vmatmul.mubr.msk.bf16.vlgmr.msra.gmra.mrb[76].mxu1 %vm876_vm2, %v8803_v39 }
0x1655   : > { %7279 = vmatprep.mubr.msk.bf16.mxu1 %vm7913_vm0, %v7912_v9 }
0x1717   : > { %v3620_v43 = vpop.f32.mrb[72].mxu1  ;;  %v3784_v45 = vpop.f32.mrb[76].mxu0 }
0x1718   : > { %v7251_v46 = vpop.f32.mrb[73].mxu1  ;;  %v7275_v47 = vpop.f32.mrb[77].mxu0  ;;  %v3785_v4 = vadd.f32 %v6428_v41, %v3784_v45  ;;  %v3621_v56 = vadd.f32 %v6398_v3, %v3620_v43 }
0x1719   : > { %v3623_v48 = vpop.f32.mrb[74].mxu1  ;;  %v3787_v49 = vpop.f32.mrb[78].mxu0 }
0x171a   : > { %v7252_v50 = vpop.f32.mrb[75].mxu1  ;;  %v7276_v51 = vpop.f32.mrb[79].mxu0  ;;  %v3788_v8 = vadd.f32 %v6428_v41, %v3787_v49  ;;  %v3795_v10 = vpack.c.bf16 %v3785_v4, %v3785_v4  ;;  %v3624_v11 = vadd.f32 %v6398_v3, %v3623_v48  ;;  %v3791_v13 = vpack.c.bf16 %v3621_v56, %v3621_v56  ;;  %v7672_v41 = vld [vmem:[%s9364_s8 + $0x228] sm:$0xff]   ;;  %v7677_v3 = vld [vmem:[%s9364_s8 + $0x2a0] sm:$0xff]  }
0x171b   : > { %v7669_v50 = vld [vmem:[%s9364_s8 + $0x1a0] sm:$0xff]   ;;  %v7678_v4 = vld [vmem:[%s9364_s8 + $0x2a8] sm:$0xff]  }
0x171c   : > { %v3796_v14 = vpack.c.bf16 %v3788_v8, %v3788_v8  ;;  %v3921_v15 = vsel %vm1416_vm4, %v3795_v10, 0  ;;  %v3792_v16 = vpack.c.bf16 %v3624_v11, %v3624_v11 }
0x171e   : > { %v3967_v17 = vsel %vm1416_vm4, %v3796_v14, 0 }
0x1727   : > { %v3702_v59 = vpop.f32.mrb[76].mxu1 }
0x1728   : > { %v3703_v53 = vadd.f32 %v6413_v52, %v3702_v59  ;;  %v7263_v55 = vpop.f32.mrb[77].mxu1  ;;  %v7670_v59 = vld [vmem:[%s9364_s8 + $0x220] sm:$0xff]  }
0x1729   : > { %v3705_v62 = vpop.f32.mrb[78].mxu1  ;;  %v7671_v55 = vld [vmem:[%s9364_s8 + $0x1a8] sm:$0xff]  }
0x172a   : > { %v3793_v61 = vpack.c.bf16 %v3703_v53, %v3703_v53  ;;  %v3706_v44 = vadd.f32 %v6413_v52, %v3705_v62  ;;  %v7264_v12 = vpop.f32.mrb[79].mxu1  ;;  %v7673_v62 = vld [vmem:[%s9364_s8 + $0x1b0] sm:$0xff]  }
0x172b   : > { %v7676_v12 = vld [vmem:[%s9364_s8 + $0x238] sm:$0xff]  }
0x172c   : > { %v3801_v7 = vsel %vm1291_vm3, %v3793_v61, 0  ;;  %v3794_v63 = vpack.c.bf16 %v3706_v44, %v3706_v44  ;;  %v7674_v61 = vld [vmem:[%s9364_s8 + $0x230] sm:$0xff]   ;;  %v7675_v44 = vld [vmem:[%s9364_s8 + $0x1b8] sm:$0xff]  }
0x172d   : > { %7278 = vmatpush3.bf16.xpose.msra.mxu1 %v3801_v7  ;;  %v7679_v7 = vld [vmem:[%s9364_s8 + $0x2b0] sm:$0xff]  }
0x172e   : > { %v3847_v58 = vsel %vm1291_vm3, %v3794_v63, 0  ;;  %7289 = vmatprep.subr.bf16.mxu1 %v7912_v9  ;;  %v7680_v63 = vld [vmem:[%s9364_s8 + $0x2b8] sm:$0xff]  }
0x172f   : > { %7284 = vmatpush3.bf16.xpose.msra.mxu0 %v3847_v58 }
0x1730   : > { %7295 = vmatprep.subr.bf16.mxu0 %v7912_v9 }
0x1734   : > { %7280 = vmatmul.mubr.msk.bf16.vlgmr.msra.gmra.mrb[80].mxu1 %vm1291_vm3, %v3791_v13 }
0x1735   : > { %7290 = vmatpush3.bf16.msra.mxu1 %v3921_v15  ;;  %7291 = vmatprep.mubr.msk.bf16.mxu1 %vm7913_vm0, %v7912_v9 }
0x1736   : > { %7286 = vmatmul.mubr.msk.bf16.vlgmr.msra.gmra.mrb[80].mxu0 %vm1291_vm3, %v3792_v16  ;;  %7301 = vmatprep.subr.bf16.mxu1 %v7912_v9 }
0x1737   : > { %7296 = vmatpush3.bf16.msra.mxu0 %v3967_v17  ;;  %7297 = vmatprep.mubr.msk.bf16.mxu0 %vm7913_vm0, %v7912_v9 }
0x1738   : > { %7313 = vmatprep.subr.bf16.mxu0 %v7912_v9 }
0x1807   : > { %v3837_v19 = vpop.f32.mrb[80].mxu1 }
0x1808   : > { %v3889_v20 = vmul.f32 0.25, %v3837_v19  ;;  %v7281_v22 = vpop.f32.mrb[81].mxu1  ;;  %v6464_v19 = vld [vmem:[%s9365_s9 + $0x11] ss:$0 sm:$0xff] }
0x1809   : > { %v3840_v24 = vpop.f32.mrb[82].mxu1  ;;  %v3883_v25 = vpop.f32.mrb[80].mxu0 }
0x180a   : > { %v3890_v26 = vmul.f32 0.25, %v3883_v25  ;;  %v7282_v27 = vpop.f32.mrb[83].mxu1  ;;  %v7287_v2 = vpop.f32.mrb[81].mxu0  ;;  %v3891_v5 = vadd.f32 %v3889_v20, %v8286_v18 }
0x180b   : > { %v3886_v6 = vpop.f32.mrb[82].mxu0 }
0x180c   : > { %v7288_v28 = vpop.f32.mrb[83].mxu0  ;;  %v3893_v29 = vsel %vm1388_vm7, %v3891_v5, -inf  ;;  %v3892_v30 = vadd.f32 %v3890_v26, %v8288_v23 }
0x180d   : > { %3894 = vmax.xlane.f32.xlu1 %v3893_v29  ;;  %v6449_v28 = vld [vmem:[%s9365_s9 + $0xd] ss:$0 sm:$0xff] }
0x180e   : > { %v3896_v31 = vsel %vm1388_vm7, %v3892_v30, -inf }
0x180f   : > { %3897 = vmax.xlane.f32.xlu0 %v3896_v31 }
0x189a   : > { %v3895_v32 = vpop.xlane.xlu1 %3894 }
0x189b   : > { %v3899_v33 = vsub.f32 %v3891_v5, %v3895_v32 }
0x189c   : > { %v3898_v34 = vpop.xlane.xlu0 %3897 }
0x189d   : > { %v3901_v35 = vmul.f32 1.442695, %v3899_v33  ;;  %v3900_v36 = vsub.f32 %v3892_v30, %v3898_v34  ;;  %v6479_v34 = vld [vmem:[%s9365_s9 + $0x15] ss:$0 sm:$0xff] }
0x189f   : > { %7789 = vpow2.f32 %v3901_v35  ;;  %v3903_v37 = vmul.f32 1.442695, %v3900_v36 }
0x18a1   : > { %7791 = vpow2.f32 %v3903_v37 }
0x18a9   : > { %v7790_v40 = vpop.eup %7789 }
0x18aa   : > { %v3905_v38 = vsel %vm1388_vm7, %v7790_v40, 0.0 }
0x18ab   : > { %v7792_v42 = vpop.eup %7791  ;;  %3906 = vadd.xlane.f32.xlu1 %v3905_v38 }
0x18ac   : > { %v3908_v43 = vsel %vm1388_vm7, %v7792_v42, 0.0 }
0x18ad   : > { %3909 = vadd.xlane.f32.xlu0 %v3908_v43 }
0x1938   : > { %v3907_v45 = vpop.xlane.xlu1 %3906 }
0x1939   : > { %7793 = vrcp.f32 %v3907_v45 }
0x193a   : > { %v3910_v46 = vpop.xlane.xlu0 %3909 }
0x193b   : > { %7795 = vrcp.f32 %v3910_v46 }
0x1943   : > { %v7794_v47 = vpop.eup %7793 }
0x1944   : > { %v3912_v48 = vmul.f32 %v7794_v47, %v7790_v40 }
0x1945   : > { %v7796_v49 = vpop.eup %7795 }
0x1946   : > { %v3914_v51 = vmul.f32 %v7796_v49, %v7792_v42  ;;  %v3915_v52 = vpack.c.bf16 %v3912_v48, %v3912_v48 }
0x1948   : > { %7292 = vmatmul.mubr.msk.bf16.vlgmr.msra.gmra.mrb[84].mxu1 %vm1388_vm7, %v3915_v52  ;;  %v3916_v53 = vpack.c.bf16 %v3914_v51, %v3914_v51 }
0x1949   : > { %7302 = vmatpush3.bf16.msra.mxu1 %v7669_v50  ;;  %7309 = vmatprep.mubr.msk.bf16.mxu1 %vm7913_vm0, %v7912_v9 }
0x194a   : > { %7298 = vmatmul.mubr.msk.bf16.vlgmr.msra.gmra.mrb[84].mxu0 %vm1388_vm7, %v3916_v53  ;;  %7303 = vmatprep.subr.bf16.mxu1 %v7912_v9 }
0x194b   : > { %7314 = vmatpush3.bf16.msra.mxu0 %v7670_v59  ;;  %7321 = vmatprep.mubr.msk.bf16.mxu0 %vm7913_vm0, %v7912_v9 }
0x194c   : > { %7315 = vmatprep.subr.bf16.mxu0 %v7912_v9 }
0x194d   : > { %7304 = vmatpush3.bf16.msra.mxu1 %v7671_v55 }
0x194e   : > { %7305 = vmatprep.subr.bf16.mxu1 %v7912_v9 }
0x194f   : > { %7316 = vmatpush3.bf16.msra.mxu0 %v7672_v41 }
0x1950   : > { %7317 = vmatprep.subr.bf16.mxu0 %v7912_v9 }
0x1951   : > { %7306 = vmatpush3.bf16.msra.mxu1 %v7673_v62 }
0x1952   : > { %7307 = vmatprep.subr.bf16.mxu1 %v7912_v9 }
0x1953   : > { %7318 = vmatpush3.bf16.msra.mxu0 %v7674_v61 }
0x1954   : > { %7319 = vmatprep.subr.bf16.mxu0 %v7912_v9 }
0x1955   : > { %7308 = vmatpush3.bf16.msra.mxu1 %v7675_v44 }
0x1956   : > { %7325 = vmatprep.subr.bf16.mxu1 %v7912_v9 }
0x1957   : > { %7320 = vmatpush3.bf16.msra.mxu0 %v7676_v12 }
0x1958   : > { %7310 = vmatmul.mubr.msk.bf16.vlgmr.msra.gmra.mrb[88].mxu1 %vm876_vm2, %v8803_v39  ;;  %7337 = vmatprep.subr.bf16.mxu0 %v7912_v9 }
0x1959   : > { %7326 = vmatpush3.bf16.msra.mxu1 %v7677_v3  ;;  %7333 = vmatprep.mubr.msk.bf16.mxu1 %vm7913_vm0, %v7912_v9 }
0x195a   : > { %7322 = vmatmul.mubr.msk.bf16.vlgmr.msra.gmra.mrb[88].mxu0 %vm876_vm2, %v8803_v39  ;;  %7327 = vmatprep.subr.bf16.mxu1 %v7912_v9 }
0x195b   : > { %7339 = vmatprep.mubr.msk.bf16.mxu0 %vm7913_vm0, %v7912_v9 }
0x195d   : > { %7328 = vmatpush3.bf16.msra.mxu1 %v7678_v4 }
0x195e   : > { %7329 = vmatprep.subr.bf16.mxu1 %v7912_v9 }
0x1961   : > { %7330 = vmatpush3.bf16.msra.mxu1 %v7679_v7 }
0x1962   : > { %7331 = vmatprep.subr.bf16.mxu1 %v7912_v9 }
0x1965   : > { %7332 = vmatpush3.bf16.msra.mxu1 %v7680_v63 }
0x1966   : > { %7349 = vmatprep.subr.bf16.mxu1 %v7912_v9 }
0x1968   : > { %7334 = vmatmul.mubr.msk.bf16.vlgmr.msra.gmra.mrb[92].mxu1 %vm876_vm2, %v8803_v39 }
0x1969   : > { %7351 = vmatprep.mubr.msk.bf16.mxu1 %vm7913_vm0, %v7912_v9 }
0x1a1b   : > { %v8925_v56 = vpop.f32.mrb[84].mxu1 }
0x1a1c   : > { %v7293_v8 = vpop.f32.mrb[85].mxu1 }
0x1a1d   : > { %v3960_v58 = vpop.f32.mrb[86].mxu1  ;;  %v8927_v10 = vpop.f32.mrb[84].mxu0 }
0x1a1e   : > { %v4009_v11 = vpack.c.bf16 %v8927_v10, %v8925_v56  ;;  %v7294_v13 = vpop.f32.mrb[87].mxu1  ;;  %v7299_v14 = vpop.f32.mrb[85].mxu0  ;;  %v7685_v56 = vld [vmem:[%s9364_s8 + $0x258] sm:$0xff]   ;;  %v7686_v10 = vld [vmem:[%s9366_s10 + $0x28] sm:$0xff]  }
0x1a1f   : > { %v4006_v15 = vpop.f32.mrb[86].mxu0 }
0x1a20   : > { %v7300_v16 = vpop.f32.mrb[87].mxu0 }
0x1a2b   : > { %v4088_v17 = vpop.f32.mrb[88].mxu1 }
0x1a2c   : > { %v7311_v20 = vpop.f32.mrb[89].mxu1  ;;  %v4089_v31 = vadd.f32 %v6449_v28, %v4088_v17 }
0x1a2d   : > { %v4091_v22 = vpop.f32.mrb[90].mxu1  ;;  %v4170_v24 = vpop.f32.mrb[88].mxu0 }
0x1a2e   : > { %v4171_v25 = vadd.f32 %v6464_v19, %v4170_v24  ;;  %v7312_v26 = vpop.f32.mrb[91].mxu1  ;;  %v7323_v27 = vpop.f32.mrb[89].mxu0  ;;  %v4259_v33 = vpack.c.bf16 %v4089_v31, %v4089_v31  ;;  %v4092_v37 = vadd.f32 %v6449_v28, %v4091_v22  ;;  %v7681_v28 = vld [vmem:[%s9366_s10 + $0x20] sm:$0xff]   ;;  %v7683_v31 = vld [vmem:[%s9364_s8 + $0x248] sm:$0xff]  }
0x1a2f   : > { %v4173_v2 = vpop.f32.mrb[90].mxu0 }
0x1a30   : > { %v4261_v5 = vpack.c.bf16 %v4171_v25, %v4171_v25  ;;  %v7324_v6 = vpop.f32.mrb[91].mxu0  ;;  %v4174_v30 = vadd.f32 %v6464_v19, %v4173_v2  ;;  %v4260_v47 = vpack.c.bf16 %v4092_v37, %v4092_v37  ;;  %v7687_v37 = vld [vmem:[%s9364_s8 + $0x1c0] sm:$0xff]  }
0x1a32   : > { %v4269_v29 = vsel %vm1291_vm3, %v4261_v5, 0  ;;  %v4262_v32 = vpack.c.bf16 %v4174_v30, %v4174_v30  ;;  %v7682_v30 = vld [vmem:[%s9364_s8 + $0x240] sm:$0xff]  }
0x1a33   : > { %7338 = vmatpush3.bf16.xpose.msra.mxu0 %v4269_v29 }
0x1a34   : > { %7343 = vmatprep.subr.bf16.mxu0 %v7912_v9  ;;  %v4315_v35 = vsel %vm1291_vm3, %v4262_v32, 0  ;;  %v7684_v32 = vld [vmem:[%s9364_s8 + $0x250] sm:$0xff]  }
0x1a3a   : > { %7340 = vmatmul.mubr.msk.bf16.vlgmr.msra.gmra.mrb[92].mxu0 %vm1291_vm3, %v4259_v33 }
0x1a3b   : > { %v4252_v36 = vpop.f32.mrb[92].mxu1  ;;  %7344 = vmatpush3.bf16.xpose.msra.mxu0 %v4315_v35  ;;  %7345 = vmatprep.mubr.msk.bf16.mxu0 %vm7913_vm0, %v7912_v9 }
0x1a3c   : > { %v4253_v40 = vadd.f32 %v6479_v34, %v4252_v36  ;;  %v7335_v38 = vpop.f32.mrb[93].mxu1  ;;  %7355 = vmatprep.subr.bf16.mxu0 %v7912_v9 }
0x1a3d   : > { %v4255_v42 = vpop.f32.mrb[94].mxu1 }
0x1a3e   : > { %v4263_v43 = vpack.c.bf16 %v4253_v40, %v4253_v40  ;;  %v4256_v45 = vadd.f32 %v6479_v34, %v4255_v42  ;;  %v7336_v46 = vpop.f32.mrb[95].mxu1 }
0x1a40   : > { %v4389_v48 = vsel %vm1416_vm4, %v4263_v43, 0  ;;  %v4264_v49 = vpack.c.bf16 %v4256_v45, %v4256_v45  ;;  %v7688_v45 = vld [vmem:[%s9364_s8 + $0x1c8] sm:$0xff]  }
0x1a41   : > { %7350 = vmatpush3.bf16.msra.mxu1 %v4389_v48 }
0x1a42   : > { %v4435_v50 = vsel %vm1416_vm4, %v4264_v49, 0  ;;  %7346 = vmatmul.mubr.msk.bf16.vlgmr.msra.gmra.mrb[96].mxu0 %vm1291_vm3, %v4260_v47  ;;  %7361 = vmatprep.subr.bf16.mxu1 %v7912_v9  ;;  %v7689_v47 = vld [vmem:[%s9364_s8 + $0x1d0] sm:$0xff]  }
0x1a43   : > { %7356 = vmatpush3.bf16.msra.mxu0 %v4435_v50  ;;  %7357 = vmatprep.mubr.msk.bf16.mxu0 %vm7913_vm0, %v7912_v9 }
0x1a44   : > { %7367 = vmatprep.subr.bf16.mxu0 %v7912_v9 }
0x1b0d   : > { %v4305_v51 = vpop.f32.mrb[92].mxu0 }
0x1b0e   : > { %v4357_v52 = vmul.f32 0.25, %v4305_v51  ;;  %v7341_v59 = vpop.f32.mrb[93].mxu0  ;;  %v7690_v51 = vld [vmem:[%s9364_s8 + $0x1d8] sm:$0xff]  }
0x1b0f   : > { %v4308_v53 = vpop.f32.mrb[94].mxu0  ;;  %v7692_v59 = vld [vmem:[%s9364_s8 + $0x2c8] sm:$0xff]  }
0x1b10   : > { %v7342_v55 = vpop.f32.mrb[95].mxu0  ;;  %v4359_v41 = vadd.f32 %v4357_v52, %v8286_v18  ;;  %v7691_v52 = vld [vmem:[%s9364_s8 + $0x2c0] sm:$0xff]   ;;  %v6519_v53 = vld [vmem:[%s9365_s9 + $0x12] ss:$0 sm:$0xff] }
0x1b12   : > { %v4361_v62 = vsel %vm1388_vm7, %v4359_v41, -inf }
0x1b13   : > { %4362 = vmax.xlane.f32.xlu0 %v4361_v62 }
0x1b15   : > { %v4351_v61 = vpop.f32.mrb[96].mxu0 }
0x1b16   : > { %v4358_v44 = vmul.f32 0.25, %v4351_v61  ;;  %v7347_v12 = vpop.f32.mrb[97].mxu0 }
0x1b17   : > { %v4354_v3 = vpop.f32.mrb[98].mxu0 }
0x1b18   : > { %v7348_v4 = vpop.f32.mrb[99].mxu0  ;;  %v4360_v7 = vadd.f32 %v4358_v44, %v8288_v23 }
0x1b1a   : > { %v4364_v63 = vsel %vm1388_vm7, %v4360_v7, -inf }
0x1b1b   : > { %4365 = vmax.xlane.f32.xlu1 %v4364_v63 }
0x1ba0   : > { %v4363_v8 = vpop.xlane.xlu0 %4362 }
0x1ba1   : > { %v4367_v58 = vsub.f32 %v4359_v41, %v4363_v8  ;;  %v7693_v41 = vld [vmem:[%s9364_s8 + $0x2d0] sm:$0xff]  }
0x1ba3   : > { %v4369_v13 = vmul.f32 1.442695, %v4367_v58 }
0x1ba5   : > { %7797 = vpow2.f32 %v4369_v13 }
0x1ba8   : > { %v4366_v14 = vpop.xlane.xlu1 %4365 }
0x1ba9   : > { %v4368_v15 = vsub.f32 %v4360_v7, %v4366_v14  ;;  %v7694_v7 = vld [vmem:[%s9364_s8 + $0x2d8] sm:$0xff]  }
0x1bab   : > { %v4371_v16 = vmul.f32 1.442695, %v4368_v15 }
0x1bad   : > { %7799 = vpow2.f32 %v4371_v16 }
0x1baf   : > { %v7798_v17 = vpop.eup %7797 }
0x1bb0   : > { %v4373_v19 = vsel %vm1388_vm7, %v7798_v17, 0.0 }
0x1bb1   : > { %4374 = vadd.xlane.f32.xlu0 %v4373_v19 }
0x1bb7   : > { %v7800_v20 = vpop.eup %7799 }
0x1bb8   : > { %v4376_v22 = vsel %vm1388_vm7, %v7800_v20, 0.0 }
0x1bb9   : > { %4377 = vadd.xlane.f32.xlu1 %v4376_v22 }
0x1c3e   : > { %v4375_v24 = vpop.xlane.xlu0 %4374 }
0x1c3f   : > { %7801 = vrcp.f32 %v4375_v24 }
0x1c46   : > { %v4378_v25 = vpop.xlane.xlu1 %4377 }
0x1c47   : > { %7803 = vrcp.f32 %v4378_v25 }
0x1c49   : > { %v7802_v26 = vpop.eup %7801 }
0x1c4a   : > { %v4380_v27 = vmul.f32 %v7802_v26, %v7798_v17  ;;  %v6504_v17 = vld [vmem:[%s9365_s9 + $0xe] ss:$0 sm:$0xff] }
0x1c4c   : > { %v4383_v2 = vpack.c.bf16 %v4380_v27, %v4380_v27 }
0x1c4e   : > { %7352 = vmatmul.mubr.msk.bf16.vlgmr.msra.gmra.mrb[96].mxu1 %vm1388_vm7, %v4383_v2 }
0x1c4f   : > { %7363 = vmatprep.mubr.msk.bf16.mxu1 %vm7913_vm0, %v7912_v9  ;;  %7362 = vmatpush3.bf16.msra.mxu1 %v7686_v10 }
0x1c50   : > { %7373 = vmatprep.subr.bf16.mxu1 %v7912_v9 }
0x1c51   : > { %v7804_v5 = vpop.eup %7803 }
0x1c52   : > { %v4382_v6 = vmul.f32 %v7804_v5, %v7800_v20 }
0x1c54   : > { %v4384_v29 = vpack.c.bf16 %v4382_v6, %v4382_v6 }
0x1c56   : > { %7358 = vmatmul.mubr.msk.bf16.vlgmr.msra.gmra.mrb[100].mxu0 %vm1388_vm7, %v4384_v29 }
0x1c57   : > { %7368 = vmatpush3.bf16.msra.mxu0 %v7681_v28  ;;  %7369 = vmatprep.mubr.msk.bf16.mxu0 %vm7913_vm0, %v7912_v9  ;;  %v6534_v28 = vld [vmem:[%s9365_s9 + $0x16] ss:$0 sm:$0xff] }
0x1c58   : > { %7385 = vmatprep.subr.bf16.mxu0 %v7912_v9 }
0x1c5e   : > { %7370 = vmatmul.mubr.msk.bf16.vlgmr.msra.gmra.mrb[104].mxu0 %vm1291_vm3, %v4009_v11 }
0x1c5f   : > { %7386 = vmatpush3.bf16.msra.mxu0 %v7682_v30  ;;  %7393 = vmatprep.mubr.msk.bf16.mxu0 %vm7913_vm0, %v7912_v9 }
0x1c60   : > { %7387 = vmatprep.subr.bf16.mxu0 %v7912_v9 }
0x1c63   : > { %7388 = vmatpush3.bf16.msra.mxu0 %v7683_v31 }
0x1c64   : > { %7389 = vmatprep.subr.bf16.mxu0 %v7912_v9 }
0x1c67   : > { %7390 = vmatpush3.bf16.msra.mxu0 %v7684_v32 }
0x1c68   : > { %7391 = vmatprep.subr.bf16.mxu0 %v7912_v9 }
0x1c6b   : > { %7392 = vmatpush3.bf16.msra.mxu0 %v7685_v56 }
0x1c6c   : > { %7409 = vmatprep.subr.bf16.mxu0 %v7912_v9 }
0x1c6e   : > { %7394 = vmatmul.mubr.msk.bf16.vlgmr.msra.gmra.mrb[108].mxu0 %vm876_vm2, %v8803_v39 }
0x1c6f   : > { %7411 = vmatprep.mubr.msk.bf16.mxu0 %vm7913_vm0, %v7912_v9 }
0x1d21   : > { %v4425_v11 = vpop.f32.mrb[96].mxu1 }
0x1d22   : > { %v7353_v33 = vpop.f32.mrb[97].mxu1 }
0x1d23   : > { %v4428_v34 = vpop.f32.mrb[98].mxu1 }
0x1d24   : > { %v7354_v35 = vpop.f32.mrb[99].mxu1 }
0x1d29   : > { %v4471_v36 = vpop.f32.mrb[100].mxu0 }
0x1d2a   : > { %v4477_v40 = vpack.c.bf16 %v4471_v36, %v4425_v11  ;;  %v7359_v38 = vpop.f32.mrb[101].mxu0 }
0x1d2b   : > { %v4474_v42 = vpop.f32.mrb[102].mxu0 }
0x1d2c   : > { %v7360_v43 = vpop.f32.mrb[103].mxu0  ;;  %7364 = vmatmul.mubr.msk.bf16.vlgmr.msra.gmra.mrb[100].mxu1 %vm1291_vm3, %v4477_v40 }
0x1d2d   : > { %7374 = vmatpush3.bf16.msra.mxu1 %v7687_v37  ;;  %7381 = vmatprep.mubr.msk.bf16.mxu1 %vm7913_vm0, %v7912_v9 }
0x1d2e   : > { %7375 = vmatprep.subr.bf16.mxu1 %v7912_v9 }
0x1d31   : > { %7376 = vmatpush3.bf16.msra.mxu1 %v7688_v45  ;;  %v4574_v46 = vpop.f32.mrb[104].mxu0 }
0x1d32   : > { %v7371_v48 = vpop.f32.mrb[105].mxu0  ;;  %7377 = vmatprep.subr.bf16.mxu1 %v7912_v9 }
0x1d33   : > { %v4577_v49 = vpop.f32.mrb[106].mxu0 }
0x1d34   : > { %v7372_v50 = vpop.f32.mrb[107].mxu0 }
0x1d35   : > { %7378 = vmatpush3.bf16.msra.mxu1 %v7689_v47 }
0x1d36   : > { %7379 = vmatprep.subr.bf16.mxu1 %v7912_v9 }
0x1d39   : > { %7380 = vmatpush3.bf16.msra.mxu1 %v7690_v51 }
0x1d3a   : > { %7397 = vmatprep.subr.bf16.mxu1 %v7912_v9 }
0x1d3c   : > { %7382 = vmatmul.mubr.msk.bf16.vlgmr.msra.gmra.mrb[104].mxu1 %vm876_vm2, %v8803_v39 }
0x1d3d   : > { %7398 = vmatpush3.bf16.msra.mxu1 %v7691_v52  ;;  %7405 = vmatprep.mubr.msk.bf16.mxu1 %vm7913_vm0, %v7912_v9 }
0x1d3e   : > { %7399 = vmatprep.subr.bf16.mxu1 %v7912_v9 }
0x1d41   : > { %v4738_v55 = vpop.f32.mrb[108].mxu0  ;;  %7400 = vmatpush3.bf16.msra.mxu1 %v7692_v59 }
0x1d42   : > { %v4739_v62 = vadd.f32 %v6519_v53, %v4738_v55  ;;  %v7395_v61 = vpop.f32.mrb[109].mxu0  ;;  %7401 = vmatprep.subr.bf16.mxu1 %v7912_v9 }
0x1d43   : > { %v4741_v44 = vpop.f32.mrb[110].mxu0 }
0x1d44   : > { %v4829_v12 = vpack.c.bf16 %v4739_v62, %v4739_v62  ;;  %v4742_v3 = vadd.f32 %v6519_v53, %v4741_v44  ;;  %v7396_v4 = vpop.f32.mrb[111].mxu0 }
0x1d45   : > { %7402 = vmatpush3.bf16.msra.mxu1 %v7693_v41 }
0x1d46   : > { %v4837_v63 = vsel %vm1291_vm3, %v4829_v12, 0  ;;  %7403 = vmatprep.subr.bf16.mxu1 %v7912_v9  ;;  %v4830_v20 = vpack.c.bf16 %v4742_v3, %v4742_v3 }
0x1d47   : > { %7410 = vmatpush3.bf16.xpose.msra.mxu0 %v4837_v63 }
0x1d48   : > { %7415 = vmatprep.subr.bf16.mxu0 %v7912_v9  ;;  %v4883_v2 = vsel %vm1291_vm3, %v4830_v20, 0 }
0x1d49   : > { %7404 = vmatpush3.bf16.msra.mxu1 %v7694_v7 }
0x1d4a   : > { %7421 = vmatprep.subr.bf16.mxu1 %v7912_v9 }
0x1d4c   : > { %7406 = vmatmul.mubr.msk.bf16.vlgmr.msra.gmra.mrb[108].mxu1 %vm876_vm2, %v8803_v39 }
0x1d4d   : > { %7423 = vmatprep.mubr.msk.bf16.mxu1 %vm7913_vm0, %v7912_v9 }
0x1dff   : > { %v4524_v8 = vpop.f32.mrb[100].mxu1 }
0x1e00   : > { %v9048_v58 = vadd.f32 %v4574_v46, %v4524_v8  ;;  %v7365_v13 = vpop.f32.mrb[101].mxu1 }
0x1e01   : > { %v4527_v14 = vpop.f32.mrb[102].mxu1 }
0x1e02   : > { %v9050_v15 = vadd.f32 %v4577_v49, %v4527_v14  ;;  %v7366_v16 = vpop.f32.mrb[103].mxu1 }
0x1e0f   : > { %v4656_v19 = vpop.f32.mrb[104].mxu1 }
0x1e10   : > { %v4657_v22 = vadd.f32 %v6504_v17, %v4656_v19  ;;  %v7383_v24 = vpop.f32.mrb[105].mxu1  ;;  %v7695_v19 = vld [vmem:[%s9364_s8 + $0x1e0] sm:$0xff]  }
0x1e11   : > { %v4659_v25 = vpop.f32.mrb[106].mxu1  ;;  %v7697_v24 = vld [vmem:[%s9364_s8 + $0x1f0] sm:$0xff]  }
0x1e12   : > { %v4827_v26 = vpack.c.bf16 %v4657_v22, %v4657_v22  ;;  %v7384_v27 = vpop.f32.mrb[107].mxu1  ;;  %v4660_v5 = vadd.f32 %v6504_v17, %v4659_v25  ;;  %v7696_v22 = vld [vmem:[%s9364_s8 + $0x1e8] sm:$0xff]   ;;  %v7698_v25 = vld [vmem:[%s9364_s8 + $0x1f8] sm:$0xff]  }
0x1e13   : > { %v7700_v27 = vld [vmem:[%s9364_s8 + $0x2e8] sm:$0xff]  }
0x1e14   : > { %7412 = vmatmul.mubr.msk.bf16.vlgmr.msra.gmra.mrb[112].mxu0 %vm1291_vm3, %v4827_v26  ;;  %v4828_v6 = vpack.c.bf16 %v4660_v5, %v4660_v5  ;;  %v7699_v26 = vld [vmem:[%s9364_s8 + $0x2e0] sm:$0xff]   ;;  %v7702_v5 = vld [vmem:[%s9364_s8 + $0x2f8] sm:$0xff]  }
0x1e15   : > { %7416 = vmatpush3.bf16.xpose.msra.mxu0 %v4883_v2  ;;  %7417 = vmatprep.mubr.msk.bf16.mxu0 %vm7913_vm0, %v7912_v9  ;;  %v7701_v2 = vld [vmem:[%s9364_s8 + $0x2f0] sm:$0xff]  }
0x1e16   : > { %7427 = vmatprep.subr.bf16.mxu0 %v7912_v9 }
0x1e1c   : > { %7418 = vmatmul.mubr.msk.bf16.vlgmr.msra.gmra.mrb[116].mxu0 %vm1291_vm3, %v4828_v6  ;;  %v7703_v6 = vld [vmem:[%s9366_s10 + $0x30] sm:$0xff]  }
0x1e1d   : > { %7429 = vmatprep.mubr.msk.bf16.mxu0 %vm7913_vm0, %v7912_v9 }
0x1e1f   : > { %v4820_v29 = vpop.f32.mrb[108].mxu1 }
0x1e20   : > { %v4821_v30 = vadd.f32 %v6534_v28, %v4820_v29  ;;  %v7407_v31 = vpop.f32.mrb[109].mxu1 }
0x1e21   : > { %v4823_v32 = vpop.f32.mrb[110].mxu1 }
0x1e22   : > { %v4831_v56 = vpack.c.bf16 %v4821_v30, %v4821_v30  ;;  %v4824_v10 = vadd.f32 %v6534_v28, %v4823_v32  ;;  %v7408_v11 = vpop.f32.mrb[111].mxu1 }
0x1e24   : > { %v4957_v33 = vsel %vm1416_vm4, %v4831_v56, 0  ;;  %v4832_v34 = vpack.c.bf16 %v4824_v10, %v4824_v10  ;;  %v7704_v56 = vld [vmem:[%s9364_s8 + $0x260] sm:$0xff]  }
0x1e25   : > { %7422 = vmatpush3.bf16.msra.mxu1 %v4957_v33 }
0x1e26   : > { %v5003_v35 = vsel %vm1416_vm4, %v4832_v34, 0  ;;  %7433 = vmatprep.subr.bf16.mxu1 %v7912_v9 }
0x1e27   : > { %7428 = vmatpush3.bf16.msra.mxu0 %v5003_v35  ;;  %v7705_v35 = vld [vmem:[%s9364_s8 + $0x268] sm:$0xff]  }
0x1e28   : > { %7439 = vmatprep.subr.bf16.mxu0 %v7912_v9 }
0x1ee7   : > { %v4873_v36 = vpop.f32.mrb[112].mxu0 }
0x1ee8   : > { %v4925_v37 = vmul.f32 0.25, %v4873_v36  ;;  %v7413_v40 = vpop.f32.mrb[113].mxu0  ;;  %v7706_v36 = vld [vmem:[%s9364_s8 + $0x270] sm:$0xff]  }
0x1ee9   : > { %v4876_v38 = vpop.f32.mrb[114].mxu0 }
0x1eea   : > { %v7414_v42 = vpop.f32.mrb[115].mxu0  ;;  %v4927_v43 = vadd.f32 %v4925_v37, %v8286_v18  ;;  %v7707_v37 = vld [vmem:[%s9364_s8 + $0x278] sm:$0xff]  }
0x1eec   : > { %v4929_v45 = vsel %vm1388_vm7, %v4927_v43, -inf }
0x1eed   : > { %4930 = vmax.xlane.f32.xlu0 %v4929_v45  ;;  %v6587_v45 = vld [vmem:[%s9365_s9 + $0x17] ss:$0 sm:$0xff] }
0x1eef   : > { %v4919_v46 = vpop.f32.mrb[116].mxu0 }
0x1ef0   : > { %v4926_v47 = vmul.f32 0.25, %v4919_v46  ;;  %v7419_v48 = vpop.f32.mrb[117].mxu0 }
0x1ef1   : > { %v4922_v49 = vpop.f32.mrb[118].mxu0 }
0x1ef2   : > { %v7420_v50 = vpop.f32.mrb[119].mxu0  ;;  %v4928_v51 = vadd.f32 %v4926_v47, %v8288_v23 }
0x1ef4   : > { %v4932_v52 = vsel %vm1388_vm7, %v4928_v51, -inf }
0x1ef5   : > { %4933 = vmax.xlane.f32.xlu1 %v4932_v52 }
0x1f7a   : > { %v4931_v59 = vpop.xlane.xlu0 %4930 }
0x1f7b   : > { %v4935_v53 = vsub.f32 %v4927_v43, %v4931_v59 }
0x1f7d   : > { %v4937_v55 = vmul.f32 1.442695, %v4935_v53 }
0x1f7f   : > { %7805 = vpow2.f32 %v4937_v55 }
0x1f82   : > { %v4934_v41 = vpop.xlane.xlu1 %4933 }
0x1f83   : > { %v4936_v62 = vsub.f32 %v4928_v51, %v4934_v41 }
0x1f85   : > { %v4939_v61 = vmul.f32 1.442695, %v4936_v62 }
0x1f87   : > { %7807 = vpow2.f32 %v4939_v61 }
0x1f89   : > { %v7806_v44 = vpop.eup %7805 }
0x1f8a   : > { %v4941_v12 = vsel %vm1388_vm7, %v7806_v44, 0.0 }
0x1f8b   : > { %4942 = vadd.xlane.f32.xlu0 %v4941_v12 }
0x1f91   : > { %v7808_v3 = vpop.eup %7807 }
0x1f92   : > { %v4944_v4 = vsel %vm1388_vm7, %v7808_v3, 0.0 }
0x1f93   : > { %4945 = vadd.xlane.f32.xlu1 %v4944_v4 }
0x2018   : > { %v4943_v7 = vpop.xlane.xlu0 %4942 }
0x2019   : > { %7809 = vrcp.f32 %v4943_v7 }
0x2020   : > { %v4946_v63 = vpop.xlane.xlu1 %4945 }
0x2021   : > { %7811 = vrcp.f32 %v4946_v63 }
0x2023   : > { %v7810_v8 = vpop.eup %7809 }
0x2024   : > { %v4948_v13 = vmul.f32 %v7810_v8, %v7806_v44  ;;  %v6572_v44 = vld [vmem:[%s9365_s9 + $0x13] ss:$0 sm:$0xff] }
0x2026   : > { %v4951_v14 = vpack.c.bf16 %v4948_v13, %v4948_v13 }
0x2028   : > { %7424 = vmatmul.mubr.msk.bf16.vlgmr.msra.gmra.mrb[112].mxu1 %vm1388_vm7, %v4951_v14 }
0x2029   : > { %7435 = vmatprep.mubr.msk.bf16.mxu1 %vm7913_vm0, %v7912_v9  ;;  %7434 = vmatpush3.bf16.msra.mxu1 %v7703_v6 }
0x202a   : > { %7451 = vmatprep.subr.bf16.mxu1 %v7912_v9 }
0x202b   : > { %v7812_v16 = vpop.eup %7811 }
0x202c   : > { %v4950_v17 = vmul.f32 %v7812_v16, %v7808_v3 }
0x202e   : > { %v4952_v20 = vpack.c.bf16 %v4950_v17, %v4950_v17 }
0x2030   : > { %7430 = vmatmul.mubr.msk.bf16.vlgmr.msra.gmra.mrb[120].mxu0 %vm1388_vm7, %v4952_v20 }
0x2031   : > { %7440 = vmatpush3.bf16.msra.mxu0 %v7695_v19  ;;  %7447 = vmatprep.mubr.msk.bf16.mxu0 %vm7913_vm0, %v7912_v9 }
0x2032   : > { %7441 = vmatprep.subr.bf16.mxu0 %v7912_v9 }
0x2035   : > { %7442 = vmatpush3.bf16.msra.mxu0 %v7696_v22 }
0x2036   : > { %7443 = vmatprep.subr.bf16.mxu0 %v7912_v9 }
0x2039   : > { %7444 = vmatpush3.bf16.msra.mxu0 %v7697_v24 }
0x203a   : > { %7445 = vmatprep.subr.bf16.mxu0 %v7912_v9 }
0x203d   : > { %7446 = vmatpush3.bf16.msra.mxu0 %v7698_v25 }
0x203e   : > { %7463 = vmatprep.subr.bf16.mxu0 %v7912_v9 }
0x2040   : > { %7448 = vmatmul.mubr.msk.bf16.vlgmr.msra.gmra.mrb[124].mxu0 %vm876_vm2, %v8803_v39 }
0x2041   : > { %7464 = vmatpush3.bf16.msra.mxu0 %v7699_v26  ;;  %7471 = vmatprep.mubr.msk.bf16.mxu0 %vm7913_vm0, %v7912_v9 }
0x2042   : > { %7465 = vmatprep.subr.bf16.mxu0 %v7912_v9 }
0x2045   : > { %7466 = vmatpush3.bf16.msra.mxu0 %v7700_v27 }
0x2046   : > { %7467 = vmatprep.subr.bf16.mxu0 %v7912_v9 }
0x2049   : > { %7468 = vmatpush3.bf16.msra.mxu0 %v7701_v2 }
0x204a   : > { %7469 = vmatprep.subr.bf16.mxu0 %v7912_v9 }
0x204d   : > { %7470 = vmatpush3.bf16.msra.mxu0 %v7702_v5 }
0x204e   : > { %7487 = vmatprep.subr.bf16.mxu0 %v7912_v9 }
0x2050   : > { %7472 = vmatmul.mubr.msk.bf16.vlgmr.msra.gmra.mrb[128].mxu0 %vm876_vm2, %v8803_v39 }
0x2051   : > { %7489 = vmatprep.mubr.msk.bf16.mxu0 %vm7913_vm0, %v7912_v9 }
0x20fb   : > { %v4993_v28 = vpop.f32.mrb[112].mxu1 }
0x20fc   : > { %v7425_v29 = vpop.f32.mrb[113].mxu1 }
0x20fd   : > { %v4996_v30 = vpop.f32.mrb[114].mxu1 }
0x20fe   : > { %v7426_v31 = vpop.f32.mrb[115].mxu1 }
0x2103   : > { %v5039_v32 = vpop.f32.mrb[120].mxu0 }
0x2104   : > { %v5045_v10 = vpack.c.bf16 %v5039_v32, %v4993_v28  ;;  %v7431_v11 = vpop.f32.mrb[121].mxu0 }
0x2105   : > { %v5042_v33 = vpop.f32.mrb[122].mxu0 }
0x2106   : > { %v7432_v34 = vpop.f32.mrb[123].mxu0  ;;  %7436 = vmatmul.mubr.msk.bf16.vlgmr.msra.gmra.mrb[116].mxu1 %vm1291_vm3, %v5045_v10 }
0x2107   : > { %7452 = vmatpush3.bf16.msra.mxu1 %v7704_v56  ;;  %7459 = vmatprep.mubr.msk.bf16.mxu1 %vm7913_vm0, %v7912_v9 }
0x2108   : > { %7453 = vmatprep.subr.bf16.mxu1 %v7912_v9 }
0x210b   : > { %7454 = vmatpush3.bf16.msra.mxu1 %v7705_v35 }
0x210c   : > { %7455 = vmatprep.subr.bf16.mxu1 %v7912_v9 }
0x210f   : > { %7456 = vmatpush3.bf16.msra.mxu1 %v7706_v36 }
0x2110   : > { %7457 = vmatprep.subr.bf16.mxu1 %v7912_v9 }
0x2113   : > { %v5176_v40 = vpop.f32.mrb[124].mxu0  ;;  %7458 = vmatpush3.bf16.msra.mxu1 %v7707_v37 }
0x2114   : > { %v7449_v38 = vpop.f32.mrb[125].mxu0  ;;  %7475 = vmatprep.subr.bf16.mxu1 %v7912_v9 }
0x2115   : > { %v5179_v42 = vpop.f32.mrb[126].mxu0 }
0x2116   : > { %v7450_v43 = vpop.f32.mrb[127].mxu0  ;;  %7460 = vmatmul.mubr.msk.bf16.vlgmr.msra.gmra.mrb[120].mxu1 %vm876_vm2, %v8803_v39 }
0x2117   : > { %7477 = vmatprep.mubr.msk.bf16.mxu1 %vm7913_vm0, %v7912_v9 }
0x2123   : > { %v5340_v46 = vpop.f32.mrb[128].mxu0 }
0x2124   : > { %v5341_v47 = vadd.f32 %v6587_v45, %v5340_v46  ;;  %v7473_v48 = vpop.f32.mrb[129].mxu0 }
0x2125   : > { %v5343_v49 = vpop.f32.mrb[130].mxu0 }
0x2126   : > { %v5351_v50 = vpack.c.bf16 %v5341_v47, %v5341_v47  ;;  %v5344_v51 = vadd.f32 %v6587_v45, %v5343_v49  ;;  %v7474_v52 = vpop.f32.mrb[131].mxu0 }
0x2128   : > { %v5477_v59 = vsel %vm1416_vm4, %v5351_v50, 0  ;;  %v5352_v22 = vpack.c.bf16 %v5344_v51, %v5344_v51 }
0x2129   : > { %7488 = vmatpush3.bf16.msra.mxu0 %v5477_v59  ;;  %v7708_v59 = vld [vmem:[%s9366_s10 + $0x38] sm:$0xff]  }
0x212a   : > { %7499 = vmatprep.subr.bf16.mxu0 %v7912_v9  ;;  %v5523_v25 = vsel %vm1416_vm4, %v5352_v22, 0 }
0x21d9   : > { %v5092_v39 = vpop.f32.mrb[116].mxu1 }
0x21da   : > { %v9155_v53 = vadd.f32 %v5092_v39, %v9048_v58  ;;  %v7437_v55 = vpop.f32.mrb[117].mxu1  ;;  %v6557_v58 = vld [vmem:[%s9365_s9 + $0xf] ss:$0 sm:$0xff] }
0x21db   : > { %v5095_v41 = vpop.f32.mrb[118].mxu1  ;;  %v5180_v20 = vadd.f32 %v6557_v58, %v5179_v42 }
0x21dc   : > { %v9158_v62 = vadd.f32 %v5095_v41, %v9050_v15  ;;  %v7438_v61 = vpop.f32.mrb[119].mxu1  ;;  %v5177_v15 = vadd.f32 %v6557_v58, %v5176_v40 }
0x21dd   : > { %v5348_v24 = vpack.c.bf16 %v5180_v20, %v5180_v20 }
0x21de   : > { %v5347_v17 = vpack.c.bf16 %v5177_v15, %v5177_v15 }
0x21e9   : > { %v5258_v12 = vpop.f32.mrb[120].mxu1 }
0x21ea   : > { %v5259_v3 = vadd.f32 %v6572_v44, %v5258_v12  ;;  %v7461_v4 = vpop.f32.mrb[121].mxu1 }
0x21eb   : > { %v5261_v7 = vpop.f32.mrb[122].mxu1 }
0x21ec   : > { %v5349_v63 = vpack.c.bf16 %v5259_v3, %v5259_v3  ;;  %v7462_v8 = vpop.f32.mrb[123].mxu1  ;;  %v5262_v14 = vadd.f32 %v6572_v44, %v5261_v7 }
0x21ed   : > { %v6602_v8 = vld [vmem:[%s9367_s11 + $0x1] ss:$0 sm:$0xff] }
0x21ee   : > { %v5357_v13 = vsel %vm1291_vm3, %v5349_v63, 0  ;;  %v5350_v16 = vpack.c.bf16 %v5262_v14, %v5262_v14 }
0x21ef   : > { %7476 = vmatpush3.bf16.xpose.msra.mxu1 %v5357_v13 }
0x21f0   : > { %7481 = vmatprep.subr.bf16.mxu1 %v7912_v9  ;;  %v5403_v19 = vsel %vm1291_vm3, %v5350_v16, 0 }
0x21f6   : > { %7478 = vmatmul.mubr.msk.bf16.vlgmr.msra.gmra.mrb[124].mxu1 %vm1291_vm3, %v5347_v17 }
0x21f7   : > { %7482 = vmatpush3.bf16.xpose.msra.mxu1 %v5403_v19  ;;  %7483 = vmatprep.mubr.msk.bf16.mxu1 %vm7913_vm0, %v7912_v9 }
0x21f8   : > { %7493 = vmatprep.subr.bf16.mxu1 %v7912_v9 }
0x21fe   : > { %7484 = vmatmul.mubr.msk.bf16.vlgmr.msra.gmra.mrb[128].mxu1 %vm1291_vm3, %v5348_v24 }
0x21ff   : > { %7494 = vmatpush3.bf16.msra.mxu1 %v5523_v25  ;;  %7495 = vmatprep.mubr.msk.bf16.mxu1 %vm7913_vm0, %v7912_v9 }
0x22c9   : > { %v5393_v26 = vpop.f32.mrb[124].mxu1 }
0x22ca   : > { %v5445_v27 = vmul.f32 0.25, %v5393_v26  ;;  %v7479_v2 = vpop.f32.mrb[125].mxu1 }
0x22cb   : > { %v5396_v5 = vpop.f32.mrb[126].mxu1 }
0x22cc   : > { %v7480_v6 = vpop.f32.mrb[127].mxu1  ;;  %v5447_v28 = vadd.f32 %v5445_v27, %v8286_v18 }
0x22cd   : > { %v7711_v6 = vld [vmem:[%s9370_s14 + $0x44] ss:$8 sps:$4 sm:$0xff]  }
0x22ce   : > { %v5449_v29 = vsel %vm1388_vm7, %v5447_v28, -inf  ;;  %5745 = vmatprep.subr.bf16.mxu1 %v7711_v6 }
0x22cf   : > { %5450 = vmax.xlane.f32.xlu0 %v5449_v29  ;;  %v7714_v29 = vld [vmem:[%s9370_s14 + $0x54] ss:$8 sps:$4 sm:$0xff]  }
0x22d1   : > { %v5439_v30 = vpop.f32.mrb[128].mxu1 }
0x22d2   : > { %v5446_v31 = vmul.f32 0.25, %v5439_v30  ;;  %v7485_v32 = vpop.f32.mrb[129].mxu1  ;;  %v7712_v30 = vld [vmem:[%s9370_s14 + $0x50] ss:$8 sps:$4 sm:$0xff]  }
0x22d3   : > { %v5442_v56 = vpop.f32.mrb[130].mxu1  ;;  %v7715_v32 = vld [vmem:[%s9370_s14 + $0x60] ss:$8 sps:$4 sm:$0xff]  }
0x22d4   : > { %v7486_v10 = vpop.f32.mrb[131].mxu1  ;;  %v5448_v11 = vadd.f32 %v5446_v31, %v8288_v23  ;;  %v7717_v31 = vld [vmem:[%s9370_s14 + $0x64] ss:$8 sps:$4 sm:$0xff]   ;;  %v7718_v56 = vld [vmem:[%s9370_s14 + $0x70] ss:$8 sps:$4 sm:$0xff]  }
0x22d5   : > { %v7720_v10 = vld [vmem:[%s9370_s14 + $0x74] ss:$8 sps:$4 sm:$0xff]  }
0x22d6   : > { %v5452_v33 = vsel %vm1388_vm7, %v5448_v11, -inf }
0x22d7   : > { %5453 = vmax.xlane.f32.xlu1 %v5452_v33 }
0x235c   : > { %v5451_v34 = vpop.xlane.xlu0 %5450 }
0x235d   : > { %v5455_v35 = vsub.f32 %v5447_v28, %v5451_v34  ;;  %v7709_v28 = vld [vmem:[%s9370_s14 + $0x40] ss:$8 sps:$4 sm:$0xff]  }
0x235f   : > { %v5457_v36 = vmul.f32 1.442695, %v5455_v35 }
0x2361   : > { %7813 = vpow2.f32 %v5457_v36 }
0x2364   : > { %v5454_v37 = vpop.xlane.xlu1 %5453 }
0x2365   : > { %v5456_v40 = vsub.f32 %v5448_v11, %v5454_v37 }
0x2367   : > { %v5459_v18 = vmul.f32 1.442695, %v5456_v40 }
0x2369   : > { %7815 = vpow2.f32 %v5459_v18  ;;  %v6605_v18 = vld [vmem:[%s9397_s30 + $0x1] ss:$0 sm:$0xff] }
0x236b   : > { %v7814_v38 = vpop.eup %7813 }
0x236c   : > { %v5461_v42 = vsel %vm1388_vm7, %v7814_v38, 0.0 }
0x236d   : > { %5462 = vadd.xlane.f32.xlu0 %v5461_v42 }
0x2373   : > { %v7816_v43 = vpop.eup %7815 }
0x2374   : > { %v5464_v45 = vsel %vm1388_vm7, %v7816_v43, 0.0 }
0x2375   : > { %5465 = vadd.xlane.f32.xlu1 %v5464_v45 }
0x23fa   : > { %v5463_v23 = vpop.xlane.xlu0 %5462 }
0x23fb   : > { %7817 = vrcp.f32 %v5463_v23  ;;  %v6606_v23 = vld [vmem:[%s9369_s13 + $0x1] ss:$0 sm:$0xff] }
0x2402   : > { %v5466_v46 = vpop.xlane.xlu1 %5465 }
0x2403   : > { %7819 = vrcp.f32 %v5466_v46 }
0x2405   : > { %v7818_v47 = vpop.eup %7817 }
0x2406   : > { %v5468_v48 = vmul.f32 %v7818_v47, %v7814_v38 }
0x2408   : > { %v5471_v49 = vpack.c.bf16 %v5468_v48, %v5468_v48 }
0x240a   : > { %7490 = vmatmul.mubr.msk.bf16.vlgmr.msra.gmra.mrb[132].mxu0 %vm1388_vm7, %v5471_v49 }
0x240b   : > { %7501 = vmatprep.mubr.msk.bf16.mxu0 %vm7913_vm0, %v7912_v9  ;;  %7500 = vmatpush3.bf16.msra.mxu0 %v7708_v59  ;;  %v7724_v59 = vld [vmem:[%s9372_s16 + $0x88] sm:$0xff]  }
0x240d   : > { %v7820_v50 = vpop.eup %7819 }
0x240e   : > { %v5470_v51 = vmul.f32 %v7820_v50, %v7816_v43  ;;  %v7721_v50 = vld [vmem:[%s9372_s16 + $0xc0] sm:$0xff]  }
0x240f   : > { %6935 = vmatprep.subr.bf16.mxu0 %v7721_v50 }
0x2410   : > { %v5472_v52 = vpack.c.bf16 %v5470_v51, %v5470_v51  ;;  %v7722_v51 = vld [vmem:[%s9372_s16 + $0x80] sm:$0xff]  }
0x2412   : > { %7496 = vmatmul.mubr.msk.bf16.vlgmr.msra.gmra.mrb[132].mxu1 %vm1388_vm7, %v5472_v52  ;;  %v7723_v52 = vld [vmem:[%s9372_s16 + $0xc8] sm:$0xff]  }
0x2413   : > { %5777 = vmatprep.mubr.bf16.mxu1 %v7915_v21  ;;  %5746 = vmatpush1.bf16.msra.mxu1 %v7709_v28 }
0x2414   : > { %5747 = vmatprep.subr.bf16.mxu1 %v7714_v29 }
0x2417   : > { %5748 = vmatpush1.bf16.msra.mxu1 %v7712_v30 }
0x2418   : > { %5749 = vmatprep.subr.bf16.mxu1 %v7717_v31 }
0x241b   : > { %5750 = vmatpush1.bf16.msra.mxu1 %v7715_v32 }
0x241c   : > { %5751 = vmatprep.subr.bf16.mxu1 %v7720_v10 }
0x241f   : > { %5752 = vmatpush1.bf16.msra.mxu1 %v7718_v56 }
0x24dd   : > { %v5513_v39 = vpop.f32.mrb[132].mxu0 }
0x24de   : > { %v7491_v55 = vpop.f32.mrb[133].mxu0 }
0x24df   : > { %v5516_v41 = vpop.f32.mrb[134].mxu0  ;;  %v7726_v55 = vld [vmem:[%s9372_s16 + $0x90] sm:$0xff]  }
0x24e0   : > { %v7492_v61 = vpop.f32.mrb[135].mxu0  ;;  %v7727_v41 = vld [vmem:[%s9372_s16 + $0xd8] sm:$0xff]  }
0x24e1   : > { %v7728_v61 = vld [vmem:[%s9372_s16 + $0x98] sm:$0xff]  }
0x24e5   : > { %v5559_v44 = vpop.f32.mrb[132].mxu1 }
0x24e6   : > { %v5565_v12 = vpack.c.bf16 %v5559_v44, %v5513_v39  ;;  %v7497_v3 = vpop.f32.mrb[133].mxu1  ;;  %v7725_v39 = vld [vmem:[%s9372_s16 + $0xd0] sm:$0xff]   ;;  %v7729_v44 = vld [vmem:[%s9372_s16 + $0xe0] sm:$0xff]  }
0x24e7   : > { %v5562_v9 = vpop.f32.mrb[134].mxu1  ;;  %v7731_v3 = vld [vmem:[%s9372_s16 + $0xe8] sm:$0xff]  }
0x24e8   : > { %v7498_v4 = vpop.f32.mrb[135].mxu1  ;;  %7502 = vmatmul.mubr.msk.bf16.vlgmr.msra.gmra.mrb[136].mxu0 %vm1291_vm3, %v5565_v12  ;;  %v7730_v12 = vld [vmem:[%s9372_s16 + $0xa0] sm:$0xff]   ;;  %v7732_v9 = vld [vmem:[%s9372_s16 + $0xa8] sm:$0xff]  }
0x24e9   : > { %6936 = vmatpush3.bf16.msra.mxu0 %v7722_v51  ;;  %v7733_v4 = vld [vmem:[%s9372_s16 + $0xf0] sm:$0xff]  }
0x24ea   : > { %6937 = vmatprep.subr.bf16.mxu0 %v7723_v52 }
0x24ed   : > { %6938 = vmatpush3.bf16.msra.mxu0 %v7724_v59 }
0x24ee   : > { %6939 = vmatprep.subr.bf16.mxu0 %v7725_v39  ;;  %v6658_v39 = vld [vmem:[%s9373_s17 + $0x1] ss:$0 sm:$0xff] }
0x24f1   : > { %6940 = vmatpush3.bf16.msra.mxu0 %v7726_v55 }
0x24f2   : > { %6941 = vmatprep.subr.bf16.mxu0 %v7727_v41 }
0x24f5   : > { %6942 = vmatpush3.bf16.msra.mxu0 %v7728_v61 }
0x24f6   : > { %6943 = vmatprep.subr.bf16.mxu0 %v7729_v44 }
0x24f9   : > { %6944 = vmatpush3.bf16.msra.mxu0 %v7730_v12 }
0x24fa   : > { %6945 = vmatprep.subr.bf16.mxu0 %v7731_v3 }
0x24fd   : > { %6946 = vmatpush3.bf16.msra.mxu0 %v7732_v9 }
0x24fe   : > { %6947 = vmatprep.subr.bf16.mxu0 %v7733_v4 }
0x25bb   : > { %v5612_v7 = vpop.f32.mrb[136].mxu0 }
0x25bc   : > { %v5619_v63 = vadd.f32 %v5612_v7, %v9155_v53  ;;  %v7503_v21 = vpop.f32.mrb[137].mxu0  ;;  %v7734_v7 = vld [vmem:[%s9372_s16 + $0xb0] sm:$0xff]  }
0x25bd   : > { %v5615_v58 = vpop.f32.mrb[138].mxu0  ;;  %6948 = vmatpush3.bf16.msra.mxu0 %v7734_v7  ;;  %v7736_v21 = vld [vmem:[%s9372_s16 + $0xb8] sm:$0xff]  }
0x25be   : > { %v5621_v13 = vadd.f32 %v5619_v63, %v8749_v60  ;;  %v5620_v14 = vadd.f32 %v5615_v58, %v9158_v62  ;;  %v7504_v15 = vpop.f32.mrb[139].mxu0  ;;  %v7735_v63 = vld [vmem:[%s9372_s16 + $0xf8] sm:$0xff]  }
0x25bf   : > { %6949 = vmatprep.subr.bf16.mxu0 %v7735_v63 }
0x25c0   : > { %v9198_v16 = vadd.f32 %v6602_v8, %v5621_v13  ;;  %v5622_v17 = vadd.f32 %v5620_v14, %v8752_v1 }
0x25c1   : > { %6950 = vmatpush3.bf16.msra.mxu0 %v7736_v21 }
0x25c2   : > { %v9201_v19 = vadd.f32 %v6602_v8, %v5622_v17  ;;  %v5637_v53 = vsel %vm876_vm2, %v9198_v16, 0.0  ;;  %v6615_v8 = vld [vmem:[%s9371_s15 + $0x2] sm:$0x3] }
0x25c3   : > { %5638 = vadd.xlane.f32.xlu0 %v5637_v53  ;;  %v5695_v58 = vrot.slane %v6615_v8, %v3185_v0  ;;  %v5699_v13 = vrot.slane %v6615_v8, %v3189_v57 }
0x25c4   : > { %v5640_v20 = vsel %vm876_vm2, %v9201_v19, 0.0 }
0x25c5   : > { %5641 = vadd.xlane.f32.xlu1 %v5640_v20 }
0x2650   : > { %v5639_v22 = vpop.xlane.xlu0 %5638 }
0x2651   : > { %v5643_v24 = vmul.f32 0.015625, %v5639_v22 }
0x2652   : > { %v5642_v60 = vpop.xlane.xlu1 %5641 }
0x2653   : > { %v5645_v62 = vsub.f32 %v9198_v16, %v5643_v24  ;;  %v5644_v25 = vmul.f32 0.015625, %v5642_v60 }
0x2655   : > { %v5646_v26 = vsub.f32 %v9201_v19, %v5644_v25  ;;  %v5647_v27 = vmul.f32 %v5645_v62, %v5645_v62 }
0x2657   : > { %v5649_v1 = vsel %vm876_vm2, %v5647_v27, 0.0  ;;  %v5648_v2 = vmul.f32 %v5646_v26, %v5646_v26 }
0x2658   : > { %5650 = vadd.xlane.f32.xlu0 %v5649_v1 }
0x2659   : > { %v5652_v5 = vsel %vm876_vm2, %v5648_v2, 0.0 }
0x265a   : > { %5653 = vadd.xlane.f32.xlu1 %v5652_v5 }
0x26e5   : > { %v5651_v11 = vpop.xlane.xlu0 %5650 }
0x26e6   : > { %v5655_v33 = vmul.f32 0.015625, %v5651_v11 }
0x26e7   : > { %v5654_v34 = vpop.xlane.xlu1 %5653 }
0x26e8   : > { %v5657_v35 = vadd.f32 1e-05, %v5655_v33  ;;  %v5656_v36 = vmul.f32 0.015625, %v5654_v34 }
0x26ea   : > { %7821 = vrsqrt.f32 %v5657_v35  ;;  %v5658_v37 = vadd.f32 1e-05, %v5656_v36 }
0x26ec   : > { %7823 = vrsqrt.f32 %v5658_v37 }
0x26f4   : > { %v7822_v40 = vpop.eup %7821 }
0x26f5   : > { %v5661_v38 = vmul.f32 %v7822_v40, %v5645_v62 }
0x26f6   : > { %v7824_v42 = vpop.eup %7823 }
0x26f7   : > { %v5669_v43 = vmul.f32 %v6605_v18, %v5661_v38  ;;  %v5662_v45 = vmul.f32 %v7824_v42, %v5646_v26 }
0x26f9   : > { %v5670_v46 = vmul.f32 %v6605_v18, %v5662_v45  ;;  %v5677_v47 = vadd.f32 %v6606_v23, %v5669_v43 }
0x26fb   : > { %v5678_v48 = vadd.f32 %v6606_v23, %v5670_v46 }
0x26fd   : > { %v5679_v49 = vpack.c.bf16 %v5678_v48, %v5677_v47 }
0x26ff   : > { %6624 = vmatmul.mubr.msk.bf16.vlgmr.msra.gmra.mrb[136].mxu1 %vm876_vm2, %v5679_v49 }
0x27d2   : > { %v5779_v14 = vpop.f32.mrb[136].mxu1 }
0x27d3   : > { %v5780_v15 = vadd.f32 %v5779_v14, %v5695_v58  ;;  %v5781_v17 = vpop.f32.mrb[137].mxu1 }
0x27d4   : > { %v5782_v53 = vadd.f32 %v5781_v17, %v5699_v13  ;;  %v5783_v20 = vpop.f32.mrb[138].mxu1 }
0x27d5   : > { %v5788_v22 = vmul.f32 %v5780_v15, %v5780_v15  ;;  %v5784_v24 = vadd.f32 %v5783_v20, %v5695_v58  ;;  %v5785_v60 = vpop.f32.mrb[139].mxu1 }
0x27d6   : > { %v5789_v62 = vmul.f32 %v5782_v53, %v5782_v53  ;;  %v5786_v25 = vadd.f32 %v5785_v60, %v5699_v13 }
0x27d7   : > { %v5792_v26 = vmul.f32 %v5788_v22, %v5780_v15  ;;  %v5790_v27 = vmul.f32 %v5784_v24, %v5784_v24 }
0x27d8   : > { %v5793_v1 = vmul.f32 %v5789_v62, %v5782_v53  ;;  %v5791_v2 = vmul.f32 %v5786_v25, %v5786_v25 }
0x27d9   : > { %v5796_v5 = vmul.f32 0.044715, %v5792_v26  ;;  %v5794_v6 = vmul.f32 %v5790_v27, %v5784_v24 }
0x27da   : > { %v5797_v0 = vmul.f32 0.044715, %v5793_v1  ;;  %v5795_v28 = vmul.f32 %v5791_v2, %v5786_v25 }
0x27db   : > { %v5800_v54 = vadd.f32 %v5796_v5, %v5780_v15  ;;  %v5798_v57 = vmul.f32 0.044715, %v5794_v6 }
0x27dc   : > { %v5801_v29 = vadd.f32 %v5797_v0, %v5782_v53  ;;  %v5799_v30 = vmul.f32 0.044715, %v5795_v28 }
0x27dd   : > { %v5804_v31 = vmul.f32 0.7978846, %v5800_v54  ;;  %v5802_v32 = vadd.f32 %v5798_v57, %v5784_v24 }
0x27de   : > { %v5805_v56 = vmul.f32 0.7978846, %v5801_v29  ;;  %v5803_v10 = vadd.f32 %v5799_v30, %v5786_v25 }
0x27df   : > { %7825 = vtanh.f32 %v5804_v31  ;;  %v5806_v11 = vmul.f32 0.7978846, %v5802_v32 }
0x27e0   : > { %7827 = vtanh.f32 %v5805_v56  ;;  %v5807_v33 = vmul.f32 0.7978846, %v5803_v10 }
0x27e1   : > { %7829 = vtanh.f32 %v5806_v11 }
0x27e2   : > { %7831 = vtanh.f32 %v5807_v33 }
0x27e9   : > { %v7826_v34 = vpop.eup %7825 }
0x27ea   : > { %v7828_v35 = vpop.eup %7827  ;;  %v5812_v36 = vadd.f32 1.0, %v7826_v34 }
0x27eb   : > { %v7830_v37 = vpop.eup %7829  ;;  %v5813_v40 = vadd.f32 1.0, %v7828_v35 }
0x27ec   : > { %v7832_v18 = vpop.eup %7831  ;;  %v5816_v38 = vmul.f32 0.5, %v5812_v36  ;;  %v5814_v42 = vadd.f32 1.0, %v7830_v37 }
0x27ed   : > { %v5815_v43 = vadd.f32 1.0, %v7832_v18  ;;  %v5817_v45 = vmul.f32 0.5, %v5813_v40 }
0x27ee   : > { %v5818_v23 = vmul.f32 0.5, %v5814_v42  ;;  %v5820_v47 = vmul.f32 %v5816_v38, %v5780_v15 }
0x27ef   : > { %v5819_v46 = vmul.f32 0.5, %v5815_v43  ;;  %v5821_v49 = vmul.f32 %v5817_v45, %v5782_v53 }
0x27f0   : > { %v5822_v48 = vmul.f32 %v5818_v23, %v5784_v24 }
0x27f1   : > { %v5823_v50 = vmul.f32 %v5819_v46, %v5786_v25 }
0x27f2   : > { %v5824_v51 = vpack.c.bf16 %v5822_v48, %v5820_v47 }
0x27f3   : > { %v5825_v52 = vpack.c.bf16 %v5823_v50, %v5821_v49 }
0x27f5   : > { %5995 = vmatprep.mubr.bf16.mxu0 %v5825_v52 }
0x27f6   : > { %5996 = vmatmul.mubr.bf16.vlgmr.msra.gmra.mrb[140].mxu0 %v5824_v51 }
0x28c9   : > { %v6951_v59 = vpop.f32.mrb[140].mxu0 }
0x28ca   : > { %v6952_v55 = vpop.f32.mrb[141].mxu0 }
0x28cb   : > { %v6953_v41 = vadd.f32 %v6952_v55, %v6951_v59  ;;  %v6954_v61 = vpop.f32.mrb[142].mxu0 }
0x28cc   : > { %v6955_v44 = vpop.f32.mrb[143].mxu0 }
0x28cd   : > { %v5998_v12 = vadd.f32 %v6953_v41, %v6658_v39  ;;  %v6956_v3 = vadd.f32 %v6955_v44, %v6954_v61 }
0x28cf   : > { %v6004_v9 = vadd.f32 %v5998_v12, %v9198_v16  ;;  %v6001_v4 = vadd.f32 %v6956_v3, %v6658_v39 }
0x28d1   : > { %6006 = vst.msk [vmem:[%s641_s2] sm:$0xff] %vm876_vm2, %v6004_v9  ;;  %v6005_v7 = vadd.f32 %v6001_v4, %v9201_v19 }
0x28d3   : > { %6007 = vst.msk [vmem:[%s641_s2 + $0x8] sm:$0xff] %vm876_vm2, %v6005_v7 }
0x28d4   : > { %7858 = shalt.err (!%p7855_p3)
}
0x28d5   : > { %s7859_s2 = scalar_lea.hbm %s9309_s29, 256  ;;  %s7863_s26 = scalar_lea.hbm %s9374_s18, 512 }
0x28d6   : > { %p7860_p4 = scmp.ne.s32.totalorder %s9309_s29, %s7859_s2  ;;  %p7864_p7 = scmp.lt.u32.totalorder %s9309_s29, %s9374_s18 }
0x28d7   : > { %p7865_p8 = scmp.lt.u32.totalorder %s7863_s26, %s7859_s2  ;;  %p7867_p10 = scmp.lt.u32.totalorder %s7859_s2, %s9309_s29 }
0x28d8   : > { %p7861_p5 = pnand %p7860_p4, %p8061_p11 }
0x28d9   : > { %p7866_p9 = por %p7865_p8, %p7864_p7 }
0x28da   : > { %p7862_p6 = pneg %p7861_p5 }
0x28db   : > { %p7868_p12 = por %p7867_p10, %p7866_p9 }
0x28dd   : > { %p7869_p1 = pnand %p7868_p12, %p7862_p6 }
0x28df   : > { %7872 = shalt.err (!%p7869_p1)
}
0x28e0   : > { %s7917_s23 = smov 128   ;;  %s7918_s22 = smov 256  }
0x28e1   : > { %s7919_s12 = smov 8   ;;  %s9399_s19 = scalar_lea.sflag [#allocation7], %s8099_s28 }
0x28e2   : > { %7508 = dma.vmem_to_hbm [thread:$0]  (%p8061_p11), %s9304_s3, 256, %s9309_s29, %s9399_s19, %s7917_s23, %s7918_s22, %s7919_s12  }
0x28e3 PF: > { %s9400_s25 = sld [smem:[#allocation10_spill]]  ;;  %p7511_p2 = pnand %p6109_p0, %p8065_p13 }
0x28e9   : > { %s6036_s26 = sand.u32 1, %s9400_s25  }
0x28ea   : > { %s6037_s2 = scalar_lea.sflag [#allocation7], %s6036_s26 }
0x28eb   : > { %7892 = dma.done.wait (!%p7511_p2), %s6037_s2, 256  }
0x28ec   : > { %7894 = vsyncadd (!%p7511_p2), %s6037_s2, 4294967040  ;;  %s9402_s21 = sld [smem:[#allocation11_spill]]  ;;  %s9403_s0 = sld [smem:[#allocation12_spill]] }
0x28ed   : > { %s9404_s19 = smov %s7901_s1  ;;  %s9405_s1 = smov %s7905_s20 }
0x28f2   : > { %p34_p3 = scmp.ge.s32.totalorder %s9402_s21, 4   ;;  %s9406_s20 = smov %s9403_s0 }
0x28f4   :  { %36 = sbr.rel (!%p34_p3) target bundleno = 25 (0x19), region = 259 }
0x28fb   :  { %6042 = vsyncpa [#allocation7], 1 }
0x28fc   :  { %6044 = vsyncpa [#allocation7 + $0x1], 1 }

// kernel: tpu_custom_call.1
= control target key start
LH: loop header
LB: loop body
LE: loop exit
PB: predicated region body
PF: predicated region fallthrough
CT: control target
= control target key end

     0   :  { %s9356_s0 = inlined_call_operand.vmem [shape: s32[2], index: 0, kind: input, shape index: {}]   ;;  %s9357_s1 = inlined_call_operand.vmem [shape: f32[2,2,8,320], index: 1, kind: input, shape index: {}]   ;;  %s9358_s2 = inlined_call_operand.vmem [shape: f32[2,2,8,32], index: 2, kind: input, shape index: {}]   ;;  %s9359_s3 = inlined_call_operand.vmem [shape: bf16[320,64], index: 3, kind: input, shape index: {}]   ;;  %s9360_s4 = inlined_call_operand.vmem [shape: bf16[32,64], index: 4, kind: input, shape index: {}]   ;;  %s9361_s5 = inlined_call_operand.vmem [shape: f32[1,64], index: 5, kind: input, shape index: {}]   ;;  %s9362_s6 = inlined_call_operand.vmem [shape: f32[2,1,64], index: 6, kind: input, shape index: {}]   ;;  %s9363_s7 = inlined_call_operand.vmem [shape: f32[2,1,64], index: 7, kind: input, shape index: {}]   ;;  %s9364_s8 = inlined_call_operand.vmem [shape: bf16[24,64,16], index: 8, kind: input, shape index: {}]   ;;  %s9365_s9 = inlined_call_operand.vmem [shape: f32[24,1,16], index: 9, kind: input, shape index: {}]   ;;  %s9366_s10 = inlined_call_operand.vmem [shape: bf16[8,16,64], index: 10, kind: input, shape index: {}]   ;;  %s9367_s11 = inlined_call_operand.vmem [shape: f32[2,1,64], index: 11, kind: input, shape index: {}]   ;;  %s9368_s12 = inlined_call_operand.vmem [shape: f32[2,1,64], index: 12, kind: input, shape index: {}]   ;;  %s9369_s13 = inlined_call_operand.vmem [shape: f32[2,1,64], index: 13, kind: input, shape index: {}]   ;;  %s9370_s14 = inlined_call_operand.vmem [shape: bf16[2,64,256], index: 14, kind: input, shape index: {}]   ;;  %s9371_s15 = inlined_call_operand.vmem [shape: f32[2,1,256], index: 15, kind: input, shape index: {}]   ;;  %s9372_s16 = inlined_call_operand.vmem [shape: bf16[2,256,64], index: 16, kind: input, shape index: {}]   ;;  %s9373_s17 = inlined_call_operand.vmem [shape: f32[2,1,64], index: 17, kind: input, shape index: {}]   ;;  %s9374_s18 = inlined_call_operand.hbm [shape: f32[2,2,8,64], index: 18, kind: output, shape index: {}]  }
   0x1   :  { %9381 = sst [smem:[#allocation14_spill]] %s9356_s0 }
   0x2   :  { %9382 = sst [smem:[#allocation15_spill]] %s9357_s1  ;;  %s9386_s29 = sld [smem:[#allocation14_spill]] }
   0x3   :  { %9383 = sst [smem:[#allocation16_spill]] %s9358_s2 }
   0x4   :  { %9384 = sst [smem:[#allocation17_spill]] %s9359_s3 }
   0x5   :  { %9385 = sst [smem:[#allocation18_spill]] %s9368_s12 }
   0x8   :  { %s23_s12 = sshll.u32 %s9386_s29, 4  ;;  %s24_s12 = int_to_ptr.vmem [resolvable:$true] %s23_s12 }
   0x9   :  { %s7833_s30 = scalar_lea.vmem %s24_s12, 16  ;;  %p7838_p1 = scmp.lt.s32.totalorder %s24_s12, %s24_s12 }
   0xa   :  { %p7834_p0 = scmp.ne.s32.totalorder %s24_s12, %s7833_s30  ;;  %p7839_p2 = scmp.lt.s32.totalorder %s7833_s30, %s7833_s30 }
   0xc   :  { %p7840_p3 = por %p7839_p2, %p7838_p1 }
   0xe   :  { %p7841_p4 = pnand %p7840_p3, %p7834_p0 }
  0x10   :  { %7844 = shalt.err (!%p7841_p4)  }
  0x11   :  { %s7911_s0 = smov [#allocation3]  }
  0x12   :  { %26 = dma.vmem_to_smem %s24_s12, 16, %s7911_s0, [#allocation2] }
  0x13   :  { %7889 = dma.done.wait [#allocation2], 16 }
  0x14   :  { %7890 = vsyncadd [#allocation2], 4294967280 }
  0x15   :  { %28 = sfence }
  0x16   :  { %29 = vsyncpa [#allocation7], 0 }
  0x17   :  { %31 = vsyncpa [#allocation7 + $0x1], 0  ;;  %s8018_s19 = smov 0   ;;  %s8020_s1 = smov 0  }
  0x18   :  { %s8022_s20 = smov 0   ;;  %s8024_s21 = smov 0  }
  0x19 LB: > { %9387 = sst [smem:[#allocation10_spill]] %s7897_s19  ;;  %s8039_s12 = sadd.s32 4294967295, %s7909_s21   ;;  %s7909_s21 = sphi %s8024_s21, %s9402_s21   ;;  %s7905_s20 = sphi %s8022_s20, %s9406_s20   ;;  %s7901_s1 = sphi %s8020_s1, %s9405_s1   ;;  %s7897_s19 = sphi %s8018_s19, %s9404_s19  }
  0x1a   : > { %s6107_s22 = sadd.s32 4294967294, %s7909_s21   ;;  %s8043_s2 = sadd.s32 1, %s7909_s21  }
  0x1b   : > { %9388 = sst [smem:[#allocation11_spill]] %s8043_s2  ;;  %s44_s23 = sadd.s32 1, %s7905_s20 }
  0x1c   : > { %s41_s24 = ssub.s32 %s7909_s21, %s8043_s2  ;;  %p51_p5 = scmp.ne.s32.totalorder %s7905_s20, %s7901_s1 }
  0x1d   : > { %p42_p6 = scmp.eq.s32.totalorder %s41_s24, 0  ;;  %p52_p7 = scmp.eq.s32.totalorder %s7909_s21, 0 }
  0x1e   : > { %p422_p8 = scmp.eq.s32.totalorder %s8039_s12, 1  ;;  %p427_p9 = scmp.ne.s32.totalorder %s7901_s1, %s7897_s19 }
  0x1f   : > { %s8055_s25 = scalar_select %p42_p6, %s7905_s20, %s44_s23  }
  0x20   : > { %p8057_p10 = por %p52_p7, %p51_p5  ;;  %p8061_p11 = por %p422_p8, %p51_p5 }
  0x21   : > { %9389 = sst [smem:[#allocation12_spill]] %s8055_s25  ;;  %p428_p12 = scmp.eq.s32.totalorder %s6107_s22, 1 }
  0x22   : > { %p6109_p0 = scmp.ge.s32.totalorder %s7909_s21, 2 }
  0x23   : > { %p8065_p13 = por %p428_p12, %p427_p9 }
  0x24   : > { %489 = sbr.rel (%p6109_p0) target bundleno = 66 (0x42), region = 76 }
  0x25   : > { %s9392_s28 = scalar_select %p8065_p13, 1, 0 }
  0x27   : > { %9393 = sst [smem:[#allocation13_spill]] %s9392_s28 }
  0x2b   : > { %492 = sbr.rel (!%p8057_p10) target bundleno = 55 (0x37), region = 80  ;;  %s494_s29 = sand.u32 (%p8057_p10), 1, %s7905_s20  }
  0x2c   : > { %s7506_s30 = smul.u32 (%p8057_p10), 24, %s7909_s21  ;;  %s9394_s22 = sld [smem:[#allocation15_spill]] (%p8057_p10) }
  0x2d   : > { %s7505_s0 = smul.u32 (%p8057_p10), 48, %s494_s29 }
  0x2f   : > { %s496_s2 = scalar_lea.vmem (%p8057_p10), [#allocation4], %s7505_s0 }
  0x32   : > { %s499_s25 = scalar_lea.vmem %s9394_s22, %s7506_s30 }
  0x33   : > { %v512_v0 = vld [vmem:[%s499_s25] sm:$0xff]  ;;  %v514_v1 = vld [vmem:[%s499_s25 + $0x8] sm:$0xff]  ;;  %v516_v2 = vld [vmem:[%s499_s25 + $0x10] sm:$0xff] }
  0x34   : > { %513 = vst [vmem:[%s496_s2] sm:$0xff] %v512_v0  ;;  %515 = vst [vmem:[%s496_s2 + $0x8] sm:$0xff] %v514_v1  ;;  %v518_v3 = vld [vmem:[%s499_s25 + $0x30] sm:$0xff]  ;;  %v520_v4 = vld [vmem:[%s499_s25 + $0x38] sm:$0xff] }
  0x35   : > { %517 = vst [vmem:[%s496_s2 + $0x10] sm:$0xff] %v516_v2  ;;  %v522_v5 = vld [vmem:[%s499_s25 + $0x40] sm:$0xff]  ;;  %519 = vst [vmem:[%s496_s2 + $0x18] sm:$0xff] %v518_v3 }
  0x36   : > { %521 = vst [vmem:[%s496_s2 + $0x20] sm:$0xff] %v520_v4  ;;  %523 = vst [vmem:[%s496_s2 + $0x28] sm:$0xff] %v522_v5 }
  0x37 PF: > { %529 = sbr.rel (!%p8057_p10) target bundleno = 66 (0x42), region = 103  ;;  %s531_s29 = sand.u32 (%p8057_p10), 1, %s7905_s20  }
  0x38   : > { %s6112_s30 = sshll.u32 (%p8057_p10), %s7909_s21, 3  ;;  %s6111_s23 = sshll.u32 (%p8057_p10), %s531_s29, 4 }
  0x39   : > { %s9395_s22 = sld [smem:[#allocation16_spill]] (%p8057_p10)  ;;  %s533_s19 = scalar_lea.vmem (%p8057_p10), [#allocation5], %s6111_s23 }
  0x3f   : > { %s535_s28 = scalar_lea.vmem %s9395_s22, %s6112_s30 }
  0x40   : > { %v565_v6 = vld [vmem:[%s535_s28] sm:$0xff]  ;;  %v567_v7 = vld [vmem:[%s535_s28 + $0x10] sm:$0xff] }
  0x41   : > { %566 = vst [vmem:[%s533_s19] sm:$0xff] %v565_v6  ;;  %568 = vst [vmem:[%s533_s19 + $0x8] sm:$0xff] %v567_v7 }
  0x42 PF: > { %p6113_p1 = scmp.ge.s32.totalorder %s7909_s21, 1  ;;  %p573_p2 = scmp.lt.s32.totalorder %s7909_s21, 3 }
  0x44   : > { %p574_p3 = pnand %p6113_p1, %p573_p2 }
  0x45   : > { %v7555_v8 = vld [vmem:[%s9360_s4] sm:$0xff] (!%p574_p3)   ;;  %v7912_v9 = vmov (!%p574_p3), 0.0   ;;  %v7556_v10 = vld [vmem:[%s9360_s4 + $0x8] sm:$0xff] (!%p574_p3)   ;;  %vm7913_vm0 = vmmov (!%p574_p3), 0   ;;  %s8099_s28 = sand.u32 (!%p574_p3), 1, %s7901_s1   ;;  %s9396_s3 = sld [smem:[#allocation17_spill]] (!%p574_p3) }
  0x46   : > { %577 = sbr.rel (%p574_p3) target bundleno = 10467 (0x28e3), region = 141  ;;  %6957 = vmatprep.subr.bf16.mxu1 (!%p574_p3), %v7912_v9  ;;  %6965 = vmatprep.subr.bf16.mxu0 (!%p574_p3), %v7912_v9  ;;  %s9380_s29 = sshll.u32 (!%p574_p3), %s8099_s28, 4  ;;  %vm711_vm1 = vcmask (!%p574_p3), 261120   ;;  %vm876_vm2 = vcmask (!%p574_p3), 523264   ;;  %v6140_v58 = vld [vmem:[%s9361_s5] ss:$0 sm:$0xff] (!%p574_p3) }
  0x47   : > { %6958 = vmatpush3.bf16.msra.mxu1 (!%p574_p3), %v7555_v8  ;;  %6961 = vmatprep.mubr.msk.bf16.mxu1 (!%p574_p3), %vm7913_vm0, %v7912_v9  ;;  %s589_s24 = scalar_lea.vmem (!%p574_p3), [#allocation5], %s9380_s29  ;;  %s7507_s19 = smul.u32 (!%p574_p3), 48, %s8099_s28  ;;  %vm1291_vm3 = vcmask (!%p574_p3), 130048   ;;  %vm1416_vm4 = vcmask (!%p574_p3), 1043456   ;;  %vm1388_vm7 = vcmask (!%p574_p3), 64512  }
  0x48   : > { %6959 = vmatprep.subr.bf16.mxu1 (!%p574_p3), %v7912_v9  ;;  %6973 = vmatprep.mubr.msk.bf16.mxu0 (!%p574_p3), %vm7913_vm0, %v7912_v9  ;;  %v652_v12 = vld [vmem:[%s589_s24] sm:$0xff] (!%p574_p3)  ;;  %v653_v13 = vld [vmem:[%s589_s24 + $0x8] sm:$0xff] (!%p574_p3)  ;;  %s973_s23 = sld [smem:[#allocation3]] (!%p574_p3)  ;;  %s6147_s24 = sld [smem:[#allocation3 + $0x1]] (!%p574_p3) }
  0x49   : > { %v654_v14 = vpack.c.bf16 (!%p574_p3), %v653_v13, %v652_v12  ;;  %s582_s30 = scalar_lea.vmem (!%p574_p3), [#allocation4], %s7507_s19  ;;  %v7577_v13 = vld [vmem:[%s9364_s8] sm:$0xff] (!%p574_p3)   ;;  %s6141_s0 = sshll.u32 (!%p574_p3), %s8039_s12, 3 }
  0x4a   : > { %v644_v27 = vld [vmem:[%s582_s30 + $0x8] sm:$0xff] (!%p574_p3)  ;;  %v647_v28 = vld [vmem:[%s582_s30 + $0x20] sm:$0xff] (!%p574_p3)  ;;  %v645_v33 = vld [vmem:[%s582_s30 + $0x10] sm:$0xff] (!%p574_p3)  ;;  %s6676_s19 = sshll.u32 (!%p574_p3), %s8039_s12, 7 }
  0x4b   : > { %v7557_v11 = vld [vmem:[%s9396_s3 + $0x40] sm:$0xff] (!%p574_p3)   ;;  %6960 = vmatpush3.bf16.msra.mxu1 (!%p574_p3), %v7556_v10  ;;  %v7559_v16 = vld [vmem:[%s9396_s3 + $0x48] sm:$0xff] (!%p574_p3)   ;;  %v7561_v18 = vld [vmem:[%s9396_s3 + $0x50] sm:$0xff] (!%p574_p3)   ;;  %v650_v30 = vpack.c.bf16 (!%p574_p3), %v647_v28, %v644_v27  ;;  %s9309_s29 = scalar_lea.hbm (!%p574_p3), %s9374_s18, %s6676_s19 }
  0x4c   : > { %v7558_v15 = vld [vmem:[%s9396_s3] sm:$0xff] (!%p574_p3)   ;;  %6686 = vmatprep.subr.bf16.mxu1 (!%p574_p3), %v7557_v11  ;;  %v7560_v17 = vld [vmem:[%s9396_s3 + $0x8] sm:$0xff] (!%p574_p3)   ;;  %v7562_v20 = vld [vmem:[%s9396_s3 + $0x10] sm:$0xff] (!%p574_p3)  }
  0x4d   : > { %v7567_v19 = vld [vmem:[%s9396_s3 + $0x80] sm:$0xff]   ;;  %v7563_v21 = vld [vmem:[%s9396_s3 + $0x58] sm:$0xff]   ;;  %v7570_v22 = vld [vmem:[%s9396_s3 + $0x88] sm:$0xff]  }
  0x4e   : > { %6962 = vmatmul.mubr.msk.bf16.vlgmr.msra.gmra.mrb[0].mxu1 %vm711_vm1, %v654_v14  ;;  %6966 = vmatpush3.bf16.msra.mxu0 %v7567_v19  ;;  %v7564_v23 = vld [vmem:[%s9396_s3 + $0x18] sm:$0xff]   ;;  %v7565_v24 = vld [vmem:[%s9396_s3 + $0x60] sm:$0xff]   ;;  %v7573_v25 = vld [vmem:[%s9396_s3 + $0x90] sm:$0xff]   ;;  %s975_s22 = ssub.s32 %s973_s23, %s6141_s0 }
  0x4f   : > { %6687 = vmatpush3.bf16.msra.mxu1 %v7558_v15  ;;  %6967 = vmatprep.subr.bf16.mxu0 %v7912_v9  ;;  %v7566_v26 = vld [vmem:[%s9396_s3 + $0x20] sm:$0xff]   ;;  %v7568_v29 = vld [vmem:[%s9396_s3 + $0x68] sm:$0xff]   ;;  %v7576_v31 = vld [vmem:[%s9396_s3 + $0x98] sm:$0xff]   ;;  %p976_p4 = scmp.gt.s32.totalorder %s975_s22, 0  ;;  %p6142_p6 = scmp.lt.s32.totalorder %s975_s22, 8 }
  0x50   : > { %6688 = vmatprep.subr.bf16.mxu1 %v7559_v16  ;;  %v7569_v32 = vld [vmem:[%s9396_s3 + $0x28] sm:$0xff]   ;;  %v7571_v35 = vld [vmem:[%s9396_s3 + $0x70] sm:$0xff]   ;;  %912 = vmatprep.mubr.bf16.mxu1 %v650_v30  ;;  %v7574_v38 = vld [vmem:[%s9396_s3 + $0x78] sm:$0xff]  }
  0x51   : > { %v648_v34 = vld [vmem:[%s582_s30 + $0x28] sm:$0xff]  ;;  %v7572_v37 = vld [vmem:[%s9396_s3 + $0x30] sm:$0xff]   ;;  %v646_v41 = vld [vmem:[%s582_s30 + $0x18] sm:$0xff]  ;;  %s977_s2 = scalar_select %p976_p4, %s975_s22, 0 }
  0x52   : > { %6968 = vmatpush3.bf16.msra.mxu0 %v7570_v22  ;;  %v651_v36 = vpack.c.bf16 %v648_v34, %v645_v33  ;;  %v7575_v39 = vld [vmem:[%s9396_s3 + $0x38] sm:$0xff]   ;;  %v643_v40 = vld [vmem:[%s582_s30] sm:$0xff]  ;;  %v7579_v15 = vld [vmem:[%s9364_s8 + $0x8] sm:$0xff]   ;;  %s982_s30 = ssub.s32 %s6147_s24, %s6141_s0  ;;  %s9398_s22 = sshll.u32 %s8099_s28, 4 }
  0x53   : > { %6689 = vmatpush3.bf16.msra.mxu1 %v7560_v17  ;;  %6969 = vmatprep.subr.bf16.mxu0 %v7912_v9  ;;  %v649_v42 = vpack.c.bf16 %v646_v41, %v643_v40  ;;  %v7578_v14 = vld [vmem:[%s9364_s8 + $0x80] sm:$0xff]   ;;  %v7580_v16 = vld [vmem:[%s9364_s8 + $0x88] sm:$0xff]   ;;  %v7581_v17 = vld [vmem:[%s9364_s8 + $0x10] sm:$0xff]   ;;  %p983_p5 = scmp.gt.s32.totalorder %s982_s30, 0  ;;  %p6148_p7 = scmp.lt.s32.totalorder %s982_s30, 8 }
  0x54   : > { %6690 = vmatprep.subr.bf16.mxu1 %v7561_v18  ;;  %v7582_v18 = vld [vmem:[%s9364_s8 + $0x90] sm:$0xff]   ;;  %v7583_v19 = vld [vmem:[%s9364_s8 + $0x18] sm:$0xff]   ;;  %v6154_v33 = vld [vmem:[%s9363_s7] ss:$0 sm:$0xff]  ;;  %s9410_s2 = smov (!%p6142_p6, %s977_s2), 8  ;;  %s7916_s24 = smov [#allocation6]  }
  0x55   : > { %v7587_v40 = vld [vmem:[%s9364_s8 + $0x110] sm:$0xff]   ;;  %v7588_v41 = vld [vmem:[%s9364_s8 + $0x118] sm:$0xff]   ;;  %s9408_s30 = smov (!%p983_p5, %s982_s30), 0  ;;  %s7849_s0 = sshll.u32 %s7916_s24, 4  ;;  %s7850_s0 = int_to_ptr.vmem [resolvable:$false] %s7849_s0 }
  0x56   : > { %6970 = vmatpush3.bf16.msra.mxu0 %v7573_v25  ;;  %s9412_s30 = smov (!%p6148_p7, %s9408_s30), 8 }
  0x57   : > { %6691 = vmatpush3.bf16.msra.mxu1 %v7562_v20  ;;  %6971 = vmatprep.subr.bf16.mxu0 %v7912_v9  ;;  %v7584_v20 = vld [vmem:[%s9364_s8 + $0x98] sm:$0xff]  }
  0x58   : > { %6692 = vmatprep.subr.bf16.mxu1 %v7563_v21 }
  0x5a   : > { %6972 = vmatpush3.bf16.msra.mxu0 %v7576_v31 }
  0x5b   : > { %6693 = vmatpush3.bf16.msra.mxu1 %v7564_v23  ;;  %6977 = vmatprep.subr.bf16.mxu0 %v7912_v9 }
  0x5c   : > { %6694 = vmatprep.subr.bf16.mxu1 %v7565_v24 }
  0x5d   : > { %6974 = vmatmul.mubr.msk.bf16.vlgmr.msra.gmra.mrb[0].mxu0 %vm876_vm2, %v651_v36 }
  0x5e   : > { %6985 = vmatprep.mubr.msk.bf16.mxu0 %vm7913_vm0, %v7912_v9  ;;  %6978 = vmatpush3.bf16.msra.mxu0 %v7577_v13 }
  0x5f   : > { %6695 = vmatpush3.bf16.msra.mxu1 %v7566_v26  ;;  %6979 = vmatprep.subr.bf16.mxu0 %v7912_v9 }
  0x60   : > { %6696 = vmatprep.subr.bf16.mxu1 %v7568_v29  ;;  %v6153_v29 = vld [vmem:[%s9362_s6] ss:$0 sm:$0xff] }
  0x62   : > { %6980 = vmatpush3.bf16.msra.mxu0 %v7579_v15  ;;  %v987_v15 = vstv %s9412_s30  ;;  %s9397_s30 = sld [smem:[#allocation18_spill]] }
  0x63   : > { %6697 = vmatpush3.bf16.msra.mxu1 %v7569_v32  ;;  %6981 = vmatprep.subr.bf16.mxu0 %v7912_v9 }
  0x64   : > { %6698 = vmatprep.subr.bf16.mxu1 %v7571_v35 }
  0x66   : > { %6982 = vmatpush3.bf16.msra.mxu0 %v7581_v17  ;;  %v7914_v17 = vmov -1e+30  }
  0x67   : > { %6699 = vmatpush3.bf16.msra.mxu1 %v7572_v37  ;;  %6983 = vmatprep.subr.bf16.mxu0 %v7912_v9  ;;  %v7585_v37 = vld [vmem:[%s9364_s8 + $0x100] sm:$0xff]  }
  0x68   : > { %6700 = vmatprep.subr.bf16.mxu1 %v7574_v38 }
  0x6a   : > { %6984 = vmatpush3.bf16.msra.mxu0 %v7583_v19 }
  0x6b   : > { %6701 = vmatpush3.bf16.msra.mxu1 %v7575_v39  ;;  %7001 = vmatprep.subr.bf16.mxu0 %v7912_v9  ;;  %v7586_v39 = vld [vmem:[%s9364_s8 + $0x108] sm:$0xff]  }
  0x6c   : > { %6989 = vmatprep.subr.bf16.mxu1 %v7912_v9 }
  0x6e   : > { %913 = vmatmul.mubr.bf16.vlgmr.msra.gmra.mrb[4].mxu1 %v649_v42  ;;  %v6170_v42 = vld [vmem:[%s9365_s9 + $0x4] ss:$0 sm:$0xff] }
  0x6f   : > { %6997 = vmatprep.mubr.msk.bf16.mxu1 %vm7913_vm0, %v7912_v9  ;;  %6990 = vmatpush3.bf16.msra.mxu1 %v7578_v14  ;;  %v980_v14 = vstv %s9410_s2  ;;  %s641_s2 = scalar_lea.vmem [#allocation6], %s9398_s22  ;;  %s7851_s22 = scalar_lea.vmem %s7850_s0, 512 }
  0x70   : > { %6991 = vmatprep.subr.bf16.mxu1 %v7912_v9  ;;  %s6021_s3 = sshll.u32 %s641_s2, 4  ;;  %s9304_s3 = int_to_ptr.vmem [resolvable:$true] %s6021_s3 }
  0x71   : > { %s7845_s23 = scalar_lea.vmem %s9304_s3, 256  ;;  %p7852_p12 = scmp.lt.s32.totalorder %s9304_s3, %s7850_s0 }
  0x72   : > { %p7846_p8 = scmp.ne.s32.totalorder %s9304_s3, %s7845_s23  ;;  %p7853_p1 = scmp.lt.s32.totalorder %s7851_s22, %s7845_s23 }
  0x73   : > { %6992 = vmatpush3.bf16.msra.mxu1 %v7580_v16 }
  0x74   : > { %6993 = vmatprep.subr.bf16.mxu1 %v7912_v9  ;;  %p7847_p9 = pnand %p7846_p8, %p8061_p11  ;;  %p7854_p2 = por %p7853_p1, %p7852_p12 }
  0x76   : > { %p7848_p10 = pneg %p7847_p9 }
  0x77   : > { %6994 = vmatpush3.bf16.msra.mxu1 %v7582_v18 }
  0x78   : > { %6995 = vmatprep.subr.bf16.mxu1 %v7912_v9  ;;  %p7855_p3 = pnand %p7854_p2, %p7848_p10 }
  0x7b   : > { %6996 = vmatpush3.bf16.msra.mxu1 %v7584_v20 }
  0x7c   : > { %7013 = vmatprep.subr.bf16.mxu1 %v7912_v9 }
 0x121   : > { %v749_v43 = vpop.f32.mrb[0].mxu1 }
 0x122   : > { %v6963_v44 = vpop.f32.mrb[1].mxu1 }
 0x123   : > { %v752_v45 = vpop.f32.mrb[2].mxu1 }
 0x124   : > { %v6964_v46 = vpop.f32.mrb[3].mxu1 }
 0x130   : > { %v955_v47 = vpop.f32.mrb[0].mxu0 }
 0x131   : > { %v6975_v48 = vpop.f32.mrb[1].mxu0 }
 0x132   : > { %v958_v49 = vpop.f32.mrb[2].mxu0 }
 0x133   : > { %v6976_v50 = vpop.f32.mrb[3].mxu0 }
 0x141   : > { %v6702_v51 = vpop.f32.mrb[4].mxu1 }
 0x142   : > { %v6703_v52 = vpop.f32.mrb[5].mxu1 }
 0x143   : > { %v6704_v53 = vadd.f32 %v6703_v52, %v6702_v51  ;;  %v6705_v54 = vpop.f32.mrb[6].mxu1 }
 0x144   : > { %v6706_v55 = vpop.f32.mrb[7].mxu1 }
 0x145   : > { %v915_v56 = vadd.f32 %v6704_v53, %v749_v43  ;;  %v6707_v57 = vadd.f32 %v6706_v55, %v6705_v54  ;;  %v6155_v54 = vld [vmem:[%s9365_s9] ss:$0 sm:$0xff] }
 0x147   : > { %v956_v59 = vadd.f32 %v955_v47, %v915_v56  ;;  %v918_v60 = vadd.f32 %v6707_v57, %v752_v45 }
 0x149   : > { %v8181_v61 = vadd.f32 %v6140_v58, %v956_v59  ;;  %v959_v62 = vadd.f32 %v958_v49, %v918_v60 }
 0x14b   : > { %v8183_v63 = vadd.f32 %v6140_v58, %v959_v62  ;;  %v994_v0 = vsel %vm876_vm2, %v8181_v61, 0.0 }
 0x14c   : > { %995 = vadd.xlane.f32.xlu0 %v994_v0  ;;  %v6185_v0 = vld [vmem:[%s9365_s9 + $0x8] ss:$0 sm:$0xff] }
 0x14d   : > { %v997_v1 = vsel %vm876_vm2, %v8183_v63, 0.0 }
 0x150   : > { %998 = vadd.xlane.f32.xlu0 %v997_v1 }
 0x1d9   : > { %v996_v2 = vpop.xlane.xlu0 %995 }
 0x1da   : > { %v1001_v3 = vmul.f32 0.015625, %v996_v2 }
 0x1dc   : > { %v1003_v4 = vsub.f32 %v8181_v61, %v1001_v3 }
 0x1dd   : > { %v999_v5 = vpop.xlane.xlu0 %998 }
 0x1de   : > { %v1002_v6 = vmul.f32 0.015625, %v999_v5  ;;  %v1005_v7 = vmul.f32 %v1003_v4, %v1003_v4 }
 0x1e0   : > { %v1004_v8 = vsub.f32 %v8183_v63, %v1002_v6  ;;  %v1007_v10 = vsel %vm876_vm2, %v1005_v7, 0.0 }
 0x1e1   : > { %1008 = vadd.xlane.f32.xlu1 %v1007_v10 }
 0x1e2   : > { %v1006_v11 = vmul.f32 %v1004_v8, %v1004_v8 }
 0x1e4   : > { %v1010_v12 = vsel %vm876_vm2, %v1006_v11, 0.0 }
 0x1e5   : > { %1011 = vadd.xlane.f32.xlu1 %v1010_v12  ;;  %v971_v12 = vlaneseq }
 0x1e7   : > { %v972_v13 = vand.u32 127, %v971_v12 }
 0x1e9   : > { %vm988_vm5 = vcmp.lt.s32.totalorder %v972_v13, %v980_v14  ;;  %vm989_vm6 = vcmp.lt.s32.totalorder %v972_v13, %v987_v15  ;;  %v6219_v14 = vld [vmem:[%s9365_s9 + $0x5] ss:$0 sm:$0xff] }
 0x1ea   : > { %v8286_v18 = vsel %vm988_vm5, 0.0, %v7914_v17 }
 0x26e   : > { %v1009_v21 = vpop.xlane.xlu1 %1008 }
 0x26f   : > { %v1013_v22 = vmul.f32 0.015625, %v1009_v21 }
 0x271   : > { %v1015_v23 = vadd.f32 1e-05, %v1013_v22 }
 0x272   : > { %v1012_v24 = vpop.xlane.xlu1 %1011 }
 0x273   : > { %7737 = vrsqrt.f32 %v1015_v23  ;;  %v1014_v25 = vmul.f32 0.015625, %v1012_v24  ;;  %v8288_v23 = vsel %vm989_vm6, 0.0, %v7914_v17 }
 0x275   : > { %v1016_v26 = vadd.f32 1e-05, %v1014_v25 }
 0x277   : > { %7739 = vrsqrt.f32 %v1016_v26 }
 0x27d   : > { %v7738_v27 = vpop.eup %7737 }
 0x27e   : > { %v1019_v28 = vmul.f32 %v7738_v27, %v1003_v4 }
 0x280   : > { %v1027_v31 = vmul.f32 %v6153_v29, %v1019_v28 }
 0x281   : > { %v7740_v30 = vpop.eup %7739 }
 0x282   : > { %v1020_v32 = vmul.f32 %v7740_v30, %v1004_v8  ;;  %v1035_v35 = vadd.f32 %v6154_v33, %v1027_v31 }
 0x284   : > { %v1028_v34 = vmul.f32 %v6153_v29, %v1020_v32 }
 0x286   : > { %v1036_v36 = vadd.f32 %v6154_v33, %v1028_v34 }
 0x288   : > { %v8234_v38 = vpack.c.bf16 %v1036_v36, %v1035_v35 }
 0x28a   : > { %6986 = vmatmul.mubr.msk.bf16.vlgmr.msra.gmra.mrb[4].mxu0 %vm876_vm2, %v8234_v38  ;;  %6998 = vmatmul.mubr.msk.bf16.vlgmr.msra.gmra.mrb[8].mxu1 %vm876_vm2, %v8234_v38 }
 0x28b   : > { %7002 = vmatpush3.bf16.msra.mxu0 %v7585_v37  ;;  %7009 = vmatprep.mubr.msk.bf16.mxu0 %vm7913_vm0, %v7912_v9 }
 0x28c   : > { %7003 = vmatprep.subr.bf16.mxu0 %v7912_v9  ;;  %7015 = vmatprep.mubr.msk.bf16.mxu1 %vm7913_vm0, %v7912_v9 }
 0x28f   : > { %7004 = vmatpush3.bf16.msra.mxu0 %v7586_v39 }
 0x290   : > { %7005 = vmatprep.subr.bf16.mxu0 %v7912_v9 }
 0x293   : > { %7006 = vmatpush3.bf16.msra.mxu0 %v7587_v40 }
 0x294   : > { %7007 = vmatprep.subr.bf16.mxu0 %v7912_v9 }
 0x297   : > { %7008 = vmatpush3.bf16.msra.mxu0 %v7588_v41 }
 0x298   : > { %7019 = vmatprep.subr.bf16.mxu0 %v7912_v9 }
 0x29a   : > { %7010 = vmatmul.mubr.msk.bf16.vlgmr.msra.gmra.mrb[8].mxu0 %vm876_vm2, %v8234_v38 }
 0x29b   : > { %7021 = vmatprep.mubr.msk.bf16.mxu0 %vm7913_vm0, %v7912_v9 }
 0x35d   : > { %v1114_v43 = vpop.f32.mrb[4].mxu0  ;;  %v1196_v44 = vpop.f32.mrb[8].mxu1 }
 0x35e   : > { %v1197_v45 = vadd.f32 %v6170_v42, %v1196_v44  ;;  %v6987_v46 = vpop.f32.mrb[5].mxu0  ;;  %v6999_v47 = vpop.f32.mrb[9].mxu1  ;;  %v1115_v57 = vadd.f32 %v6155_v54, %v1114_v43 }
 0x35f   : > { %v1117_v48 = vpop.f32.mrb[6].mxu0  ;;  %v1199_v49 = vpop.f32.mrb[10].mxu1 }
 0x360   : > { %v1287_v50 = vpack.c.bf16 %v1197_v45, %v1197_v45  ;;  %v1200_v51 = vadd.f32 %v6170_v42, %v1199_v49  ;;  %v6988_v52 = vpop.f32.mrb[7].mxu0  ;;  %v7000_v53 = vpop.f32.mrb[11].mxu1  ;;  %v1118_v59 = vadd.f32 %v6155_v54, %v1117_v48  ;;  %v1285_v60 = vpack.c.bf16 %v1115_v57, %v1115_v57  ;;  %v7589_v49 = vld [vmem:[%s9364_s8 + $0x20] sm:$0xff]   ;;  %v7591_v54 = vld [vmem:[%s9364_s8 + $0x28] sm:$0xff]   ;;  %v7594_v57 = vld [vmem:[%s9364_s8 + $0xb0] sm:$0xff]  }
 0x361   : > { %v7590_v52 = vld [vmem:[%s9364_s8 + $0xa0] sm:$0xff]  }
 0x362   : > { %v1296_v55 = vsel %vm1291_vm3, %v1287_v50, 0  ;;  %v1288_v56 = vpack.c.bf16 %v1200_v51, %v1200_v51  ;;  %v1286_v62 = vpack.c.bf16 %v1118_v59, %v1118_v59  ;;  %v7596_v59 = vld [vmem:[%s9364_s8 + $0xb8] sm:$0xff]  }
 0x363   : > { %7014 = vmatpush3.bf16.xpose.msra.mxu1 %v1296_v55  ;;  %v7592_v55 = vld [vmem:[%s9364_s8 + $0xa8] sm:$0xff]  }
 0x364   : > { %v1342_v58 = vsel %vm1291_vm3, %v1288_v56, 0  ;;  %7025 = vmatprep.subr.bf16.mxu1 %v7912_v9  ;;  %v7593_v56 = vld [vmem:[%s9364_s8 + $0x30] sm:$0xff]  }
 0x365   : > { %7020 = vmatpush3.bf16.xpose.msra.mxu0 %v1342_v58  ;;  %v7595_v58 = vld [vmem:[%s9364_s8 + $0x38] sm:$0xff]  }
 0x366   : > { %7031 = vmatprep.subr.bf16.mxu0 %v7912_v9 }
 0x36a   : > { %7016 = vmatmul.mubr.msk.bf16.vlgmr.msra.gmra.mrb[12].mxu1 %vm1291_vm3, %v1285_v60  ;;  %v7597_v60 = vld [vmem:[%s9364_s8 + $0x120] sm:$0xff]  }
 0x36b   : > { %7027 = vmatprep.mubr.msk.bf16.mxu1 %vm7913_vm0, %v7912_v9 }
 0x36c   : > { %7022 = vmatmul.mubr.msk.bf16.vlgmr.msra.gmra.mrb[12].mxu0 %vm1291_vm3, %v1286_v62  ;;  %v7598_v62 = vld [vmem:[%s9364_s8 + $0x128] sm:$0xff]  }
 0x36d   : > { %v1278_v1 = vpop.f32.mrb[8].mxu0  ;;  %7033 = vmatprep.mubr.msk.bf16.mxu0 %vm7913_vm0, %v7912_v9 }
 0x36e   : > { %v1279_v2 = vadd.f32 %v6185_v0, %v1278_v1  ;;  %v7011_v3 = vpop.f32.mrb[9].mxu0  ;;  %v7600_v1 = vld [vmem:[%s9364_s8 + $0x138] sm:$0xff]  }
 0x36f   : > { %v1281_v4 = vpop.f32.mrb[10].mxu0 }
 0x370   : > { %v1289_v5 = vpack.c.bf16 %v1279_v2, %v1279_v2  ;;  %v1282_v6 = vadd.f32 %v6185_v0, %v1281_v4  ;;  %v7012_v7 = vpop.f32.mrb[11].mxu0  ;;  %v7599_v0 = vld [vmem:[%s9364_s8 + $0x130] sm:$0xff]  }
 0x372   : > { %v1418_v8 = vsel %vm1416_vm4, %v1289_v5, 0  ;;  %v1290_v10 = vpack.c.bf16 %v1282_v6, %v1282_v6 }
 0x373   : > { %7026 = vmatpush3.bf16.msra.mxu1 %v1418_v8 }
 0x374   : > { %v1464_v11 = vsel %vm1416_vm4, %v1290_v10, 0  ;;  %7037 = vmatprep.subr.bf16.mxu1 %v7912_v9 }
 0x375   : > { %7032 = vmatpush3.bf16.msra.mxu0 %v1464_v11 }
 0x376   : > { %7049 = vmatprep.subr.bf16.mxu0 %v7912_v9 }
 0x43d   : > { %v1332_v16 = vpop.f32.mrb[12].mxu1 }
 0x43e   : > { %v1384_v19 = vmul.f32 0.25, %v1332_v16  ;;  %v7017_v20 = vpop.f32.mrb[13].mxu1 }
 0x43f   : > { %v1335_v21 = vpop.f32.mrb[14].mxu1  ;;  %v1378_v22 = vpop.f32.mrb[12].mxu0 }
 0x440   : > { %v1385_v24 = vmul.f32 0.25, %v1378_v22  ;;  %v7018_v25 = vpop.f32.mrb[15].mxu1  ;;  %v7023_v26 = vpop.f32.mrb[13].mxu0  ;;  %v1386_v27 = vadd.f32 %v1384_v19, %v8286_v18 }
 0x441   : > { %v1381_v28 = vpop.f32.mrb[14].mxu0  ;;  %v6204_v26 = vld [vmem:[%s9365_s9 + $0x1] ss:$0 sm:$0xff] }
 0x442   : > { %v7024_v29 = vpop.f32.mrb[15].mxu0  ;;  %v1389_v30 = vsel %vm1388_vm7, %v1386_v27, -inf  ;;  %v1387_v31 = vadd.f32 %v1385_v24, %v8288_v23 }
 0x443   : > { %1390 = vmax.xlane.f32.xlu1 %v1389_v30 }
 0x444   : > { %v1392_v32 = vsel %vm1388_vm7, %v1387_v31, -inf }
 0x445   : > { %1393 = vmax.xlane.f32.xlu0 %v1392_v32  ;;  %v6234_v32 = vld [vmem:[%s9365_s9 + $0x9] ss:$0 sm:$0xff] }
 0x4d0   : > { %v1391_v33 = vpop.xlane.xlu1 %1390 }
 0x4d1   : > { %v1395_v34 = vsub.f32 %v1386_v27, %v1391_v33 }
 0x4d2   : > { %v1394_v35 = vpop.xlane.xlu0 %1393 }
 0x4d3   : > { %v1397_v36 = vmul.f32 1.442695, %v1395_v34  ;;  %v1396_v37 = vsub.f32 %v1387_v31, %v1394_v35 }
 0x4d5   : > { %7741 = vpow2.f32 %v1397_v36  ;;  %v1399_v39 = vmul.f32 1.442695, %v1396_v37 }
 0x4d7   : > { %7743 = vpow2.f32 %v1399_v39 }
 0x4df   : > { %v7742_v40 = vpop.eup %7741 }
 0x4e0   : > { %v1401_v41 = vsel %vm1388_vm7, %v7742_v40, 0.0 }
 0x4e1   : > { %v7744_v42 = vpop.eup %7743  ;;  %1402 = vadd.xlane.f32.xlu1 %v1401_v41 }
 0x4e2   : > { %v1404_v43 = vsel %vm1388_vm7, %v7744_v42, 0.0 }
 0x4e3   : > { %1405 = vadd.xlane.f32.xlu0 %v1404_v43 }
 0x56e   : > { %v1403_v44 = vpop.xlane.xlu1 %1402 }
 0x56f   : > { %7745 = vrcp.f32 %v1403_v44 }
 0x570   : > { %v1406_v45 = vpop.xlane.xlu0 %1405 }
 0x571   : > { %7747 = vrcp.f32 %v1406_v45 }
 0x579   : > { %v7746_v46 = vpop.eup %7745 }
 0x57a   : > { %v1408_v47 = vmul.f32 %v7746_v46, %v7742_v40 }
 0x57b   : > { %v7748_v48 = vpop.eup %7747 }
 0x57c   : > { %v1410_v50 = vmul.f32 %v7748_v48, %v7744_v42  ;;  %v1411_v51 = vpack.c.bf16 %v1408_v47, %v1408_v47 }
 0x57e   : > { %7028 = vmatmul.mubr.msk.bf16.vlgmr.msra.gmra.mrb[16].mxu1 %vm1388_vm7, %v1411_v51  ;;  %v1412_v53 = vpack.c.bf16 %v1410_v50, %v1410_v50 }
 0x57f   : > { %7038 = vmatpush3.bf16.msra.mxu1 %v7589_v49  ;;  %7045 = vmatprep.mubr.msk.bf16.mxu1 %vm7913_vm0, %v7912_v9 }
 0x580   : > { %7034 = vmatmul.mubr.msk.bf16.vlgmr.msra.gmra.mrb[16].mxu0 %vm1388_vm7, %v1412_v53  ;;  %7039 = vmatprep.subr.bf16.mxu1 %v7912_v9 }
 0x581   : > { %7050 = vmatpush3.bf16.msra.mxu0 %v7590_v52  ;;  %7057 = vmatprep.mubr.msk.bf16.mxu0 %vm7913_vm0, %v7912_v9 }
 0x582   : > { %7051 = vmatprep.subr.bf16.mxu0 %v7912_v9 }
 0x583   : > { %7040 = vmatpush3.bf16.msra.mxu1 %v7591_v54 }
 0x584   : > { %7041 = vmatprep.subr.bf16.mxu1 %v7912_v9 }
 0x585   : > { %7052 = vmatpush3.bf16.msra.mxu0 %v7592_v55 }
 0x586   : > { %7053 = vmatprep.subr.bf16.mxu0 %v7912_v9 }
 0x587   : > { %7042 = vmatpush3.bf16.msra.mxu1 %v7593_v56 }
 0x588   : > { %7043 = vmatprep.subr.bf16.mxu1 %v7912_v9 }
 0x589   : > { %7054 = vmatpush3.bf16.msra.mxu0 %v7594_v57 }
 0x58a   : > { %7055 = vmatprep.subr.bf16.mxu0 %v7912_v9 }
 0x58b   : > { %7044 = vmatpush3.bf16.msra.mxu1 %v7595_v58 }
 0x58c   : > { %7061 = vmatprep.subr.bf16.mxu1 %v7912_v9 }
 0x58d   : > { %7056 = vmatpush3.bf16.msra.mxu0 %v7596_v59 }
 0x58e   : > { %7046 = vmatmul.mubr.msk.bf16.vlgmr.msra.gmra.mrb[20].mxu1 %vm876_vm2, %v8234_v38  ;;  %7073 = vmatprep.subr.bf16.mxu0 %v7912_v9 }
 0x58f   : > { %7062 = vmatpush3.bf16.msra.mxu1 %v7597_v60  ;;  %7069 = vmatprep.mubr.msk.bf16.mxu1 %vm7913_vm0, %v7912_v9 }
 0x590   : > { %7058 = vmatmul.mubr.msk.bf16.vlgmr.msra.gmra.mrb[20].mxu0 %vm876_vm2, %v8234_v38  ;;  %7063 = vmatprep.subr.bf16.mxu1 %v7912_v9 }
 0x591   : > { %7075 = vmatprep.mubr.msk.bf16.mxu0 %vm7913_vm0, %v7912_v9 }
 0x593   : > { %7064 = vmatpush3.bf16.msra.mxu1 %v7598_v62 }
 0x594   : > { %7065 = vmatprep.subr.bf16.mxu1 %v7912_v9 }
 0x597   : > { %7066 = vmatpush3.bf16.msra.mxu1 %v7599_v0 }
 0x598   : > { %7067 = vmatprep.subr.bf16.mxu1 %v7912_v9 }
 0x59b   : > { %7068 = vmatpush3.bf16.msra.mxu1 %v7600_v1 }
 0x59c   : > { %7085 = vmatprep.subr.bf16.mxu1 %v7912_v9 }
 0x59e   : > { %7070 = vmatmul.mubr.msk.bf16.vlgmr.msra.gmra.mrb[24].mxu1 %vm876_vm2, %v8234_v38 }
 0x59f   : > { %7087 = vmatprep.mubr.msk.bf16.mxu1 %vm7913_vm0, %v7912_v9 }
 0x651   : > { %v8362_v2 = vpop.f32.mrb[16].mxu1 }
 0x652   : > { %v7029_v3 = vpop.f32.mrb[17].mxu1 }
 0x653   : > { %v1457_v4 = vpop.f32.mrb[18].mxu1  ;;  %v8364_v5 = vpop.f32.mrb[16].mxu0 }
 0x654   : > { %v1506_v6 = vpack.c.bf16 %v8364_v5, %v8362_v2  ;;  %v7030_v7 = vpop.f32.mrb[19].mxu1  ;;  %v7035_v8 = vpop.f32.mrb[17].mxu0  ;;  %v7605_v2 = vld [vmem:[%s9364_s8 + $0xd8] sm:$0xff]   ;;  %v7606_v5 = vld [vmem:[%s9366_s10 + $0x8] sm:$0xff]  }
 0x655   : > { %v1503_v10 = vpop.f32.mrb[18].mxu0 }
 0x656   : > { %v7036_v11 = vpop.f32.mrb[19].mxu0 }
 0x661   : > { %v1584_v13 = vpop.f32.mrb[20].mxu1 }
 0x662   : > { %v7047_v15 = vpop.f32.mrb[21].mxu1  ;;  %v1585_v29 = vadd.f32 %v6204_v26, %v1584_v13 }
 0x663   : > { %v1587_v16 = vpop.f32.mrb[22].mxu1  ;;  %v1666_v17 = vpop.f32.mrb[20].mxu0 }
 0x664   : > { %v1667_v19 = vadd.f32 %v6219_v14, %v1666_v17  ;;  %v7048_v20 = vpop.f32.mrb[23].mxu1  ;;  %v7059_v21 = vpop.f32.mrb[21].mxu0  ;;  %v1755_v31 = vpack.c.bf16 %v1585_v29, %v1585_v29  ;;  %v1588_v35 = vadd.f32 %v6204_v26, %v1587_v16  ;;  %v7603_v26 = vld [vmem:[%s9364_s8 + $0xc8] sm:$0xff]  }
 0x665   : > { %v1669_v22 = vpop.f32.mrb[22].mxu0 }
 0x666   : > { %v1757_v24 = vpack.c.bf16 %v1667_v19, %v1667_v19  ;;  %v7060_v25 = vpop.f32.mrb[23].mxu0  ;;  %v1670_v28 = vadd.f32 %v6219_v14, %v1669_v22  ;;  %v1756_v43 = vpack.c.bf16 %v1588_v35, %v1588_v35  ;;  %v7601_v22 = vld [vmem:[%s9366_s10] sm:$0xff]  }
 0x667   : > { %v7602_v25 = vld [vmem:[%s9364_s8 + $0xc0] sm:$0xff]  }
 0x668   : > { %v1765_v27 = vsel %vm1291_vm3, %v1757_v24, 0  ;;  %v1758_v30 = vpack.c.bf16 %v1670_v28, %v1670_v28 }
 0x669   : > { %7074 = vmatpush3.bf16.xpose.msra.mxu0 %v1765_v27  ;;  %v7604_v27 = vld [vmem:[%s9364_s8 + $0xd0] sm:$0xff]  }
 0x66a   : > { %7079 = vmatprep.subr.bf16.mxu0 %v7912_v9  ;;  %v1811_v33 = vsel %vm1291_vm3, %v1758_v30, 0 }
 0x670   : > { %7076 = vmatmul.mubr.msk.bf16.vlgmr.msra.gmra.mrb[24].mxu0 %vm1291_vm3, %v1755_v31 }
 0x671   : > { %v1748_v34 = vpop.f32.mrb[24].mxu1  ;;  %7080 = vmatpush3.bf16.xpose.msra.mxu0 %v1811_v33  ;;  %7081 = vmatprep.mubr.msk.bf16.mxu0 %vm7913_vm0, %v7912_v9 }
 0x672   : > { %v1749_v36 = vadd.f32 %v6234_v32, %v1748_v34  ;;  %v7071_v37 = vpop.f32.mrb[25].mxu1  ;;  %7091 = vmatprep.subr.bf16.mxu0 %v7912_v9 }
 0x673   : > { %v1751_v39 = vpop.f32.mrb[26].mxu1  ;;  %v7608_v37 = vld [vmem:[%s9364_s8 + $0x48] sm:$0xff]  }
 0x674   : > { %v1759_v40 = vpack.c.bf16 %v1749_v36, %v1749_v36  ;;  %v1752_v41 = vadd.f32 %v6234_v32, %v1751_v39  ;;  %v7072_v42 = vpop.f32.mrb[27].mxu1  ;;  %v7607_v32 = vld [vmem:[%s9364_s8 + $0x40] sm:$0xff]  }
 0x676   : > { %v1885_v44 = vsel %vm1416_vm4, %v1759_v40, 0  ;;  %v1760_v45 = vpack.c.bf16 %v1752_v41, %v1752_v41  ;;  %v7609_v40 = vld [vmem:[%s9364_s8 + $0x50] sm:$0xff]  }
 0x677   : > { %7086 = vmatpush3.bf16.msra.mxu1 %v1885_v44  ;;  %v7610_v44 = vld [vmem:[%s9364_s8 + $0x58] sm:$0xff]  }
 0x678   : > { %v1931_v46 = vsel %vm1416_vm4, %v1760_v45, 0  ;;  %7082 = vmatmul.mubr.msk.bf16.vlgmr.msra.gmra.mrb[28].mxu0 %vm1291_vm3, %v1756_v43  ;;  %7097 = vmatprep.subr.bf16.mxu1 %v7912_v9  ;;  %v7611_v45 = vld [vmem:[%s9364_s8 + $0x140] sm:$0xff]  }
 0x679   : > { %7092 = vmatpush3.bf16.msra.mxu0 %v1931_v46  ;;  %7093 = vmatprep.mubr.msk.bf16.mxu0 %vm7913_vm0, %v7912_v9  ;;  %v7612_v46 = vld [vmem:[%s9364_s8 + $0x148] sm:$0xff]  }
 0x67a   : > { %7103 = vmatprep.subr.bf16.mxu0 %v7912_v9 }
 0x743   : > { %v1801_v47 = vpop.f32.mrb[24].mxu0 }
 0x744   : > { %v1853_v48 = vmul.f32 0.25, %v1801_v47  ;;  %v7077_v49 = vpop.f32.mrb[25].mxu0  ;;  %v6274_v47 = vld [vmem:[%s9365_s9 + $0x6] ss:$0 sm:$0xff] }
 0x745   : > { %v1804_v50 = vpop.f32.mrb[26].mxu0  ;;  %v7613_v49 = vld [vmem:[%s9364_s8 + $0x150] sm:$0xff]  }
 0x746   : > { %v7078_v51 = vpop.f32.mrb[27].mxu0  ;;  %v1855_v52 = vadd.f32 %v1853_v48, %v8286_v18 }
 0x748   : > { %v1857_v53 = vsel %vm1388_vm7, %v1855_v52, -inf }
 0x749   : > { %1858 = vmax.xlane.f32.xlu0 %v1857_v53 }
 0x74b   : > { %v1847_v54 = vpop.f32.mrb[28].mxu0 }
 0x74c   : > { %v1854_v55 = vmul.f32 0.25, %v1847_v54  ;;  %v7083_v56 = vpop.f32.mrb[29].mxu0 }
 0x74d   : > { %v1850_v57 = vpop.f32.mrb[30].mxu0  ;;  %v7614_v56 = vld [vmem:[%s9364_s8 + $0x158] sm:$0xff]  }
 0x74e   : > { %v7084_v58 = vpop.f32.mrb[31].mxu0  ;;  %v1856_v59 = vadd.f32 %v1854_v55, %v8288_v23 }
 0x750   : > { %v1860_v60 = vsel %vm1388_vm7, %v1856_v59, -inf }
 0x751   : > { %1861 = vmax.xlane.f32.xlu1 %v1860_v60 }
 0x7d6   : > { %v1859_v62 = vpop.xlane.xlu0 %1858 }
 0x7d7   : > { %v1863_v0 = vsub.f32 %v1855_v52, %v1859_v62 }
 0x7d9   : > { %v1865_v1 = vmul.f32 1.442695, %v1863_v0 }
 0x7db   : > { %7749 = vpow2.f32 %v1865_v1 }
 0x7de   : > { %v1862_v3 = vpop.xlane.xlu1 %1861 }
 0x7df   : > { %v1864_v4 = vsub.f32 %v1856_v59, %v1862_v3  ;;  %v6259_v3 = vld [vmem:[%s9365_s9 + $0x2] ss:$0 sm:$0xff] }
 0x7e1   : > { %v1867_v7 = vmul.f32 1.442695, %v1864_v4 }
 0x7e3   : > { %7751 = vpow2.f32 %v1867_v7 }
 0x7e5   : > { %v7750_v8 = vpop.eup %7749 }
 0x7e6   : > { %v1869_v10 = vsel %vm1388_vm7, %v7750_v8, 0.0 }
 0x7e7   : > { %1870 = vadd.xlane.f32.xlu0 %v1869_v10 }
 0x7ed   : > { %v7752_v11 = vpop.eup %7751 }
 0x7ee   : > { %v1872_v13 = vsel %vm1388_vm7, %v7752_v11, 0.0 }
 0x7ef   : > { %1873 = vadd.xlane.f32.xlu1 %v1872_v13 }
 0x874   : > { %v1871_v14 = vpop.xlane.xlu0 %1870 }
 0x875   : > { %7753 = vrcp.f32 %v1871_v14 }
 0x87c   : > { %v1874_v15 = vpop.xlane.xlu1 %1873 }
 0x87d   : > { %7755 = vrcp.f32 %v1874_v15 }
 0x87f   : > { %v7754_v16 = vpop.eup %7753 }
 0x880   : > { %v1876_v17 = vmul.f32 %v7754_v16, %v7750_v8 }
 0x882   : > { %v1879_v19 = vpack.c.bf16 %v1876_v17, %v1876_v17 }
 0x884   : > { %7088 = vmatmul.mubr.msk.bf16.vlgmr.msra.gmra.mrb[28].mxu1 %vm1388_vm7, %v1879_v19  ;;  %v6289_v19 = vld [vmem:[%s9365_s9 + $0xa] ss:$0 sm:$0xff] }
 0x885   : > { %7099 = vmatprep.mubr.msk.bf16.mxu1 %vm7913_vm0, %v7912_v9  ;;  %7098 = vmatpush3.bf16.msra.mxu1 %v7606_v5 }
 0x886   : > { %7109 = vmatprep.subr.bf16.mxu1 %v7912_v9 }
 0x887   : > { %v7756_v20 = vpop.eup %7755 }
 0x888   : > { %v1878_v21 = vmul.f32 %v7756_v20, %v7752_v11 }
 0x88a   : > { %v1880_v24 = vpack.c.bf16 %v1878_v21, %v1878_v21 }
 0x88c   : > { %7094 = vmatmul.mubr.msk.bf16.vlgmr.msra.gmra.mrb[32].mxu0 %vm1388_vm7, %v1880_v24 }
 0x88d   : > { %7104 = vmatpush3.bf16.msra.mxu0 %v7601_v22  ;;  %7105 = vmatprep.mubr.msk.bf16.mxu0 %vm7913_vm0, %v7912_v9 }
 0x88e   : > { %7121 = vmatprep.subr.bf16.mxu0 %v7912_v9 }
 0x894   : > { %7106 = vmatmul.mubr.msk.bf16.vlgmr.msra.gmra.mrb[36].mxu0 %vm1291_vm3, %v1506_v6 }
 0x895   : > { %7122 = vmatpush3.bf16.msra.mxu0 %v7602_v25  ;;  %7129 = vmatprep.mubr.msk.bf16.mxu0 %vm7913_vm0, %v7912_v9 }
 0x896   : > { %7123 = vmatprep.subr.bf16.mxu0 %v7912_v9 }
 0x899   : > { %7124 = vmatpush3.bf16.msra.mxu0 %v7603_v26 }
 0x89a   : > { %7125 = vmatprep.subr.bf16.mxu0 %v7912_v9 }
 0x89d   : > { %7126 = vmatpush3.bf16.msra.mxu0 %v7604_v27 }
 0x89e   : > { %7127 = vmatprep.subr.bf16.mxu0 %v7912_v9 }
 0x8a1   : > { %7128 = vmatpush3.bf16.msra.mxu0 %v7605_v2 }
 0x8a2   : > { %7145 = vmatprep.subr.bf16.mxu0 %v7912_v9 }
 0x8a4   : > { %7130 = vmatmul.mubr.msk.bf16.vlgmr.msra.gmra.mrb[40].mxu0 %vm876_vm2, %v8234_v38 }
 0x8a5   : > { %7147 = vmatprep.mubr.msk.bf16.mxu0 %vm7913_vm0, %v7912_v9 }
 0x957   : > { %v1921_v6 = vpop.f32.mrb[28].mxu1 }
 0x958   : > { %v7089_v28 = vpop.f32.mrb[29].mxu1 }
 0x959   : > { %v1924_v29 = vpop.f32.mrb[30].mxu1 }
 0x95a   : > { %v7090_v30 = vpop.f32.mrb[31].mxu1 }
 0x95f   : > { %v1967_v31 = vpop.f32.mrb[32].mxu0 }
 0x960   : > { %v1973_v33 = vpack.c.bf16 %v1967_v31, %v1921_v6  ;;  %v7095_v34 = vpop.f32.mrb[33].mxu0 }
 0x961   : > { %v1970_v35 = vpop.f32.mrb[34].mxu0 }
 0x962   : > { %v7096_v36 = vpop.f32.mrb[35].mxu0  ;;  %7100 = vmatmul.mubr.msk.bf16.vlgmr.msra.gmra.mrb[32].mxu1 %vm1291_vm3, %v1973_v33 }
 0x963   : > { %7110 = vmatpush3.bf16.msra.mxu1 %v7607_v32  ;;  %7117 = vmatprep.mubr.msk.bf16.mxu1 %vm7913_vm0, %v7912_v9 }
 0x964   : > { %7111 = vmatprep.subr.bf16.mxu1 %v7912_v9 }
 0x967   : > { %7112 = vmatpush3.bf16.msra.mxu1 %v7608_v37  ;;  %v2070_v39 = vpop.f32.mrb[36].mxu0 }
 0x968   : > { %v7107_v41 = vpop.f32.mrb[37].mxu0  ;;  %7113 = vmatprep.subr.bf16.mxu1 %v7912_v9 }
 0x969   : > { %v2073_v42 = vpop.f32.mrb[38].mxu0 }
 0x96a   : > { %v7108_v43 = vpop.f32.mrb[39].mxu0 }
 0x96b   : > { %7114 = vmatpush3.bf16.msra.mxu1 %v7609_v40 }
 0x96c   : > { %7115 = vmatprep.subr.bf16.mxu1 %v7912_v9 }
 0x96f   : > { %7116 = vmatpush3.bf16.msra.mxu1 %v7610_v44 }
 0x970   : > { %7133 = vmatprep.subr.bf16.mxu1 %v7912_v9 }
 0x972   : > { %7118 = vmatmul.mubr.msk.bf16.vlgmr.msra.gmra.mrb[36].mxu1 %vm876_vm2, %v8234_v38 }
 0x973   : > { %7134 = vmatpush3.bf16.msra.mxu1 %v7611_v45  ;;  %7141 = vmatprep.mubr.msk.bf16.mxu1 %vm7913_vm0, %v7912_v9 }
 0x974   : > { %7135 = vmatprep.subr.bf16.mxu1 %v7912_v9 }
 0x977   : > { %v2234_v48 = vpop.f32.mrb[40].mxu0  ;;  %7136 = vmatpush3.bf16.msra.mxu1 %v7612_v46 }
 0x978   : > { %v2235_v50 = vadd.f32 %v6274_v47, %v2234_v48  ;;  %v7131_v51 = vpop.f32.mrb[41].mxu0  ;;  %7137 = vmatprep.subr.bf16.mxu1 %v7912_v9 }
 0x979   : > { %v2237_v52 = vpop.f32.mrb[42].mxu0 }
 0x97a   : > { %v2325_v53 = vpack.c.bf16 %v2235_v50, %v2235_v50  ;;  %v2238_v54 = vadd.f32 %v6274_v47, %v2237_v52  ;;  %v7132_v55 = vpop.f32.mrb[43].mxu0 }
 0x97b   : > { %7138 = vmatpush3.bf16.msra.mxu1 %v7613_v49 }
 0x97c   : > { %v2333_v57 = vsel %vm1291_vm3, %v2325_v53, 0  ;;  %7139 = vmatprep.subr.bf16.mxu1 %v7912_v9  ;;  %v2326_v7 = vpack.c.bf16 %v2238_v54, %v2238_v54 }
 0x97d   : > { %7146 = vmatpush3.bf16.xpose.msra.mxu0 %v2333_v57 }
 0x97e   : > { %7151 = vmatprep.subr.bf16.mxu0 %v7912_v9  ;;  %v2379_v15 = vsel %vm1291_vm3, %v2326_v7, 0  ;;  %v7618_v7 = vld [vmem:[%s9364_s8 + $0x78] sm:$0xff]  }
 0x97f   : > { %7140 = vmatpush3.bf16.msra.mxu1 %v7614_v56 }
 0x980   : > { %7157 = vmatprep.subr.bf16.mxu1 %v7912_v9 }
 0x982   : > { %7142 = vmatmul.mubr.msk.bf16.vlgmr.msra.gmra.mrb[40].mxu1 %vm876_vm2, %v8234_v38 }
 0x983   : > { %7159 = vmatprep.mubr.msk.bf16.mxu1 %vm7913_vm0, %v7912_v9 }
 0xa35   : > { %v2020_v58 = vpop.f32.mrb[32].mxu1 }
 0xa36   : > { %v8485_v59 = vadd.f32 %v2070_v39, %v2020_v58  ;;  %v7101_v60 = vpop.f32.mrb[33].mxu1 }
 0xa37   : > { %v2023_v62 = vpop.f32.mrb[34].mxu1 }
 0xa38   : > { %v8487_v0 = vadd.f32 %v2073_v42, %v2023_v62  ;;  %v7102_v1 = vpop.f32.mrb[35].mxu1  ;;  %v7615_v62 = vld [vmem:[%s9364_s8 + $0x60] sm:$0xff]  }
 0xa45   : > { %v2152_v4 = vpop.f32.mrb[36].mxu1 }
 0xa46   : > { %v2153_v8 = vadd.f32 %v6259_v3, %v2152_v4  ;;  %v7119_v10 = vpop.f32.mrb[37].mxu1  ;;  %v7617_v4 = vld [vmem:[%s9364_s8 + $0x70] sm:$0xff]  }
 0xa47   : > { %v2155_v11 = vpop.f32.mrb[38].mxu1  ;;  %v7620_v10 = vld [vmem:[%s9364_s8 + $0x168] sm:$0xff]  }
 0xa48   : > { %v2323_v13 = vpack.c.bf16 %v2153_v8, %v2153_v8  ;;  %v7120_v14 = vpop.f32.mrb[39].mxu1  ;;  %v2156_v16 = vadd.f32 %v6259_v3, %v2155_v11  ;;  %v7616_v3 = vld [vmem:[%s9364_s8 + $0x68] sm:$0xff]   ;;  %v7619_v8 = vld [vmem:[%s9364_s8 + $0x160] sm:$0xff]   ;;  %v7621_v11 = vld [vmem:[%s9364_s8 + $0x170] sm:$0xff]  }
 0xa49   : > { %v7623_v14 = vld [vmem:[%s9366_s10 + $0x10] sm:$0xff]  }
 0xa4a   : > { %7148 = vmatmul.mubr.msk.bf16.vlgmr.msra.gmra.mrb[44].mxu0 %vm1291_vm3, %v2323_v13  ;;  %v2324_v17 = vpack.c.bf16 %v2156_v16, %v2156_v16  ;;  %v7622_v13 = vld [vmem:[%s9364_s8 + $0x178] sm:$0xff]  }
 0xa4b   : > { %7152 = vmatpush3.bf16.xpose.msra.mxu0 %v2379_v15  ;;  %7153 = vmatprep.mubr.msk.bf16.mxu0 %vm7913_vm0, %v7912_v9 }
 0xa4c   : > { %7163 = vmatprep.subr.bf16.mxu0 %v7912_v9 }
 0xa52   : > { %7154 = vmatmul.mubr.msk.bf16.vlgmr.msra.gmra.mrb[48].mxu0 %vm1291_vm3, %v2324_v17 }
 0xa53   : > { %7165 = vmatprep.mubr.msk.bf16.mxu0 %vm7913_vm0, %v7912_v9 }
 0xa55   : > { %v2316_v20 = vpop.f32.mrb[40].mxu1 }
 0xa56   : > { %v2317_v21 = vadd.f32 %v6289_v19, %v2316_v20  ;;  %v7143_v22 = vpop.f32.mrb[41].mxu1 }
 0xa57   : > { %v2319_v24 = vpop.f32.mrb[42].mxu1 }
 0xa58   : > { %v2327_v25 = vpack.c.bf16 %v2317_v21, %v2317_v21  ;;  %v2320_v26 = vadd.f32 %v6289_v19, %v2319_v24  ;;  %v7144_v27 = vpop.f32.mrb[43].mxu1  ;;  %v7624_v21 = vld [vmem:[%s9364_s8 + $0xe0] sm:$0xff]  }
 0xa59   : > { %v7625_v27 = vld [vmem:[%s9364_s8 + $0xe8] sm:$0xff]  }
 0xa5a   : > { %v2453_v2 = vsel %vm1416_vm4, %v2327_v25, 0  ;;  %v2328_v5 = vpack.c.bf16 %v2320_v26, %v2320_v26 }
 0xa5b   : > { %7158 = vmatpush3.bf16.msra.mxu1 %v2453_v2  ;;  %v7626_v2 = vld [vmem:[%s9364_s8 + $0xf0] sm:$0xff]  }
 0xa5c   : > { %v2499_v6 = vsel %vm1416_vm4, %v2328_v5, 0  ;;  %7169 = vmatprep.subr.bf16.mxu1 %v7912_v9  ;;  %v7627_v5 = vld [vmem:[%s9364_s8 + $0xf8] sm:$0xff]  }
 0xa5d   : > { %7164 = vmatpush3.bf16.msra.mxu0 %v2499_v6 }
 0xa5e   : > { %7175 = vmatprep.subr.bf16.mxu0 %v7912_v9 }
 0xb1d   : > { %v2369_v28 = vpop.f32.mrb[44].mxu0 }
 0xb1e   : > { %v2421_v29 = vmul.f32 0.25, %v2369_v28  ;;  %v7149_v30 = vpop.f32.mrb[45].mxu0 }
 0xb1f   : > { %v2372_v31 = vpop.f32.mrb[46].mxu0 }
 0xb20   : > { %v7150_v32 = vpop.f32.mrb[47].mxu0  ;;  %v2423_v33 = vadd.f32 %v2421_v29, %v8286_v18  ;;  %v6342_v31 = vld [vmem:[%s9365_s9 + $0xb] ss:$0 sm:$0xff] }
 0xb22   : > { %v2425_v34 = vsel %vm1388_vm7, %v2423_v33, -inf }
 0xb23   : > { %2426 = vmax.xlane.f32.xlu0 %v2425_v34 }
 0xb25   : > { %v2415_v35 = vpop.f32.mrb[48].mxu0 }
 0xb26   : > { %v2422_v36 = vmul.f32 0.25, %v2415_v35  ;;  %v7155_v37 = vpop.f32.mrb[49].mxu0 }
 0xb27   : > { %v2418_v39 = vpop.f32.mrb[50].mxu0 }
 0xb28   : > { %v7156_v40 = vpop.f32.mrb[51].mxu0  ;;  %v2424_v41 = vadd.f32 %v2422_v36, %v8288_v23 }
 0xb2a   : > { %v2428_v42 = vsel %vm1388_vm7, %v2424_v41, -inf }
 0xb2b   : > { %2429 = vmax.xlane.f32.xlu1 %v2428_v42 }
 0xbb0   : > { %v2427_v43 = vpop.xlane.xlu0 %2426 }
 0xbb1   : > { %v2431_v44 = vsub.f32 %v2423_v33, %v2427_v43 }
 0xbb3   : > { %v2433_v45 = vmul.f32 1.442695, %v2431_v44 }
 0xbb5   : > { %7757 = vpow2.f32 %v2433_v45 }
 0xbb8   : > { %v2430_v46 = vpop.xlane.xlu1 %2429 }
 0xbb9   : > { %v2432_v47 = vsub.f32 %v2424_v41, %v2430_v46  ;;  %v6327_v46 = vld [vmem:[%s9365_s9 + $0x7] ss:$0 sm:$0xff] }
 0xbbb   : > { %v2435_v48 = vmul.f32 1.442695, %v2432_v47 }
 0xbbd   : > { %7759 = vpow2.f32 %v2435_v48 }
 0xbbf   : > { %v7758_v49 = vpop.eup %7757 }
 0xbc0   : > { %v2437_v50 = vsel %vm1388_vm7, %v7758_v49, 0.0 }
 0xbc1   : > { %2438 = vadd.xlane.f32.xlu0 %v2437_v50 }
 0xbc7   : > { %v7760_v51 = vpop.eup %7759 }
 0xbc8   : > { %v2440_v52 = vsel %vm1388_vm7, %v7760_v51, 0.0 }
 0xbc9   : > { %2441 = vadd.xlane.f32.xlu1 %v2440_v52 }
 0xc4e   : > { %v2439_v53 = vpop.xlane.xlu0 %2438 }
 0xc4f   : > { %7761 = vrcp.f32 %v2439_v53 }
 0xc56   : > { %v2442_v54 = vpop.xlane.xlu1 %2441 }
 0xc57   : > { %7763 = vrcp.f32 %v2442_v54 }
 0xc59   : > { %v7762_v55 = vpop.eup %7761 }
 0xc5a   : > { %v2444_v56 = vmul.f32 %v7762_v55, %v7758_v49 }
 0xc5c   : > { %v2447_v57 = vpack.c.bf16 %v2444_v56, %v2444_v56 }
 0xc5e   : > { %7160 = vmatmul.mubr.msk.bf16.vlgmr.msra.gmra.mrb[44].mxu1 %vm1388_vm7, %v2447_v57 }
 0xc5f   : > { %7171 = vmatprep.mubr.msk.bf16.mxu1 %vm7913_vm0, %v7912_v9  ;;  %7170 = vmatpush3.bf16.msra.mxu1 %v7623_v14 }
 0xc60   : > { %7187 = vmatprep.subr.bf16.mxu1 %v7912_v9 }
 0xc61   : > { %v7764_v58 = vpop.eup %7763 }
 0xc62   : > { %v2446_v60 = vmul.f32 %v7764_v58, %v7760_v51 }
 0xc64   : > { %v2448_v1 = vpack.c.bf16 %v2446_v60, %v2446_v60 }
 0xc66   : > { %7166 = vmatmul.mubr.msk.bf16.vlgmr.msra.gmra.mrb[52].mxu0 %vm1388_vm7, %v2448_v1 }
 0xc67   : > { %7176 = vmatpush3.bf16.msra.mxu0 %v7615_v62  ;;  %7183 = vmatprep.mubr.msk.bf16.mxu0 %vm7913_vm0, %v7912_v9 }
 0xc68   : > { %7177 = vmatprep.subr.bf16.mxu0 %v7912_v9 }
 0xc6b   : > { %7178 = vmatpush3.bf16.msra.mxu0 %v7616_v3 }
 0xc6c   : > { %7179 = vmatprep.subr.bf16.mxu0 %v7912_v9 }
 0xc6f   : > { %7180 = vmatpush3.bf16.msra.mxu0 %v7617_v4 }
 0xc70   : > { %7181 = vmatprep.subr.bf16.mxu0 %v7912_v9 }
 0xc73   : > { %7182 = vmatpush3.bf16.msra.mxu0 %v7618_v7 }
 0xc74   : > { %7199 = vmatprep.subr.bf16.mxu0 %v7912_v9 }
 0xc76   : > { %7184 = vmatmul.mubr.msk.bf16.vlgmr.msra.gmra.mrb[56].mxu0 %vm876_vm2, %v8234_v38 }
 0xc77   : > { %7200 = vmatpush3.bf16.msra.mxu0 %v7619_v8  ;;  %7207 = vmatprep.mubr.msk.bf16.mxu0 %vm7913_vm0, %v7912_v9 }
 0xc78   : > { %7201 = vmatprep.subr.bf16.mxu0 %v7912_v9 }
 0xc7b   : > { %7202 = vmatpush3.bf16.msra.mxu0 %v7620_v10 }
 0xc7c   : > { %7203 = vmatprep.subr.bf16.mxu0 %v7912_v9 }
 0xc7f   : > { %7204 = vmatpush3.bf16.msra.mxu0 %v7621_v11 }
 0xc80   : > { %7205 = vmatprep.subr.bf16.mxu0 %v7912_v9 }
 0xc83   : > { %7206 = vmatpush3.bf16.msra.mxu0 %v7622_v13 }
 0xc84   : > { %7223 = vmatprep.subr.bf16.mxu0 %v7912_v9 }
 0xc86   : > { %7208 = vmatmul.mubr.msk.bf16.vlgmr.msra.gmra.mrb[60].mxu0 %vm876_vm2, %v8234_v38 }
 0xc87   : > { %7225 = vmatprep.mubr.msk.bf16.mxu0 %vm7913_vm0, %v7912_v9 }
 0xd31   : > { %v2489_v15 = vpop.f32.mrb[44].mxu1 }
 0xd32   : > { %v7161_v16 = vpop.f32.mrb[45].mxu1 }
 0xd33   : > { %v2492_v17 = vpop.f32.mrb[46].mxu1 }
 0xd34   : > { %v7162_v19 = vpop.f32.mrb[47].mxu1 }
 0xd39   : > { %v2535_v20 = vpop.f32.mrb[52].mxu0 }
 0xd3a   : > { %v2541_v22 = vpack.c.bf16 %v2535_v20, %v2489_v15  ;;  %v7167_v24 = vpop.f32.mrb[53].mxu0 }
 0xd3b   : > { %v2538_v25 = vpop.f32.mrb[54].mxu0 }
 0xd3c   : > { %v7168_v26 = vpop.f32.mrb[55].mxu0  ;;  %7172 = vmatmul.mubr.msk.bf16.vlgmr.msra.gmra.mrb[48].mxu1 %vm1291_vm3, %v2541_v22 }
 0xd3d   : > { %7188 = vmatpush3.bf16.msra.mxu1 %v7624_v21  ;;  %7195 = vmatprep.mubr.msk.bf16.mxu1 %vm7913_vm0, %v7912_v9 }
 0xd3e   : > { %7189 = vmatprep.subr.bf16.mxu1 %v7912_v9 }
 0xd41   : > { %7190 = vmatpush3.bf16.msra.mxu1 %v7625_v27 }
 0xd42   : > { %7191 = vmatprep.subr.bf16.mxu1 %v7912_v9 }
 0xd45   : > { %7192 = vmatpush3.bf16.msra.mxu1 %v7626_v2 }
 0xd46   : > { %7193 = vmatprep.subr.bf16.mxu1 %v7912_v9 }
 0xd49   : > { %v2672_v6 = vpop.f32.mrb[56].mxu0  ;;  %7194 = vmatpush3.bf16.msra.mxu1 %v7627_v5 }
 0xd4a   : > { %v7185_v28 = vpop.f32.mrb[57].mxu0  ;;  %7211 = vmatprep.subr.bf16.mxu1 %v7912_v9 }
 0xd4b   : > { %v2675_v29 = vpop.f32.mrb[58].mxu0 }
 0xd4c   : > { %v7186_v30 = vpop.f32.mrb[59].mxu0  ;;  %7196 = vmatmul.mubr.msk.bf16.vlgmr.msra.gmra.mrb[52].mxu1 %vm876_vm2, %v8234_v38 }
 0xd4d   : > { %7213 = vmatprep.mubr.msk.bf16.mxu1 %vm7913_vm0, %v7912_v9 }
 0xd59   : > { %v2836_v32 = vpop.f32.mrb[60].mxu0 }
 0xd5a   : > { %v2837_v33 = vadd.f32 %v6342_v31, %v2836_v32  ;;  %v7209_v34 = vpop.f32.mrb[61].mxu0 }
 0xd5b   : > { %v2839_v35 = vpop.f32.mrb[62].mxu0 }
 0xd5c   : > { %v2847_v36 = vpack.c.bf16 %v2837_v33, %v2837_v33  ;;  %v2840_v37 = vadd.f32 %v6342_v31, %v2839_v35  ;;  %v7210_v39 = vpop.f32.mrb[63].mxu0 }
 0xd5d   : > { %v7628_v39 = vld [vmem:[%s9366_s10 + $0x18] sm:$0xff]  }
 0xd5e   : > { %v2973_v40 = vsel %vm1416_vm4, %v2847_v36, 0  ;;  %v2848_v60 = vpack.c.bf16 %v2840_v37, %v2840_v37 }
 0xd5f   : > { %7224 = vmatpush3.bf16.msra.mxu0 %v2973_v40 }
 0xd60   : > { %7235 = vmatprep.subr.bf16.mxu0 %v7912_v9  ;;  %v3019_v1 = vsel %vm1416_vm4, %v2848_v60, 0 }
 0xe0f   : > { %v2588_v38 = vpop.f32.mrb[48].mxu1 }
 0xe10   : > { %v8592_v41 = vadd.f32 %v2588_v38, %v8485_v59  ;;  %v7173_v42 = vpop.f32.mrb[49].mxu1  ;;  %v6312_v59 = vld [vmem:[%s9365_s9 + $0x3] ss:$0 sm:$0xff] }
 0xe11   : > { %v2591_v43 = vpop.f32.mrb[50].mxu1  ;;  %v2676_v58 = vadd.f32 %v6312_v59, %v2675_v29 }
 0xe12   : > { %v8595_v44 = vadd.f32 %v2591_v43, %v8487_v0  ;;  %v7174_v45 = vpop.f32.mrb[51].mxu1  ;;  %v2673_v0 = vadd.f32 %v6312_v59, %v2672_v6  ;;  %v6356_v59 = vld [vmem:[%s9367_s11] ss:$0 sm:$0xff] }
 0xe13   : > { %v2844_v62 = vpack.c.bf16 %v2676_v58, %v2676_v58 }
 0xe14   : > { %v2843_v56 = vpack.c.bf16 %v2673_v0, %v2673_v0 }
 0xe1f   : > { %v2754_v47 = vpop.f32.mrb[52].mxu1 }
 0xe20   : > { %v2755_v48 = vadd.f32 %v6327_v46, %v2754_v47  ;;  %v7197_v49 = vpop.f32.mrb[53].mxu1 }
 0xe21   : > { %v2757_v50 = vpop.f32.mrb[54].mxu1 }
 0xe22   : > { %v2845_v51 = vpack.c.bf16 %v2755_v48, %v2755_v48  ;;  %v7198_v52 = vpop.f32.mrb[55].mxu1  ;;  %v2758_v54 = vadd.f32 %v6327_v46, %v2757_v50 }
 0xe24   : > { %v2853_v53 = vsel %vm1291_vm3, %v2845_v51, 0  ;;  %v2846_v55 = vpack.c.bf16 %v2758_v54, %v2758_v54 }
 0xe25   : > { %7212 = vmatpush3.bf16.xpose.msra.mxu1 %v2853_v53 }
 0xe26   : > { %7217 = vmatprep.subr.bf16.mxu1 %v7912_v9  ;;  %v2899_v57 = vsel %vm1291_vm3, %v2846_v55, 0 }
 0xe2c   : > { %7214 = vmatmul.mubr.msk.bf16.vlgmr.msra.gmra.mrb[56].mxu1 %vm1291_vm3, %v2843_v56 }
 0xe2d   : > { %7218 = vmatpush3.bf16.xpose.msra.mxu1 %v2899_v57  ;;  %7219 = vmatprep.mubr.msk.bf16.mxu1 %vm7913_vm0, %v7912_v9 }
 0xe2e   : > { %7229 = vmatprep.subr.bf16.mxu1 %v7912_v9 }
 0xe34   : > { %7220 = vmatmul.mubr.msk.bf16.vlgmr.msra.gmra.mrb[60].mxu1 %vm1291_vm3, %v2844_v62 }
 0xe35   : > { %7230 = vmatpush3.bf16.msra.mxu1 %v3019_v1  ;;  %7231 = vmatprep.mubr.msk.bf16.mxu1 %vm7913_vm0, %v7912_v9 }
 0xeff   : > { %v2889_v3 = vpop.f32.mrb[56].mxu1 }
 0xf00   : > { %v2941_v4 = vmul.f32 0.25, %v2889_v3  ;;  %v7215_v7 = vpop.f32.mrb[57].mxu1 }
 0xf01   : > { %v2892_v8 = vpop.f32.mrb[58].mxu1 }
 0xf02   : > { %v7216_v10 = vpop.f32.mrb[59].mxu1  ;;  %v2943_v11 = vadd.f32 %v2941_v4, %v8286_v18 }
 0xf04   : > { %v2945_v13 = vsel %vm1388_vm7, %v2943_v11, -inf }
 0xf05   : > { %2946 = vmax.xlane.f32.xlu0 %v2945_v13  ;;  %v7629_v13 = vld [vmem:[%s9370_s14] ss:$8 sps:$4 sm:$0xff]  }
 0xf07   : > { %v2935_v14 = vpop.f32.mrb[60].mxu1 }
 0xf08   : > { %v2942_v15 = vmul.f32 0.25, %v2935_v14  ;;  %v7221_v16 = vpop.f32.mrb[61].mxu1  ;;  %v7634_v14 = vld [vmem:[%s9370_s14 + $0x14] ss:$8 sps:$4 sm:$0xff]  }
 0xf09   : > { %v2938_v17 = vpop.f32.mrb[62].mxu1  ;;  %v7637_v16 = vld [vmem:[%s9370_s14 + $0x24] ss:$8 sps:$4 sm:$0xff]  }
 0xf0a   : > { %v7222_v19 = vpop.f32.mrb[63].mxu1  ;;  %v2944_v20 = vadd.f32 %v2942_v15, %v8288_v23  ;;  %v7632_v15 = vld [vmem:[%s9370_s14 + $0x10] ss:$8 sps:$4 sm:$0xff]   ;;  %v7635_v17 = vld [vmem:[%s9370_s14 + $0x20] ss:$8 sps:$4 sm:$0xff]  }
 0xf0b   : > { %v7638_v19 = vld [vmem:[%s9370_s14 + $0x30] ss:$8 sps:$4 sm:$0xff]  }
 0xf0c   : > { %v2948_v21 = vsel %vm1388_vm7, %v2944_v20, -inf }
 0xf0d   : > { %2949 = vmax.xlane.f32.xlu1 %v2948_v21  ;;  %v7915_v21 = vmov 0  }
 0xf92   : > { %v2947_v22 = vpop.xlane.xlu0 %2946 }
 0xf93   : > { %v2951_v24 = vsub.f32 %v2943_v11, %v2947_v22  ;;  %v7631_v11 = vld [vmem:[%s9370_s14 + $0x4] ss:$8 sps:$4 sm:$0xff]  }
 0xf94   : > { %3236 = vmatprep.subr.bf16.mxu1 %v7631_v11 }
 0xf95   : > { %v2953_v25 = vmul.f32 1.442695, %v2951_v24 }
 0xf97   : > { %7765 = vpow2.f32 %v2953_v25 }
 0xf9a   : > { %v2950_v26 = vpop.xlane.xlu1 %2949 }
 0xf9b   : > { %v2952_v27 = vsub.f32 %v2944_v20, %v2950_v26  ;;  %v7640_v20 = vld [vmem:[%s9370_s14 + $0x34] ss:$8 sps:$4 sm:$0xff]  }
 0xf9d   : > { %v2955_v2 = vmul.f32 1.442695, %v2952_v27 }
 0xf9f   : > { %7767 = vpow2.f32 %v2955_v2 }
 0xfa1   : > { %v7766_v5 = vpop.eup %7765 }
 0xfa2   : > { %v2957_v6 = vsel %vm1388_vm7, %v7766_v5, 0.0 }
 0xfa3   : > { %2958 = vadd.xlane.f32.xlu0 %v2957_v6  ;;  %v6357_v6 = vld [vmem:[%s9397_s30] ss:$0 sm:$0xff] }
 0xfa9   : > { %v7768_v28 = vpop.eup %7767 }
 0xfaa   : > { %v2960_v29 = vsel %vm1388_vm7, %v7768_v28, 0.0 }
 0xfab   : > { %2961 = vadd.xlane.f32.xlu1 %v2960_v29 }
0x1030   : > { %v2959_v30 = vpop.xlane.xlu0 %2958 }
0x1031   : > { %7769 = vrcp.f32 %v2959_v30 }
0x1038   : > { %v2962_v31 = vpop.xlane.xlu1 %2961 }
0x1039   : > { %7771 = vrcp.f32 %v2962_v31 }
0x103b   : > { %v7770_v32 = vpop.eup %7769 }
0x103c   : > { %v2964_v33 = vmul.f32 %v7770_v32, %v7766_v5  ;;  %v6358_v32 = vld [vmem:[%s9369_s13] ss:$0 sm:$0xff] }
0x103e   : > { %v2967_v34 = vpack.c.bf16 %v2964_v33, %v2964_v33 }
0x1040   : > { %7226 = vmatmul.mubr.msk.bf16.vlgmr.msra.gmra.mrb[64].mxu0 %vm1388_vm7, %v2967_v34 }
0x1041   : > { %7237 = vmatprep.mubr.msk.bf16.mxu0 %vm7913_vm0, %v7912_v9  ;;  %7236 = vmatpush3.bf16.msra.mxu0 %v7628_v39  ;;  %v7642_v39 = vld [vmem:[%s9372_s16] sm:$0xff]  }
0x1043   : > { %v7772_v35 = vpop.eup %7771 }
0x1044   : > { %v2966_v36 = vmul.f32 %v7772_v35, %v7768_v28 }
0x1046   : > { %v2968_v37 = vpack.c.bf16 %v2966_v36, %v2966_v36 }
0x1048   : > { %7232 = vmatmul.mubr.msk.bf16.vlgmr.msra.gmra.mrb[64].mxu1 %vm1388_vm7, %v2968_v37  ;;  %v7641_v37 = vld [vmem:[%s9372_s16 + $0x40] sm:$0xff]  }
0x1049   : > { %3237 = vmatpush1.bf16.msra.mxu1 %v7629_v13  ;;  %3268 = vmatprep.mubr.bf16.mxu1 %v7915_v21 }
0x104a   : > { %3238 = vmatprep.subr.bf16.mxu1 %v7634_v14  ;;  %6813 = vmatprep.subr.bf16.mxu0 %v7641_v37 }
0x104d   : > { %3239 = vmatpush1.bf16.msra.mxu1 %v7632_v15 }
0x104e   : > { %3240 = vmatprep.subr.bf16.mxu1 %v7637_v16 }
0x1051   : > { %3241 = vmatpush1.bf16.msra.mxu1 %v7635_v17 }
0x1052   : > { %3242 = vmatprep.subr.bf16.mxu1 %v7640_v20 }
0x1055   : > { %3243 = vmatpush1.bf16.msra.mxu1 %v7638_v19 }
0x1056   : > { %7241 = vmatprep.subr.bf16.mxu1 %v7912_v9 }
0x1113   : > { %v3009_v40 = vpop.f32.mrb[64].mxu0 }
0x1114   : > { %v7227_v38 = vpop.f32.mrb[65].mxu0 }
0x1115   : > { %v3012_v42 = vpop.f32.mrb[66].mxu0  ;;  %v7644_v38 = vld [vmem:[%s9372_s16 + $0x8] sm:$0xff]  }
0x1116   : > { %v7228_v43 = vpop.f32.mrb[67].mxu0  ;;  %v7645_v42 = vld [vmem:[%s9372_s16 + $0x50] sm:$0xff]  }
0x1117   : > { %v7646_v43 = vld [vmem:[%s9372_s16 + $0x10] sm:$0xff]  }
0x111b   : > { %v3055_v45 = vpop.f32.mrb[64].mxu1 }
0x111c   : > { %v3061_v46 = vpack.c.bf16 %v3055_v45, %v3009_v40  ;;  %v7233_v47 = vpop.f32.mrb[65].mxu1  ;;  %v7643_v40 = vld [vmem:[%s9372_s16 + $0x48] sm:$0xff]   ;;  %v7647_v45 = vld [vmem:[%s9372_s16 + $0x58] sm:$0xff]  }
0x111d   : > { %v3058_v48 = vpop.f32.mrb[66].mxu1  ;;  %v7649_v47 = vld [vmem:[%s9372_s16 + $0x60] sm:$0xff]  }
0x111e   : > { %v7234_v49 = vpop.f32.mrb[67].mxu1  ;;  %7238 = vmatmul.mubr.msk.bf16.vlgmr.msra.gmra.mrb[68].mxu0 %vm1291_vm3, %v3061_v46  ;;  %v7648_v46 = vld [vmem:[%s9372_s16 + $0x18] sm:$0xff]   ;;  %v7650_v48 = vld [vmem:[%s9372_s16 + $0x20] sm:$0xff]  }
0x111f   : > { %6814 = vmatpush3.bf16.msra.mxu0 %v7642_v39  ;;  %v7651_v49 = vld [vmem:[%s9372_s16 + $0x68] sm:$0xff]  }
0x1120   : > { %6815 = vmatprep.subr.bf16.mxu0 %v7643_v40 }
0x1123   : > { %6816 = vmatpush3.bf16.msra.mxu0 %v7644_v38 }
0x1124   : > { %6817 = vmatprep.subr.bf16.mxu0 %v7645_v42 }
0x1127   : > { %6818 = vmatpush3.bf16.msra.mxu0 %v7646_v43 }
0x1128   : > { %6819 = vmatprep.subr.bf16.mxu0 %v7647_v45 }
0x112b   : > { %6820 = vmatpush3.bf16.msra.mxu0 %v7648_v46 }
0x112c   : > { %6821 = vmatprep.subr.bf16.mxu0 %v7649_v47 }
0x112f   : > { %6822 = vmatpush3.bf16.msra.mxu0 %v7650_v48 }
0x1130   : > { %6823 = vmatprep.subr.bf16.mxu0 %v7651_v49 }
0x11f1   : > { %v3108_v50 = vpop.f32.mrb[68].mxu0 }
0x11f2   : > { %v3115_v51 = vadd.f32 %v3108_v50, %v8592_v41  ;;  %v7239_v52 = vpop.f32.mrb[69].mxu0  ;;  %v7652_v50 = vld [vmem:[%s9372_s16 + $0x28] sm:$0xff]  }
0x11f3   : > { %v3111_v53 = vpop.f32.mrb[70].mxu0  ;;  %6824 = vmatpush3.bf16.msra.mxu0 %v7652_v50  ;;  %v7654_v52 = vld [vmem:[%s9372_s16 + $0x30] sm:$0xff]   ;;  %v6368_v50 = vld [vmem:[%s9373_s17] ss:$0 sm:$0xff] }
0x11f4   : > { %v3117_v54 = vadd.f32 %v3115_v51, %v8181_v61  ;;  %v3116_v0 = vadd.f32 %v3111_v53, %v8595_v44  ;;  %v7240_v55 = vpop.f32.mrb[71].mxu0  ;;  %v7653_v51 = vld [vmem:[%s9372_s16 + $0x70] sm:$0xff]   ;;  %v7656_v53 = vld [vmem:[%s9372_s16 + $0x38] sm:$0xff]  }
0x11f5   : > { %6825 = vmatprep.subr.bf16.mxu0 %v7653_v51  ;;  %v3181_v55 = vld [vmem:[%s9371_s15] sm:$0x3] }
0x11f6   : > { %v8634_v56 = vadd.f32 %v6356_v59, %v3117_v54  ;;  %v3118_v57 = vadd.f32 %v3116_v0, %v8183_v63  ;;  %v8732_v54 = vshrl.u32 %v971_v12, 7 }
0x11f7   : > { %6826 = vmatpush3.bf16.msra.mxu0 %v7654_v52 }
0x11f8   : > { %v8637_v58 = vadd.f32 %v6356_v59, %v3118_v57  ;;  %v3130_v41 = vsel %vm876_vm2, %v8634_v56, 0.0  ;;  %v7655_v59 = vld [vmem:[%s9372_s16 + $0x78] sm:$0xff]   ;;  %v3185_v0 = vsub.s32 0, %v8732_v54  ;;  %v3189_v57 = vsub.s32 1, %v8732_v54 }
0x11f9   : > { %3131 = vadd.xlane.f32.xlu0 %v3130_v41  ;;  %6827 = vmatprep.subr.bf16.mxu0 %v7655_v59 }
0x11fa   : > { %v3133_v60 = vsel %vm876_vm2, %v8637_v58, 0.0  ;;  %v3186_v41 = vrot.slane %v3181_v55, %v3185_v0 }
0x11fb   : > { %3134 = vadd.xlane.f32.xlu1 %v3133_v60  ;;  %6828 = vmatpush3.bf16.msra.mxu0 %v7656_v53  ;;  %v3190_v60 = vrot.slane %v3181_v55, %v3189_v57 }
0x11fc   : > { %7265 = vmatprep.subr.bf16.mxu0 %v7912_v9 }
0x1286   : > { %v3132_v62 = vpop.xlane.xlu0 %3131 }
0x1287   : > { %v3136_v1 = vmul.f32 0.015625, %v3132_v62 }
0x1288   : > { %v3135_v61 = vpop.xlane.xlu1 %3134 }
0x1289   : > { %v3138_v44 = vsub.f32 %v8634_v56, %v3136_v1  ;;  %v3137_v3 = vmul.f32 0.015625, %v3135_v61 }
0x128b   : > { %v3139_v4 = vsub.f32 %v8637_v58, %v3137_v3  ;;  %v3140_v7 = vmul.f32 %v3138_v44, %v3138_v44 }
0x128d   : > { %v3142_v63 = vsel %vm876_vm2, %v3140_v7, 0.0  ;;  %v3141_v8 = vmul.f32 %v3139_v4, %v3139_v4 }
0x128e   : > { %3143 = vadd.xlane.f32.xlu0 %v3142_v63 }
0x128f   : > { %v3145_v10 = vsel %vm876_vm2, %v3141_v8, 0.0 }
0x1290   : > { %3146 = vadd.xlane.f32.xlu1 %v3145_v10 }
0x131b   : > { %v3144_v22 = vpop.xlane.xlu0 %3143 }
0x131c   : > { %v3148_v24 = vmul.f32 0.015625, %v3144_v22 }
0x131d   : > { %v3147_v25 = vpop.xlane.xlu1 %3146 }
0x131e   : > { %v3150_v26 = vadd.f32 1e-05, %v3148_v24  ;;  %v3149_v27 = vmul.f32 0.015625, %v3147_v25 }
0x1320   : > { %7773 = vrsqrt.f32 %v3150_v26  ;;  %v3151_v2 = vadd.f32 1e-05, %v3149_v27 }
0x1322   : > { %7775 = vrsqrt.f32 %v3151_v2 }
0x132a   : > { %v7774_v5 = vpop.eup %7773 }
0x132b   : > { %v3154_v28 = vmul.f32 %v7774_v5, %v3138_v44 }
0x132c   : > { %v7776_v29 = vpop.eup %7775 }
0x132d   : > { %v3162_v30 = vmul.f32 %v6357_v6, %v3154_v28  ;;  %v3155_v31 = vmul.f32 %v7776_v29, %v3139_v4 }
0x132f   : > { %v3163_v33 = vmul.f32 %v6357_v6, %v3155_v31  ;;  %v3170_v34 = vadd.f32 %v6358_v32, %v3162_v30 }
0x1331   : > { %v3171_v35 = vadd.f32 %v6358_v32, %v3163_v33 }
0x1333   : > { %v3172_v36 = vpack.c.bf16 %v3171_v35, %v3170_v34 }
0x1335   : > { %6367 = vmatmul.mubr.msk.bf16.vlgmr.msra.gmra.mrb[68].mxu1 %vm876_vm2, %v3172_v36 }
0x1336   : > { %7249 = vmatprep.mubr.msk.bf16.mxu1 %vm7913_vm0, %v7912_v9 }
0x1408   : > { %v3270_v62 = vpop.f32.mrb[68].mxu1 }
0x1409   : > { %v3271_v1 = vadd.f32 %v3270_v62, %v3186_v41  ;;  %v3272_v61 = vpop.f32.mrb[69].mxu1 }
0x140a   : > { %v3273_v44 = vadd.f32 %v3272_v61, %v3190_v60  ;;  %v3274_v12 = vpop.f32.mrb[70].mxu1 }
0x140b   : > { %v3279_v3 = vmul.f32 %v3271_v1, %v3271_v1  ;;  %v3275_v4 = vadd.f32 %v3274_v12, %v3186_v41  ;;  %v3276_v7 = vpop.f32.mrb[71].mxu1 }
0x140c   : > { %v3280_v63 = vmul.f32 %v3273_v44, %v3273_v44  ;;  %v3277_v8 = vadd.f32 %v3276_v7, %v3190_v60 }
0x140d   : > { %v3283_v10 = vmul.f32 %v3279_v3, %v3271_v1  ;;  %v3281_v11 = vmul.f32 %v3275_v4, %v3275_v4 }
0x140e   : > { %v3284_v13 = vmul.f32 %v3280_v63, %v3273_v44  ;;  %v3282_v14 = vmul.f32 %v3277_v8, %v3277_v8 }
0x140f   : > { %v3287_v15 = vmul.f32 0.044715, %v3283_v10  ;;  %v3285_v16 = vmul.f32 %v3281_v11, %v3275_v4 }
0x1410   : > { %v3288_v17 = vmul.f32 0.044715, %v3284_v13  ;;  %v3286_v19 = vmul.f32 %v3282_v14, %v3277_v8  ;;  %v7657_v13 = vld [vmem:[%s9364_s8 + $0x180] sm:$0xff]  }
0x1411   : > { %v3291_v20 = vadd.f32 %v3287_v15, %v3271_v1  ;;  %v3289_v22 = vmul.f32 0.044715, %v3285_v16  ;;  %v7658_v14 = vld [vmem:[%s9364_s8 + $0x280] sm:$0xff]   ;;  %7242 = vmatpush3.bf16.msra.mxu1 %v7657_v13  ;;  %v7659_v15 = vld [vmem:[%s9364_s8 + $0x188] sm:$0xff]  }
0x1412   : > { %v3292_v24 = vadd.f32 %v3288_v17, %v3273_v44  ;;  %v3290_v25 = vmul.f32 0.044715, %v3286_v19  ;;  %7243 = vmatprep.subr.bf16.mxu1 %v7912_v9  ;;  %v7660_v16 = vld [vmem:[%s9364_s8 + $0x288] sm:$0xff]   ;;  %v7661_v17 = vld [vmem:[%s9364_s8 + $0x190] sm:$0xff]  }
0x1413   : > { %v3295_v26 = vmul.f32 0.7978846, %v3291_v20  ;;  %v3293_v27 = vadd.f32 %v3289_v22, %v3275_v4  ;;  %v7662_v19 = vld [vmem:[%s9364_s8 + $0x290] sm:$0xff]   ;;  %v7663_v20 = vld [vmem:[%s9364_s8 + $0x198] sm:$0xff]  }
0x1414   : > { %v3296_v2 = vmul.f32 0.7978846, %v3292_v24  ;;  %v3294_v5 = vadd.f32 %v3290_v25, %v3277_v8  ;;  %v7664_v22 = vld [vmem:[%s9364_s8 + $0x298] sm:$0xff]  }
0x1415   : > { %7777 = vtanh.f32 %v3295_v26  ;;  %v3297_v6 = vmul.f32 0.7978846, %v3293_v27  ;;  %7244 = vmatpush3.bf16.msra.mxu1 %v7659_v15 }
0x1416   : > { %7779 = vtanh.f32 %v3296_v2  ;;  %v3298_v28 = vmul.f32 0.7978846, %v3294_v5  ;;  %7245 = vmatprep.subr.bf16.mxu1 %v7912_v9 }
0x1417   : > { %7781 = vtanh.f32 %v3297_v6 }
0x1418   : > { %7783 = vtanh.f32 %v3298_v28  ;;  %v6387_v28 = vld [vmem:[%s9362_s6 + $0x1] ss:$0 sm:$0xff] }
0x1419   : > { %7246 = vmatpush3.bf16.msra.mxu1 %v7661_v17 }
0x141a   : > { %7247 = vmatprep.subr.bf16.mxu1 %v7912_v9 }
0x141d   : > { %7248 = vmatpush3.bf16.msra.mxu1 %v7663_v20 }
0x141e   : > { %7253 = vmatprep.subr.bf16.mxu1 %v7912_v9 }
0x141f   : > { %v7778_v29 = vpop.eup %7777 }
0x1420   : > { %v7780_v30 = vpop.eup %7779  ;;  %v3303_v31 = vadd.f32 1.0, %v7778_v29 }
0x1421   : > { %v7782_v32 = vpop.eup %7781  ;;  %v3304_v33 = vadd.f32 1.0, %v7780_v30 }
0x1422   : > { %v7784_v34 = vpop.eup %7783  ;;  %v3307_v35 = vmul.f32 0.5, %v3303_v31  ;;  %v3305_v36 = vadd.f32 1.0, %v7782_v32 }
0x1423   : > { %v3306_v37 = vadd.f32 1.0, %v7784_v34  ;;  %v3308_v39 = vmul.f32 0.5, %v3304_v33  ;;  %v6388_v33 = vld [vmem:[%s9363_s7 + $0x1] ss:$0 sm:$0xff] }
0x1424   : > { %v3309_v40 = vmul.f32 0.5, %v3305_v36  ;;  %v3311_v42 = vmul.f32 %v3307_v35, %v3271_v1 }
0x1425   : > { %v3310_v38 = vmul.f32 0.5, %v3306_v37  ;;  %v3312_v45 = vmul.f32 %v3308_v39, %v3273_v44  ;;  %v7665_v37 = vld [vmem:[%s9364_s8 + $0x200] sm:$0xff]  }
0x1426   : > { %v3313_v43 = vmul.f32 %v3309_v40, %v3275_v4  ;;  %v7666_v40 = vld [vmem:[%s9364_s8 + $0x208] sm:$0xff]  }
0x1427   : > { %v3314_v46 = vmul.f32 %v3310_v38, %v3277_v8  ;;  %v7667_v38 = vld [vmem:[%s9364_s8 + $0x210] sm:$0xff]  }
0x1428   : > { %v3315_v47 = vpack.c.bf16 %v3313_v43, %v3311_v42  ;;  %v7668_v42 = vld [vmem:[%s9364_s8 + $0x218] sm:$0xff]  }
0x1429   : > { %v3316_v48 = vpack.c.bf16 %v3314_v46, %v3312_v45 }
0x142b   : > { %3484 = vmatprep.mubr.bf16.mxu0 %v3316_v48 }
0x142c   : > { %3485 = vmatmul.mubr.bf16.vlgmr.msra.gmra.mrb[72].mxu0 %v3315_v47 }
0x142d   : > { %7273 = vmatprep.mubr.msk.bf16.mxu0 %vm7913_vm0, %v7912_v9  ;;  %7266 = vmatpush3.bf16.msra.mxu0 %v7658_v14 }
0x142e   : > { %7267 = vmatprep.subr.bf16.mxu0 %v7912_v9 }
0x1431   : > { %7268 = vmatpush3.bf16.msra.mxu0 %v7660_v16 }
0x1432   : > { %7269 = vmatprep.subr.bf16.mxu0 %v7912_v9 }
0x1435   : > { %7270 = vmatpush3.bf16.msra.mxu0 %v7662_v19 }
0x1436   : > { %7271 = vmatprep.subr.bf16.mxu0 %v7912_v9 }
0x1439   : > { %7272 = vmatpush3.bf16.msra.mxu0 %v7664_v22 }
0x143a   : > { %7283 = vmatprep.subr.bf16.mxu0 %v7912_v9 }
0x14ff   : > { %v6829_v49 = vpop.f32.mrb[72].mxu0 }
0x1500   : > { %v6830_v51 = vpop.f32.mrb[73].mxu0 }
0x1501   : > { %v6831_v52 = vadd.f32 %v6830_v51, %v6829_v49  ;;  %v6832_v59 = vpop.f32.mrb[74].mxu0 }
0x1502   : > { %v6833_v53 = vpop.f32.mrb[75].mxu0 }
0x1503   : > { %v3487_v55 = vadd.f32 %v6831_v52, %v6368_v50  ;;  %v6834_v41 = vadd.f32 %v6833_v53, %v6832_v59  ;;  %v6413_v52 = vld [vmem:[%s9365_s9 + $0x10] ss:$0 sm:$0xff] }
0x1505   : > { %v8749_v60 = vadd.f32 %v3487_v55, %v8634_v56  ;;  %v3490_v62 = vadd.f32 %v6834_v41, %v6368_v50  ;;  %v6428_v41 = vld [vmem:[%s9365_s9 + $0x14] ss:$0 sm:$0xff] }
0x1507   : > { %v8752_v1 = vadd.f32 %v3490_v62, %v8637_v58  ;;  %v3499_v61 = vsel %vm876_vm2, %v8749_v60, 0.0 }
0x1508   : > { %3500 = vadd.xlane.f32.xlu0 %v3499_v61 }
0x1509   : > { %v3502_v44 = vsel %vm876_vm2, %v8752_v1, 0.0 }
0x150a   : > { %3503 = vadd.xlane.f32.xlu1 %v3502_v44 }
0x1595   : > { %v3501_v12 = vpop.xlane.xlu0 %3500 }
0x1596   : > { %v3505_v3 = vmul.f32 0.015625, %v3501_v12 }
0x1597   : > { %v3504_v4 = vpop.xlane.xlu1 %3503 }
0x1598   : > { %v3507_v7 = vsub.f32 %v8749_v60, %v3505_v3  ;;  %v3506_v63 = vmul.f32 0.015625, %v3504_v4  ;;  %v6398_v3 = vld [vmem:[%s9365_s9 + $0xc] ss:$0 sm:$0xff] }
0x159a   : > { %v3508_v56 = vsub.f32 %v8752_v1, %v3506_v63  ;;  %v3509_v8 = vmul.f32 %v3507_v7, %v3507_v7 }
0x159c   : > { %v3511_v58 = vsel %vm876_vm2, %v3509_v8, 0.0  ;;  %v3510_v10 = vmul.f32 %v3508_v56, %v3508_v56 }
0x159d   : > { %3512 = vadd.xlane.f32.xlu0 %v3511_v58 }
0x159e   : > { %v3514_v11 = vsel %vm876_vm2, %v3510_v10, 0.0 }
0x159f   : > { %3515 = vadd.xlane.f32.xlu1 %v3514_v11 }
0x162a   : > { %v3513_v24 = vpop.xlane.xlu0 %3512 }
0x162b   : > { %v3517_v25 = vmul.f32 0.015625, %v3513_v24 }
0x162c   : > { %v3516_v26 = vpop.xlane.xlu1 %3515 }
0x162d   : > { %v3519_v27 = vadd.f32 1e-05, %v3517_v25  ;;  %v3518_v2 = vmul.f32 0.015625, %v3516_v26 }
0x162f   : > { %7785 = vrsqrt.f32 %v3519_v27  ;;  %v3520_v5 = vadd.f32 1e-05, %v3518_v2 }
0x1631   : > { %7787 = vrsqrt.f32 %v3520_v5 }
0x1639   : > { %v7786_v6 = vpop.eup %7785 }
0x163a   : > { %v3523_v29 = vmul.f32 %v7786_v6, %v3507_v7 }
0x163b   : > { %v7788_v30 = vpop.eup %7787 }
0x163c   : > { %v3531_v31 = vmul.f32 %v6387_v28, %v3523_v29  ;;  %v3524_v32 = vmul.f32 %v7788_v30, %v3508_v56 }
0x163e   : > { %v3532_v34 = vmul.f32 %v6387_v28, %v3524_v32  ;;  %v3539_v35 = vadd.f32 %v6388_v33, %v3531_v31 }
0x1640   : > { %v3540_v36 = vadd.f32 %v6388_v33, %v3532_v34 }
0x1642   : > { %v8803_v39 = vpack.c.bf16 %v3540_v36, %v3539_v35 }
0x1644   : > { %7250 = vmatmul.mubr.msk.bf16.vlgmr.msra.gmra.mrb[72].mxu1 %vm876_vm2, %v8803_v39  ;;  %7274 = vmatmul.mubr.msk.bf16.vlgmr.msra.gmra.mrb[76].mxu0 %vm876_vm2, %v8803_v39 }
0x1645   : > { %7254 = vmatpush3.bf16.msra.mxu1 %v7665_v37  ;;  %7261 = vmatprep.mubr.msk.bf16.mxu1 %vm7913_vm0, %v7912_v9 }
0x1646   : > { %7255 = vmatprep.subr.bf16.mxu1 %v7912_v9  ;;  %7285 = vmatprep.mubr.msk.bf16.mxu0 %vm7913_vm0, %v7912_v9 }
0x1649   : > { %7256 = vmatpush3.bf16.msra.mxu1 %v7666_v40 }
0x164a   : > { %7257 = vmatprep.subr.bf16.mxu1 %v7912_v9 }
0x164d   : > { %7258 = vmatpush3.bf16.msra.mxu1 %v7667_v38 }
0x164e   : > { %7259 = vmatprep.subr.bf16.mxu1 %v7912_v9 }
0x1651   : > { %7260 = vmatpush3.bf16.msra.mxu1 %v7668_v42 }
0x1652   : > { %7277 = vmatprep.subr.bf16.mxu1 %v7912_v9 }
0x1654   : > { %7262 = vmatmul.mubr.msk.bf16.vlgmr.msra.gmra.mrb[76].mxu1 %vm876_vm2, %v8803_v39 }
0x1655   : > { %7279 = vmatprep.mubr.msk.bf16.mxu1 %vm7913_vm0, %v7912_v9 }
0x1717   : > { %v3620_v43 = vpop.f32.mrb[72].mxu1  ;;  %v3784_v45 = vpop.f32.mrb[76].mxu0 }
0x1718   : > { %v7251_v46 = vpop.f32.mrb[73].mxu1  ;;  %v7275_v47 = vpop.f32.mrb[77].mxu0  ;;  %v3785_v4 = vadd.f32 %v6428_v41, %v3784_v45  ;;  %v3621_v56 = vadd.f32 %v6398_v3, %v3620_v43 }
0x1719   : > { %v3623_v48 = vpop.f32.mrb[74].mxu1  ;;  %v3787_v49 = vpop.f32.mrb[78].mxu0 }
0x171a   : > { %v7252_v50 = vpop.f32.mrb[75].mxu1  ;;  %v7276_v51 = vpop.f32.mrb[79].mxu0  ;;  %v3788_v8 = vadd.f32 %v6428_v41, %v3787_v49  ;;  %v3795_v10 = vpack.c.bf16 %v3785_v4, %v3785_v4  ;;  %v3624_v11 = vadd.f32 %v6398_v3, %v3623_v48  ;;  %v3791_v13 = vpack.c.bf16 %v3621_v56, %v3621_v56  ;;  %v7672_v41 = vld [vmem:[%s9364_s8 + $0x228] sm:$0xff]   ;;  %v7677_v3 = vld [vmem:[%s9364_s8 + $0x2a0] sm:$0xff]  }
0x171b   : > { %v7669_v50 = vld [vmem:[%s9364_s8 + $0x1a0] sm:$0xff]   ;;  %v7678_v4 = vld [vmem:[%s9364_s8 + $0x2a8] sm:$0xff]  }
0x171c   : > { %v3796_v14 = vpack.c.bf16 %v3788_v8, %v3788_v8  ;;  %v3921_v15 = vsel %vm1416_vm4, %v3795_v10, 0  ;;  %v3792_v16 = vpack.c.bf16 %v3624_v11, %v3624_v11 }
0x171e   : > { %v3967_v17 = vsel %vm1416_vm4, %v3796_v14, 0 }
0x1727   : > { %v3702_v59 = vpop.f32.mrb[76].mxu1 }
0x1728   : > { %v3703_v53 = vadd.f32 %v6413_v52, %v3702_v59  ;;  %v7263_v55 = vpop.f32.mrb[77].mxu1  ;;  %v7670_v59 = vld [vmem:[%s9364_s8 + $0x220] sm:$0xff]  }
0x1729   : > { %v3705_v62 = vpop.f32.mrb[78].mxu1  ;;  %v7671_v55 = vld [vmem:[%s9364_s8 + $0x1a8] sm:$0xff]  }
0x172a   : > { %v3793_v61 = vpack.c.bf16 %v3703_v53, %v3703_v53  ;;  %v3706_v44 = vadd.f32 %v6413_v52, %v3705_v62  ;;  %v7264_v12 = vpop.f32.mrb[79].mxu1  ;;  %v7673_v62 = vld [vmem:[%s9364_s8 + $0x1b0] sm:$0xff]  }
0x172b   : > { %v7676_v12 = vld [vmem:[%s9364_s8 + $0x238] sm:$0xff]  }
0x172c   : > { %v3801_v7 = vsel %vm1291_vm3, %v3793_v61, 0  ;;  %v3794_v63 = vpack.c.bf16 %v3706_v44, %v3706_v44  ;;  %v7674_v61 = vld [vmem:[%s9364_s8 + $0x230] sm:$0xff]   ;;  %v7675_v44 = vld [vmem:[%s9364_s8 + $0x1b8] sm:$0xff]  }
0x172d   : > { %7278 = vmatpush3.bf16.xpose.msra.mxu1 %v3801_v7  ;;  %v7679_v7 = vld [vmem:[%s9364_s8 + $0x2b0] sm:$0xff]  }
0x172e   : > { %v3847_v58 = vsel %vm1291_vm3, %v3794_v63, 0  ;;  %7289 = vmatprep.subr.bf16.mxu1 %v7912_v9  ;;  %v7680_v63 = vld [vmem:[%s9364_s8 + $0x2b8] sm:$0xff]  }
0x172f   : > { %7284 = vmatpush3.bf16.xpose.msra.mxu0 %v3847_v58 }
0x1730   : > { %7295 = vmatprep.subr.bf16.mxu0 %v7912_v9 }
0x1734   : > { %7280 = vmatmul.mubr.msk.bf16.vlgmr.msra.gmra.mrb[80].mxu1 %vm1291_vm3, %v3791_v13 }
0x1735   : > { %7290 = vmatpush3.bf16.msra.mxu1 %v3921_v15  ;;  %7291 = vmatprep.mubr.msk.bf16.mxu1 %vm7913_vm0, %v7912_v9 }
0x1736   : > { %7286 = vmatmul.mubr.msk.bf16.vlgmr.msra.gmra.mrb[80].mxu0 %vm1291_vm3, %v3792_v16  ;;  %7301 = vmatprep.subr.bf16.mxu1 %v7912_v9 }
0x1737   : > { %7296 = vmatpush3.bf16.msra.mxu0 %v3967_v17  ;;  %7297 = vmatprep.mubr.msk.bf16.mxu0 %vm7913_vm0, %v7912_v9 }
0x1738   : > { %7313 = vmatprep.subr.bf16.mxu0 %v7912_v9 }
0x1807   : > { %v3837_v19 = vpop.f32.mrb[80].mxu1 }
0x1808   : > { %v3889_v20 = vmul.f32 0.25, %v3837_v19  ;;  %v7281_v22 = vpop.f32.mrb[81].mxu1  ;;  %v6464_v19 = vld [vmem:[%s9365_s9 + $0x11] ss:$0 sm:$0xff] }
0x1809   : > { %v3840_v24 = vpop.f32.mrb[82].mxu1  ;;  %v3883_v25 = vpop.f32.mrb[80].mxu0 }
0x180a   : > { %v3890_v26 = vmul.f32 0.25, %v3883_v25  ;;  %v7282_v27 = vpop.f32.mrb[83].mxu1  ;;  %v7287_v2 = vpop.f32.mrb[81].mxu0  ;;  %v3891_v5 = vadd.f32 %v3889_v20, %v8286_v18 }
0x180b   : > { %v3886_v6 = vpop.f32.mrb[82].mxu0 }
0x180c   : > { %v7288_v28 = vpop.f32.mrb[83].mxu0  ;;  %v3893_v29 = vsel %vm1388_vm7, %v3891_v5, -inf  ;;  %v3892_v30 = vadd.f32 %v3890_v26, %v8288_v23 }
0x180d   : > { %3894 = vmax.xlane.f32.xlu1 %v3893_v29  ;;  %v6449_v28 = vld [vmem:[%s9365_s9 + $0xd] ss:$0 sm:$0xff] }
0x180e   : > { %v3896_v31 = vsel %vm1388_vm7, %v3892_v30, -inf }
0x180f   : > { %3897 = vmax.xlane.f32.xlu0 %v3896_v31 }
0x189a   : > { %v3895_v32 = vpop.xlane.xlu1 %3894 }
0x189b   : > { %v3899_v33 = vsub.f32 %v3891_v5, %v3895_v32 }
0x189c   : > { %v3898_v34 = vpop.xlane.xlu0 %3897 }
0x189d   : > { %v3901_v35 = vmul.f32 1.442695, %v3899_v33  ;;  %v3900_v36 = vsub.f32 %v3892_v30, %v3898_v34  ;;  %v6479_v34 = vld [vmem:[%s9365_s9 + $0x15] ss:$0 sm:$0xff] }
0x189f   : > { %7789 = vpow2.f32 %v3901_v35  ;;  %v3903_v37 = vmul.f32 1.442695, %v3900_v36 }
0x18a1   : > { %7791 = vpow2.f32 %v3903_v37 }
0x18a9   : > { %v7790_v40 = vpop.eup %7789 }
0x18aa   : > { %v3905_v38 = vsel %vm1388_vm7, %v7790_v40, 0.0 }
0x18ab   : > { %v7792_v42 = vpop.eup %7791  ;;  %3906 = vadd.xlane.f32.xlu1 %v3905_v38 }
0x18ac   : > { %v3908_v43 = vsel %vm1388_vm7, %v7792_v42, 0.0 }
0x18ad   : > { %3909 = vadd.xlane.f32.xlu0 %v3908_v43 }
0x1938   : > { %v3907_v45 = vpop.xlane.xlu1 %3906 }
0x1939   : > { %7793 = vrcp.f32 %v3907_v45 }
0x193a   : > { %v3910_v46 = vpop.xlane.xlu0 %3909 }
0x193b   : > { %7795 = vrcp.f32 %v3910_v46 }
0x1943   : > { %v7794_v47 = vpop.eup %7793 }
0x1944   : > { %v3912_v48 = vmul.f32 %v7794_v47, %v7790_v40 }
0x1945   : > { %v7796_v49 = vpop.eup %7795 }
0x1946   : > { %v3914_v51 = vmul.f32 %v7796_v49, %v7792_v42  ;;  %v3915_v52 = vpack.c.bf16 %v3912_v48, %v3912_v48 }
0x1948   : > { %7292 = vmatmul.mubr.msk.bf16.vlgmr.msra.gmra.mrb[84].mxu1 %vm1388_vm7, %v3915_v52  ;;  %v3916_v53 = vpack.c.bf16 %v3914_v51, %v3914_v51 }
0x1949   : > { %7302 = vmatpush3.bf16.msra.mxu1 %v7669_v50  ;;  %7309 = vmatprep.mubr.msk.bf16.mxu1 %vm7913_vm0, %v7912_v9 }
0x194a   : > { %7298 = vmatmul.mubr.msk.bf16.vlgmr.msra.gmra.mrb[84].mxu0 %vm1388_vm7, %v3916_v53  ;;  %7303 = vmatprep.subr.bf16.mxu1 %v7912_v9 }
0x194b   : > { %7314 = vmatpush3.bf16.msra.mxu0 %v7670_v59  ;;  %7321 = vmatprep.mubr.msk.bf16.mxu0 %vm7913_vm0, %v7912_v9 }
0x194c   : > { %7315 = vmatprep.subr.bf16.mxu0 %v7912_v9 }
0x194d   : > { %7304 = vmatpush3.bf16.msra.mxu1 %v7671_v55 }
0x194e   : > { %7305 = vmatprep.subr.bf16.mxu1 %v7912_v9 }
0x194f   : > { %7316 = vmatpush3.bf16.msra.mxu0 %v7672_v41 }
0x1950   : > { %7317 = vmatprep.subr.bf16.mxu0 %v7912_v9 }
0x1951   : > { %7306 = vmatpush3.bf16.msra.mxu1 %v7673_v62 }
0x1952   : > { %7307 = vmatprep.subr.bf16.mxu1 %v7912_v9 }
0x1953   : > { %7318 = vmatpush3.bf16.msra.mxu0 %v7674_v61 }
0x1954   : > { %7319 = vmatprep.subr.bf16.mxu0 %v7912_v9 }
0x1955   : > { %7308 = vmatpush3.bf16.msra.mxu1 %v7675_v44 }
0x1956   : > { %7325 = vmatprep.subr.bf16.mxu1 %v7912_v9 }
0x1957   : > { %7320 = vmatpush3.bf16.msra.mxu0 %v7676_v12 }
0x1958   : > { %7310 = vmatmul.mubr.msk.bf16.vlgmr.msra.gmra.mrb[88].mxu1 %vm876_vm2, %v8803_v39  ;;  %7337 = vmatprep.subr.bf16.mxu0 %v7912_v9 }
0x1959   : > { %7326 = vmatpush3.bf16.msra.mxu1 %v7677_v3  ;;  %7333 = vmatprep.mubr.msk.bf16.mxu1 %vm7913_vm0, %v7912_v9 }
0x195a   : > { %7322 = vmatmul.mubr.msk.bf16.vlgmr.msra.gmra.mrb[88].mxu0 %vm876_vm2, %v8803_v39  ;;  %7327 = vmatprep.subr.bf16.mxu1 %v7912_v9 }
0x195b   : > { %7339 = vmatprep.mubr.msk.bf16.mxu0 %vm7913_vm0, %v7912_v9 }
0x195d   : > { %7328 = vmatpush3.bf16.msra.mxu1 %v7678_v4 }
0x195e   : > { %7329 = vmatprep.subr.bf16.mxu1 %v7912_v9 }
0x1961   : > { %7330 = vmatpush3.bf16.msra.mxu1 %v7679_v7 }
0x1962   : > { %7331 = vmatprep.subr.bf16.mxu1 %v7912_v9 }
0x1965   : > { %7332 = vmatpush3.bf16.msra.mxu1 %v7680_v63 }
0x1966   : > { %7349 = vmatprep.subr.bf16.mxu1 %v7912_v9 }
0x1968   : > { %7334 = vmatmul.mubr.msk.bf16.vlgmr.msra.gmra.mrb[92].mxu1 %vm876_vm2, %v8803_v39 }
0x1969   : > { %7351 = vmatprep.mubr.msk.bf16.mxu1 %vm7913_vm0, %v7912_v9 }
0x1a1b   : > { %v8925_v56 = vpop.f32.mrb[84].mxu1 }
0x1a1c   : > { %v7293_v8 = vpop.f32.mrb[85].mxu1 }
0x1a1d   : > { %v3960_v58 = vpop.f32.mrb[86].mxu1  ;;  %v8927_v10 = vpop.f32.mrb[84].mxu0 }
0x1a1e   : > { %v4009_v11 = vpack.c.bf16 %v8927_v10, %v8925_v56  ;;  %v7294_v13 = vpop.f32.mrb[87].mxu1  ;;  %v7299_v14 = vpop.f32.mrb[85].mxu0  ;;  %v7685_v56 = vld [vmem:[%s9364_s8 + $0x258] sm:$0xff]   ;;  %v7686_v10 = vld [vmem:[%s9366_s10 + $0x28] sm:$0xff]  }
0x1a1f   : > { %v4006_v15 = vpop.f32.mrb[86].mxu0 }
0x1a20   : > { %v7300_v16 = vpop.f32.mrb[87].mxu0 }
0x1a2b   : > { %v4088_v17 = vpop.f32.mrb[88].mxu1 }
0x1a2c   : > { %v7311_v20 = vpop.f32.mrb[89].mxu1  ;;  %v4089_v31 = vadd.f32 %v6449_v28, %v4088_v17 }
0x1a2d   : > { %v4091_v22 = vpop.f32.mrb[90].mxu1  ;;  %v4170_v24 = vpop.f32.mrb[88].mxu0 }
0x1a2e   : > { %v4171_v25 = vadd.f32 %v6464_v19, %v4170_v24  ;;  %v7312_v26 = vpop.f32.mrb[91].mxu1  ;;  %v7323_v27 = vpop.f32.mrb[89].mxu0  ;;  %v4259_v33 = vpack.c.bf16 %v4089_v31, %v4089_v31  ;;  %v4092_v37 = vadd.f32 %v6449_v28, %v4091_v22  ;;  %v7681_v28 = vld [vmem:[%s9366_s10 + $0x20] sm:$0xff]   ;;  %v7683_v31 = vld [vmem:[%s9364_s8 + $0x248] sm:$0xff]  }
0x1a2f   : > { %v4173_v2 = vpop.f32.mrb[90].mxu0 }
0x1a30   : > { %v4261_v5 = vpack.c.bf16 %v4171_v25, %v4171_v25  ;;  %v7324_v6 = vpop.f32.mrb[91].mxu0  ;;  %v4174_v30 = vadd.f32 %v6464_v19, %v4173_v2  ;;  %v4260_v47 = vpack.c.bf16 %v4092_v37, %v4092_v37  ;;  %v7687_v37 = vld [vmem:[%s9364_s8 + $0x1c0] sm:$0xff]  }
0x1a32   : > { %v4269_v29 = vsel %vm1291_vm3, %v4261_v5, 0  ;;  %v4262_v32 = vpack.c.bf16 %v4174_v30, %v4174_v30  ;;  %v7682_v30 = vld [vmem:[%s9364_s8 + $0x240] sm:$0xff]  }
0x1a33   : > { %7338 = vmatpush3.bf16.xpose.msra.mxu0 %v4269_v29 }
0x1a34   : > { %7343 = vmatprep.subr.bf16.mxu0 %v7912_v9  ;;  %v4315_v35 = vsel %vm1291_vm3, %v4262_v32, 0  ;;  %v7684_v32 = vld [vmem:[%s9364_s8 + $0x250] sm:$0xff]  }
0x1a3a   : > { %7340 = vmatmul.mubr.msk.bf16.vlgmr.msra.gmra.mrb[92].mxu0 %vm1291_vm3, %v4259_v33 }
0x1a3b   : > { %v4252_v36 = vpop.f32.mrb[92].mxu1  ;;  %7344 = vmatpush3.bf16.xpose.msra.mxu0 %v4315_v35  ;;  %7345 = vmatprep.mubr.msk.bf16.mxu0 %vm7913_vm0, %v7912_v9 }
0x1a3c   : > { %v4253_v40 = vadd.f32 %v6479_v34, %v4252_v36  ;;  %v7335_v38 = vpop.f32.mrb[93].mxu1  ;;  %7355 = vmatprep.subr.bf16.mxu0 %v7912_v9 }
0x1a3d   : > { %v4255_v42 = vpop.f32.mrb[94].mxu1 }
0x1a3e   : > { %v4263_v43 = vpack.c.bf16 %v4253_v40, %v4253_v40  ;;  %v4256_v45 = vadd.f32 %v6479_v34, %v4255_v42  ;;  %v7336_v46 = vpop.f32.mrb[95].mxu1 }
0x1a40   : > { %v4389_v48 = vsel %vm1416_vm4, %v4263_v43, 0  ;;  %v4264_v49 = vpack.c.bf16 %v4256_v45, %v4256_v45  ;;  %v7688_v45 = vld [vmem:[%s9364_s8 + $0x1c8] sm:$0xff]  }
0x1a41   : > { %7350 = vmatpush3.bf16.msra.mxu1 %v4389_v48 }
0x1a42   : > { %v4435_v50 = vsel %vm1416_vm4, %v4264_v49, 0  ;;  %7346 = vmatmul.mubr.msk.bf16.vlgmr.msra.gmra.mrb[96].mxu0 %vm1291_vm3, %v4260_v47  ;;  %7361 = vmatprep.subr.bf16.mxu1 %v7912_v9  ;;  %v7689_v47 = vld [vmem:[%s9364_s8 + $0x1d0] sm:$0xff]  }
0x1a43   : > { %7356 = vmatpush3.bf16.msra.mxu0 %v4435_v50  ;;  %7357 = vmatprep.mubr.msk.bf16.mxu0 %vm7913_vm0, %v7912_v9 }
0x1a44   : > { %7367 = vmatprep.subr.bf16.mxu0 %v7912_v9 }
0x1b0d   : > { %v4305_v51 = vpop.f32.mrb[92].mxu0 }
0x1b0e   : > { %v4357_v52 = vmul.f32 0.25, %v4305_v51  ;;  %v7341_v59 = vpop.f32.mrb[93].mxu0  ;;  %v7690_v51 = vld [vmem:[%s9364_s8 + $0x1d8] sm:$0xff]  }
0x1b0f   : > { %v4308_v53 = vpop.f32.mrb[94].mxu0  ;;  %v7692_v59 = vld [vmem:[%s9364_s8 + $0x2c8] sm:$0xff]  }
0x1b10   : > { %v7342_v55 = vpop.f32.mrb[95].mxu0  ;;  %v4359_v41 = vadd.f32 %v4357_v52, %v8286_v18  ;;  %v7691_v52 = vld [vmem:[%s9364_s8 + $0x2c0] sm:$0xff]   ;;  %v6519_v53 = vld [vmem:[%s9365_s9 + $0x12] ss:$0 sm:$0xff] }
0x1b12   : > { %v4361_v62 = vsel %vm1388_vm7, %v4359_v41, -inf }
0x1b13   : > { %4362 = vmax.xlane.f32.xlu0 %v4361_v62 }
0x1b15   : > { %v4351_v61 = vpop.f32.mrb[96].mxu0 }
0x1b16   : > { %v4358_v44 = vmul.f32 0.25, %v4351_v61  ;;  %v7347_v12 = vpop.f32.mrb[97].mxu0 }
0x1b17   : > { %v4354_v3 = vpop.f32.mrb[98].mxu0 }
0x1b18   : > { %v7348_v4 = vpop.f32.mrb[99].mxu0  ;;  %v4360_v7 = vadd.f32 %v4358_v44, %v8288_v23 }
0x1b1a   : > { %v4364_v63 = vsel %vm1388_vm7, %v4360_v7, -inf }
0x1b1b   : > { %4365 = vmax.xlane.f32.xlu1 %v4364_v63 }
0x1ba0   : > { %v4363_v8 = vpop.xlane.xlu0 %4362 }
0x1ba1   : > { %v4367_v58 = vsub.f32 %v4359_v41, %v4363_v8  ;;  %v7693_v41 = vld [vmem:[%s9364_s8 + $0x2d0] sm:$0xff]  }
0x1ba3   : > { %v4369_v13 = vmul.f32 1.442695, %v4367_v58 }
0x1ba5   : > { %7797 = vpow2.f32 %v4369_v13 }
0x1ba8   : > { %v4366_v14 = vpop.xlane.xlu1 %4365 }
0x1ba9   : > { %v4368_v15 = vsub.f32 %v4360_v7, %v4366_v14  ;;  %v7694_v7 = vld [vmem:[%s9364_s8 + $0x2d8] sm:$0xff]  }
0x1bab   : > { %v4371_v16 = vmul.f32 1.442695, %v4368_v15 }
0x1bad   : > { %7799 = vpow2.f32 %v4371_v16 }
0x1baf   : > { %v7798_v17 = vpop.eup %7797 }
0x1bb0   : > { %v4373_v19 = vsel %vm1388_vm7, %v7798_v17, 0.0 }
0x1bb1   : > { %4374 = vadd.xlane.f32.xlu0 %v4373_v19 }
0x1bb7   : > { %v7800_v20 = vpop.eup %7799 }
0x1bb8   : > { %v4376_v22 = vsel %vm1388_vm7, %v7800_v20, 0.0 }
0x1bb9   : > { %4377 = vadd.xlane.f32.xlu1 %v4376_v22 }
0x1c3e   : > { %v4375_v24 = vpop.xlane.xlu0 %4374 }
0x1c3f   : > { %7801 = vrcp.f32 %v4375_v24 }
0x1c46   : > { %v4378_v25 = vpop.xlane.xlu1 %4377 }
0x1c47   : > { %7803 = vrcp.f32 %v4378_v25 }
0x1c49   : > { %v7802_v26 = vpop.eup %7801 }
0x1c4a   : > { %v4380_v27 = vmul.f32 %v7802_v26, %v7798_v17  ;;  %v6504_v17 = vld [vmem:[%s9365_s9 + $0xe] ss:$0 sm:$0xff] }
0x1c4c   : > { %v4383_v2 = vpack.c.bf16 %v4380_v27, %v4380_v27 }
0x1c4e   : > { %7352 = vmatmul.mubr.msk.bf16.vlgmr.msra.gmra.mrb[96].mxu1 %vm1388_vm7, %v4383_v2 }
0x1c4f   : > { %7363 = vmatprep.mubr.msk.bf16.mxu1 %vm7913_vm0, %v7912_v9  ;;  %7362 = vmatpush3.bf16.msra.mxu1 %v7686_v10 }
0x1c50   : > { %7373 = vmatprep.subr.bf16.mxu1 %v7912_v9 }
0x1c51   : > { %v7804_v5 = vpop.eup %7803 }
0x1c52   : > { %v4382_v6 = vmul.f32 %v7804_v5, %v7800_v20 }
0x1c54   : > { %v4384_v29 = vpack.c.bf16 %v4382_v6, %v4382_v6 }
0x1c56   : > { %7358 = vmatmul.mubr.msk.bf16.vlgmr.msra.gmra.mrb[100].mxu0 %vm1388_vm7, %v4384_v29 }
0x1c57   : > { %7368 = vmatpush3.bf16.msra.mxu0 %v7681_v28  ;;  %7369 = vmatprep.mubr.msk.bf16.mxu0 %vm7913_vm0, %v7912_v9  ;;  %v6534_v28 = vld [vmem:[%s9365_s9 + $0x16] ss:$0 sm:$0xff] }
0x1c58   : > { %7385 = vmatprep.subr.bf16.mxu0 %v7912_v9 }
0x1c5e   : > { %7370 = vmatmul.mubr.msk.bf16.vlgmr.msra.gmra.mrb[104].mxu0 %vm1291_vm3, %v4009_v11 }
0x1c5f   : > { %7386 = vmatpush3.bf16.msra.mxu0 %v7682_v30  ;;  %7393 = vmatprep.mubr.msk.bf16.mxu0 %vm7913_vm0, %v7912_v9 }
0x1c60   : > { %7387 = vmatprep.subr.bf16.mxu0 %v7912_v9 }
0x1c63   : > { %7388 = vmatpush3.bf16.msra.mxu0 %v7683_v31 }
0x1c64   : > { %7389 = vmatprep.subr.bf16.mxu0 %v7912_v9 }
0x1c67   : > { %7390 = vmatpush3.bf16.msra.mxu0 %v7684_v32 }
0x1c68   : > { %7391 = vmatprep.subr.bf16.mxu0 %v7912_v9 }
0x1c6b   : > { %7392 = vmatpush3.bf16.msra.mxu0 %v7685_v56 }
0x1c6c   : > { %7409 = vmatprep.subr.bf16.mxu0 %v7912_v9 }
0x1c6e   : > { %7394 = vmatmul.mubr.msk.bf16.vlgmr.msra.gmra.mrb[108].mxu0 %vm876_vm2, %v8803_v39 }
0x1c6f   : > { %7411 = vmatprep.mubr.msk.bf16.mxu0 %vm7913_vm0, %v7912_v9 }
0x1d21   : > { %v4425_v11 = vpop.f32.mrb[96].mxu1 }
0x1d22   : > { %v7353_v33 = vpop.f32.mrb[97].mxu1 }
0x1d23   : > { %v4428_v34 = vpop.f32.mrb[98].mxu1 }
0x1d24   : > { %v7354_v35 = vpop.f32.mrb[99].mxu1 }
0x1d29   : > { %v4471_v36 = vpop.f32.mrb[100].mxu0 }
0x1d2a   : > { %v4477_v40 = vpack.c.bf16 %v4471_v36, %v4425_v11  ;;  %v7359_v38 = vpop.f32.mrb[101].mxu0 }
0x1d2b   : > { %v4474_v42 = vpop.f32.mrb[102].mxu0 }
0x1d2c   : > { %v7360_v43 = vpop.f32.mrb[103].mxu0  ;;  %7364 = vmatmul.mubr.msk.bf16.vlgmr.msra.gmra.mrb[100].mxu1 %vm1291_vm3, %v4477_v40 }
0x1d2d   : > { %7374 = vmatpush3.bf16.msra.mxu1 %v7687_v37  ;;  %7381 = vmatprep.mubr.msk.bf16.mxu1 %vm7913_vm0, %v7912_v9 }
0x1d2e   : > { %7375 = vmatprep.subr.bf16.mxu1 %v7912_v9 }
0x1d31   : > { %7376 = vmatpush3.bf16.msra.mxu1 %v7688_v45  ;;  %v4574_v46 = vpop.f32.mrb[104].mxu0 }
0x1d32   : > { %v7371_v48 = vpop.f32.mrb[105].mxu0  ;;  %7377 = vmatprep.subr.bf16.mxu1 %v7912_v9 }
0x1d33   : > { %v4577_v49 = vpop.f32.mrb[106].mxu0 }
0x1d34   : > { %v7372_v50 = vpop.f32.mrb[107].mxu0 }
0x1d35   : > { %7378 = vmatpush3.bf16.msra.mxu1 %v7689_v47 }
0x1d36   : > { %7379 = vmatprep.subr.bf16.mxu1 %v7912_v9 }
0x1d39   : > { %7380 = vmatpush3.bf16.msra.mxu1 %v7690_v51 }
0x1d3a   : > { %7397 = vmatprep.subr.bf16.mxu1 %v7912_v9 }
0x1d3c   : > { %7382 = vmatmul.mubr.msk.bf16.vlgmr.msra.gmra.mrb[104].mxu1 %vm876_vm2, %v8803_v39 }
0x1d3d   : > { %7398 = vmatpush3.bf16.msra.mxu1 %v7691_v52  ;;  %7405 = vmatprep.mubr.msk.bf16.mxu1 %vm7913_vm0, %v7912_v9 }
0x1d3e   : > { %7399 = vmatprep.subr.bf16.mxu1 %v7912_v9 }
0x1d41   : > { %v4738_v55 = vpop.f32.mrb[108].mxu0  ;;  %7400 = vmatpush3.bf16.msra.mxu1 %v7692_v59 }
0x1d42   : > { %v4739_v62 = vadd.f32 %v6519_v53, %v4738_v55  ;;  %v7395_v61 = vpop.f32.mrb[109].mxu0  ;;  %7401 = vmatprep.subr.bf16.mxu1 %v7912_v9 }
0x1d43   : > { %v4741_v44 = vpop.f32.mrb[110].mxu0 }
0x1d44   : > { %v4829_v12 = vpack.c.bf16 %v4739_v62, %v4739_v62  ;;  %v4742_v3 = vadd.f32 %v6519_v53, %v4741_v44  ;;  %v7396_v4 = vpop.f32.mrb[111].mxu0 }
0x1d45   : > { %7402 = vmatpush3.bf16.msra.mxu1 %v7693_v41 }
0x1d46   : > { %v4837_v63 = vsel %vm1291_vm3, %v4829_v12, 0  ;;  %7403 = vmatprep.subr.bf16.mxu1 %v7912_v9  ;;  %v4830_v20 = vpack.c.bf16 %v4742_v3, %v4742_v3 }
0x1d47   : > { %7410 = vmatpush3.bf16.xpose.msra.mxu0 %v4837_v63 }
0x1d48   : > { %7415 = vmatprep.subr.bf16.mxu0 %v7912_v9  ;;  %v4883_v2 = vsel %vm1291_vm3, %v4830_v20, 0 }
0x1d49   : > { %7404 = vmatpush3.bf16.msra.mxu1 %v7694_v7 }
0x1d4a   : > { %7421 = vmatprep.subr.bf16.mxu1 %v7912_v9 }
0x1d4c   : > { %7406 = vmatmul.mubr.msk.bf16.vlgmr.msra.gmra.mrb[108].mxu1 %vm876_vm2, %v8803_v39 }
0x1d4d   : > { %7423 = vmatprep.mubr.msk.bf16.mxu1 %vm7913_vm0, %v7912_v9 }
0x1dff   : > { %v4524_v8 = vpop.f32.mrb[100].mxu1 }
0x1e00   : > { %v9048_v58 = vadd.f32 %v4574_v46, %v4524_v8  ;;  %v7365_v13 = vpop.f32.mrb[101].mxu1 }
0x1e01   : > { %v4527_v14 = vpop.f32.mrb[102].mxu1 }
0x1e02   : > { %v9050_v15 = vadd.f32 %v4577_v49, %v4527_v14  ;;  %v7366_v16 = vpop.f32.mrb[103].mxu1 }
0x1e0f   : > { %v4656_v19 = vpop.f32.mrb[104].mxu1 }
0x1e10   : > { %v4657_v22 = vadd.f32 %v6504_v17, %v4656_v19  ;;  %v7383_v24 = vpop.f32.mrb[105].mxu1  ;;  %v7695_v19 = vld [vmem:[%s9364_s8 + $0x1e0] sm:$0xff]  }
0x1e11   : > { %v4659_v25 = vpop.f32.mrb[106].mxu1  ;;  %v7697_v24 = vld [vmem:[%s9364_s8 + $0x1f0] sm:$0xff]  }
0x1e12   : > { %v4827_v26 = vpack.c.bf16 %v4657_v22, %v4657_v22  ;;  %v7384_v27 = vpop.f32.mrb[107].mxu1  ;;  %v4660_v5 = vadd.f32 %v6504_v17, %v4659_v25  ;;  %v7696_v22 = vld [vmem:[%s9364_s8 + $0x1e8] sm:$0xff]   ;;  %v7698_v25 = vld [vmem:[%s9364_s8 + $0x1f8] sm:$0xff]  }
0x1e13   : > { %v7700_v27 = vld [vmem:[%s9364_s8 + $0x2e8] sm:$0xff]  }
0x1e14   : > { %7412 = vmatmul.mubr.msk.bf16.vlgmr.msra.gmra.mrb[112].mxu0 %vm1291_vm3, %v4827_v26  ;;  %v4828_v6 = vpack.c.bf16 %v4660_v5, %v4660_v5  ;;  %v7699_v26 = vld [vmem:[%s9364_s8 + $0x2e0] sm:$0xff]   ;;  %v7702_v5 = vld [vmem:[%s9364_s8 + $0x2f8] sm:$0xff]  }
0x1e15   : > { %7416 = vmatpush3.bf16.xpose.msra.mxu0 %v4883_v2  ;;  %7417 = vmatprep.mubr.msk.bf16.mxu0 %vm7913_vm0, %v7912_v9  ;;  %v7701_v2 = vld [vmem:[%s9364_s8 + $0x2f0] sm:$0xff]  }
0x1e16   : > { %7427 = vmatprep.subr.bf16.mxu0 %v7912_v9 }
0x1e1c   : > { %7418 = vmatmul.mubr.msk.bf16.vlgmr.msra.gmra.mrb[116].mxu0 %vm1291_vm3, %v4828_v6  ;;  %v7703_v6 = vld [vmem:[%s9366_s10 + $0x30] sm:$0xff]  }
0x1e1d   : > { %7429 = vmatprep.mubr.msk.bf16.mxu0 %vm7913_vm0, %v7912_v9 }
0x1e1f   : > { %v4820_v29 = vpop.f32.mrb[108].mxu1 }
0x1e20   : > { %v4821_v30 = vadd.f32 %v6534_v28, %v4820_v29  ;;  %v7407_v31 = vpop.f32.mrb[109].mxu1 }
0x1e21   : > { %v4823_v32 = vpop.f32.mrb[110].mxu1 }
0x1e22   : > { %v4831_v56 = vpack.c.bf16 %v4821_v30, %v4821_v30  ;;  %v4824_v10 = vadd.f32 %v6534_v28, %v4823_v32  ;;  %v7408_v11 = vpop.f32.mrb[111].mxu1 }
0x1e24   : > { %v4957_v33 = vsel %vm1416_vm4, %v4831_v56, 0  ;;  %v4832_v34 = vpack.c.bf16 %v4824_v10, %v4824_v10  ;;  %v7704_v56 = vld [vmem:[%s9364_s8 + $0x260] sm:$0xff]  }
0x1e25   : > { %7422 = vmatpush3.bf16.msra.mxu1 %v4957_v33 }
0x1e26   : > { %v5003_v35 = vsel %vm1416_vm4, %v4832_v34, 0  ;;  %7433 = vmatprep.subr.bf16.mxu1 %v7912_v9 }
0x1e27   : > { %7428 = vmatpush3.bf16.msra.mxu0 %v5003_v35  ;;  %v7705_v35 = vld [vmem:[%s9364_s8 + $0x268] sm:$0xff]  }
0x1e28   : > { %7439 = vmatprep.subr.bf16.mxu0 %v7912_v9 }
0x1ee7   : > { %v4873_v36 = vpop.f32.mrb[112].mxu0 }
0x1ee8   : > { %v4925_v37 = vmul.f32 0.25, %v4873_v36  ;;  %v7413_v40 = vpop.f32.mrb[113].mxu0  ;;  %v7706_v36 = vld [vmem:[%s9364_s8 + $0x270] sm:$0xff]  }
0x1ee9   : > { %v4876_v38 = vpop.f32.mrb[114].mxu0 }
0x1eea   : > { %v7414_v42 = vpop.f32.mrb[115].mxu0  ;;  %v4927_v43 = vadd.f32 %v4925_v37, %v8286_v18  ;;  %v7707_v37 = vld [vmem:[%s9364_s8 + $0x278] sm:$0xff]  }
0x1eec   : > { %v4929_v45 = vsel %vm1388_vm7, %v4927_v43, -inf }
0x1eed   : > { %4930 = vmax.xlane.f32.xlu0 %v4929_v45  ;;  %v6587_v45 = vld [vmem:[%s9365_s9 + $0x17] ss:$0 sm:$0xff] }
0x1eef   : > { %v4919_v46 = vpop.f32.mrb[116].mxu0 }
0x1ef0   : > { %v4926_v47 = vmul.f32 0.25, %v4919_v46  ;;  %v7419_v48 = vpop.f32.mrb[117].mxu0 }
0x1ef1   : > { %v4922_v49 = vpop.f32.mrb[118].mxu0 }
0x1ef2   : > { %v7420_v50 = vpop.f32.mrb[119].mxu0  ;;  %v4928_v51 = vadd.f32 %v4926_v47, %v8288_v23 }
0x1ef4   : > { %v4932_v52 = vsel %vm1388_vm7, %v4928_v51, -inf }
0x1ef5   : > { %4933 = vmax.xlane.f32.xlu1 %v4932_v52 }
0x1f7a   : > { %v4931_v59 = vpop.xlane.xlu0 %4930 }
0x1f7b   : > { %v4935_v53 = vsub.f32 %v4927_v43, %v4931_v59 }
0x1f7d   : > { %v4937_v55 = vmul.f32 1.442695, %v4935_v53 }
0x1f7f   : > { %7805 = vpow2.f32 %v4937_v55 }
0x1f82   : > { %v4934_v41 = vpop.xlane.xlu1 %4933 }
0x1f83   : > { %v4936_v62 = vsub.f32 %v4928_v51, %v4934_v41 }
0x1f85   : > { %v4939_v61 = vmul.f32 1.442695, %v4936_v62 }
0x1f87   : > { %7807 = vpow2.f32 %v4939_v61 }
0x1f89   : > { %v7806_v44 = vpop.eup %7805 }
0x1f8a   : > { %v4941_v12 = vsel %vm1388_vm7, %v7806_v44, 0.0 }
0x1f8b   : > { %4942 = vadd.xlane.f32.xlu0 %v4941_v12 }
0x1f91   : > { %v7808_v3 = vpop.eup %7807 }
0x1f92   : > { %v4944_v4 = vsel %vm1388_vm7, %v7808_v3, 0.0 }
0x1f93   : > { %4945 = vadd.xlane.f32.xlu1 %v4944_v4 }
0x2018   : > { %v4943_v7 = vpop.xlane.xlu0 %4942 }
0x2019   : > { %7809 = vrcp.f32 %v4943_v7 }
0x2020   : > { %v4946_v63 = vpop.xlane.xlu1 %4945 }
0x2021   : > { %7811 = vrcp.f32 %v4946_v63 }
0x2023   : > { %v7810_v8 = vpop.eup %7809 }
0x2024   : > { %v4948_v13 = vmul.f32 %v7810_v8, %v7806_v44  ;;  %v6572_v44 = vld [vmem:[%s9365_s9 + $0x13] ss:$0 sm:$0xff] }
0x2026   : > { %v4951_v14 = vpack.c.bf16 %v4948_v13, %v4948_v13 }
0x2028   : > { %7424 = vmatmul.mubr.msk.bf16.vlgmr.msra.gmra.mrb[112].mxu1 %vm1388_vm7, %v4951_v14 }
0x2029   : > { %7435 = vmatprep.mubr.msk.bf16.mxu1 %vm7913_vm0, %v7912_v9  ;;  %7434 = vmatpush3.bf16.msra.mxu1 %v7703_v6 }
0x202a   : > { %7451 = vmatprep.subr.bf16.mxu1 %v7912_v9 }
0x202b   : > { %v7812_v16 = vpop.eup %7811 }
0x202c   : > { %v4950_v17 = vmul.f32 %v7812_v16, %v7808_v3 }
0x202e   : > { %v4952_v20 = vpack.c.bf16 %v4950_v17, %v4950_v17 }
0x2030   : > { %7430 = vmatmul.mubr.msk.bf16.vlgmr.msra.gmra.mrb[120].mxu0 %vm1388_vm7, %v4952_v20 }
0x2031   : > { %7440 = vmatpush3.bf16.msra.mxu0 %v7695_v19  ;;  %7447 = vmatprep.mubr.msk.bf16.mxu0 %vm7913_vm0, %v7912_v9 }
0x2032   : > { %7441 = vmatprep.subr.bf16.mxu0 %v7912_v9 }
0x2035   : > { %7442 = vmatpush3.bf16.msra.mxu0 %v7696_v22 }
0x2036   : > { %7443 = vmatprep.subr.bf16.mxu0 %v7912_v9 }
0x2039   : > { %7444 = vmatpush3.bf16.msra.mxu0 %v7697_v24 }
0x203a   : > { %7445 = vmatprep.subr.bf16.mxu0 %v7912_v9 }
0x203d   : > { %7446 = vmatpush3.bf16.msra.mxu0 %v7698_v25 }
0x203e   : > { %7463 = vmatprep.subr.bf16.mxu0 %v7912_v9 }
0x2040   : > { %7448 = vmatmul.mubr.msk.bf16.vlgmr.msra.gmra.mrb[124].mxu0 %vm876_vm2, %v8803_v39 }
0x2041   : > { %7464 = vmatpush3.bf16.msra.mxu0 %v7699_v26  ;;  %7471 = vmatprep.mubr.msk.bf16.mxu0 %vm7913_vm0, %v7912_v9 }
0x2042   : > { %7465 = vmatprep.subr.bf16.mxu0 %v7912_v9 }
0x2045   : > { %7466 = vmatpush3.bf16.msra.mxu0 %v7700_v27 }
0x2046   : > { %7467 = vmatprep.subr.bf16.mxu0 %v7912_v9 }
0x2049   : > { %7468 = vmatpush3.bf16.msra.mxu0 %v7701_v2 }
0x204a   : > { %7469 = vmatprep.subr.bf16.mxu0 %v7912_v9 }
0x204d   : > { %7470 = vmatpush3.bf16.msra.mxu0 %v7702_v5 }
0x204e   : > { %7487 = vmatprep.subr.bf16.mxu0 %v7912_v9 }
0x2050   : > { %7472 = vmatmul.mubr.msk.bf16.vlgmr.msra.gmra.mrb[128].mxu0 %vm876_vm2, %v8803_v39 }
0x2051   : > { %7489 = vmatprep.mubr.msk.bf16.mxu0 %vm7913_vm0, %v7912_v9 }
0x20fb   : > { %v4993_v28 = vpop.f32.mrb[112].mxu1 }
0x20fc   : > { %v7425_v29 = vpop.f32.mrb[113].mxu1 }
0x20fd   : > { %v4996_v30 = vpop.f32.mrb[114].mxu1 }
0x20fe   : > { %v7426_v31 = vpop.f32.mrb[115].mxu1 }
0x2103   : > { %v5039_v32 = vpop.f32.mrb[120].mxu0 }
0x2104   : > { %v5045_v10 = vpack.c.bf16 %v5039_v32, %v4993_v28  ;;  %v7431_v11 = vpop.f32.mrb[121].mxu0 }
0x2105   : > { %v5042_v33 = vpop.f32.mrb[122].mxu0 }
0x2106   : > { %v7432_v34 = vpop.f32.mrb[123].mxu0  ;;  %7436 = vmatmul.mubr.msk.bf16.vlgmr.msra.gmra.mrb[116].mxu1 %vm1291_vm3, %v5045_v10 }
0x2107   : > { %7452 = vmatpush3.bf16.msra.mxu1 %v7704_v56  ;;  %7459 = vmatprep.mubr.msk.bf16.mxu1 %vm7913_vm0, %v7912_v9 }
0x2108   : > { %7453 = vmatprep.subr.bf16.mxu1 %v7912_v9 }
0x210b   : > { %7454 = vmatpush3.bf16.msra.mxu1 %v7705_v35 }
0x210c   : > { %7455 = vmatprep.subr.bf16.mxu1 %v7912_v9 }
0x210f   : > { %7456 = vmatpush3.bf16.msra.mxu1 %v7706_v36 }
0x2110   : > { %7457 = vmatprep.subr.bf16.mxu1 %v7912_v9 }
0x2113   : > { %v5176_v40 = vpop.f32.mrb[124].mxu0  ;;  %7458 = vmatpush3.bf16.msra.mxu1 %v7707_v37 }
0x2114   : > { %v7449_v38 = vpop.f32.mrb[125].mxu0  ;;  %7475 = vmatprep.subr.bf16.mxu1 %v7912_v9 }
0x2115   : > { %v5179_v42 = vpop.f32.mrb[126].mxu0 }
0x2116   : > { %v7450_v43 = vpop.f32.mrb[127].mxu0  ;;  %7460 = vmatmul.mubr.msk.bf16.vlgmr.msra.gmra.mrb[120].mxu1 %vm876_vm2, %v8803_v39 }
0x2117   : > { %7477 = vmatprep.mubr.msk.bf16.mxu1 %vm7913_vm0, %v7912_v9 }
0x2123   : > { %v5340_v46 = vpop.f32.mrb[128].mxu0 }
0x2124   : > { %v5341_v47 = vadd.f32 %v6587_v45, %v5340_v46  ;;  %v7473_v48 = vpop.f32.mrb[129].mxu0 }
0x2125   : > { %v5343_v49 = vpop.f32.mrb[130].mxu0 }
0x2126   : > { %v5351_v50 = vpack.c.bf16 %v5341_v47, %v5341_v47  ;;  %v5344_v51 = vadd.f32 %v6587_v45, %v5343_v49  ;;  %v7474_v52 = vpop.f32.mrb[131].mxu0 }
0x2128   : > { %v5477_v59 = vsel %vm1416_vm4, %v5351_v50, 0  ;;  %v5352_v22 = vpack.c.bf16 %v5344_v51, %v5344_v51 }
0x2129   : > { %7488 = vmatpush3.bf16.msra.mxu0 %v5477_v59  ;;  %v7708_v59 = vld [vmem:[%s9366_s10 + $0x38] sm:$0xff]  }
0x212a   : > { %7499 = vmatprep.subr.bf16.mxu0 %v7912_v9  ;;  %v5523_v25 = vsel %vm1416_vm4, %v5352_v22, 0 }
0x21d9   : > { %v5092_v39 = vpop.f32.mrb[116].mxu1 }
0x21da   : > { %v9155_v53 = vadd.f32 %v5092_v39, %v9048_v58  ;;  %v7437_v55 = vpop.f32.mrb[117].mxu1  ;;  %v6557_v58 = vld [vmem:[%s9365_s9 + $0xf] ss:$0 sm:$0xff] }
0x21db   : > { %v5095_v41 = vpop.f32.mrb[118].mxu1  ;;  %v5180_v20 = vadd.f32 %v6557_v58, %v5179_v42 }
0x21dc   : > { %v9158_v62 = vadd.f32 %v5095_v41, %v9050_v15  ;;  %v7438_v61 = vpop.f32.mrb[119].mxu1  ;;  %v5177_v15 = vadd.f32 %v6557_v58, %v5176_v40 }
0x21dd   : > { %v5348_v24 = vpack.c.bf16 %v5180_v20, %v5180_v20 }
0x21de   : > { %v5347_v17 = vpack.c.bf16 %v5177_v15, %v5177_v15 }
0x21e9   : > { %v5258_v12 = vpop.f32.mrb[120].mxu1 }
0x21ea   : > { %v5259_v3 = vadd.f32 %v6572_v44, %v5258_v12  ;;  %v7461_v4 = vpop.f32.mrb[121].mxu1 }
0x21eb   : > { %v5261_v7 = vpop.f32.mrb[122].mxu1 }
0x21ec   : > { %v5349_v63 = vpack.c.bf16 %v5259_v3, %v5259_v3  ;;  %v7462_v8 = vpop.f32.mrb[123].mxu1  ;;  %v5262_v14 = vadd.f32 %v6572_v44, %v5261_v7 }
0x21ed   : > { %v6602_v8 = vld [vmem:[%s9367_s11 + $0x1] ss:$0 sm:$0xff] }
0x21ee   : > { %v5357_v13 = vsel %vm1291_vm3, %v5349_v63, 0  ;;  %v5350_v16 = vpack.c.bf16 %v5262_v14, %v5262_v14 }
0x21ef   : > { %7476 = vmatpush3.bf16.xpose.msra.mxu1 %v5357_v13 }
0x21f0   : > { %7481 = vmatprep.subr.bf16.mxu1 %v7912_v9  ;;  %v5403_v19 = vsel %vm1291_vm3, %v5350_v16, 0 }
0x21f6   : > { %7478 = vmatmul.mubr.msk.bf16.vlgmr.msra.gmra.mrb[124].mxu1 %vm1291_vm3, %v5347_v17 }
0x21f7   : > { %7482 = vmatpush3.bf16.xpose.msra.mxu1 %v5403_v19  ;;  %7483 = vmatprep.mubr.msk.bf16.mxu1 %vm7913_vm0, %v7912_v9 }
0x21f8   : > { %7493 = vmatprep.subr.bf16.mxu1 %v7912_v9 }
0x21fe   : > { %7484 = vmatmul.mubr.msk.bf16.vlgmr.msra.gmra.mrb[128].mxu1 %vm1291_vm3, %v5348_v24 }
0x21ff   : > { %7494 = vmatpush3.bf16.msra.mxu1 %v5523_v25  ;;  %7495 = vmatprep.mubr.msk.bf16.mxu1 %vm7913_vm0, %v7912_v9 }
0x22c9   : > { %v5393_v26 = vpop.f32.mrb[124].mxu1 }
0x22ca   : > { %v5445_v27 = vmul.f32 0.25, %v5393_v26  ;;  %v7479_v2 = vpop.f32.mrb[125].mxu1 }
0x22cb   : > { %v5396_v5 = vpop.f32.mrb[126].mxu1 }
0x22cc   : > { %v7480_v6 = vpop.f32.mrb[127].mxu1  ;;  %v5447_v28 = vadd.f32 %v5445_v27, %v8286_v18 }
0x22cd   : > { %v7711_v6 = vld [vmem:[%s9370_s14 + $0x44] ss:$8 sps:$4 sm:$0xff]  }
0x22ce   : > { %v5449_v29 = vsel %vm1388_vm7, %v5447_v28, -inf  ;;  %5745 = vmatprep.subr.bf16.mxu1 %v7711_v6 }
0x22cf   : > { %5450 = vmax.xlane.f32.xlu0 %v5449_v29  ;;  %v7714_v29 = vld [vmem:[%s9370_s14 + $0x54] ss:$8 sps:$4 sm:$0xff]  }
0x22d1   : > { %v5439_v30 = vpop.f32.mrb[128].mxu1 }
0x22d2   : > { %v5446_v31 = vmul.f32 0.25, %v5439_v30  ;;  %v7485_v32 = vpop.f32.mrb[129].mxu1  ;;  %v7712_v30 = vld [vmem:[%s9370_s14 + $0x50] ss:$8 sps:$4 sm:$0xff]  }
0x22d3   : > { %v5442_v56 = vpop.f32.mrb[130].mxu1  ;;  %v7715_v32 = vld [vmem:[%s9370_s14 + $0x60] ss:$8 sps:$4 sm:$0xff]  }
0x22d4   : > { %v7486_v10 = vpop.f32.mrb[131].mxu1  ;;  %v5448_v11 = vadd.f32 %v5446_v31, %v8288_v23  ;;  %v7717_v31 = vld [vmem:[%s9370_s14 + $0x64] ss:$8 sps:$4 sm:$0xff]   ;;  %v7718_v56 = vld [vmem:[%s9370_s14 + $0x70] ss:$8 sps:$4 sm:$0xff]  }
0x22d5   : > { %v7720_v10 = vld [vmem:[%s9370_s14 + $0x74] ss:$8 sps:$4 sm:$0xff]  }
0x22d6   : > { %v5452_v33 = vsel %vm1388_vm7, %v5448_v11, -inf }
0x22d7   : > { %5453 = vmax.xlane.f32.xlu1 %v5452_v33 }
0x235c   : > { %v5451_v34 = vpop.xlane.xlu0 %5450 }
0x235d   : > { %v5455_v35 = vsub.f32 %v5447_v28, %v5451_v34  ;;  %v7709_v28 = vld [vmem:[%s9370_s14 + $0x40] ss:$8 sps:$4 sm:$0xff]  }
0x235f   : > { %v5457_v36 = vmul.f32 1.442695, %v5455_v35 }
0x2361   : > { %7813 = vpow2.f32 %v5457_v36 }
0x2364   : > { %v5454_v37 = vpop.xlane.xlu1 %5453 }
0x2365   : > { %v5456_v40 = vsub.f32 %v5448_v11, %v5454_v37 }
0x2367   : > { %v5459_v18 = vmul.f32 1.442695, %v5456_v40 }
0x2369   : > { %7815 = vpow2.f32 %v5459_v18  ;;  %v6605_v18 = vld [vmem:[%s9397_s30 + $0x1] ss:$0 sm:$0xff] }
0x236b   : > { %v7814_v38 = vpop.eup %7813 }
0x236c   : > { %v5461_v42 = vsel %vm1388_vm7, %v7814_v38, 0.0 }
0x236d   : > { %5462 = vadd.xlane.f32.xlu0 %v5461_v42 }
0x2373   : > { %v7816_v43 = vpop.eup %7815 }
0x2374   : > { %v5464_v45 = vsel %vm1388_vm7, %v7816_v43, 0.0 }
0x2375   : > { %5465 = vadd.xlane.f32.xlu1 %v5464_v45 }
0x23fa   : > { %v5463_v23 = vpop.xlane.xlu0 %5462 }
0x23fb   : > { %7817 = vrcp.f32 %v5463_v23  ;;  %v6606_v23 = vld [vmem:[%s9369_s13 + $0x1] ss:$0 sm:$0xff] }
0x2402   : > { %v5466_v46 = vpop.xlane.xlu1 %5465 }
0x2403   : > { %7819 = vrcp.f32 %v5466_v46 }
0x2405   : > { %v7818_v47 = vpop.eup %7817 }
0x2406   : > { %v5468_v48 = vmul.f32 %v7818_v47, %v7814_v38 }
0x2408   : > { %v5471_v49 = vpack.c.bf16 %v5468_v48, %v5468_v48 }
0x240a   : > { %7490 = vmatmul.mubr.msk.bf16.vlgmr.msra.gmra.mrb[132].mxu0 %vm1388_vm7, %v5471_v49 }
0x240b   : > { %7501 = vmatprep.mubr.msk.bf16.mxu0 %vm7913_vm0, %v7912_v9  ;;  %7500 = vmatpush3.bf16.msra.mxu0 %v7708_v59  ;;  %v7724_v59 = vld [vmem:[%s9372_s16 + $0x88] sm:$0xff]  }
0x240d   : > { %v7820_v50 = vpop.eup %7819 }
0x240e   : > { %v5470_v51 = vmul.f32 %v7820_v50, %v7816_v43  ;;  %v7721_v50 = vld [vmem:[%s9372_s16 + $0xc0] sm:$0xff]  }
0x240f   : > { %6935 = vmatprep.subr.bf16.mxu0 %v7721_v50 }
0x2410   : > { %v5472_v52 = vpack.c.bf16 %v5470_v51, %v5470_v51  ;;  %v7722_v51 = vld [vmem:[%s9372_s16 + $0x80] sm:$0xff]  }
0x2412   : > { %7496 = vmatmul.mubr.msk.bf16.vlgmr.msra.gmra.mrb[132].mxu1 %vm1388_vm7, %v5472_v52  ;;  %v7723_v52 = vld [vmem:[%s9372_s16 + $0xc8] sm:$0xff]  }
0x2413   : > { %5777 = vmatprep.mubr.bf16.mxu1 %v7915_v21  ;;  %5746 = vmatpush1.bf16.msra.mxu1 %v7709_v28 }
0x2414   : > { %5747 = vmatprep.subr.bf16.mxu1 %v7714_v29 }
0x2417   : > { %5748 = vmatpush1.bf16.msra.mxu1 %v7712_v30 }
0x2418   : > { %5749 = vmatprep.subr.bf16.mxu1 %v7717_v31 }
0x241b   : > { %5750 = vmatpush1.bf16.msra.mxu1 %v7715_v32 }
0x241c   : > { %5751 = vmatprep.subr.bf16.mxu1 %v7720_v10 }
0x241f   : > { %5752 = vmatpush1.bf16.msra.mxu1 %v7718_v56 }
0x24dd   : > { %v5513_v39 = vpop.f32.mrb[132].mxu0 }
0x24de   : > { %v7491_v55 = vpop.f32.mrb[133].mxu0 }
0x24df   : > { %v5516_v41 = vpop.f32.mrb[134].mxu0  ;;  %v7726_v55 = vld [vmem:[%s9372_s16 + $0x90] sm:$0xff]  }
0x24e0   : > { %v7492_v61 = vpop.f32.mrb[135].mxu0  ;;  %v7727_v41 = vld [vmem:[%s9372_s16 + $0xd8] sm:$0xff]  }
0x24e1   : > { %v7728_v61 = vld [vmem:[%s9372_s16 + $0x98] sm:$0xff]  }
0x24e5   : > { %v5559_v44 = vpop.f32.mrb[132].mxu1 }
0x24e6   : > { %v5565_v12 = vpack.c.bf16 %v5559_v44, %v5513_v39  ;;  %v7497_v3 = vpop.f32.mrb[133].mxu1  ;;  %v7725_v39 = vld [vmem:[%s9372_s16 + $0xd0] sm:$0xff]   ;;  %v7729_v44 = vld [vmem:[%s9372_s16 + $0xe0] sm:$0xff]  }
0x24e7   : > { %v5562_v9 = vpop.f32.mrb[134].mxu1  ;;  %v7731_v3 = vld [vmem:[%s9372_s16 + $0xe8] sm:$0xff]  }
0x24e8   : > { %v7498_v4 = vpop.f32.mrb[135].mxu1  ;;  %7502 = vmatmul.mubr.msk.bf16.vlgmr.msra.gmra.mrb[136].mxu0 %vm1291_vm3, %v5565_v12  ;;  %v7730_v12 = vld [vmem:[%s9372_s16 + $0xa0] sm:$0xff]   ;;  %v7732_v9 = vld [vmem:[%s9372_s16 + $0xa8] sm:$0xff]  }
0x24e9   : > { %6936 = vmatpush3.bf16.msra.mxu0 %v7722_v51  ;;  %v7733_v4 = vld [vmem:[%s9372_s16 + $0xf0] sm:$0xff]  }
0x24ea   : > { %6937 = vmatprep.subr.bf16.mxu0 %v7723_v52 }
0x24ed   : > { %6938 = vmatpush3.bf16.msra.mxu0 %v7724_v59 }
0x24ee   : > { %6939 = vmatprep.subr.bf16.mxu0 %v7725_v39  ;;  %v6658_v39 = vld [vmem:[%s9373_s17 + $0x1] ss:$0 sm:$0xff] }
0x24f1   : > { %6940 = vmatpush3.bf16.msra.mxu0 %v7726_v55 }
0x24f2   : > { %6941 = vmatprep.subr.bf16.mxu0 %v7727_v41 }
0x24f5   : > { %6942 = vmatpush3.bf16.msra.mxu0 %v7728_v61 }
0x24f6   : > { %6943 = vmatprep.subr.bf16.mxu0 %v7729_v44 }
0x24f9   : > { %6944 = vmatpush3.bf16.msra.mxu0 %v7730_v12 }
0x24fa   : > { %6945 = vmatprep.subr.bf16.mxu0 %v7731_v3 }
0x24fd   : > { %6946 = vmatpush3.bf16.msra.mxu0 %v7732_v9 }
0x24fe   : > { %6947 = vmatprep.subr.bf16.mxu0 %v7733_v4 }
0x25bb   : > { %v5612_v7 = vpop.f32.mrb[136].mxu0 }
0x25bc   : > { %v5619_v63 = vadd.f32 %v5612_v7, %v9155_v53  ;;  %v7503_v21 = vpop.f32.mrb[137].mxu0  ;;  %v7734_v7 = vld [vmem:[%s9372_s16 + $0xb0] sm:$0xff]  }
0x25bd   : > { %v5615_v58 = vpop.f32.mrb[138].mxu0  ;;  %6948 = vmatpush3.bf16.msra.mxu0 %v7734_v7  ;;  %v7736_v21 = vld [vmem:[%s9372_s16 + $0xb8] sm:$0xff]  }
0x25be   : > { %v5621_v13 = vadd.f32 %v5619_v63, %v8749_v60  ;;  %v5620_v14 = vadd.f32 %v5615_v58, %v9158_v62  ;;  %v7504_v15 = vpop.f32.mrb[139].mxu0  ;;  %v7735_v63 = vld [vmem:[%s9372_s16 + $0xf8] sm:$0xff]  }
0x25bf   : > { %6949 = vmatprep.subr.bf16.mxu0 %v7735_v63 }
0x25c0   : > { %v9198_v16 = vadd.f32 %v6602_v8, %v5621_v13  ;;  %v5622_v17 = vadd.f32 %v5620_v14, %v8752_v1 }
0x25c1   : > { %6950 = vmatpush3.bf16.msra.mxu0 %v7736_v21 }
0x25c2   : > { %v9201_v19 = vadd.f32 %v6602_v8, %v5622_v17  ;;  %v5637_v53 = vsel %vm876_vm2, %v9198_v16, 0.0  ;;  %v6615_v8 = vld [vmem:[%s9371_s15 + $0x2] sm:$0x3] }
0x25c3   : > { %5638 = vadd.xlane.f32.xlu0 %v5637_v53  ;;  %v5695_v58 = vrot.slane %v6615_v8, %v3185_v0  ;;  %v5699_v13 = vrot.slane %v6615_v8, %v3189_v57 }
0x25c4   : > { %v5640_v20 = vsel %vm876_vm2, %v9201_v19, 0.0 }
0x25c5   : > { %5641 = vadd.xlane.f32.xlu1 %v5640_v20 }
0x2650   : > { %v5639_v22 = vpop.xlane.xlu0 %5638 }
0x2651   : > { %v5643_v24 = vmul.f32 0.015625, %v5639_v22 }
0x2652   : > { %v5642_v60 = vpop.xlane.xlu1 %5641 }
0x2653   : > { %v5645_v62 = vsub.f32 %v9198_v16, %v5643_v24  ;;  %v5644_v25 = vmul.f32 0.015625, %v5642_v60 }
0x2655   : > { %v5646_v26 = vsub.f32 %v9201_v19, %v5644_v25  ;;  %v5647_v27 = vmul.f32 %v5645_v62, %v5645_v62 }
0x2657   : > { %v5649_v1 = vsel %vm876_vm2, %v5647_v27, 0.0  ;;  %v5648_v2 = vmul.f32 %v5646_v26, %v5646_v26 }
0x2658   : > { %5650 = vadd.xlane.f32.xlu0 %v5649_v1 }
0x2659   : > { %v5652_v5 = vsel %vm876_vm2, %v5648_v2, 0.0 }
0x265a   : > { %5653 = vadd.xlane.f32.xlu1 %v5652_v5 }
0x26e5   : > { %v5651_v11 = vpop.xlane.xlu0 %5650 }
0x26e6   : > { %v5655_v33 = vmul.f32 0.015625, %v5651_v11 }
0x26e7   : > { %v5654_v34 = vpop.xlane.xlu1 %5653 }
0x26e8   : > { %v5657_v35 = vadd.f32 1e-05, %v5655_v33  ;;  %v5656_v36 = vmul.f32 0.015625, %v5654_v34 }
0x26ea   : > { %7821 = vrsqrt.f32 %v5657_v35  ;;  %v5658_v37 = vadd.f32 1e-05, %v5656_v36 }
0x26ec   : > { %7823 = vrsqrt.f32 %v5658_v37 }
0x26f4   : > { %v7822_v40 = vpop.eup %7821 }
0x26f5   : > { %v5661_v38 = vmul.f32 %v7822_v40, %v5645_v62 }
0x26f6   : > { %v7824_v42 = vpop.eup %7823 }
0x26f7   : > { %v5669_v43 = vmul.f32 %v6605_v18, %v5661_v38  ;;  %v5662_v45 = vmul.f32 %v7824_v42, %v5646_v26 }
0x26f9   : > { %v5670_v46 = vmul.f32 %v6605_v18, %v5662_v45  ;;  %v5677_v47 = vadd.f32 %v6606_v23, %v5669_v43 }
0x26fb   : > { %v5678_v48 = vadd.f32 %v6606_v23, %v5670_v46 }
0x26fd   : > { %v5679_v49 = vpack.c.bf16 %v5678_v48, %v5677_v47 }
0x26ff   : > { %6624 = vmatmul.mubr.msk.bf16.vlgmr.msra.gmra.mrb[136].mxu1 %vm876_vm2, %v5679_v49 }
0x27d2   : > { %v5779_v14 = vpop.f32.mrb[136].mxu1 }
0x27d3   : > { %v5780_v15 = vadd.f32 %v5779_v14, %v5695_v58  ;;  %v5781_v17 = vpop.f32.mrb[137].mxu1 }
0x27d4   : > { %v5782_v53 = vadd.f32 %v5781_v17, %v5699_v13  ;;  %v5783_v20 = vpop.f32.mrb[138].mxu1 }
0x27d5   : > { %v5788_v22 = vmul.f32 %v5780_v15, %v5780_v15  ;;  %v5784_v24 = vadd.f32 %v5783_v20, %v5695_v58  ;;  %v5785_v60 = vpop.f32.mrb[139].mxu1 }
0x27d6   : > { %v5789_v62 = vmul.f32 %v5782_v53, %v5782_v53  ;;  %v5786_v25 = vadd.f32 %v5785_v60, %v5699_v13 }
0x27d7   : > { %v5792_v26 = vmul.f32 %v5788_v22, %v5780_v15  ;;  %v5790_v27 = vmul.f32 %v5784_v24, %v5784_v24 }
0x27d8   : > { %v5793_v1 = vmul.f32 %v5789_v62, %v5782_v53  ;;  %v5791_v2 = vmul.f32 %v5786_v25, %v5786_v25 }
0x27d9   : > { %v5796_v5 = vmul.f32 0.044715, %v5792_v26  ;;  %v5794_v6 = vmul.f32 %v5790_v27, %v5784_v24 }
0x27da   : > { %v5797_v0 = vmul.f32 0.044715, %v5793_v1  ;;  %v5795_v28 = vmul.f32 %v5791_v2, %v5786_v25 }
0x27db   : > { %v5800_v54 = vadd.f32 %v5796_v5, %v5780_v15  ;;  %v5798_v57 = vmul.f32 0.044715, %v5794_v6 }
0x27dc   : > { %v5801_v29 = vadd.f32 %v5797_v0, %v5782_v53  ;;  %v5799_v30 = vmul.f32 0.044715, %v5795_v28 }
0x27dd   : > { %v5804_v31 = vmul.f32 0.7978846, %v5800_v54  ;;  %v5802_v32 = vadd.f32 %v5798_v57, %v5784_v24 }
0x27de   : > { %v5805_v56 = vmul.f32 0.7978846, %v5801_v29  ;;  %v5803_v10 = vadd.f32 %v5799_v30, %v5786_v25 }
0x27df   : > { %7825 = vtanh.f32 %v5804_v31  ;;  %v5806_v11 = vmul.f32 0.7978846, %v5802_v32 }
0x27e0   : > { %7827 = vtanh.f32 %v5805_v56  ;;  %v5807_v33 = vmul.f32 0.7978846, %v5803_v10 }
0x27e1   : > { %7829 = vtanh.f32 %v5806_v11 }
0x27e2   : > { %7831 = vtanh.f32 %v5807_v33 }
0x27e9   : > { %v7826_v34 = vpop.eup %7825 }
0x27ea   : > { %v7828_v35 = vpop.eup %7827  ;;  %v5812_v36 = vadd.f32 1.0, %v7826_v34 }
0x27eb   : > { %v7830_v37 = vpop.eup %7829  ;;  %v5813_v40 = vadd.f32 1.0, %v7828_v35 }
0x27ec   : > { %v7832_v18 = vpop.eup %7831  ;;  %v5816_v38 = vmul.f32 0.5, %v5812_v36  ;;  %v5814_v42 = vadd.f32 1.0, %v7830_v37 }
0x27ed   : > { %v5815_v43 = vadd.f32 1.0, %v7832_v18  ;;  %v5817_v45 = vmul.f32 0.5, %v5813_v40 }
0x27ee   : > { %v5818_v23 = vmul.f32 0.5, %v5814_v42  ;;  %v5820_v47 = vmul.f32 %v5816_v38, %v5780_v15 }
0x27ef   : > { %v5819_v46 = vmul.f32 0.5, %v5815_v43  ;;  %v5821_v49 = vmul.f32 %v5817_v45, %v5782_v53 }
0x27f0   : > { %v5822_v48 = vmul.f32 %v5818_v23, %v5784_v24 }
0x27f1   : > { %v5823_v50 = vmul.f32 %v5819_v46, %v5786_v25 }
0x27f2   : > { %v5824_v51 = vpack.c.bf16 %v5822_v48, %v5820_v47 }
0x27f3   : > { %v5825_v52 = vpack.c.bf16 %v5823_v50, %v5821_v49 }
0x27f5   : > { %5995 = vmatprep.mubr.bf16.mxu0 %v5825_v52 }
0x27f6   : > { %5996 = vmatmul.mubr.bf16.vlgmr.msra.gmra.mrb[140].mxu0 %v5824_v51 }
0x28c9   : > { %v6951_v59 = vpop.f32.mrb[140].mxu0 }
0x28ca   : > { %v6952_v55 = vpop.f32.mrb[141].mxu0 }
0x28cb   : > { %v6953_v41 = vadd.f32 %v6952_v55, %v6951_v59  ;;  %v6954_v61 = vpop.f32.mrb[142].mxu0 }
0x28cc   : > { %v6955_v44 = vpop.f32.mrb[143].mxu0 }
0x28cd   : > { %v5998_v12 = vadd.f32 %v6953_v41, %v6658_v39  ;;  %v6956_v3 = vadd.f32 %v6955_v44, %v6954_v61 }
0x28cf   : > { %v6004_v9 = vadd.f32 %v5998_v12, %v9198_v16  ;;  %v6001_v4 = vadd.f32 %v6956_v3, %v6658_v39 }
0x28d1   : > { %6006 = vst.msk [vmem:[%s641_s2] sm:$0xff] %vm876_vm2, %v6004_v9  ;;  %v6005_v7 = vadd.f32 %v6001_v4, %v9201_v19 }
0x28d3   : > { %6007 = vst.msk [vmem:[%s641_s2 + $0x8] sm:$0xff] %vm876_vm2, %v6005_v7 }
0x28d4   : > { %7858 = shalt.err (!%p7855_p3)
}
0x28d5   : > { %s7859_s2 = scalar_lea.hbm %s9309_s29, 256  ;;  %s7863_s26 = scalar_lea.hbm %s9374_s18, 512 }
0x28d6   : > { %p7860_p4 = scmp.ne.s32.totalorder %s9309_s29, %s7859_s2  ;;  %p7864_p7 = scmp.lt.u32.totalorder %s9309_s29, %s9374_s18 }
0x28d7   : > { %p7865_p8 = scmp.lt.u32.totalorder %s7863_s26, %s7859_s2  ;;  %p7867_p10 = scmp.lt.u32.totalorder %s7859_s2, %s9309_s29 }
0x28d8   : > { %p7861_p5 = pnand %p7860_p4, %p8061_p11 }
0x28d9   : > { %p7866_p9 = por %p7865_p8, %p7864_p7 }
0x28da   : > { %p7862_p6 = pneg %p7861_p5 }
0x28db   : > { %p7868_p12 = por %p7867_p10, %p7866_p9 }
0x28dd   : > { %p7869_p1 = pnand %p7868_p12, %p7862_p6 }
0x28df   : > { %7872 = shalt.err (!%p7869_p1)
}
0x28e0   : > { %s7917_s23 = smov 128   ;;  %s7918_s22 = smov 256  }
0x28e1   : > { %s7919_s12 = smov 8   ;;  %s9399_s19 = scalar_lea.sflag [#allocation7], %s8099_s28 }
0x28e2   : > { %7508 = dma.vmem_to_hbm [thread:$0]  (%p8061_p11), %s9304_s3, 256, %s9309_s29, %s9399_s19, %s7917_s23, %s7918_s22, %s7919_s12  }
0x28e3 PF: > { %s9400_s25 = sld [smem:[#allocation10_spill]]  ;;  %p7511_p2 = pnand %p6109_p0, %p8065_p13 }
0x28e9   : > { %s6036_s26 = sand.u32 1, %s9400_s25  }
0x28ea   : > { %s6037_s2 = scalar_lea.sflag [#allocation7], %s6036_s26 }
0x28eb   : > { %7892 = dma.done.wait (!%p7511_p2), %s6037_s2, 256  }
0x28ec   : > { %7894 = vsyncadd (!%p7511_p2), %s6037_s2, 4294967040  ;;  %s9402_s21 = sld [smem:[#allocation11_spill]]  ;;  %s9403_s0 = sld [smem:[#allocation12_spill]] }
0x28ed   : > { %s9404_s19 = smov %s7901_s1  ;;  %s9405_s1 = smov %s7905_s20 }
0x28f2   : > { %p34_p3 = scmp.ge.s32.totalorder %s9402_s21, 4   ;;  %s9406_s20 = smov %s9403_s0 }
0x28f4   :  { %36 = sbr.rel (!%p34_p3) target bundleno = 25 (0x19), region = 259 }
0x28fb   :  { %6042 = vsyncpa [#allocation7], 1 }
0x28fc   :  { %6044 = vsyncpa [#allocation7 + $0x1], 1 }

</bundles_post_ra>
